<compile_context>
chip_gen: v6e
topology: v6e:2x2x1
jax: 0.10.0
libtpu: 0.0.40
codegen_flags: <defaults>
</compile_context>

<pallas_src>
import functools

import numpy as np

import jax
import jax.numpy as jnp
from jax.experimental import pallas as pl
from jax.experimental.pallas import tpu as pltpu

F32 = jnp.float32


# ------------------- constant spatial gather matrices (host) ------------------

def _conv_gather(h_in, w_in, k):
    """[k*k, Ho*Wo, H*W] 0/1 matrices; tap t=dy*k+dx selects rows (i+dy, j+dx)."""
    h_out, w_out = h_in - k + 1, w_in - k + 1
    g = np.zeros((k * k, h_out * w_out, h_in * w_in), np.float32)
    for dy in range(k):
        for dx in range(k):
            t = dy * k + dx
            for i in range(h_out):
                for j in range(w_out):
                    g[t, i * w_out + j, (i + dy) * w_in + (j + dx)] = 1.0
    return g


def _pool_gather(h_in, w_in):
    """[4, (H/2)*(W/2), H*W] 0/1 matrices; corner k=ph*2+pw of each 2x2 window."""
    h_out, w_out = h_in // 2, w_in // 2
    p = np.zeros((4, h_out * w_out, h_in * w_in), np.float32)
    for ph in range(2):
        for pw in range(2):
            k = ph * 2 + pw
            for u in range(h_out):
                for v in range(w_out):
                    p[k, u * w_out + v, (2 * u + ph) * w_in + (2 * v + pw)] = 1.0
    return p


_G1 = _conv_gather(14, 14, 3)   # [9, 144, 196]
_P1 = _pool_gather(12, 12)      # [4,  36, 144]
_G2 = _conv_gather(6, 6, 3)     # [9,  16,  36]
_P2 = _pool_gather(4, 4)        # [4,   4,  16]


# ------------------------------- parameters ----------------------------------

def init_params(key):
    def lin(k, fan_in, fan_out):
        kw, kb = jax.random.split(k)
        bound = 1.0 / jnp.sqrt(jnp.float32(fan_in))
        w = jax.random.uniform(kw, (fan_in, fan_out), F32, -bound, bound)
        b = jax.random.uniform(kb, (fan_out,), F32, -bound, bound)
        return w, b

    keys = jax.random.split(key, 7)
    return {
        "conv1": lin(keys[0], 3 * 3 * 1, 32),     # Conv2d(1, 32, 3)  as [9, 32]
        "conv2": lin(keys[1], 3 * 3 * 32, 64),    # Conv2d(32, 64, 3) as [288, 64]
        "fc1":   lin(keys[2], 256, 200),
        "fc2":   lin(keys[3], 200, 10),
        "fc3":   lin(keys[4], 20, 300),
        "fc4":   lin(keys[5], 300, 300),
        "fc5":   lin(keys[6], 300, 2),
    }


_CONST_KEYS = ("g1", "w1p", "b1p", "p1", "g2", "w2p", "b2p", "p2",
               "wf1", "bf1", "wf2", "bf2", "wf3", "bf3", "wf4", "bf4",
               "wf5", "bf5")


def prepare_params(params):
    """Build kernel-resident operands: block-diagonal (two-branch) weights,
    paired biases and the constant gather matrices. Done once, outside jit."""
    w1, b1 = params["conv1"]
    w2, b2 = params["conv2"]
    wf1, bf1 = params["fc1"]
    wf2, bf2 = params["fc2"]
    wf3, bf3 = params["fc3"]
    wf4, bf4 = params["fc4"]
    wf5, bf5 = params["fc5"]

    def pair(b):
        return jnp.concatenate([b, b]).reshape(1, -1)

    # conv1: per tap, [2, 64] block-diagonal of the [1, 32] weight row.
    w1p = (jnp.zeros((9, 2, 64), F32)
           .at[:, 0, 0:32].set(w1)
           .at[:, 1, 32:64].set(w1))
    # conv2: per tap, [64, 128] block-diagonal of the [32, 64] weight slice.
    w2r = w2.reshape(9, 32, 64)
    w2p = (jnp.zeros((9, 64, 128), F32)
           .at[:, 0:32, 0:64].set(w2r)
           .at[:, 32:64, 64:128].set(w2r))
    # fc1 with the NCHW flatten (index = c*4 + h*2 + w) folded into 4 per-spatial
    # weight slices, then block-diagonalized for the two branches.
    wf1r = jnp.transpose(wf1.reshape(64, 4, 200), (1, 0, 2))      # [4, 64, 200]
    wf1p = (jnp.zeros((4, 128, 400), F32)
            .at[:, 0:64, 0:200].set(wf1r)
            .at[:, 64:128, 200:400].set(wf1r))
    # fc2 block-diagonal -> its output row is [output_1 | output_2].
    wf2p = (jnp.zeros((400, 20), F32)
            .at[0:200, 0:10].set(wf2)
            .at[200:400, 10:20].set(wf2))

    return {
        "g1": jnp.asarray(_G1), "w1p": w1p, "b1p": pair(b1),
        "p1": jnp.asarray(_P1),
        "g2": jnp.asarray(_G2), "w2p": w2p, "b2p": pair(b2),
        "p2": jnp.asarray(_P2),
        "wf1": wf1p, "bf1": pair(bf1),
        "wf2": wf2p, "bf2": pair(bf2),
        "wf3": wf3, "bf3": bf3.reshape(1, 300),
        "wf4": wf4, "bf4": bf4.reshape(1, 300),
        "wf5": wf5, "bf5": bf5.reshape(1, 2),
    }


# ------------------------------ fused kernel ----------------------------------

def _forward_kernel(x_ref, g1_ref, w1p_ref, b1p_ref, p1_ref,
                    g2_ref, w2p_ref, b2p_ref, p2_ref,
                    wf1_ref, bf1_ref, wf2_ref, bf2_ref,
                    wf3_ref, bf3_ref, wf4_ref, bf4_ref, wf5_ref, bf5_ref,
                    o1_ref, o2_ref, cmp_ref):
    dot = functools.partial(jnp.dot, preferred_element_type=F32)

    x = x_ref[0]                                     # [196, 2]  cols = (branch1, branch2)

    # conv1 (both branches in the lane dim): 9 taps of gather-dot + weight-dot.
    acc1 = jnp.zeros((144, 64), F32)
    for t in range(9):
        g = dot(g1_ref[t], x)                        # [144, 2] shifted input pixels
        acc1 = acc1 + dot(g, w1p_ref[t])             # [144, 64]
    acc1 = acc1 + b1p_ref[...]

    # relu(maxpool2x2): 4 corner row-selections via constant 0/1 matmuls.
    m = dot(p1_ref[0], acc1)
    for k in range(1, 4):
        m = jnp.maximum(m, dot(p1_ref[k], acc1))
    a1 = jnp.maximum(m, 0.0)                         # [36, 64]
    # dropout_1: identity (eval mode)

    # conv2
    acc2 = jnp.zeros((16, 128), F32)
    for t in range(9):
        g = dot(g2_ref[t], a1)                       # [16, 64]
        acc2 = acc2 + dot(g, w2p_ref[t])             # [16, 128]
    acc2 = acc2 + b2p_ref[...]

    m = dot(p2_ref[0], acc2)
    for k in range(1, 4):
        m = jnp.maximum(m, dot(p2_ref[k], acc2))
    a2 = jnp.maximum(m, 0.0)                         # [4, 128]
    # dropout_2: identity (eval mode)

    # fc1 with the NCHW .view(-1, 256) flatten folded into the weight slices.
    h1 = bf1_ref[...]                                # [1, 400]
    for s in range(4):
        h1 = h1 + dot(a2[s:s + 1, :], wf1_ref[s])
    h1 = jnp.maximum(h1, 0.0)
    # dropout_3: identity (eval mode)

    out12 = dot(h1, wf2_ref[...]) + bf2_ref[...]     # [1, 20] = [output_1 | output_2]

    # MLP head on the concatenated outputs.
    h = jnp.maximum(dot(out12, wf3_ref[...]) + bf3_ref[...], 0.0)
    h = jnp.maximum(dot(h, wf4_ref[...]) + bf4_ref[...], 0.0)
    comp = dot(h, wf5_ref[...]) + bf5_ref[...]       # [1, 2]

    o1_ref[0] = out12[:, 0:10]
    o2_ref[0] = out12[:, 10:20]
    cmp_ref[0] = comp


def _resident_spec(arr):
    """Full-array block with a constant index_map: DMA'd once, stays in VMEM."""
    zeros = (0,) * arr.ndim
    return pl.BlockSpec(tuple(arr.shape), lambda i: zeros)


def forward(kparams, x):
    """x: [N, 2, 14, 14] -> (output_1 [N,10], output_2 [N,10], comparison [N,2])."""
    n = x.shape[0]
    # rows = (h, w), cols = (branch0, branch1)
    x2 = jnp.transpose(x, (0, 2, 3, 1)).reshape(n, 14 * 14, 2)
    consts = [kparams[k] for k in _CONST_KEYS]

    o1, o2, comp = pl.pallas_call(
        _forward_kernel,
        out_shape=(jax.ShapeDtypeStruct((n, 1, 10), F32),
                   jax.ShapeDtypeStruct((n, 1, 10), F32),
                   jax.ShapeDtypeStruct((n, 1, 2), F32)),
        grid=(n,),
        in_specs=[pl.BlockSpec((1, 196, 2), lambda i: (i, 0, 0))] +
                 [_resident_spec(a) for a in consts],
        out_specs=(pl.BlockSpec((1, 1, 10), lambda i: (i, 0, 0)),
                   pl.BlockSpec((1, 1, 10), lambda i: (i, 0, 0)),
                   pl.BlockSpec((1, 1, 2), lambda i: (i, 0, 0))),
        compiler_params=pltpu.CompilerParams(
            dimension_semantics=("parallel",),
            vmem_limit_bytes=32 * 1024 * 1024),
    )(x2, *consts)
    return o1.reshape(n, 10), o2.reshape(n, 10), comp.reshape(n, 2)


# --------------------------- pure-JAX reference -------------------------------

def _ref_cnn(params, x_nchw):
    x = jnp.transpose(x_nchw, (0, 2, 3, 1))          # NHWC

    def conv3x3(x, w_col, b):
        nb, h, w, c = x.shape
        ho, wo = h - 2, w - 2
        cols = [x[:, dy:dy + ho, dx:dx + wo, :] for dy in range(3) for dx in range(3)]
        patches = jnp.concatenate(cols, axis=-1).reshape(nb * ho * wo, 9 * c)
        y = patches @ w_col + b
        return y.reshape(nb, ho, wo, w_col.shape[1])

    def pool_relu(x):
        v = jnp.max(jnp.stack([x[:, dy::2, dx::2, :] for dy in (0, 1) for dx in (0, 1)]),
                    axis=0)
        return jnp.maximum(v, 0.0)

    x = pool_relu(conv3x3(x, *params["conv1"]))
    x = pool_relu(conv3x3(x, *params["conv2"]))
    nb = x.shape[0]
    x = jnp.transpose(x, (0, 3, 1, 2)).reshape(nb, 256)   # NCHW .view(-1, 256)
    x = jnp.maximum(x @ params["fc1"][0] + params["fc1"][1], 0.0)
    return x @ params["fc2"][0] + params["fc2"][1]


def _ref_forward(params, x):
    o1 = _ref_cnn(params, x[:, 0:1])
    o2 = _ref_cnn(params, x[:, 1:2])
    cat = jnp.concatenate([o1, o2], axis=1)
    h = jnp.maximum(cat @ params["fc3"][0] + params["fc3"][1], 0.0)
    h = jnp.maximum(h @ params["fc4"][0] + params["fc4"][1], 0.0)
    return o1, o2, h @ params["fc5"][0] + params["fc5"][1]


# ----------------------------------- main --------------------------------------

if __name__ == "__main__":
    key = jax.random.PRNGKey(0)
    kp, kx = jax.random.split(key)
    params = init_params(kp)
    kparams = prepare_params(params)
    x = jax.random.normal(kx, (2, 2, 14, 14), F32)

    o1, o2, comp = jax.jit(forward)(kparams, x)
    jax.block_until_ready((o1, o2, comp))

    assert o1.shape == (2, 10), o1.shape
    assert o2.shape == (2, 10), o2.shape
    assert comp.shape == (2, 2), comp.shape

    # Correctness check against a pure-JAX reference (loose tolerance: the MXU
    # matmuls use default precision).
    r1, r2, rc = _ref_forward(params, x)
    assert jnp.allclose(o1, r1, rtol=5e-2, atol=5e-2), float(jnp.max(jnp.abs(o1 - r1)))
    assert jnp.allclose(o2, r2, rtol=5e-2, atol=5e-2), float(jnp.max(jnp.abs(o2 - r2)))
    assert jnp.allclose(comp, rc, rtol=5e-2, atol=5e-2), float(jnp.max(jnp.abs(comp - rc)))

    print("KERNEL_OK")
</pallas_src>

<mosaic_0001>
module attributes {stable_mosaic.version = 11 : i64} {
  func.func @_forward_kernel(%arg0: i32, %arg1: memref<1x196x2xf32, #tpu.memory_space<vmem>>, %arg2: memref<9x144x196xf32, #tpu.memory_space<vmem>>, %arg3: memref<9x2x64xf32, #tpu.memory_space<vmem>>, %arg4: memref<1x64xf32, #tpu.memory_space<vmem>>, %arg5: memref<4x36x144xf32, #tpu.memory_space<vmem>>, %arg6: memref<9x16x36xf32, #tpu.memory_space<vmem>>, %arg7: memref<9x64x128xf32, #tpu.memory_space<vmem>>, %arg8: memref<1x128xf32, #tpu.memory_space<vmem>>, %arg9: memref<4x4x16xf32, #tpu.memory_space<vmem>>, %arg10: memref<4x128x400xf32, #tpu.memory_space<vmem>>, %arg11: memref<1x400xf32, #tpu.memory_space<vmem>>, %arg12: memref<400x20xf32, #tpu.memory_space<vmem>>, %arg13: memref<1x20xf32, #tpu.memory_space<vmem>>, %arg14: memref<20x300xf32, #tpu.memory_space<vmem>>, %arg15: memref<1x300xf32, #tpu.memory_space<vmem>>, %arg16: memref<300x300xf32, #tpu.memory_space<vmem>>, %arg17: memref<1x300xf32, #tpu.memory_space<vmem>>, %arg18: memref<300x2xf32, #tpu.memory_space<vmem>>, %arg19: memref<1x2xf32, #tpu.memory_space<vmem>>, %arg20: memref<1x1x10xf32, #tpu.memory_space<vmem>>, %arg21: memref<1x1x10xf32, #tpu.memory_space<vmem>>, %arg22: memref<1x1x2xf32, #tpu.memory_space<vmem>>) attributes {dimension_semantics = [#tpu.dimension_semantics<parallel>], iteration_bounds = array<i64: 2>, scalar_prefetch = 0 : i64, scratch_operands = 0 : i64, tpu.core_type = #tpu.core_type<tc>, window_params = [{transform_indices = @transform_0, window_bounds = array<i64: 1, 196, 2>}, {pipeline_mode = #tpu.pipeline_mode<synchronous>, transform_indices = @transform_1, window_bounds = array<i64: 9, 144, 196>}, {pipeline_mode = #tpu.pipeline_mode<synchronous>, transform_indices = @transform_2, window_bounds = array<i64: 9, 2, 64>}, {pipeline_mode = #tpu.pipeline_mode<synchronous>, transform_indices = @transform_3, window_bounds = array<i64: 1, 64>}, {pipeline_mode = #tpu.pipeline_mode<synchronous>, transform_indices = @transform_4, window_bounds = array<i64: 4, 36, 144>}, {pipeline_mode = #tpu.pipeline_mode<synchronous>, transform_indices = @transform_5, window_bounds = array<i64: 9, 16, 36>}, {pipeline_mode = #tpu.pipeline_mode<synchronous>, transform_indices = @transform_6, window_bounds = array<i64: 9, 64, 128>}, {pipeline_mode = #tpu.pipeline_mode<synchronous>, transform_indices = @transform_7, window_bounds = array<i64: 1, 128>}, {pipeline_mode = #tpu.pipeline_mode<synchronous>, transform_indices = @transform_8, window_bounds = array<i64: 4, 4, 16>}, {pipeline_mode = #tpu.pipeline_mode<synchronous>, transform_indices = @transform_9, window_bounds = array<i64: 4, 128, 400>}, {pipeline_mode = #tpu.pipeline_mode<synchronous>, transform_indices = @transform_10, window_bounds = array<i64: 1, 400>}, {pipeline_mode = #tpu.pipeline_mode<synchronous>, transform_indices = @transform_11, window_bounds = array<i64: 400, 20>}, {pipeline_mode = #tpu.pipeline_mode<synchronous>, transform_indices = @transform_12, window_bounds = array<i64: 1, 20>}, {pipeline_mode = #tpu.pipeline_mode<synchronous>, transform_indices = @transform_13, window_bounds = array<i64: 20, 300>}, {pipeline_mode = #tpu.pipeline_mode<synchronous>, transform_indices = @transform_14, window_bounds = array<i64: 1, 300>}, {pipeline_mode = #tpu.pipeline_mode<synchronous>, transform_indices = @transform_15, window_bounds = array<i64: 300, 300>}, {pipeline_mode = #tpu.pipeline_mode<synchronous>, transform_indices = @transform_16, window_bounds = array<i64: 1, 300>}, {pipeline_mode = #tpu.pipeline_mode<synchronous>, transform_indices = @transform_17, window_bounds = array<i64: 300, 2>}, {pipeline_mode = #tpu.pipeline_mode<synchronous>, transform_indices = @transform_18, window_bounds = array<i64: 1, 2>}, {transform_indices = @transform_19, window_bounds = array<i64: 1, 1, 10>}, {transform_indices = @transform_20, window_bounds = array<i64: 1, 1, 10>}, {transform_indices = @transform_21, window_bounds = array<i64: 1, 1, 2>}]} {
    %c0 = arith.constant 0 : index
    %c0_0 = arith.constant 0 : index
    %c0_1 = arith.constant 0 : index
    %0 = vector.load %arg1[%c0, %c0_0, %c0_1] : memref<1x196x2xf32, #tpu.memory_space<vmem>>, vector<1x196x2xf32>
    %1 = vector.shape_cast %0 : vector<1x196x2xf32> to vector<196x2xf32>
    %cst = arith.constant 0.000000e+00 : f32
    %2 = vector.broadcast %cst : f32 to vector<144x64xf32>
    %c0_2 = arith.constant 0 : index
    %c0_3 = arith.constant 0 : index
    %c0_4 = arith.constant 0 : index
    %3 = vector.load %arg2[%c0_2, %c0_3, %c0_4] : memref<9x144x196xf32, #tpu.memory_space<vmem>>, vector<1x144x196xf32>
    %4 = vector.shape_cast %3 : vector<1x144x196xf32> to vector<144x196xf32>
    %cst_5 = arith.constant dense<0.000000e+00> : vector<144x2xf32>
    %5 = tpu.matmul %4, %1, %cst_5 {dimension_numbers = #tpu.dot_dimension_numbers<[1], [0], [0], [1], [0, 0, 1, 1], [], []>} : vector<144x196xf32>, vector<196x2xf32>, vector<144x2xf32> -> vector<144x2xf32>
    %c0_6 = arith.constant 0 : index
    %c0_7 = arith.constant 0 : index
    %c0_8 = arith.constant 0 : index
    %6 = vector.load %arg3[%c0_6, %c0_7, %c0_8] : memref<9x2x64xf32, #tpu.memory_space<vmem>>, vector<1x2x64xf32>
    %7 = vector.shape_cast %6 : vector<1x2x64xf32> to vector<2x64xf32>
    %cst_9 = arith.constant dense<0.000000e+00> : vector<144x64xf32>
    %8 = tpu.matmul %5, %7, %cst_9 {dimension_numbers = #tpu.dot_dimension_numbers<[1], [0], [0], [1], [0, 0, 1, 1], [], []>} : vector<144x2xf32>, vector<2x64xf32>, vector<144x64xf32> -> vector<144x64xf32>
    %9 = arith.addf %2, %8 : vector<144x64xf32>
    %c1 = arith.constant 1 : index
    %c0_10 = arith.constant 0 : index
    %c0_11 = arith.constant 0 : index
    %10 = vector.load %arg2[%c1, %c0_10, %c0_11] : memref<9x144x196xf32, #tpu.memory_space<vmem>>, vector<1x144x196xf32>
    %11 = vector.shape_cast %10 : vector<1x144x196xf32> to vector<144x196xf32>
    %cst_12 = arith.constant dense<0.000000e+00> : vector<144x2xf32>
    %12 = tpu.matmul %11, %1, %cst_12 {dimension_numbers = #tpu.dot_dimension_numbers<[1], [0], [0], [1], [0, 0, 1, 1], [], []>} : vector<144x196xf32>, vector<196x2xf32>, vector<144x2xf32> -> vector<144x2xf32>
    %c1_13 = arith.constant 1 : index
    %c0_14 = arith.constant 0 : index
    %c0_15 = arith.constant 0 : index
    %13 = vector.load %arg3[%c1_13, %c0_14, %c0_15] : memref<9x2x64xf32, #tpu.memory_space<vmem>>, vector<1x2x64xf32>
    %14 = vector.shape_cast %13 : vector<1x2x64xf32> to vector<2x64xf32>
    %cst_16 = arith.constant dense<0.000000e+00> : vector<144x64xf32>
    %15 = tpu.matmul %12, %14, %cst_16 {dimension_numbers = #tpu.dot_dimension_numbers<[1], [0], [0], [1], [0, 0, 1, 1], [], []>} : vector<144x2xf32>, vector<2x64xf32>, vector<144x64xf32> -> vector<144x64xf32>
    %16 = arith.addf %9, %15 : vector<144x64xf32>
    %c2 = arith.constant 2 : index
    %c0_17 = arith.constant 0 : index
    %c0_18 = arith.constant 0 : index
    %17 = vector.load %arg2[%c2, %c0_17, %c0_18] : memref<9x144x196xf32, #tpu.memory_space<vmem>>, vector<1x144x196xf32>
    %18 = vector.shape_cast %17 : vector<1x144x196xf32> to vector<144x196xf32>
    %cst_19 = arith.constant dense<0.000000e+00> : vector<144x2xf32>
    %19 = tpu.matmul %18, %1, %cst_19 {dimension_numbers = #tpu.dot_dimension_numbers<[1], [0], [0], [1], [0, 0, 1, 1], [], []>} : vector<144x196xf32>, vector<196x2xf32>, vector<144x2xf32> -> vector<144x2xf32>
    %c2_20 = arith.constant 2 : index
    %c0_21 = arith.constant 0 : index
    %c0_22 = arith.constant 0 : index
    %20 = vector.load %arg3[%c2_20, %c0_21, %c0_22] : memref<9x2x64xf32, #tpu.memory_space<vmem>>, vector<1x2x64xf32>
    %21 = vector.shape_cast %20 : vector<1x2x64xf32> to vector<2x64xf32>
    %cst_23 = arith.constant dense<0.000000e+00> : vector<144x64xf32>
    %22 = tpu.matmul %19, %21, %cst_23 {dimension_numbers = #tpu.dot_dimension_numbers<[1], [0], [0], [1], [0, 0, 1, 1], [], []>} : vector<144x2xf32>, vector<2x64xf32>, vector<144x64xf32> -> vector<144x64xf32>
    %23 = arith.addf %16, %22 : vector<144x64xf32>
    %c3 = arith.constant 3 : index
    %c0_24 = arith.constant 0 : index
    %c0_25 = arith.constant 0 : index
    %24 = vector.load %arg2[%c3, %c0_24, %c0_25] : memref<9x144x196xf32, #tpu.memory_space<vmem>>, vector<1x144x196xf32>
    %25 = vector.shape_cast %24 : vector<1x144x196xf32> to vector<144x196xf32>
    %cst_26 = arith.constant dense<0.000000e+00> : vector<144x2xf32>
    %26 = tpu.matmul %25, %1, %cst_26 {dimension_numbers = #tpu.dot_dimension_numbers<[1], [0], [0], [1], [0, 0, 1, 1], [], []>} : vector<144x196xf32>, vector<196x2xf32>, vector<144x2xf32> -> vector<144x2xf32>
    %c3_27 = arith.constant 3 : index
    %c0_28 = arith.constant 0 : index
    %c0_29 = arith.constant 0 : index
    %27 = vector.load %arg3[%c3_27, %c0_28, %c0_29] : memref<9x2x64xf32, #tpu.memory_space<vmem>>, vector<1x2x64xf32>
    %28 = vector.shape_cast %27 : vector<1x2x64xf32> to vector<2x64xf32>
    %cst_30 = arith.constant dense<0.000000e+00> : vector<144x64xf32>
    %29 = tpu.matmul %26, %28, %cst_30 {dimension_numbers = #tpu.dot_dimension_numbers<[1], [0], [0], [1], [0, 0, 1, 1], [], []>} : vector<144x2xf32>, vector<2x64xf32>, vector<144x64xf32> -> vector<144x64xf32>
    %30 = arith.addf %23, %29 : vector<144x64xf32>
    %c4 = arith.constant 4 : index
    %c0_31 = arith.constant 0 : index
    %c0_32 = arith.constant 0 : index
    %31 = vector.load %arg2[%c4, %c0_31, %c0_32] : memref<9x144x196xf32, #tpu.memory_space<vmem>>, vector<1x144x196xf32>
    %32 = vector.shape_cast %31 : vector<1x144x196xf32> to vector<144x196xf32>
    %cst_33 = arith.constant dense<0.000000e+00> : vector<144x2xf32>
    %33 = tpu.matmul %32, %1, %cst_33 {dimension_numbers = #tpu.dot_dimension_numbers<[1], [0], [0], [1], [0, 0, 1, 1], [], []>} : vector<144x196xf32>, vector<196x2xf32>, vector<144x2xf32> -> vector<144x2xf32>
    %c4_34 = arith.constant 4 : index
    %c0_35 = arith.constant 0 : index
    %c0_36 = arith.constant 0 : index
    %34 = vector.load %arg3[%c4_34, %c0_35, %c0_36] : memref<9x2x64xf32, #tpu.memory_space<vmem>>, vector<1x2x64xf32>
    %35 = vector.shape_cast %34 : vector<1x2x64xf32> to vector<2x64xf32>
    %cst_37 = arith.constant dense<0.000000e+00> : vector<144x64xf32>
    %36 = tpu.matmul %33, %35, %cst_37 {dimension_numbers = #tpu.dot_dimension_numbers<[1], [0], [0], [1], [0, 0, 1, 1], [], []>} : vector<144x2xf32>, vector<2x64xf32>, vector<144x64xf32> -> vector<144x64xf32>
    %37 = arith.addf %30, %36 : vector<144x64xf32>
    %c5 = arith.constant 5 : index
    %c0_38 = arith.constant 0 : index
    %c0_39 = arith.constant 0 : index
    %38 = vector.load %arg2[%c5, %c0_38, %c0_39] : memref<9x144x196xf32, #tpu.memory_space<vmem>>, vector<1x144x196xf32>
    %39 = vector.shape_cast %38 : vector<1x144x196xf32> to vector<144x196xf32>
    %cst_40 = arith.constant dense<0.000000e+00> : vector<144x2xf32>
    %40 = tpu.matmul %39, %1, %cst_40 {dimension_numbers = #tpu.dot_dimension_numbers<[1], [0], [0], [1], [0, 0, 1, 1], [], []>} : vector<144x196xf32>, vector<196x2xf32>, vector<144x2xf32> -> vector<144x2xf32>
    %c5_41 = arith.constant 5 : index
    %c0_42 = arith.constant 0 : index
    %c0_43 = arith.constant 0 : index
    %41 = vector.load %arg3[%c5_41, %c0_42, %c0_43] : memref<9x2x64xf32, #tpu.memory_space<vmem>>, vector<1x2x64xf32>
    %42 = vector.shape_cast %41 : vector<1x2x64xf32> to vector<2x64xf32>
    %cst_44 = arith.constant dense<0.000000e+00> : vector<144x64xf32>
    %43 = tpu.matmul %40, %42, %cst_44 {dimension_numbers = #tpu.dot_dimension_numbers<[1], [0], [0], [1], [0, 0, 1, 1], [], []>} : vector<144x2xf32>, vector<2x64xf32>, vector<144x64xf32> -> vector<144x64xf32>
    %44 = arith.addf %37, %43 : vector<144x64xf32>
    %c6 = arith.constant 6 : index
    %c0_45 = arith.constant 0 : index
    %c0_46 = arith.constant 0 : index
    %45 = vector.load %arg2[%c6, %c0_45, %c0_46] : memref<9x144x196xf32, #tpu.memory_space<vmem>>, vector<1x144x196xf32>
    %46 = vector.shape_cast %45 : vector<1x144x196xf32> to vector<144x196xf32>
    %cst_47 = arith.constant dense<0.000000e+00> : vector<144x2xf32>
    %47 = tpu.matmul %46, %1, %cst_47 {dimension_numbers = #tpu.dot_dimension_numbers<[1], [0], [0], [1], [0, 0, 1, 1], [], []>} : vector<144x196xf32>, vector<196x2xf32>, vector<144x2xf32> -> vector<144x2xf32>
    %c6_48 = arith.constant 6 : index
    %c0_49 = arith.constant 0 : index
    %c0_50 = arith.constant 0 : index
    %48 = vector.load %arg3[%c6_48, %c0_49, %c0_50] : memref<9x2x64xf32, #tpu.memory_space<vmem>>, vector<1x2x64xf32>
    %49 = vector.shape_cast %48 : vector<1x2x64xf32> to vector<2x64xf32>
    %cst_51 = arith.constant dense<0.000000e+00> : vector<144x64xf32>
    %50 = tpu.matmul %47, %49, %cst_51 {dimension_numbers = #tpu.dot_dimension_numbers<[1], [0], [0], [1], [0, 0, 1, 1], [], []>} : vector<144x2xf32>, vector<2x64xf32>, vector<144x64xf32> -> vector<144x64xf32>
    %51 = arith.addf %44, %50 : vector<144x64xf32>
    %c7 = arith.constant 7 : index
    %c0_52 = arith.constant 0 : index
    %c0_53 = arith.constant 0 : index
    %52 = vector.load %arg2[%c7, %c0_52, %c0_53] : memref<9x144x196xf32, #tpu.memory_space<vmem>>, vector<1x144x196xf32>
    %53 = vector.shape_cast %52 : vector<1x144x196xf32> to vector<144x196xf32>
    %cst_54 = arith.constant dense<0.000000e+00> : vector<144x2xf32>
    %54 = tpu.matmul %53, %1, %cst_54 {dimension_numbers = #tpu.dot_dimension_numbers<[1], [0], [0], [1], [0, 0, 1, 1], [], []>} : vector<144x196xf32>, vector<196x2xf32>, vector<144x2xf32> -> vector<144x2xf32>
    %c7_55 = arith.constant 7 : index
    %c0_56 = arith.constant 0 : index
    %c0_57 = arith.constant 0 : index
    %55 = vector.load %arg3[%c7_55, %c0_56, %c0_57] : memref<9x2x64xf32, #tpu.memory_space<vmem>>, vector<1x2x64xf32>
    %56 = vector.shape_cast %55 : vector<1x2x64xf32> to vector<2x64xf32>
    %cst_58 = arith.constant dense<0.000000e+00> : vector<144x64xf32>
    %57 = tpu.matmul %54, %56, %cst_58 {dimension_numbers = #tpu.dot_dimension_numbers<[1], [0], [0], [1], [0, 0, 1, 1], [], []>} : vector<144x2xf32>, vector<2x64xf32>, vector<144x64xf32> -> vector<144x64xf32>
    %58 = arith.addf %51, %57 : vector<144x64xf32>
    %c8 = arith.constant 8 : index
    %c0_59 = arith.constant 0 : index
    %c0_60 = arith.constant 0 : index
    %59 = vector.load %arg2[%c8, %c0_59, %c0_60] : memref<9x144x196xf32, #tpu.memory_space<vmem>>, vector<1x144x196xf32>
    %60 = vector.shape_cast %59 : vector<1x144x196xf32> to vector<144x196xf32>
    %cst_61 = arith.constant dense<0.000000e+00> : vector<144x2xf32>
    %61 = tpu.matmul %60, %1, %cst_61 {dimension_numbers = #tpu.dot_dimension_numbers<[1], [0], [0], [1], [0, 0, 1, 1], [], []>} : vector<144x196xf32>, vector<196x2xf32>, vector<144x2xf32> -> vector<144x2xf32>
    %c8_62 = arith.constant 8 : index
    %c0_63 = arith.constant 0 : index
    %c0_64 = arith.constant 0 : index
    %62 = vector.load %arg3[%c8_62, %c0_63, %c0_64] : memref<9x2x64xf32, #tpu.memory_space<vmem>>, vector<1x2x64xf32>
    %63 = vector.shape_cast %62 : vector<1x2x64xf32> to vector<2x64xf32>
    %cst_65 = arith.constant dense<0.000000e+00> : vector<144x64xf32>
    %64 = tpu.matmul %61, %63, %cst_65 {dimension_numbers = #tpu.dot_dimension_numbers<[1], [0], [0], [1], [0, 0, 1, 1], [], []>} : vector<144x2xf32>, vector<2x64xf32>, vector<144x64xf32> -> vector<144x64xf32>
    %65 = arith.addf %58, %64 : vector<144x64xf32>
    %c0_66 = arith.constant 0 : index
    %c0_67 = arith.constant 0 : index
    %66 = vector.load %arg4[%c0_66, %c0_67] : memref<1x64xf32, #tpu.memory_space<vmem>>, vector<1x64xf32>
    %67 = vector.broadcast %66 : vector<1x64xf32> to vector<144x64xf32>
    %68 = arith.addf %65, %67 : vector<144x64xf32>
    %c0_68 = arith.constant 0 : index
    %c0_69 = arith.constant 0 : index
    %c0_70 = arith.constant 0 : index
    %69 = vector.load %arg5[%c0_68, %c0_69, %c0_70] : memref<4x36x144xf32, #tpu.memory_space<vmem>>, vector<1x36x144xf32>
    %70 = vector.shape_cast %69 : vector<1x36x144xf32> to vector<36x144xf32>
    %cst_71 = arith.constant dense<0.000000e+00> : vector<36x64xf32>
    %71 = tpu.matmul %70, %68, %cst_71 {dimension_numbers = #tpu.dot_dimension_numbers<[1], [0], [0], [1], [0, 0, 1, 1], [], []>} : vector<36x144xf32>, vector<144x64xf32>, vector<36x64xf32> -> vector<36x64xf32>
    %c1_72 = arith.constant 1 : index
    %c0_73 = arith.constant 0 : index
    %c0_74 = arith.constant 0 : index
    %72 = vector.load %arg5[%c1_72, %c0_73, %c0_74] : memref<4x36x144xf32, #tpu.memory_space<vmem>>, vector<1x36x144xf32>
    %73 = vector.shape_cast %72 : vector<1x36x144xf32> to vector<36x144xf32>
    %cst_75 = arith.constant dense<0.000000e+00> : vector<36x64xf32>
    %74 = tpu.matmul %73, %68, %cst_75 {dimension_numbers = #tpu.dot_dimension_numbers<[1], [0], [0], [1], [0, 0, 1, 1], [], []>} : vector<36x144xf32>, vector<144x64xf32>, vector<36x64xf32> -> vector<36x64xf32>
    %75 = arith.maximumf %71, %74 : vector<36x64xf32>
    %c2_76 = arith.constant 2 : index
    %c0_77 = arith.constant 0 : index
    %c0_78 = arith.constant 0 : index
    %76 = vector.load %arg5[%c2_76, %c0_77, %c0_78] : memref<4x36x144xf32, #tpu.memory_space<vmem>>, vector<1x36x144xf32>
    %77 = vector.shape_cast %76 : vector<1x36x144xf32> to vector<36x144xf32>
    %cst_79 = arith.constant dense<0.000000e+00> : vector<36x64xf32>
    %78 = tpu.matmul %77, %68, %cst_79 {dimension_numbers = #tpu.dot_dimension_numbers<[1], [0], [0], [1], [0, 0, 1, 1], [], []>} : vector<36x144xf32>, vector<144x64xf32>, vector<36x64xf32> -> vector<36x64xf32>
    %79 = arith.maximumf %75, %78 : vector<36x64xf32>
    %c3_80 = arith.constant 3 : index
    %c0_81 = arith.constant 0 : index
    %c0_82 = arith.constant 0 : index
    %80 = vector.load %arg5[%c3_80, %c0_81, %c0_82] : memref<4x36x144xf32, #tpu.memory_space<vmem>>, vector<1x36x144xf32>
    %81 = vector.shape_cast %80 : vector<1x36x144xf32> to vector<36x144xf32>
    %cst_83 = arith.constant dense<0.000000e+00> : vector<36x64xf32>
    %82 = tpu.matmul %81, %68, %cst_83 {dimension_numbers = #tpu.dot_dimension_numbers<[1], [0], [0], [1], [0, 0, 1, 1], [], []>} : vector<36x144xf32>, vector<144x64xf32>, vector<36x64xf32> -> vector<36x64xf32>
    %83 = arith.maximumf %79, %82 : vector<36x64xf32>
    %cst_84 = arith.constant 0.000000e+00 : f32
    %84 = vector.broadcast %cst_84 : f32 to vector<36x64xf32>
    %85 = arith.maximumf %83, %84 : vector<36x64xf32>
    %cst_85 = arith.constant 0.000000e+00 : f32
    %86 = vector.broadcast %cst_85 : f32 to vector<16x128xf32>
    %c0_86 = arith.constant 0 : index
    %c0_87 = arith.constant 0 : index
    %c0_88 = arith.constant 0 : index
    %87 = vector.load %arg6[%c0_86, %c0_87, %c0_88] : memref<9x16x36xf32, #tpu.memory_space<vmem>>, vector<1x16x36xf32>
    %88 = vector.shape_cast %87 : vector<1x16x36xf32> to vector<16x36xf32>
    %cst_89 = arith.constant dense<0.000000e+00> : vector<16x64xf32>
    %89 = tpu.matmul %88, %85, %cst_89 {dimension_numbers = #tpu.dot_dimension_numbers<[1], [0], [0], [1], [0, 0, 1, 1], [], []>} : vector<16x36xf32>, vector<36x64xf32>, vector<16x64xf32> -> vector<16x64xf32>
    %c0_90 = arith.constant 0 : index
    %c0_91 = arith.constant 0 : index
    %c0_92 = arith.constant 0 : index
    %90 = vector.load %arg7[%c0_90, %c0_91, %c0_92] : memref<9x64x128xf32, #tpu.memory_space<vmem>>, vector<1x64x128xf32>
    %91 = vector.shape_cast %90 : vector<1x64x128xf32> to vector<64x128xf32>
    %cst_93 = arith.constant dense<0.000000e+00> : vector<16x128xf32>
    %92 = tpu.matmul %89, %91, %cst_93 {dimension_numbers = #tpu.dot_dimension_numbers<[1], [0], [0], [1], [0, 0, 1, 1], [], []>} : vector<16x64xf32>, vector<64x128xf32>, vector<16x128xf32> -> vector<16x128xf32>
    %93 = arith.addf %86, %92 : vector<16x128xf32>
    %c1_94 = arith.constant 1 : index
    %c0_95 = arith.constant 0 : index
    %c0_96 = arith.constant 0 : index
    %94 = vector.load %arg6[%c1_94, %c0_95, %c0_96] : memref<9x16x36xf32, #tpu.memory_space<vmem>>, vector<1x16x36xf32>
    %95 = vector.shape_cast %94 : vector<1x16x36xf32> to vector<16x36xf32>
    %cst_97 = arith.constant dense<0.000000e+00> : vector<16x64xf32>
    %96 = tpu.matmul %95, %85, %cst_97 {dimension_numbers = #tpu.dot_dimension_numbers<[1], [0], [0], [1], [0, 0, 1, 1], [], []>} : vector<16x36xf32>, vector<36x64xf32>, vector<16x64xf32> -> vector<16x64xf32>
    %c1_98 = arith.constant 1 : index
    %c0_99 = arith.constant 0 : index
    %c0_100 = arith.constant 0 : index
    %97 = vector.load %arg7[%c1_98, %c0_99, %c0_100] : memref<9x64x128xf32, #tpu.memory_space<vmem>>, vector<1x64x128xf32>
    %98 = vector.shape_cast %97 : vector<1x64x128xf32> to vector<64x128xf32>
    %cst_101 = arith.constant dense<0.000000e+00> : vector<16x128xf32>
    %99 = tpu.matmul %96, %98, %cst_101 {dimension_numbers = #tpu.dot_dimension_numbers<[1], [0], [0], [1], [0, 0, 1, 1], [], []>} : vector<16x64xf32>, vector<64x128xf32>, vector<16x128xf32> -> vector<16x128xf32>
    %100 = arith.addf %93, %99 : vector<16x128xf32>
    %c2_102 = arith.constant 2 : index
    %c0_103 = arith.constant 0 : index
    %c0_104 = arith.constant 0 : index
    %101 = vector.load %arg6[%c2_102, %c0_103, %c0_104] : memref<9x16x36xf32, #tpu.memory_space<vmem>>, vector<1x16x36xf32>
    %102 = vector.shape_cast %101 : vector<1x16x36xf32> to vector<16x36xf32>
    %cst_105 = arith.constant dense<0.000000e+00> : vector<16x64xf32>
    %103 = tpu.matmul %102, %85, %cst_105 {dimension_numbers = #tpu.dot_dimension_numbers<[1], [0], [0], [1], [0, 0, 1, 1], [], []>} : vector<16x36xf32>, vector<36x64xf32>, vector<16x64xf32> -> vector<16x64xf32>
    %c2_106 = arith.constant 2 : index
    %c0_107 = arith.constant 0 : index
    %c0_108 = arith.constant 0 : index
    %104 = vector.load %arg7[%c2_106, %c0_107, %c0_108] : memref<9x64x128xf32, #tpu.memory_space<vmem>>, vector<1x64x128xf32>
    %105 = vector.shape_cast %104 : vector<1x64x128xf32> to vector<64x128xf32>
    %cst_109 = arith.constant dense<0.000000e+00> : vector<16x128xf32>
    %106 = tpu.matmul %103, %105, %cst_109 {dimension_numbers = #tpu.dot_dimension_numbers<[1], [0], [0], [1], [0, 0, 1, 1], [], []>} : vector<16x64xf32>, vector<64x128xf32>, vector<16x128xf32> -> vector<16x128xf32>
    %107 = arith.addf %100, %106 : vector<16x128xf32>
    %c3_110 = arith.constant 3 : index
    %c0_111 = arith.constant 0 : index
    %c0_112 = arith.constant 0 : index
    %108 = vector.load %arg6[%c3_110, %c0_111, %c0_112] : memref<9x16x36xf32, #tpu.memory_space<vmem>>, vector<1x16x36xf32>
    %109 = vector.shape_cast %108 : vector<1x16x36xf32> to vector<16x36xf32>
    %cst_113 = arith.constant dense<0.000000e+00> : vector<16x64xf32>
    %110 = tpu.matmul %109, %85, %cst_113 {dimension_numbers = #tpu.dot_dimension_numbers<[1], [0], [0], [1], [0, 0, 1, 1], [], []>} : vector<16x36xf32>, vector<36x64xf32>, vector<16x64xf32> -> vector<16x64xf32>
    %c3_114 = arith.constant 3 : index
    %c0_115 = arith.constant 0 : index
    %c0_116 = arith.constant 0 : index
    %111 = vector.load %arg7[%c3_114, %c0_115, %c0_116] : memref<9x64x128xf32, #tpu.memory_space<vmem>>, vector<1x64x128xf32>
    %112 = vector.shape_cast %111 : vector<1x64x128xf32> to vector<64x128xf32>
    %cst_117 = arith.constant dense<0.000000e+00> : vector<16x128xf32>
    %113 = tpu.matmul %110, %112, %cst_117 {dimension_numbers = #tpu.dot_dimension_numbers<[1], [0], [0], [1], [0, 0, 1, 1], [], []>} : vector<16x64xf32>, vector<64x128xf32>, vector<16x128xf32> -> vector<16x128xf32>
    %114 = arith.addf %107, %113 : vector<16x128xf32>
    %c4_118 = arith.constant 4 : index
    %c0_119 = arith.constant 0 : index
    %c0_120 = arith.constant 0 : index
    %115 = vector.load %arg6[%c4_118, %c0_119, %c0_120] : memref<9x16x36xf32, #tpu.memory_space<vmem>>, vector<1x16x36xf32>
    %116 = vector.shape_cast %115 : vector<1x16x36xf32> to vector<16x36xf32>
    %cst_121 = arith.constant dense<0.000000e+00> : vector<16x64xf32>
    %117 = tpu.matmul %116, %85, %cst_121 {dimension_numbers = #tpu.dot_dimension_numbers<[1], [0], [0], [1], [0, 0, 1, 1], [], []>} : vector<16x36xf32>, vector<36x64xf32>, vector<16x64xf32> -> vector<16x64xf32>
    %c4_122 = arith.constant 4 : index
    %c0_123 = arith.constant 0 : index
    %c0_124 = arith.constant 0 : index
    %118 = vector.load %arg7[%c4_122, %c0_123, %c0_124] : memref<9x64x128xf32, #tpu.memory_space<vmem>>, vector<1x64x128xf32>
    %119 = vector.shape_cast %118 : vector<1x64x128xf32> to vector<64x128xf32>
    %cst_125 = arith.constant dense<0.000000e+00> : vector<16x128xf32>
    %120 = tpu.matmul %117, %119, %cst_125 {dimension_numbers = #tpu.dot_dimension_numbers<[1], [0], [0], [1], [0, 0, 1, 1], [], []>} : vector<16x64xf32>, vector<64x128xf32>, vector<16x128xf32> -> vector<16x128xf32>
    %121 = arith.addf %114, %120 : vector<16x128xf32>
    %c5_126 = arith.constant 5 : index
    %c0_127 = arith.constant 0 : index
    %c0_128 = arith.constant 0 : index
    %122 = vector.load %arg6[%c5_126, %c0_127, %c0_128] : memref<9x16x36xf32, #tpu.memory_space<vmem>>, vector<1x16x36xf32>
    %123 = vector.shape_cast %122 : vector<1x16x36xf32> to vector<16x36xf32>
    %cst_129 = arith.constant dense<0.000000e+00> : vector<16x64xf32>
    %124 = tpu.matmul %123, %85, %cst_129 {dimension_numbers = #tpu.dot_dimension_numbers<[1], [0], [0], [1], [0, 0, 1, 1], [], []>} : vector<16x36xf32>, vector<36x64xf32>, vector<16x64xf32> -> vector<16x64xf32>
    %c5_130 = arith.constant 5 : index
    %c0_131 = arith.constant 0 : index
    %c0_132 = arith.constant 0 : index
    %125 = vector.load %arg7[%c5_130, %c0_131, %c0_132] : memref<9x64x128xf32, #tpu.memory_space<vmem>>, vector<1x64x128xf32>
    %126 = vector.shape_cast %125 : vector<1x64x128xf32> to vector<64x128xf32>
    %cst_133 = arith.constant dense<0.000000e+00> : vector<16x128xf32>
    %127 = tpu.matmul %124, %126, %cst_133 {dimension_numbers = #tpu.dot_dimension_numbers<[1], [0], [0], [1], [0, 0, 1, 1], [], []>} : vector<16x64xf32>, vector<64x128xf32>, vector<16x128xf32> -> vector<16x128xf32>
    %128 = arith.addf %121, %127 : vector<16x128xf32>
    %c6_134 = arith.constant 6 : index
    %c0_135 = arith.constant 0 : index
    %c0_136 = arith.constant 0 : index
    %129 = vector.load %arg6[%c6_134, %c0_135, %c0_136] : memref<9x16x36xf32, #tpu.memory_space<vmem>>, vector<1x16x36xf32>
    %130 = vector.shape_cast %129 : vector<1x16x36xf32> to vector<16x36xf32>
    %cst_137 = arith.constant dense<0.000000e+00> : vector<16x64xf32>
    %131 = tpu.matmul %130, %85, %cst_137 {dimension_numbers = #tpu.dot_dimension_numbers<[1], [0], [0], [1], [0, 0, 1, 1], [], []>} : vector<16x36xf32>, vector<36x64xf32>, vector<16x64xf32> -> vector<16x64xf32>
    %c6_138 = arith.constant 6 : index
    %c0_139 = arith.constant 0 : index
    %c0_140 = arith.constant 0 : index
    %132 = vector.load %arg7[%c6_138, %c0_139, %c0_140] : memref<9x64x128xf32, #tpu.memory_space<vmem>>, vector<1x64x128xf32>
    %133 = vector.shape_cast %132 : vector<1x64x128xf32> to vector<64x128xf32>
    %cst_141 = arith.constant dense<0.000000e+00> : vector<16x128xf32>
    %134 = tpu.matmul %131, %133, %cst_141 {dimension_numbers = #tpu.dot_dimension_numbers<[1], [0], [0], [1], [0, 0, 1, 1], [], []>} : vector<16x64xf32>, vector<64x128xf32>, vector<16x128xf32> -> vector<16x128xf32>
    %135 = arith.addf %128, %134 : vector<16x128xf32>
    %c7_142 = arith.constant 7 : index
    %c0_143 = arith.constant 0 : index
    %c0_144 = arith.constant 0 : index
    %136 = vector.load %arg6[%c7_142, %c0_143, %c0_144] : memref<9x16x36xf32, #tpu.memory_space<vmem>>, vector<1x16x36xf32>
    %137 = vector.shape_cast %136 : vector<1x16x36xf32> to vector<16x36xf32>
    %cst_145 = arith.constant dense<0.000000e+00> : vector<16x64xf32>
    %138 = tpu.matmul %137, %85, %cst_145 {dimension_numbers = #tpu.dot_dimension_numbers<[1], [0], [0], [1], [0, 0, 1, 1], [], []>} : vector<16x36xf32>, vector<36x64xf32>, vector<16x64xf32> -> vector<16x64xf32>
    %c7_146 = arith.constant 7 : index
    %c0_147 = arith.constant 0 : index
    %c0_148 = arith.constant 0 : index
    %139 = vector.load %arg7[%c7_146, %c0_147, %c0_148] : memref<9x64x128xf32, #tpu.memory_space<vmem>>, vector<1x64x128xf32>
    %140 = vector.shape_cast %139 : vector<1x64x128xf32> to vector<64x128xf32>
    %cst_149 = arith.constant dense<0.000000e+00> : vector<16x128xf32>
    %141 = tpu.matmul %138, %140, %cst_149 {dimension_numbers = #tpu.dot_dimension_numbers<[1], [0], [0], [1], [0, 0, 1, 1], [], []>} : vector<16x64xf32>, vector<64x128xf32>, vector<16x128xf32> -> vector<16x128xf32>
    %142 = arith.addf %135, %141 : vector<16x128xf32>
    %c8_150 = arith.constant 8 : index
    %c0_151 = arith.constant 0 : index
    %c0_152 = arith.constant 0 : index
    %143 = vector.load %arg6[%c8_150, %c0_151, %c0_152] : memref<9x16x36xf32, #tpu.memory_space<vmem>>, vector<1x16x36xf32>
    %144 = vector.shape_cast %143 : vector<1x16x36xf32> to vector<16x36xf32>
    %cst_153 = arith.constant dense<0.000000e+00> : vector<16x64xf32>
    %145 = tpu.matmul %144, %85, %cst_153 {dimension_numbers = #tpu.dot_dimension_numbers<[1], [0], [0], [1], [0, 0, 1, 1], [], []>} : vector<16x36xf32>, vector<36x64xf32>, vector<16x64xf32> -> vector<16x64xf32>
    %c8_154 = arith.constant 8 : index
    %c0_155 = arith.constant 0 : index
    %c0_156 = arith.constant 0 : index
    %146 = vector.load %arg7[%c8_154, %c0_155, %c0_156] : memref<9x64x128xf32, #tpu.memory_space<vmem>>, vector<1x64x128xf32>
    %147 = vector.shape_cast %146 : vector<1x64x128xf32> to vector<64x128xf32>
    %cst_157 = arith.constant dense<0.000000e+00> : vector<16x128xf32>
    %148 = tpu.matmul %145, %147, %cst_157 {dimension_numbers = #tpu.dot_dimension_numbers<[1], [0], [0], [1], [0, 0, 1, 1], [], []>} : vector<16x64xf32>, vector<64x128xf32>, vector<16x128xf32> -> vector<16x128xf32>
    %149 = arith.addf %142, %148 : vector<16x128xf32>
    %c0_158 = arith.constant 0 : index
    %c0_159 = arith.constant 0 : index
    %150 = vector.load %arg8[%c0_158, %c0_159] : memref<1x128xf32, #tpu.memory_space<vmem>>, vector<1x128xf32>
    %151 = vector.broadcast %150 : vector<1x128xf32> to vector<16x128xf32>
    %152 = arith.addf %149, %151 : vector<16x128xf32>
    %c0_160 = arith.constant 0 : index
    %c0_161 = arith.constant 0 : index
    %c0_162 = arith.constant 0 : index
    %153 = vector.load %arg9[%c0_160, %c0_161, %c0_162] : memref<4x4x16xf32, #tpu.memory_space<vmem>>, vector<1x4x16xf32>
    %154 = vector.shape_cast %153 : vector<1x4x16xf32> to vector<4x16xf32>
    %cst_163 = arith.constant dense<0.000000e+00> : vector<4x128xf32>
    %155 = tpu.matmul %154, %152, %cst_163 {dimension_numbers = #tpu.dot_dimension_numbers<[1], [0], [0], [1], [0, 0, 1, 1], [], []>} : vector<4x16xf32>, vector<16x128xf32>, vector<4x128xf32> -> vector<4x128xf32>
    %c1_164 = arith.constant 1 : index
    %c0_165 = arith.constant 0 : index
    %c0_166 = arith.constant 0 : index
    %156 = vector.load %arg9[%c1_164, %c0_165, %c0_166] : memref<4x4x16xf32, #tpu.memory_space<vmem>>, vector<1x4x16xf32>
    %157 = vector.shape_cast %156 : vector<1x4x16xf32> to vector<4x16xf32>
    %cst_167 = arith.constant dense<0.000000e+00> : vector<4x128xf32>
    %158 = tpu.matmul %157, %152, %cst_167 {dimension_numbers = #tpu.dot_dimension_numbers<[1], [0], [0], [1], [0, 0, 1, 1], [], []>} : vector<4x16xf32>, vector<16x128xf32>, vector<4x128xf32> -> vector<4x128xf32>
    %159 = arith.maximumf %155, %158 : vector<4x128xf32>
    %c2_168 = arith.constant 2 : index
    %c0_169 = arith.constant 0 : index
    %c0_170 = arith.constant 0 : index
    %160 = vector.load %arg9[%c2_168, %c0_169, %c0_170] : memref<4x4x16xf32, #tpu.memory_space<vmem>>, vector<1x4x16xf32>
    %161 = vector.shape_cast %160 : vector<1x4x16xf32> to vector<4x16xf32>
    %cst_171 = arith.constant dense<0.000000e+00> : vector<4x128xf32>
    %162 = tpu.matmul %161, %152, %cst_171 {dimension_numbers = #tpu.dot_dimension_numbers<[1], [0], [0], [1], [0, 0, 1, 1], [], []>} : vector<4x16xf32>, vector<16x128xf32>, vector<4x128xf32> -> vector<4x128xf32>
    %163 = arith.maximumf %159, %162 : vector<4x128xf32>
    %c3_172 = arith.constant 3 : index
    %c0_173 = arith.constant 0 : index
    %c0_174 = arith.constant 0 : index
    %164 = vector.load %arg9[%c3_172, %c0_173, %c0_174] : memref<4x4x16xf32, #tpu.memory_space<vmem>>, vector<1x4x16xf32>
    %165 = vector.shape_cast %164 : vector<1x4x16xf32> to vector<4x16xf32>
    %cst_175 = arith.constant dense<0.000000e+00> : vector<4x128xf32>
    %166 = tpu.matmul %165, %152, %cst_175 {dimension_numbers = #tpu.dot_dimension_numbers<[1], [0], [0], [1], [0, 0, 1, 1], [], []>} : vector<4x16xf32>, vector<16x128xf32>, vector<4x128xf32> -> vector<4x128xf32>
    %167 = arith.maximumf %163, %166 : vector<4x128xf32>
    %cst_176 = arith.constant 0.000000e+00 : f32
    %168 = vector.broadcast %cst_176 : f32 to vector<4x128xf32>
    %169 = arith.maximumf %167, %168 : vector<4x128xf32>
    %c0_177 = arith.constant 0 : index
    %c0_178 = arith.constant 0 : index
    %170 = vector.load %arg11[%c0_177, %c0_178] : memref<1x400xf32, #tpu.memory_space<vmem>>, vector<1x400xf32>
    %171 = vector.extract_strided_slice %169 {offsets = [0, 0], sizes = [1, 128], strides = [1, 1]} : vector<4x128xf32> to vector<1x128xf32>
    %c0_179 = arith.constant 0 : index
    %c0_180 = arith.constant 0 : index
    %c0_181 = arith.constant 0 : index
    %172 = vector.load %arg10[%c0_179, %c0_180, %c0_181] : memref<4x128x400xf32, #tpu.memory_space<vmem>>, vector<1x128x400xf32>
    %173 = vector.shape_cast %172 : vector<1x128x400xf32> to vector<128x400xf32>
    %cst_182 = arith.constant dense<0.000000e+00> : vector<1x400xf32>
    %174 = tpu.matmul %171, %173, %cst_182 {dimension_numbers = #tpu.dot_dimension_numbers<[1], [0], [0], [1], [0, 0, 1, 1], [], []>} : vector<1x128xf32>, vector<128x400xf32>, vector<1x400xf32> -> vector<1x400xf32>
    %175 = arith.addf %170, %174 : vector<1x400xf32>
    %176 = vector.extract_strided_slice %169 {offsets = [1, 0], sizes = [1, 128], strides = [1, 1]} : vector<4x128xf32> to vector<1x128xf32>
    %c1_183 = arith.constant 1 : index
    %c0_184 = arith.constant 0 : index
    %c0_185 = arith.constant 0 : index
    %177 = vector.load %arg10[%c1_183, %c0_184, %c0_185] : memref<4x128x400xf32, #tpu.memory_space<vmem>>, vector<1x128x400xf32>
    %178 = vector.shape_cast %177 : vector<1x128x400xf32> to vector<128x400xf32>
    %cst_186 = arith.constant dense<0.000000e+00> : vector<1x400xf32>
    %179 = tpu.matmul %176, %178, %cst_186 {dimension_numbers = #tpu.dot_dimension_numbers<[1], [0], [0], [1], [0, 0, 1, 1], [], []>} : vector<1x128xf32>, vector<128x400xf32>, vector<1x400xf32> -> vector<1x400xf32>
    %180 = arith.addf %175, %179 : vector<1x400xf32>
    %181 = vector.extract_strided_slice %169 {offsets = [2, 0], sizes = [1, 128], strides = [1, 1]} : vector<4x128xf32> to vector<1x128xf32>
    %c2_187 = arith.constant 2 : index
    %c0_188 = arith.constant 0 : index
    %c0_189 = arith.constant 0 : index
    %182 = vector.load %arg10[%c2_187, %c0_188, %c0_189] : memref<4x128x400xf32, #tpu.memory_space<vmem>>, vector<1x128x400xf32>
    %183 = vector.shape_cast %182 : vector<1x128x400xf32> to vector<128x400xf32>
    %cst_190 = arith.constant dense<0.000000e+00> : vector<1x400xf32>
    %184 = tpu.matmul %181, %183, %cst_190 {dimension_numbers = #tpu.dot_dimension_numbers<[1], [0], [0], [1], [0, 0, 1, 1], [], []>} : vector<1x128xf32>, vector<128x400xf32>, vector<1x400xf32> -> vector<1x400xf32>
    %185 = arith.addf %180, %184 : vector<1x400xf32>
    %186 = vector.extract_strided_slice %169 {offsets = [3, 0], sizes = [1, 128], strides = [1, 1]} : vector<4x128xf32> to vector<1x128xf32>
    %c3_191 = arith.constant 3 : index
    %c0_192 = arith.constant 0 : index
    %c0_193 = arith.constant 0 : index
    %187 = vector.load %arg10[%c3_191, %c0_192, %c0_193] : memref<4x128x400xf32, #tpu.memory_space<vmem>>, vector<1x128x400xf32>
    %188 = vector.shape_cast %187 : vector<1x128x400xf32> to vector<128x400xf32>
    %cst_194 = arith.constant dense<0.000000e+00> : vector<1x400xf32>
    %189 = tpu.matmul %186, %188, %cst_194 {dimension_numbers = #tpu.dot_dimension_numbers<[1], [0], [0], [1], [0, 0, 1, 1], [], []>} : vector<1x128xf32>, vector<128x400xf32>, vector<1x400xf32> -> vector<1x400xf32>
    %190 = arith.addf %185, %189 : vector<1x400xf32>
    %cst_195 = arith.constant 0.000000e+00 : f32
    %191 = vector.broadcast %cst_195 : f32 to vector<1x400xf32>
    %192 = arith.maximumf %190, %191 : vector<1x400xf32>
    %c0_196 = arith.constant 0 : index
    %c0_197 = arith.constant 0 : index
    %193 = vector.load %arg12[%c0_196, %c0_197] : memref<400x20xf32, #tpu.memory_space<vmem>>, vector<400x20xf32>
    %cst_198 = arith.constant dense<0.000000e+00> : vector<1x20xf32>
    %194 = tpu.matmul %192, %193, %cst_198 {dimension_numbers = #tpu.dot_dimension_numbers<[1], [0], [0], [1], [0, 0, 1, 1], [], []>} : vector<1x400xf32>, vector<400x20xf32>, vector<1x20xf32> -> vector<1x20xf32>
    %c0_199 = arith.constant 0 : index
    %c0_200 = arith.constant 0 : index
    %195 = vector.load %arg13[%c0_199, %c0_200] : memref<1x20xf32, #tpu.memory_space<vmem>>, vector<1x20xf32>
    %196 = arith.addf %194, %195 : vector<1x20xf32>
    %c0_201 = arith.constant 0 : index
    %c0_202 = arith.constant 0 : index
    %197 = vector.load %arg14[%c0_201, %c0_202] : memref<20x300xf32, #tpu.memory_space<vmem>>, vector<20x300xf32>
    %cst_203 = arith.constant dense<0.000000e+00> : vector<1x300xf32>
    %198 = tpu.matmul %196, %197, %cst_203 {dimension_numbers = #tpu.dot_dimension_numbers<[1], [0], [0], [1], [0, 0, 1, 1], [], []>} : vector<1x20xf32>, vector<20x300xf32>, vector<1x300xf32> -> vector<1x300xf32>
    %c0_204 = arith.constant 0 : index
    %c0_205 = arith.constant 0 : index
    %199 = vector.load %arg15[%c0_204, %c0_205] : memref<1x300xf32, #tpu.memory_space<vmem>>, vector<1x300xf32>
    %200 = arith.addf %198, %199 : vector<1x300xf32>
    %cst_206 = arith.constant 0.000000e+00 : f32
    %201 = vector.broadcast %cst_206 : f32 to vector<1x300xf32>
    %202 = arith.maximumf %200, %201 : vector<1x300xf32>
    %c0_207 = arith.constant 0 : index
    %c0_208 = arith.constant 0 : index
    %203 = vector.load %arg16[%c0_207, %c0_208] : memref<300x300xf32, #tpu.memory_space<vmem>>, vector<300x300xf32>
    %cst_209 = arith.constant dense<0.000000e+00> : vector<1x300xf32>
    %204 = tpu.matmul %202, %203, %cst_209 {dimension_numbers = #tpu.dot_dimension_numbers<[1], [0], [0], [1], [0, 0, 1, 1], [], []>} : vector<1x300xf32>, vector<300x300xf32>, vector<1x300xf32> -> vector<1x300xf32>
    %c0_210 = arith.constant 0 : index
    %c0_211 = arith.constant 0 : index
    %205 = vector.load %arg17[%c0_210, %c0_211] : memref<1x300xf32, #tpu.memory_space<vmem>>, vector<1x300xf32>
    %206 = arith.addf %204, %205 : vector<1x300xf32>
    %cst_212 = arith.constant 0.000000e+00 : f32
    %207 = vector.broadcast %cst_212 : f32 to vector<1x300xf32>
    %208 = arith.maximumf %206, %207 : vector<1x300xf32>
    %c0_213 = arith.constant 0 : index
    %c0_214 = arith.constant 0 : index
    %209 = vector.load %arg18[%c0_213, %c0_214] : memref<300x2xf32, #tpu.memory_space<vmem>>, vector<300x2xf32>
    %cst_215 = arith.constant dense<0.000000e+00> : vector<1x2xf32>
    %210 = tpu.matmul %208, %209, %cst_215 {dimension_numbers = #tpu.dot_dimension_numbers<[1], [0], [0], [1], [0, 0, 1, 1], [], []>} : vector<1x300xf32>, vector<300x2xf32>, vector<1x2xf32> -> vector<1x2xf32>
    %c0_216 = arith.constant 0 : index
    %c0_217 = arith.constant 0 : index
    %211 = vector.load %arg19[%c0_216, %c0_217] : memref<1x2xf32, #tpu.memory_space<vmem>>, vector<1x2xf32>
    %212 = arith.addf %210, %211 : vector<1x2xf32>
    %213 = vector.extract_strided_slice %196 {offsets = [0, 0], sizes = [1, 10], strides = [1, 1]} : vector<1x20xf32> to vector<1x10xf32>
    %c0_218 = arith.constant 0 : index
    %c0_219 = arith.constant 0 : index
    %c0_220 = arith.constant 0 : index
    %214 = vector.load %arg20[%c0_218, %c0_219, %c0_220] : memref<1x1x10xf32, #tpu.memory_space<vmem>>, vector<1x1x10xf32>
    %215 = vector.shape_cast %214 : vector<1x1x10xf32> to vector<1x10xf32>
    %216 = vector.shape_cast %213 : vector<1x10xf32> to vector<1x1x10xf32>
    tpu.vector_store %arg20[%c0_218, %c0_219, %c0_220], %216 {strides = array<i32>} : memref<1x1x10xf32, #tpu.memory_space<vmem>>, vector<1x1x10xf32>,
    %217 = vector.extract_strided_slice %196 {offsets = [0, 10], sizes = [1, 10], strides = [1, 1]} : vector<1x20xf32> to vector<1x10xf32>
    %c0_221 = arith.constant 0 : index
    %c0_222 = arith.constant 0 : index
    %c0_223 = arith.constant 0 : index
    %218 = vector.load %arg21[%c0_221, %c0_222, %c0_223] : memref<1x1x10xf32, #tpu.memory_space<vmem>>, vector<1x1x10xf32>
    %219 = vector.shape_cast %218 : vector<1x1x10xf32> to vector<1x10xf32>
    %220 = vector.shape_cast %217 : vector<1x10xf32> to vector<1x1x10xf32>
    tpu.vector_store %arg21[%c0_221, %c0_222, %c0_223], %220 {strides = array<i32>} : memref<1x1x10xf32, #tpu.memory_space<vmem>>, vector<1x1x10xf32>,
    %c0_224 = arith.constant 0 : index
    %c0_225 = arith.constant 0 : index
    %c0_226 = arith.constant 0 : index
    %221 = vector.load %arg22[%c0_224, %c0_225, %c0_226] : memref<1x1x2xf32, #tpu.memory_space<vmem>>, vector<1x1x2xf32>
    %222 = vector.shape_cast %221 : vector<1x1x2xf32> to vector<1x2xf32>
    %223 = vector.shape_cast %212 : vector<1x2xf32> to vector<1x1x2xf32>
    tpu.vector_store %arg22[%c0_224, %c0_225, %c0_226], %223 {strides = array<i32>} : memref<1x1x2xf32, #tpu.memory_space<vmem>>, vector<1x1x2xf32>,
    return
  }
  func.func @transform_0(%arg0: i32) -> (i32, i32, i32) {
    %c0_i32 = arith.constant 0 : i32
    %c0_i32_0 = arith.constant 0 : i32
    %c0_i32_1 = arith.constant 0 : i32
    return %arg0, %c0_i32, %c0_i32_0 : i32, i32, i32
  }
  func.func @transform_1(%arg0: i32) -> (i32, i32, i32) {
    %c0_i32 = arith.constant 0 : i32
    %c0_i32_0 = arith.constant 0 : i32
    %c0_i32_1 = arith.constant 0 : i32
    %c0_i32_2 = arith.constant 0 : i32
    return %c0_i32, %c0_i32_0, %c0_i32_1 : i32, i32, i32
  }
  func.func @transform_2(%arg0: i32) -> (i32, i32, i32) {
    %c0_i32 = arith.constant 0 : i32
    %c0_i32_0 = arith.constant 0 : i32
    %c0_i32_1 = arith.constant 0 : i32
    %c0_i32_2 = arith.constant 0 : i32
    return %c0_i32, %c0_i32_0, %c0_i32_1 : i32, i32, i32
  }
  func.func @transform_3(%arg0: i32) -> (i32, i32) {
    %c0_i32 = arith.constant 0 : i32
    %c0_i32_0 = arith.constant 0 : i32
    %c0_i32_1 = arith.constant 0 : i32
    return %c0_i32, %c0_i32_0 : i32, i32
  }
  func.func @transform_4(%arg0: i32) -> (i32, i32, i32) {
    %c0_i32 = arith.constant 0 : i32
    %c0_i32_0 = arith.constant 0 : i32
    %c0_i32_1 = arith.constant 0 : i32
    %c0_i32_2 = arith.constant 0 : i32
    return %c0_i32, %c0_i32_0, %c0_i32_1 : i32, i32, i32
  }
  func.func @transform_5(%arg0: i32) -> (i32, i32, i32) {
    %c0_i32 = arith.constant 0 : i32
    %c0_i32_0 = arith.constant 0 : i32
    %c0_i32_1 = arith.constant 0 : i32
    %c0_i32_2 = arith.constant 0 : i32
    return %c0_i32, %c0_i32_0, %c0_i32_1 : i32, i32, i32
  }
  func.func @transform_6(%arg0: i32) -> (i32, i32, i32) {
    %c0_i32 = arith.constant 0 : i32
    %c0_i32_0 = arith.constant 0 : i32
    %c0_i32_1 = arith.constant 0 : i32
    %c0_i32_2 = arith.constant 0 : i32
    return %c0_i32, %c0_i32_0, %c0_i32_1 : i32, i32, i32
  }
  func.func @transform_7(%arg0: i32) -> (i32, i32) {
    %c0_i32 = arith.constant 0 : i32
    %c0_i32_0 = arith.constant 0 : i32
    %c0_i32_1 = arith.constant 0 : i32
    return %c0_i32, %c0_i32_0 : i32, i32
  }
  func.func @transform_8(%arg0: i32) -> (i32, i32, i32) {
    %c0_i32 = arith.constant 0 : i32
    %c0_i32_0 = arith.constant 0 : i32
    %c0_i32_1 = arith.constant 0 : i32
    %c0_i32_2 = arith.constant 0 : i32
    return %c0_i32, %c0_i32_0, %c0_i32_1 : i32, i32, i32
  }
  func.func @transform_9(%arg0: i32) -> (i32, i32, i32) {
    %c0_i32 = arith.constant 0 : i32
    %c0_i32_0 = arith.constant 0 : i32
    %c0_i32_1 = arith.constant 0 : i32
    %c0_i32_2 = arith.constant 0 : i32
    return %c0_i32, %c0_i32_0, %c0_i32_1 : i32, i32, i32
  }
  func.func @transform_10(%arg0: i32) -> (i32, i32) {
    %c0_i32 = arith.constant 0 : i32
    %c0_i32_0 = arith.constant 0 : i32
    %c0_i32_1 = arith.constant 0 : i32
    return %c0_i32, %c0_i32_0 : i32, i32
  }
  func.func @transform_11(%arg0: i32) -> (i32, i32) {
    %c0_i32 = arith.constant 0 : i32
    %c0_i32_0 = arith.constant 0 : i32
    %c0_i32_1 = arith.constant 0 : i32
    return %c0_i32, %c0_i32_0 : i32, i32
  }
  func.func @transform_12(%arg0: i32) -> (i32, i32) {
    %c0_i32 = arith.constant 0 : i32
    %c0_i32_0 = arith.constant 0 : i32
    %c0_i32_1 = arith.constant 0 : i32
    return %c0_i32, %c0_i32_0 : i32, i32
  }
  func.func @transform_13(%arg0: i32) -> (i32, i32) {
    %c0_i32 = arith.constant 0 : i32
    %c0_i32_0 = arith.constant 0 : i32
    %c0_i32_1 = arith.constant 0 : i32
    return %c0_i32, %c0_i32_0 : i32, i32
  }
  func.func @transform_14(%arg0: i32) -> (i32, i32) {
    %c0_i32 = arith.constant 0 : i32
    %c0_i32_0 = arith.constant 0 : i32
    %c0_i32_1 = arith.constant 0 : i32
    return %c0_i32, %c0_i32_0 : i32, i32
  }
  func.func @transform_15(%arg0: i32) -> (i32, i32) {
    %c0_i32 = arith.constant 0 : i32
    %c0_i32_0 = arith.constant 0 : i32
    %c0_i32_1 = arith.constant 0 : i32
    return %c0_i32, %c0_i32_0 : i32, i32
  }
  func.func @transform_16(%arg0: i32) -> (i32, i32) {
    %c0_i32 = arith.constant 0 : i32
    %c0_i32_0 = arith.constant 0 : i32
    %c0_i32_1 = arith.constant 0 : i32
    return %c0_i32, %c0_i32_0 : i32, i32
  }
  func.func @transform_17(%arg0: i32) -> (i32, i32) {
    %c0_i32 = arith.constant 0 : i32
    %c0_i32_0 = arith.constant 0 : i32
    %c0_i32_1 = arith.constant 0 : i32
    return %c0_i32, %c0_i32_0 : i32, i32
  }
  func.func @transform_18(%arg0: i32) -> (i32, i32) {
    %c0_i32 = arith.constant 0 : i32
    %c0_i32_0 = arith.constant 0 : i32
    %c0_i32_1 = arith.constant 0 : i32
    return %c0_i32, %c0_i32_0 : i32, i32
  }
  func.func @transform_19(%arg0: i32) -> (i32, i32, i32) {
    %c0_i32 = arith.constant 0 : i32
    %c0_i32_0 = arith.constant 0 : i32
    %c0_i32_1 = arith.constant 0 : i32
    return %arg0, %c0_i32, %c0_i32_0 : i32, i32, i32
  }
  func.func @transform_20(%arg0: i32) -> (i32, i32, i32) {
    %c0_i32 = arith.constant 0 : i32
    %c0_i32_0 = arith.constant 0 : i32
    %c0_i32_1 = arith.constant 0 : i32
    return %arg0, %c0_i32, %c0_i32_0 : i32, i32, i32
  }
  func.func @transform_21(%arg0: i32) -> (i32, i32, i32) {
    %c0_i32 = arith.constant 0 : i32
    %c0_i32_0 = arith.constant 0 : i32
    %c0_i32_1 = arith.constant 0 : i32
    return %arg0, %c0_i32, %c0_i32_0 : i32, i32, i32
  }
}

</mosaic_0001>

<bundles_post_ra>
// kernel: forward.1
= control target key start
LH: loop header
LB: loop body
LE: loop exit
PB: predicated region body
PF: predicated region fallthrough
CT: control target
= control target key end

     0   :  { %s17559_s0 = inlined_call_operand.vmem [shape: f32[2,196,2], index: 0, kind: input, shape index: {}]   ;;  %s17560_s1 = inlined_call_operand.vmem [shape: f32[9,144,196], index: 1, kind: input, shape index: {}]   ;;  %s17561_s2 = inlined_call_operand.hbm [shape: f32[9,2,64], index: 2, kind: input, shape index: {}]   ;;  %s17562_s3 = inlined_call_operand.hbm [shape: f32[1,64], index: 3, kind: input, shape index: {}]   ;;  %s17563_s4 = inlined_call_operand.vmem [shape: f32[4,36,144], index: 4, kind: input, shape index: {}]   ;;  %s17564_s5 = inlined_call_operand.hbm [shape: f32[9,16,36], index: 5, kind: input, shape index: {}]   ;;  %s17565_s6 = inlined_call_operand.vmem [shape: f32[9,64,128], index: 6, kind: input, shape index: {}]   ;;  %s17566_s7 = inlined_call_operand.hbm [shape: f32[1,128], index: 7, kind: input, shape index: {}]   ;;  %s17567_s8 = inlined_call_operand.hbm [shape: f32[4,4,16], index: 8, kind: input, shape index: {}]   ;;  %s17568_s9 = inlined_call_operand.vmem [shape: f32[4,128,400], index: 9, kind: input, shape index: {}]   ;;  %s17569_s10 = inlined_call_operand.vmem [shape: f32[1,400], index: 10, kind: input, shape index: {}]   ;;  %s17570_s11 = inlined_call_operand.vmem [shape: f32[400,20], index: 11, kind: input, shape index: {}]   ;;  %s17571_s12 = inlined_call_operand.hbm [shape: f32[1,20], index: 12, kind: input, shape index: {}]   ;;  %s17572_s13 = inlined_call_operand.hbm [shape: f32[20,300], index: 13, kind: input, shape index: {}]   ;;  %s17573_s14 = inlined_call_operand.vmem [shape: f32[1,300], index: 14, kind: input, shape index: {}]   ;;  %s17574_s15 = inlined_call_operand.vmem [shape: f32[300,300], index: 15, kind: input, shape index: {}]   ;;  %s17575_s16 = inlined_call_operand.hbm [shape: f32[1,300], index: 16, kind: input, shape index: {}]   ;;  %s17576_s17 = inlined_call_operand.vmem [shape: f32[300,2], index: 17, kind: input, shape index: {}]   ;;  %s17577_s18 = inlined_call_operand.hbm [shape: f32[1,2], index: 18, kind: input, shape index: {}]   ;;  %s17578_s19 = inlined_call_operand.hbm [shape: f32[2,1,10], index: 19, kind: output, shape index: {0}]   ;;  %s17579_s20 = inlined_call_operand.hbm [shape: f32[2,1,10], index: 20, kind: output, shape index: {1}]   ;;  %s17580_s21 = inlined_call_operand.hbm [shape: f32[2,1,2], index: 21, kind: output, shape index: {2}]  }
   0x1   :  { %17599 = sst [smem:[#allocation78_spill]] %s17559_s0 }
   0x2   :  { %17600 = sst [smem:[#allocation79_spill]] %s17560_s1 }
   0x3   :  { %17601 = sst [smem:[#allocation80_spill]] %s17561_s2 }
   0x4   :  { %17602 = sst [smem:[#allocation81_spill]] %s17562_s3 }
   0x5   :  { %17603 = sst [smem:[#allocation82_spill]] %s17563_s4 }
   0x6   :  { %17604 = sst [smem:[#allocation83_spill]] %s17564_s5 }
   0x7   :  { %17605 = sst [smem:[#allocation84_spill]] %s17565_s6 }
   0x8   :  { %17606 = sst [smem:[#allocation85_spill]] %s17566_s7 }
   0x9   :  { %17607 = sst [smem:[#allocation86_spill]] %s17580_s21 }
   0xa   :  { %27 = vsyncpa [#allocation3], 0 }
   0xb   :  { %28 = vsyncpa [#allocation6], 0 }
   0xc   :  { %29 = vsyncpa [#allocation9], 0 }
   0xd   :  { %30 = vsyncpa [#allocation12], 0 }
   0xe   :  { %31 = vsyncpa [#allocation15], 0 }
   0xf   :  { %32 = vsyncpa [#allocation4], 0 }
  0x10   :  { %34 = vsyncpa [#allocation4 + $0x1], 0 }
  0x11   :  { %35 = vsyncpa [#allocation19], 0 }
  0x12   :  { %37 = vsyncpa [#allocation19 + $0x1], 0  ;;  %s12570_s2 = smov 0   ;;  %s12572_s25 = smov 0  }
  0x13   :  { %s12574_s26 = smov 0   ;;  %s12576_s27 = smov 0  }
  0x14 LB: > { %17608 = sst [smem:[#allocation28_spill]] %s12422_s2  ;;  %s12591_s3 = sadd.s32 4294967295, %s12434_s27   ;;  %s12434_s27 = sphi %s12576_s27, %s17736_s27   ;;  %s12430_s26 = sphi %s12574_s26, %s17738_s26   ;;  %s12426_s25 = sphi %s12572_s25, %s17740_s25   ;;  %s12422_s2 = sphi %s12570_s2, %s17739_s2  }
  0x15   : > { %17609 = sst [smem:[#allocation29_spill]] %s12430_s26  ;;  %s17583_s28 = sadd.s32 4294967294, %s12434_s27  }
  0x16   : > { %17610 = sst [smem:[#allocation30_spill]] %s12434_s27  ;;  %s12595_s29 = sadd.s32 1, %s12434_s27  }
  0x17   : > { %17611 = sst [smem:[#allocation31_spill]] %s12595_s29  ;;  %s454_s0 = sadd.s32 1, %s12430_s26 }
  0x18   : > { %s451_s4 = ssub.s32 %s12434_s27, %s12595_s29  ;;  %p464_p0 = scmp.ne.s32.totalorder %s12430_s26, %s12426_s25 }
  0x19   : > { %p452_p1 = scmp.eq.s32.totalorder %s451_s4, 0  ;;  %p465_p2 = scmp.eq.s32.totalorder %s12591_s3, 1 }
  0x1a   : > { %p470_p3 = scmp.ne.s32.totalorder %s12426_s25, %s12422_s2  ;;  %p471_p4 = scmp.eq.s32.totalorder %s17583_s28, 1 }
  0x1b   : > { %s12608_s30 = scalar_select %p452_p1, %s12430_s26, %s454_s0  }
  0x1c   : > { %p12610_p5 = por %p465_p2, %p464_p0  ;;  %p12614_p6 = por %p471_p4, %p470_p3 }
  0x1d   : > { %17612 = sst [smem:[#allocation32_spill]] %s12608_s30  ;;  %p9709_p7 = scmp.ge.s32.totalorder %s12434_s27, 1 }
  0x1e   : > { %s17613_s5 = scalar_select %p12610_p5, 1, 0 }
  0x1f   : > { %s17614_s22 = scalar_select %p12614_p6, 1, 0 }
  0x20   : > { %p530_p8 = scmp.lt.s32.totalorder %s12434_s27, 3  ;;  %p17591_p9 = scmp.eq.s32.totalorder %s12591_s3, 0 }
  0x21   : > { %17615 = sst [smem:[#allocation33_spill]] %s17614_s22  ;;  %s12436_s1 = smov [#allocation5]  }
  0x22   : > { %p12621_p10 = pnand %p9709_p7, %p530_p8  ;;  %s559_s24 = sshll.u32 %s12436_s1, 4  ;;  %s560_s24 = int_to_ptr.vmem [resolvable:$true] %s559_s24 }
  0x23   : > { %s12437_s0 = smov [#allocation8]   ;;  %s12438_s30 = smov [#allocation11]  }
  0x24   : > { %s17616_s23 = scalar_select %p12621_p10, 1, 0 }
  0x25   : > { %p11904_p11 = pneg %p12621_p10  ;;  %s589_s4 = sshll.u32 %s12437_s0, 4  ;;  %s590_s4 = int_to_ptr.vmem [resolvable:$true] %s589_s4 }
  0x26   : > { %s622_s26 = sshll.u32 %s12438_s30, 4  ;;  %s12075_s1 = scalar_lea.vmem %s560_s24, 16  ;;  %s12633_s26 = int_to_ptr.vmem [resolvable:$true] %s622_s26 }
  0x27   : > { %p12629_p12 = pnand %p17591_p9, %p11904_p11  ;;  %p12076_p0 = scmp.ne.s32.totalorder %s560_s24, %s12075_s1 }
  0x28   : > { %s12082_s0 = scalar_lea.vmem %s560_s24, 32  ;;  %p12083_p3 = scmp.lt.s32.totalorder %s560_s24, %s560_s24 }
  0x29   : > { %p12637_p13 = pneg %p12629_p12  ;;  %p12084_p4 = scmp.lt.s32.totalorder %s12082_s0, %s12075_s1 }
  0x2b   : > { %p12078_p1 = pnand %p12076_p0, %p12637_p13  ;;  %p12085_p7 = por %p12084_p4, %p12083_p3 }
  0x2d   : > { %p12079_p2 = pneg %p12078_p1 }
  0x2f   : > { %p12086_p8 = pnand %p12085_p7, %p12079_p2 }
  0x31   : > { %12089 = shalt.err (!%p12086_p8)
}
  0x32   : > { %s17619_s2 = sld [smem:[#allocation81_spill]]  ;;  %s12101_s27 = scalar_lea.vmem %s590_s4, 16 }
  0x33   : > { %p12102_p11 = scmp.ne.s32.totalorder %s590_s4, %s12101_s27  ;;  %s12108_s21 = scalar_lea.vmem %s590_s4, 32 }
  0x34   : > { %p12109_p0 = scmp.lt.s32.totalorder %s590_s4, %s590_s4  ;;  %p12110_p1 = scmp.lt.s32.totalorder %s12108_s21, %s12101_s27 }
  0x35   : > { %p12104_p9 = pnand %p12102_p11, %p12637_p13 }
  0x36   : > { %p12111_p5 = por %p12110_p1, %p12109_p0 }
  0x37   : > { %p12105_p6 = pneg %p12104_p9 }
  0x38   : > { %11910 = dma.hbm_to_vmem [thread:$0]  (!%p12629_p12), %s17619_s2, 16, %s560_s24, [#allocation6]  }
  0x39   : > { %p12112_p10 = pnand %p12111_p5, %p12105_p6 }
  0x3b   : > { %12115 = shalt.err (!%p12112_p10)
}
  0x3c   : > { %s17620_s7 = sld [smem:[#allocation85_spill]]  ;;  %s12127_s2 = scalar_lea.vmem %s12633_s26, 16 }
  0x3d   : > { %p12128_p2 = scmp.ne.s32.totalorder %s12633_s26, %s12127_s2  ;;  %s12134_s21 = scalar_lea.vmem %s12633_s26, 32 }
  0x3e   : > { %p12135_p5 = scmp.lt.s32.totalorder %s12633_s26, %s12633_s26  ;;  %p12136_p6 = scmp.lt.s32.totalorder %s12134_s21, %s12127_s2 }
  0x3f   : > { %p12130_p9 = pnand %p12128_p2, %p12637_p13 }
  0x40   : > { %p12137_p10 = por %p12136_p6, %p12135_p5 }
  0x41   : > { %p12131_p3 = pneg %p12130_p9 }
  0x42   : > { %11916 = dma.hbm_to_vmem [thread:$0]  (!%p12629_p12), %s17620_s7, 16, %s590_s4, [#allocation9]  }
  0x43   : > { %p12138_p4 = pnand %p12137_p10, %p12131_p3 }
  0x45   : > { %12141 = shalt.err (!%p12138_p4)
}
  0x46   : > { %11922 = dma.hbm_to_vmem [thread:$0]  (!%p12629_p12), %s17571_s12, 16, %s12633_s26, [#allocation12]  }
  0x47   : > { %s12439_s24 = smov [#allocation14]   ;;  %s12440_s30 = smov [#allocation2]  }
  0x48   : > { %s652_s4 = sshll.u32 %s12439_s24, 4  ;;  %s545_s1 = sshll.u32 %s12440_s30, 4  ;;  %s653_s4 = int_to_ptr.vmem [resolvable:$true] %s652_s4  ;;  %s546_s1 = int_to_ptr.vmem [resolvable:$true] %s545_s1 }
  0x49   : > { %s12153_s0 = scalar_lea.vmem %s653_s4, 48  ;;  %s12160_s2 = scalar_lea.vmem %s653_s4, 64 }
  0x4a   : > { %p12154_p7 = scmp.ne.s32.totalorder %s653_s4, %s12153_s0  ;;  %p12161_p0 = scmp.lt.s32.totalorder %s653_s4, %s653_s4 }
  0x4b   : > { %p12162_p1 = scmp.lt.s32.totalorder %s12160_s2, %s12153_s0 }
  0x4c   : > { %p12156_p8 = pnand %p12154_p7, %p12637_p13 }
  0x4d   : > { %p12163_p2 = por %p12162_p1, %p12161_p0 }
  0x4e   : > { %p12157_p11 = pneg %p12156_p8 }
  0x50   : > { %p12164_p9 = pnand %p12163_p2, %p12157_p11 }
  0x52   : > { %12167 = shalt.err (!%p12164_p9)
}
  0x53   : > { %11928 = dma.hbm_to_vmem [thread:$0]  (!%p12629_p12), %s17575_s16, 48, %s653_s4, [#allocation15]  }
  0x54   : > { %s12179_s27 = scalar_lea.vmem %s546_s1, 288  ;;  %p12187_p10 = scmp.lt.s32.totalorder %s546_s1, %s546_s1 }
  0x55   : > { %p12180_p3 = scmp.ne.s32.totalorder %s546_s1, %s12179_s27  ;;  %p12188_p4 = scmp.lt.s32.totalorder %s12179_s27, %s12179_s27 }
  0x57   : > { %p12182_p5 = pnand %p12180_p3, %p12637_p13  ;;  %p12189_p7 = por %p12188_p4, %p12187_p10 }
  0x59   : > { %p12183_p6 = pneg %p12182_p5 }
  0x5b   : > { %p12190_p8 = pnand %p12189_p7, %p12183_p6 }
  0x5d   : > { %12193 = shalt.err (!%p12190_p8)
}
  0x5e   : > { %s12441_s22 = smov 32   ;;  %s12442_s24 = smov 2  }
  0x5f   : > { %s17621_s2 = sld [smem:[#allocation80_spill]]  ;;  %s12443_s4 = smov [#allocation7]  }
  0x60   : > { %s572_s21 = sshll.u32 %s12443_s4, 4  ;;  %s573_s21 = int_to_ptr.vmem [resolvable:$true] %s572_s21 }
  0x61   : > { %s12205_s26 = scalar_lea.vmem %s573_s21, 2304  ;;  %p12213_p2 = scmp.lt.s32.totalorder %s573_s21, %s573_s21 }
  0x62   : > { %p12206_p11 = scmp.ne.s32.totalorder %s573_s21, %s12205_s26  ;;  %p12214_p9 = scmp.lt.s32.totalorder %s12205_s26, %s12205_s26 }
  0x64   : > { %p12208_p0 = pnand %p12206_p11, %p12637_p13  ;;  %p12215_p3 = por %p12214_p9, %p12213_p2 }
  0x65   : > { %11907 = dma.hbm_to_vmem [thread:$0]  (!%p12629_p12), %s17621_s2, 288, %s546_s1, [#allocation3], %s12441_s22, %s12441_s22, %s12442_s24  }
  0x66   : > { %p12209_p1 = pneg %p12208_p0 }
  0x68   : > { %p12216_p5 = pnand %p12215_p3, %p12209_p1 }
  0x6a   : > { %12219 = shalt.err (!%p12216_p5)
}
  0x6b   : > { %s12444_s27 = smov 128   ;;  %s12445_s7 = smov 8  }
  0x6c   : > { %s17622_s22 = sld [smem:[#allocation83_spill]]  ;;  %s12446_s24 = smov [#allocation10]  }
  0x6d   : > { %s599_s0 = sshll.u32 %s12446_s24, 4  ;;  %s600_s0 = int_to_ptr.vmem [resolvable:$true] %s599_s0 }
  0x6e   : > { %s12231_s2 = scalar_lea.vmem %s600_s0, 256  ;;  %p12239_p7 = scmp.lt.s32.totalorder %s600_s0, %s600_s0 }
  0x6f   : > { %p12232_p6 = scmp.ne.s32.totalorder %s600_s0, %s12231_s2  ;;  %p12240_p8 = scmp.lt.s32.totalorder %s12231_s2, %s12231_s2 }
  0x71   : > { %p12234_p10 = pnand %p12232_p6, %p12637_p13  ;;  %p12241_p11 = por %p12240_p8, %p12239_p7 }
  0x72   : > { %11913 = dma.hbm_to_vmem [thread:$0]  (!%p12629_p12), %s17622_s22, 2304, %s573_s21, [#allocation6], %s12444_s27, %s12444_s27, %s12445_s7  }
  0x73   : > { %p12235_p4 = pneg %p12234_p10 }
  0x75   : > { %p12242_p0 = pnand %p12241_p11, %p12235_p4 }
  0x77   : > { %12245 = shalt.err (!%p12242_p0)
}
  0x78   : > { %s12447_s4 = smov 64   ;;  %s12448_s26 = smov 4  }
  0x79   : > { %11919 = dma.hbm_to_vmem [thread:$0]  (!%p12629_p12), %s17567_s8, 256, %s600_s0, [#allocation9], %s12447_s4, %s12447_s4, %s12448_s26  }
  0x7a   : > { %s12449_s21 = smov [#allocation13]  }
  0x7b   : > { %s632_s27 = sshll.u32 %s12449_s21, 4  ;;  %s633_s27 = int_to_ptr.vmem [resolvable:$true] %s632_s27 }
  0x7c   : > { %s12257_s1 = scalar_lea.vmem %s633_s27, 1152  ;;  %p12265_p3 = scmp.lt.s32.totalorder %s633_s27, %s633_s27 }
  0x7d   : > { %p12258_p1 = scmp.ne.s32.totalorder %s633_s27, %s12257_s1  ;;  %p12266_p5 = scmp.lt.s32.totalorder %s12257_s1, %s12257_s1 }
  0x7f   : > { %p12260_p2 = pnand %p12258_p1, %p12637_p13  ;;  %p12267_p6 = por %p12266_p5, %p12265_p3 }
  0x81   : > { %p12261_p9 = pneg %p12260_p2 }
  0x83   : > { %p12268_p10 = pnand %p12267_p6, %p12261_p9 }
  0x85   : > { %12271 = shalt.err (!%p12268_p10)
}
  0x86   : > { %s12450_s22 = smov 384   ;;  %s12451_s24 = smov 24  }
  0x87   : > { %11925 = dma.hbm_to_vmem [thread:$0]  (!%p12629_p12), %s17572_s13, 1152, %s633_s27, [#allocation12], %s12450_s22, %s12450_s22, %s12451_s24  }
  0x88   : > { %s12452_s4 = smov [#allocation16]  }
  0x89   : > { %s666_s26 = sshll.u32 %s12452_s4, 4  ;;  %s667_s26 = int_to_ptr.vmem [resolvable:$true] %s666_s26 }
  0x8a   : > { %s12283_s30 = scalar_lea.vmem %s667_s26, 16  ;;  %s12290_s7 = scalar_lea.vmem %s667_s26, 32 }
  0x8b   : > { %p12284_p4 = scmp.ne.s32.totalorder %s667_s26, %s12283_s30  ;;  %p12291_p11 = scmp.lt.s32.totalorder %s667_s26, %s667_s26 }
  0x8c   : > { %p12292_p0 = scmp.lt.s32.totalorder %s12290_s7, %s12283_s30 }
  0x8d   : > { %p12286_p7 = pnand %p12284_p4, %p12637_p13 }
  0x8e   : > { %p12293_p1 = por %p12292_p0, %p12291_p11 }
  0x8f   : > { %p12287_p8 = pneg %p12286_p7 }
  0x91   : > { %p12294_p2 = pnand %p12293_p1, %p12287_p8 }
  0x93   : > { %12297 = shalt.err (!%p12294_p2)
}
  0x94   : > { %11931 = dma.hbm_to_vmem [thread:$0]  (!%p12629_p12), %s17577_s18, 16, %s667_s26, [#allocation15]  }
  0x95   : > { %p17623_p9 = scmp.ne.s32.totalorder %s17616_s23, 0 }
  0x97   : > { %687 = sbr.rel (%p17623_p9) target bundleno = 4935 (0x1347), region = 96 }
  0x9c   : > { %p17624_p3 = scmp.eq.s32.totalorder %s12591_s3, 0 }
  0x9e   : > { %12393 = dma.done.wait (%p17624_p3), [#allocation3], 288   ;;  %p17625_p13 = pmov %p17624_p3 }
  0x9f   : > { %p17626_p5 = pmov %p17624_p3 }
  0xa0   : > { %12395 = vsyncadd (%p17625_p13), [#allocation3], 4294967008 }
  0xa1   : > { %12397 = dma.done.wait (%p17626_p5), [#allocation6], 2320   ;;  %p17627_p6 = pmov %p17624_p3 }
  0xa2   : > { %p17628_p10 = pmov %p17624_p3 }
  0xa3   : > { %12399 = vsyncadd (%p17627_p6), [#allocation6], 4294964976 }
  0xa4   : > { %12401 = dma.done.wait (%p17628_p10), [#allocation9], 272   ;;  %p17629_p12 = pmov %p17624_p3 }
  0xa5   : > { %p17630_p4 = pmov %p17624_p3 }
  0xa6   : > { %12403 = vsyncadd (%p17629_p12), [#allocation9], 4294967024 }
  0xa7   : > { %12405 = dma.done.wait (%p17630_p4), [#allocation12], 1168   ;;  %p17631_p7 = pmov %p17624_p3 }
  0xa8   : > { %p17632_p8 = pmov %p17624_p3 }
  0xa9   : > { %12407 = vsyncadd (%p17631_p7), [#allocation12], 4294966128 }
  0xaa   : > { %12409 = dma.done.wait (%p17632_p8), [#allocation15], 64   ;;  %p17633_p11 = pmov %p17624_p3 }
  0xab   : > { %p786_p0 = scmp.lt.s32.totalorder %s12591_s3, 1  ;;  %v17595_v0 = vmov 0.0   ;;  %s17634_s22 = sld [smem:[#allocation78_spill]]  ;;  %vm852_vm0 = vcmask 556032   ;;  %vm907_vm1 = vcmask 1043456   ;;  %vm1370_vm2 = vcmask 1041408  }
  0xac   : > { %12411 = vsyncadd (%p17633_p11), [#allocation15], 4294967232  ;;  %911 = vmatprep.subr.mxu0 %v17595_v0  ;;  %11811 = vmatprep.subr.mxu1 %v17595_v0  ;;  %s17635_s4 = sld [smem:[#allocation79_spill]]  ;;  %vm1315_vm3 = vcmask 15360   ;;  %vm5122_vm4 = vcmask 130048   ;;  %vm5598_vm5 = vcmask 293888  }
  0xad   : > { %s787_s28 = scalar_select %p786_p0, %s12591_s3, 1  ;;  %vm5784_vm6 = vcmask 523264   ;;  %vm12454_vm7 = vmmov 0   ;;  %vm8686_vm8 = vcmask 162816   ;;  %vm9457_vm9 = vcmask 73728  }
  0xae   : > { %s17673_s26 = sld [smem:[#allocation82_spill]]  ;;  %s12456_s27 = smov 118   ;;  %vm8974_vm10 = vcmask 359424  }
  0xaf   : > { %s11861_s29 = smul.u32 200, %s787_s28  ;;  %s17727_s6 = sld [smem:[#allocation84_spill]] }
  0xb0   : > { %s9469_s2 = sand.u32 1, %s12591_s3   ;;  %s17468_s0 = sshll.u32 %s12591_s3, 4 }
  0xb1   : > { %s12739_s24 = scalar_lea.vmem %s17634_s22, %s11861_s29  ;;  %s17484_s22 = scalar_lea.sflag [#allocation19], %s9469_s2 }
  0xb2   : > { %v12742_v1 = vld [vmem:[%s12739_s24 + $0x78] sm:$0xff]  ;;  %v12745_v2 = vld [vmem:[%s12739_s24 + $0x70] sm:$0xff]  ;;  %v12751_v3 = vld [vmem:[%s12739_s24 + $0x68] sm:$0xff]  ;;  %p17728_p2 = scmp.ne.s32.totalorder %s17613_s5, 0  ;;  %s12457_s3 = smov [#allocation18]  }
  0xb3   : > { %912 = vmatpush1.msra.mxu0 %v12742_v1  ;;  %11836 = vmatpush1.msra.mxu1 %v12742_v1  ;;  %v12758_v4 = vld [vmem:[%s12739_s24 + $0x60] sm:$0xff]  ;;  %v12765_v5 = vld [vmem:[%s12739_s24 + $0x58] sm:$0xff]  ;;  %v12772_v6 = vld [vmem:[%s12739_s24 + $0x50] sm:$0xff] }
  0xb4   : > { %913 = vmatprep.subr.mxu0 %v17595_v0  ;;  %11812 = vmatprep.subr.mxu1 %v17595_v0  ;;  %v817_v7 = vld [vmem:[%s17635_s4 + $0x8] sm:$0xff]  ;;  %v12789_v9 = vld [vmem:[%s12739_s24 + $0x40] sm:$0xff]  ;;  %v12796_v10 = vld [vmem:[%s12739_s24 + $0x38] sm:$0xff]  ;;  %s17674_s30 = smov %s17673_s26 }
  0xb5   : > { %914 = vmatpush1.msra.mxu0 %v12745_v2  ;;  %11837 = vmatpush1.msra.mxu1 %v12745_v2  ;;  %v12782_v8 = vld [vmem:[%s12739_s24 + $0x48] sm:$0xff]  ;;  %v12803_v11 = vld [vmem:[%s12739_s24 + $0x30] sm:$0xff]  ;;  %v12817_v13 = vld [vmem:[%s12739_s24 + $0x20] sm:$0xff] }
  0xb6   : > { %915 = vmatprep.subr.mxu0 %v17595_v0  ;;  %11813 = vmatprep.subr.mxu1 %v17595_v0  ;;  %v12810_v12 = vld [vmem:[%s12739_s24 + $0x28] sm:$0xff]  ;;  %v12824_v14 = vld [vmem:[%s12739_s24 + $0x18] sm:$0xff]  ;;  %v12831_v15 = vld [vmem:[%s12739_s24 + $0x10] sm:$0xff] }
  0xb7   : > { %916 = vmatpush1.msra.mxu0 %v12751_v3  ;;  %11838 = vmatpush1.msra.mxu1 %v12751_v3  ;;  %v12838_v16 = vld [vmem:[%s12739_s24 + $0x8] sm:$0xff]  ;;  %v12845_v17 = vld [vmem:[%s12739_s24] sm:$0xff]  ;;  %v12859_v19 = vld [vmem:[%s12739_s24 + $0xb8] sm:$0xff] }
  0xb8   : > { %917 = vmatprep.subr.mxu0 %v17595_v0  ;;  %11814 = vmatprep.subr.mxu1 %v17595_v0  ;;  %v12852_v18 = vld [vmem:[%s12739_s24 + $0xc0] sm:$0xf]  ;;  %v12867_v20 = vld [vmem:[%s12739_s24 + $0xb0] sm:$0xff]  ;;  %v12875_v21 = vld [vmem:[%s12739_s24 + $0xa8] sm:$0xff] }
  0xb9   : > { %918 = vmatpush1.msra.mxu0 %v12758_v4  ;;  %11839 = vmatpush1.msra.mxu1 %v12758_v4  ;;  %v12882_v22 = vld [vmem:[%s12739_s24 + $0xa0] sm:$0xff]  ;;  %v12889_v23 = vld [vmem:[%s12739_s24 + $0x98] sm:$0xff]  ;;  %v12896_v24 = vld [vmem:[%s12739_s24 + $0x90] sm:$0xff] }
  0xba   : > { %919 = vmatprep.subr.mxu0 %v17595_v0  ;;  %11815 = vmatprep.subr.mxu1 %v17595_v0  ;;  %v12903_v25 = vld [vmem:[%s12739_s24 + $0x88] sm:$0xff]  ;;  %v12910_v26 = vld [vmem:[%s12739_s24 + $0x80] sm:$0xff]  ;;  %v819_v28 = vld [vmem:[%s17635_s4 + $0x18] sm:$0xff] }
  0xbb   : > { %920 = vmatpush1.msra.mxu0 %v12765_v5  ;;  %9732 = vmatprep.mubr.msk.f32.mxu0 %vm852_vm0, %v817_v7  ;;  %v816_v27 = vld [vmem:[%s17635_s4] sm:$0xff]  ;;  %v9755_v29 = vld [vmem:[%s17635_s4 + $0x148] sm:$0xff]  ;;  %v818_v30 = vld [vmem:[%s17635_s4 + $0x10] sm:$0xff] }
  0xbc   : > { %921 = vmatprep.subr.mxu0 %v17595_v0  ;;  %11840 = vmatpush1.msra.mxu1 %v12765_v5  ;;  %v821_v31 = vld [vmem:[%s17635_s4 + $0x28] sm:$0xff]  ;;  %v9754_v32 = vld [vmem:[%s17635_s4 + $0x140] sm:$0xff]  ;;  %v9757_v33 = vld [vmem:[%s17635_s4 + $0x158] sm:$0xff] }
  0xbd   : > { %922 = vmatpush1.msra.mxu0 %v12772_v6  ;;  %11816 = vmatprep.subr.mxu1 %v17595_v0  ;;  %v820_v34 = vld [vmem:[%s17635_s4 + $0x20] sm:$0xff]  ;;  %v823_v35 = vld [vmem:[%s17635_s4 + $0x38] sm:$0xff]  ;;  %v9756_v36 = vld [vmem:[%s17635_s4 + $0x150] sm:$0xff] }
  0xbe   : > { %923 = vmatprep.subr.mxu0 %v17595_v0  ;;  %11841 = vmatpush1.msra.mxu1 %v12772_v6  ;;  %v9759_v37 = vld [vmem:[%s17635_s4 + $0x168] sm:$0xff]  ;;  %v822_v38 = vld [vmem:[%s17635_s4 + $0x30] sm:$0xff]  ;;  %v9758_v40 = vld [vmem:[%s17635_s4 + $0x160] sm:$0xff] }
  0xbf   : > { %924 = vmatpush1.msra.mxu0 %v12782_v8  ;;  %11817 = vmatprep.subr.mxu1 %v17595_v0  ;;  %v825_v39 = vld [vmem:[%s17635_s4 + $0x48] sm:$0xff]  ;;  %v9761_v41 = vld [vmem:[%s17635_s4 + $0x178] sm:$0xff]  ;;  %v824_v42 = vld [vmem:[%s17635_s4 + $0x40] sm:$0xff] }
  0xc0   : > { %925 = vmatprep.subr.mxu0 %v17595_v0  ;;  %11842 = vmatpush1.msra.mxu1 %v12782_v8  ;;  %v827_v43 = vld [vmem:[%s17635_s4 + $0x58] sm:$0xff]  ;;  %v9760_v44 = vld [vmem:[%s17635_s4 + $0x170] sm:$0xff]  ;;  %v9763_v45 = vld [vmem:[%s17635_s4 + $0x188] sm:$0xff] }
  0xc1   : > { %926 = vmatpush1.msra.mxu0 %v12789_v9  ;;  %11818 = vmatprep.subr.mxu1 %v17595_v0  ;;  %v826_v46 = vld [vmem:[%s17635_s4 + $0x50] sm:$0xff]  ;;  %v829_v47 = vld [vmem:[%s17635_s4 + $0x68] sm:$0xff]  ;;  %v9762_v48 = vld [vmem:[%s17635_s4 + $0x180] sm:$0xff] }
  0xc2   : > { %927 = vmatprep.subr.mxu0 %v17595_v0  ;;  %11843 = vmatpush1.msra.mxu1 %v12789_v9  ;;  %v9765_v49 = vld [vmem:[%s17635_s4 + $0x198] sm:$0xff]  ;;  %v828_v50 = vld [vmem:[%s17635_s4 + $0x60] sm:$0xff]  ;;  %v9764_v52 = vld [vmem:[%s17635_s4 + $0x190] sm:$0xff] }
  0xc3   : > { %928 = vmatpush1.msra.mxu0 %v12796_v10  ;;  %11819 = vmatprep.subr.mxu1 %v17595_v0  ;;  %v831_v51 = vld [vmem:[%s17635_s4 + $0x78] sm:$0xff]  ;;  %v9767_v53 = vld [vmem:[%s17635_s4 + $0x1a8] sm:$0xff]  ;;  %v830_v54 = vld [vmem:[%s17635_s4 + $0x70] sm:$0xff] }
  0xc4   : > { %929 = vmatprep.subr.mxu0 %v17595_v0  ;;  %11844 = vmatpush1.msra.mxu1 %v12796_v10  ;;  %v833_v55 = vld [vmem:[%s17635_s4 + $0x88] sm:$0xff]  ;;  %v9766_v56 = vld [vmem:[%s17635_s4 + $0x1a0] sm:$0xff]  ;;  %v9769_v57 = vld [vmem:[%s17635_s4 + $0x1b8] sm:$0xff] }
  0xc5   : > { %930 = vmatpush1.msra.mxu0 %v12803_v11  ;;  %11820 = vmatprep.subr.mxu1 %v17595_v0  ;;  %v832_v58 = vld [vmem:[%s17635_s4 + $0x80] sm:$0xff]  ;;  %v835_v59 = vld [vmem:[%s17635_s4 + $0x98] sm:$0xff]  ;;  %v9768_v60 = vld [vmem:[%s17635_s4 + $0x1b0] sm:$0xff] }
  0xc6   : > { %931 = vmatprep.subr.mxu0 %v17595_v0  ;;  %11845 = vmatpush1.msra.mxu1 %v12803_v11  ;;  %v9771_v61 = vld [vmem:[%s17635_s4 + $0x1c8] sm:$0xff]  ;;  %v834_v62 = vld [vmem:[%s17635_s4 + $0x90] sm:$0xff]  ;;  %v9770_v7 = vld [vmem:[%s17635_s4 + $0x1c0] sm:$0xff] }
  0xc7   : > { %932 = vmatpush1.msra.mxu0 %v12810_v12  ;;  %11821 = vmatprep.subr.mxu1 %v17595_v0  ;;  %v837_v63 = vld [vmem:[%s17635_s4 + $0xa8] sm:$0xff] }
  0xc8   : > { %933 = vmatprep.subr.mxu0 %v17595_v0  ;;  %11846 = vmatpush1.msra.mxu1 %v12810_v12 }
  0xc9   : > { %934 = vmatpush1.msra.mxu0 %v12817_v13  ;;  %11822 = vmatprep.subr.mxu1 %v17595_v0 }
  0xca   : > { %935 = vmatprep.subr.mxu0 %v17595_v0  ;;  %11847 = vmatpush1.msra.mxu1 %v12817_v13 }
  0xcb   : > { %936 = vmatpush1.msra.mxu0 %v12824_v14  ;;  %11823 = vmatprep.subr.mxu1 %v17595_v0 }
  0xcc   : > { %937 = vmatprep.subr.mxu0 %v17595_v0  ;;  %11848 = vmatpush1.msra.mxu1 %v12824_v14 }
  0xcd   : > { %938 = vmatpush1.msra.mxu0 %v12831_v15  ;;  %11824 = vmatprep.subr.mxu1 %v17595_v0 }
  0xce   : > { %939 = vmatprep.subr.mxu0 %v17595_v0  ;;  %11849 = vmatpush1.msra.mxu1 %v12831_v15 }
  0xcf   : > { %940 = vmatpush1.msra.mxu0 %v12838_v16  ;;  %11825 = vmatprep.subr.mxu1 %v17595_v0 }
  0xd0   : > { %941 = vmatprep.subr.mxu0 %v17595_v0  ;;  %11850 = vmatpush1.msra.mxu1 %v12838_v16 }
  0xd1   : > { %942 = vmatpush1.msra.mxu0 %v12845_v17  ;;  %11826 = vmatprep.subr.mxu1 %v17595_v0 }
  0xd2   : > { %957 = vmatprep.subr.mxu0 %v17595_v0  ;;  %11851 = vmatpush1.msra.mxu1 %v12845_v17 }
  0xd3   : > { %9731 = vmatpush2.msk.msra.mxu0 %vm907_vm1, %v12852_v18  ;;  %11827 = vmatprep.subr.mxu1 %v17595_v0 }
  0xd4   : > { %959 = vmatprep.subr.mxu0 %v17595_v0  ;;  %11852 = vmatpush2.msk.msra.mxu1 %vm907_vm1, %v12852_v18 }
  0xd5   : > { %960 = vmatpush2.msra.mxu0 %v12859_v19  ;;  %11828 = vmatprep.subr.mxu1 %v17595_v0 }
  0xd6   : > { %961 = vmatprep.subr.mxu0 %v17595_v0  ;;  %11853 = vmatpush2.msra.mxu1 %v12859_v19 }
  0xd7   : > { %962 = vmatpush2.msra.mxu0 %v12867_v20  ;;  %11829 = vmatprep.subr.mxu1 %v17595_v0 }
  0xd8   : > { %963 = vmatprep.subr.mxu0 %v17595_v0  ;;  %11854 = vmatpush2.msra.mxu1 %v12867_v20 }
  0xd9   : > { %964 = vmatpush2.msra.mxu0 %v12875_v21  ;;  %11830 = vmatprep.subr.mxu1 %v17595_v0 }
  0xda   : > { %965 = vmatprep.subr.mxu0 %v17595_v0  ;;  %11855 = vmatpush2.msra.mxu1 %v12875_v21 }
  0xdb   : > { %966 = vmatpush2.msra.mxu0 %v12882_v22  ;;  %11831 = vmatprep.subr.mxu1 %v17595_v0 }
  0xdc   : > { %967 = vmatprep.subr.mxu0 %v17595_v0  ;;  %11856 = vmatpush2.msra.mxu1 %v12882_v22 }
  0xdd   : > { %968 = vmatpush2.msra.mxu0 %v12889_v23  ;;  %11832 = vmatprep.subr.mxu1 %v17595_v0 }
  0xde   : > { %969 = vmatprep.subr.mxu0 %v17595_v0  ;;  %11857 = vmatpush2.msra.mxu1 %v12889_v23 }
  0xdf   : > { %970 = vmatpush2.msra.mxu0 %v12896_v24  ;;  %11833 = vmatprep.subr.mxu1 %v17595_v0 }
  0xe0   : > { %971 = vmatprep.subr.mxu0 %v17595_v0  ;;  %11858 = vmatpush2.msra.mxu1 %v12896_v24 }
  0xe1   : > { %972 = vmatpush2.msra.mxu0 %v12903_v25  ;;  %11834 = vmatprep.subr.mxu1 %v17595_v0 }
  0xe2   : > { %973 = vmatprep.subr.mxu0 %v17595_v0  ;;  %11859 = vmatpush2.msra.mxu1 %v12903_v25 }
  0xe3   : > { %974 = vmatpush2.msra.mxu0 %v12910_v26  ;;  %11835 = vmatprep.subr.mxu1 %v17595_v0 }
  0xe4   : > { %976 = vmatmul.mubr.f32.vlgmr.msra.gmra.mxu0 %v816_v27  ;;  %1158 = vmatprep.subr.mxu0 %v17595_v0  ;;  %v9773_v27 = vld [vmem:[%s17635_s4 + $0x1d8] sm:$0xff] }
  0xe5   : > { %9733 = vmatprep.mubr.msk.f32.mxu0 %vm852_vm0, %v819_v28  ;;  %1159 = vmatpush1.msra.mxu0 %v12742_v1  ;;  %v836_v28 = vld [vmem:[%s17635_s4 + $0xa0] sm:$0xff] }
  0xe6   : > { %1160 = vmatprep.subr.mxu0 %v17595_v0  ;;  %11860 = vmatpush2.msra.mxu1 %v12910_v26 }
  0xe7   : > { %1161 = vmatpush1.msra.mxu0 %v12745_v2  ;;  %9789 = vmatprep.mubr.msk.f32.mxu1 %vm852_vm0, %v9755_v29  ;;  %v839_v29 = vld [vmem:[%s17635_s4 + $0xb8] sm:$0xff] }
  0xe8   : > { %981 = vmatmul.mubr.f32.gmra.mxu0 %v818_v30  ;;  %1162 = vmatprep.subr.mxu0 %v17595_v0  ;;  %v9772_v30 = vld [vmem:[%s17635_s4 + $0x1d0] sm:$0xff] }
  0xe9   : > { %9734 = vmatprep.mubr.msk.f32.mxu0 %vm852_vm0, %v821_v31  ;;  %1163 = vmatpush1.msra.mxu0 %v12751_v3  ;;  %v9775_v31 = vld [vmem:[%s17635_s4 + $0x1e8] sm:$0xff] }
  0xea   : > { %1164 = vmatprep.subr.mxu0 %v17595_v0  ;;  %1233 = vmatmul.mubr.f32.vlgmr.msra.gmra.mxu1 %v9754_v32  ;;  %v838_v32 = vld [vmem:[%s17635_s4 + $0xb0] sm:$0xff] }
  0xeb   : > { %1165 = vmatpush1.msra.mxu0 %v12758_v4  ;;  %9790 = vmatprep.mubr.msk.f32.mxu1 %vm852_vm0, %v9757_v33  ;;  %v841_v33 = vld [vmem:[%s17635_s4 + $0xc8] sm:$0xff] }
  0xec   : > { %986 = vmatmul.mubr.f32.gmra.mxu0 %v820_v34  ;;  %1166 = vmatprep.subr.mxu0 %v17595_v0  ;;  %v9774_v34 = vld [vmem:[%s17635_s4 + $0x1e0] sm:$0xff] }
  0xed   : > { %9735 = vmatprep.mubr.msk.f32.mxu0 %vm852_vm0, %v823_v35  ;;  %1167 = vmatpush1.msra.mxu0 %v12765_v5  ;;  %v9777_v35 = vld [vmem:[%s17635_s4 + $0x1f8] sm:$0xff] }
  0xee   : > { %1168 = vmatprep.subr.mxu0 %v17595_v0  ;;  %1238 = vmatmul.mubr.f32.gmra.mxu1 %v9756_v36  ;;  %v840_v36 = vld [vmem:[%s17635_s4 + $0xc0] sm:$0xff] }
  0xef   : > { %1169 = vmatpush1.msra.mxu0 %v12772_v6  ;;  %9791 = vmatprep.mubr.msk.f32.mxu1 %vm852_vm0, %v9759_v37  ;;  %v843_v37 = vld [vmem:[%s17635_s4 + $0xd8] sm:$0xff] }
  0xf0   : > { %991 = vmatmul.mubr.f32.gmra.mxu0 %v822_v38  ;;  %1170 = vmatprep.subr.mxu0 %v17595_v0  ;;  %v9776_v38 = vld [vmem:[%s17635_s4 + $0x1f0] sm:$0xff] }
  0xf1   : > { %9736 = vmatprep.mubr.msk.f32.mxu0 %vm852_vm0, %v825_v39  ;;  %1171 = vmatpush1.msra.mxu0 %v12782_v8  ;;  %v9779_v39 = vld [vmem:[%s17635_s4 + $0x208] sm:$0xff] }
  0xf2   : > { %1172 = vmatprep.subr.mxu0 %v17595_v0  ;;  %1243 = vmatmul.mubr.f32.gmra.mxu1 %v9758_v40  ;;  %v842_v40 = vld [vmem:[%s17635_s4 + $0xd0] sm:$0xff] }
  0xf3   : > { %1173 = vmatpush1.msra.mxu0 %v12789_v9  ;;  %9792 = vmatprep.mubr.msk.f32.mxu1 %vm852_vm0, %v9761_v41  ;;  %v845_v41 = vld [vmem:[%s17635_s4 + $0xe8] sm:$0xff] }
  0xf4   : > { %996 = vmatmul.mubr.f32.gmra.mxu0 %v824_v42  ;;  %1174 = vmatprep.subr.mxu0 %v17595_v0  ;;  %v9778_v42 = vld [vmem:[%s17635_s4 + $0x200] sm:$0xff] }
  0xf5   : > { %9737 = vmatprep.mubr.msk.f32.mxu0 %vm852_vm0, %v827_v43  ;;  %1175 = vmatpush1.msra.mxu0 %v12796_v10  ;;  %v9781_v43 = vld [vmem:[%s17635_s4 + $0x218] sm:$0xff] }
  0xf6   : > { %1176 = vmatprep.subr.mxu0 %v17595_v0  ;;  %1248 = vmatmul.mubr.f32.gmra.mxu1 %v9760_v44  ;;  %v844_v44 = vld [vmem:[%s17635_s4 + $0xe0] sm:$0xff] }
  0xf7   : > { %1177 = vmatpush1.msra.mxu0 %v12803_v11  ;;  %9793 = vmatprep.mubr.msk.f32.mxu1 %vm852_vm0, %v9763_v45  ;;  %v847_v45 = vld [vmem:[%s17635_s4 + $0xf8] sm:$0xff] }
  0xf8   : > { %1001 = vmatmul.mubr.f32.gmra.mxu0 %v826_v46  ;;  %1178 = vmatprep.subr.mxu0 %v17595_v0  ;;  %v9780_v46 = vld [vmem:[%s17635_s4 + $0x210] sm:$0xff] }
  0xf9   : > { %9738 = vmatprep.mubr.msk.f32.mxu0 %vm852_vm0, %v829_v47  ;;  %1179 = vmatpush1.msra.mxu0 %v12810_v12  ;;  %v9783_v47 = vld [vmem:[%s17635_s4 + $0x228] sm:$0xff] }
  0xfa   : > { %1180 = vmatprep.subr.mxu0 %v17595_v0  ;;  %1253 = vmatmul.mubr.f32.gmra.mxu1 %v9762_v48  ;;  %v846_v48 = vld [vmem:[%s17635_s4 + $0xf0] sm:$0xff] }
  0xfb   : > { %1181 = vmatpush1.msra.mxu0 %v12817_v13  ;;  %9794 = vmatprep.mubr.msk.f32.mxu1 %vm852_vm0, %v9765_v49  ;;  %v849_v49 = vld [vmem:[%s17635_s4 + $0x108] sm:$0xff] }
  0xfc   : > { %1006 = vmatmul.mubr.f32.gmra.mxu0 %v828_v50  ;;  %1182 = vmatprep.subr.mxu0 %v17595_v0  ;;  %v9782_v50 = vld [vmem:[%s17635_s4 + $0x220] sm:$0xff] }
  0xfd   : > { %9739 = vmatprep.mubr.msk.f32.mxu0 %vm852_vm0, %v831_v51  ;;  %1183 = vmatpush1.msra.mxu0 %v12824_v14  ;;  %v9785_v51 = vld [vmem:[%s17635_s4 + $0x238] sm:$0xff] }
  0xfe   : > { %1184 = vmatprep.subr.mxu0 %v17595_v0  ;;  %1258 = vmatmul.mubr.f32.gmra.mxu1 %v9764_v52  ;;  %v848_v52 = vld [vmem:[%s17635_s4 + $0x100] sm:$0xff] }
  0xff   : > { %1185 = vmatpush1.msra.mxu0 %v12831_v15  ;;  %9795 = vmatprep.mubr.msk.f32.mxu1 %vm852_vm0, %v9767_v53  ;;  %v851_v53 = vld [vmem:[%s17635_s4 + $0x118] sm:$0xff] }
 0x100   : > { %1011 = vmatmul.mubr.f32.gmra.mxu0 %v830_v54  ;;  %1186 = vmatprep.subr.mxu0 %v17595_v0  ;;  %v9784_v54 = vld [vmem:[%s17635_s4 + $0x230] sm:$0xff] }
 0x101   : > { %9740 = vmatprep.mubr.msk.f32.mxu0 %vm852_vm0, %v833_v55  ;;  %1187 = vmatpush1.msra.mxu0 %v12838_v16  ;;  %v850_v55 = vld [vmem:[%s17635_s4 + $0x110] sm:$0xff] }
 0x102   : > { %1188 = vmatprep.subr.mxu0 %v17595_v0  ;;  %1263 = vmatmul.mubr.f32.gmra.mxu1 %v9766_v56  ;;  %v9751_v56 = vld [vmem:[%s17635_s4 + $0x128] sm:$0xff] }
 0x103   : > { %1189 = vmatpush1.msra.mxu0 %v12845_v17  ;;  %9796 = vmatprep.mubr.msk.f32.mxu1 %vm852_vm0, %v9769_v57  ;;  %v1066_v57 = vld [vmem:[#allocation2] sm:$0x3] }
 0x104   : > { %1016 = vmatmul.mubr.f32.gmra.mxu0 %v832_v58  ;;  %1204 = vmatprep.subr.mxu0 %v17595_v0  ;;  %v9750_v58 = vld [vmem:[%s17635_s4 + $0x120] sm:$0xff] }
 0x105   : > { %9741 = vmatprep.mubr.msk.f32.mxu0 %vm852_vm0, %v835_v59  ;;  %9786 = vmatpush2.msk.msra.mxu0 %vm907_vm1, %v12852_v18  ;;  %v9753_v59 = vld [vmem:[%s17635_s4 + $0x138] sm:$0xff] }
 0x106   : > { %1206 = vmatprep.subr.mxu0 %v17595_v0  ;;  %1268 = vmatmul.mubr.f32.gmra.mxu1 %v9768_v60  ;;  %v9752_v60 = vld [vmem:[%s17635_s4 + $0x130] sm:$0xff] }
 0x107   : > { %1207 = vmatpush2.msra.mxu0 %v12859_v19  ;;  %9797 = vmatprep.mubr.msk.f32.mxu1 %vm852_vm0, %v9771_v61  ;;  %v1314_v61 = vld [vmem:[#allocation2 + $0x2] sm:$0x3] }
 0x108   : > { %1021 = vmatmul.mubr.f32.gmra.mxu0 %v834_v62  ;;  %1208 = vmatprep.subr.mxu0 %v17595_v0 }
 0x109   : > { %9742 = vmatprep.mubr.msk.f32.mxu0 %vm852_vm0, %v837_v63  ;;  %1209 = vmatpush2.msra.mxu0 %v12867_v20 }
 0x10a   : > { %1210 = vmatprep.subr.mxu0 %v17595_v0  ;;  %1273 = vmatmul.mubr.f32.gmra.mxu1 %v9770_v7 }
 0x10b   : > { %1211 = vmatpush2.msra.mxu0 %v12875_v21  ;;  %9798 = vmatprep.mubr.msk.f32.mxu1 %vm852_vm0, %v9773_v27 }
 0x10c   : > { %1026 = vmatmul.mubr.f32.gmra.mxu0 %v836_v28  ;;  %1212 = vmatprep.subr.mxu0 %v17595_v0 }
 0x10d   : > { %9743 = vmatprep.mubr.msk.f32.mxu0 %vm852_vm0, %v839_v29  ;;  %1213 = vmatpush2.msra.mxu0 %v12882_v22 }
 0x10e   : > { %1214 = vmatprep.subr.mxu0 %v17595_v0  ;;  %1278 = vmatmul.mubr.f32.gmra.mxu1 %v9772_v30 }
 0x10f   : > { %1215 = vmatpush2.msra.mxu0 %v12889_v23  ;;  %9799 = vmatprep.mubr.msk.f32.mxu1 %vm852_vm0, %v9775_v31 }
 0x110   : > { %1031 = vmatmul.mubr.f32.gmra.mxu0 %v838_v32  ;;  %1216 = vmatprep.subr.mxu0 %v17595_v0 }
 0x111   : > { %9744 = vmatprep.mubr.msk.f32.mxu0 %vm852_vm0, %v841_v33  ;;  %1217 = vmatpush2.msra.mxu0 %v12896_v24 }
 0x112   : > { %1218 = vmatprep.subr.mxu0 %v17595_v0  ;;  %1283 = vmatmul.mubr.f32.gmra.mxu1 %v9774_v34 }
 0x113   : > { %1219 = vmatpush2.msra.mxu0 %v12903_v25  ;;  %9800 = vmatprep.mubr.msk.f32.mxu1 %vm852_vm0, %v9777_v35 }
 0x114   : > { %1036 = vmatmul.mubr.f32.gmra.mxu0 %v840_v36  ;;  %1220 = vmatprep.subr.mxu0 %v17595_v0 }
 0x115   : > { %9745 = vmatprep.mubr.msk.f32.mxu0 %vm852_vm0, %v843_v37  ;;  %1221 = vmatpush2.msra.mxu0 %v12910_v26 }
 0x116   : > { %1288 = vmatmul.mubr.f32.gmra.mxu1 %v9776_v38  ;;  %11224 = vmatprep.subr.msk.mxu1 %vm1370_vm2, %v1066_v57 }
 0x117   : > { %9801 = vmatprep.mubr.msk.f32.mxu1 %vm852_vm0, %v9779_v39  ;;  %11225 = vmatpush3.msk.msra.mxu1 %vm1370_vm2, %v1066_v57 }
 0x118   : > { %1041 = vmatmul.mubr.f32.gmra.mxu0 %v842_v40  ;;  %11195 = vmatprep.subr.msk.mxu0 %vm1370_vm2, %v1314_v61 }
 0x119   : > { %9746 = vmatprep.mubr.msk.f32.mxu0 %vm852_vm0, %v845_v41 }
 0x11a   : > { %1293 = vmatmul.mubr.f32.gmra.mxu1 %v9778_v42 }
 0x11b   : > { %9802 = vmatprep.mubr.msk.f32.mxu1 %vm852_vm0, %v9781_v43 }
 0x11c   : > { %1046 = vmatmul.mubr.f32.gmra.mxu0 %v844_v44 }
 0x11d   : > { %9747 = vmatprep.mubr.msk.f32.mxu0 %vm852_vm0, %v847_v45 }
 0x11e   : > { %1298 = vmatmul.mubr.f32.gmra.mxu1 %v9780_v46 }
 0x11f   : > { %9803 = vmatprep.mubr.msk.f32.mxu1 %vm852_vm0, %v9783_v47 }
 0x120   : > { %1051 = vmatmul.mubr.f32.gmra.mxu0 %v846_v48 }
 0x121   : > { %9748 = vmatprep.mubr.msk.f32.mxu0 %vm852_vm0, %v849_v49 }
 0x122   : > { %1303 = vmatmul.mubr.f32.gmra.mxu1 %v9782_v50 }
 0x123   : > { %9804 = vmatprep.mubr.msk.f32.mxu1 %vm852_vm0, %v9785_v51 }
 0x124   : > { %1056 = vmatmul.mubr.f32.gmra.mxu0 %v848_v52 }
 0x125   : > { %9749 = vmatprep.mubr.msk.f32.mxu0 %vm852_vm0, %v851_v53 }
 0x126   : > { %1308 = vmatmul.mubr.f32.gmra.mxu1 %v9784_v54 }
 0x128   : > { %1061 = vmatmul.mubr.f32.gmra.mxu0 %v850_v55 }
 0x129   : > { %9787 = vmatprep.mubr.msk.f32.mxu0 %vm852_vm0, %v9751_v56 }
 0x12c   : > { %1223 = vmatmul.mubr.f32.vlgmr.msra.gmra.mxu0 %v9750_v58 }
 0x12d   : > { %9788 = vmatprep.mubr.msk.f32.mxu0 %vm852_vm0, %v9753_v59  ;;  %11196 = vmatpush3.msk.msra.mxu0 %vm1370_vm2, %v1314_v61 }
 0x12e   : > { %1832 = vmatprep.subr.mxu0 %v17595_v0 }
 0x130   : > { %1228 = vmatmul.mubr.f32.gmra.mxu0 %v9752_v60 }
 0x1a4   : > { %v977_v62 = vpop.f32.mrf.mxu0 }
 0x1a5   : > { %11226 = vmatprep.mubr.msk.f32.mxu1 %vm1315_vm3, %v977_v62 }
 0x1a6   : > { %v979_v63 = vpop.f32.mrf.mxu0 }
 0x1a8   : > { %v982_v7 = vpop.f32.mrf.mxu0 }
 0x1a9   : > { %11227 = vmatmul.mubr.msk.f32.vlgmr.msra.gmra.mxu1 %vm1315_vm3, %v982_v7 }
 0x1aa   : > { %v984_v27 = vpop.f32.mrf.mxu0  ;;  %v13226_v28 = vpop.f32.mrf.mxu1 }
 0x1ac   : > { %v987_v29 = vpop.f32.mrf.mxu0  ;;  %v1236_v30 = vpop.f32.mrf.mxu1 }
 0x1ad   : > { %11229 = vmatprep.mubr.msk.f32.mxu1 %vm1315_vm3, %v987_v29 }
 0x1ae   : > { %v989_v31 = vpop.f32.mrf.mxu0  ;;  %v13229_v32 = vpop.f32.mrf.mxu1 }
 0x1b0   : > { %v992_v33 = vpop.f32.mrf.mxu0  ;;  %v1241_v34 = vpop.f32.mrf.mxu1 }
 0x1b1   : > { %11230 = vmatmul.mubr.msk.f32.gmra.mxu1 %vm1315_vm3, %v992_v33 }
 0x1b2   : > { %v994_v35 = vpop.f32.mrf.mxu0  ;;  %v13232_v36 = vpop.f32.mrf.mxu1 }
 0x1b4   : > { %v997_v37 = vpop.f32.mrf.mxu0  ;;  %v1246_v38 = vpop.f32.mrf.mxu1 }
 0x1b5   : > { %11232 = vmatprep.mubr.msk.f32.mxu1 %vm1315_vm3, %v997_v37 }
 0x1b6   : > { %v999_v39 = vpop.f32.mrf.mxu0  ;;  %v13235_v40 = vpop.f32.mrf.mxu1 }
 0x1b8   : > { %v1002_v41 = vpop.f32.mrf.mxu0  ;;  %v1251_v42 = vpop.f32.mrf.mxu1 }
 0x1b9   : > { %11233 = vmatmul.mubr.msk.f32.gmra.mxu1 %vm1315_vm3, %v1002_v41 }
 0x1ba   : > { %v1004_v43 = vpop.f32.mrf.mxu0  ;;  %v13238_v44 = vpop.f32.mrf.mxu1 }
 0x1bc   : > { %v1007_v45 = vpop.f32.mrf.mxu0  ;;  %v1256_v46 = vpop.f32.mrf.mxu1 }
 0x1bd   : > { %11235 = vmatprep.mubr.msk.f32.mxu1 %vm1315_vm3, %v1007_v45 }
 0x1be   : > { %v1009_v47 = vpop.f32.mrf.mxu0  ;;  %v13241_v48 = vpop.f32.mrf.mxu1 }
 0x1c0   : > { %v1012_v49 = vpop.f32.mrf.mxu0  ;;  %v1261_v50 = vpop.f32.mrf.mxu1 }
 0x1c1   : > { %11236 = vmatmul.mubr.msk.f32.gmra.mxu1 %vm1315_vm3, %v1012_v49 }
 0x1c2   : > { %v1014_v51 = vpop.f32.mrf.mxu0  ;;  %v13244_v52 = vpop.f32.mrf.mxu1 }
 0x1c4   : > { %v1017_v53 = vpop.f32.mrf.mxu0  ;;  %v1266_v54 = vpop.f32.mrf.mxu1 }
 0x1c5   : > { %11238 = vmatprep.mubr.msk.f32.mxu1 %vm1315_vm3, %v1017_v53 }
 0x1c6   : > { %v1019_v55 = vpop.f32.mrf.mxu0  ;;  %v13247_v56 = vpop.f32.mrf.mxu1 }
 0x1c8   : > { %v1022_v57 = vpop.f32.mrf.mxu0  ;;  %v1271_v58 = vpop.f32.mrf.mxu1 }
 0x1c9   : > { %11239 = vmatmul.mubr.msk.f32.gmra.mxu1 %vm1315_vm3, %v1022_v57 }
 0x1ca   : > { %v1024_v59 = vpop.f32.mrf.mxu0  ;;  %v13250_v60 = vpop.f32.mrf.mxu1 }
 0x1cc   : > { %v1027_v61 = vpop.f32.mrf.mxu0  ;;  %v1276_v62 = vpop.f32.mrf.mxu1 }
 0x1cd   : > { %11241 = vmatprep.mubr.msk.f32.mxu1 %vm1315_vm3, %v1027_v61 }
 0x1ce   : > { %v1029_v63 = vpop.f32.mrf.mxu0  ;;  %v13253_v7 = vpop.f32.mrf.mxu1 }
 0x1d0   : > { %v1032_v27 = vpop.f32.mrf.mxu0  ;;  %v1281_v29 = vpop.f32.mrf.mxu1 }
 0x1d1   : > { %11242 = vmatmul.mubr.msk.f32.gmra.mxu1 %vm1315_vm3, %v1032_v27 }
 0x1d2   : > { %v1034_v30 = vpop.f32.mrf.mxu0  ;;  %v13256_v31 = vpop.f32.mrf.mxu1 }
 0x1d4   : > { %v1037_v33 = vpop.f32.mrf.mxu0  ;;  %v1286_v34 = vpop.f32.mrf.mxu1 }
 0x1d5   : > { %11244 = vmatprep.mubr.msk.f32.mxu1 %vm1315_vm3, %v1037_v33  ;;  %v9877_v33 = vld [vmem:[%s17635_s4 + $0x350] sm:$0xff] }
 0x1d6   : > { %v1039_v35 = vpop.f32.mrf.mxu0  ;;  %v13259_v37 = vpop.f32.mrf.mxu1 }
 0x1d8   : > { %v1042_v38 = vpop.f32.mrf.mxu0  ;;  %v1291_v39 = vpop.f32.mrf.mxu1 }
 0x1d9   : > { %11245 = vmatmul.mubr.msk.f32.gmra.mxu1 %vm1315_vm3, %v1042_v38 }
 0x1da   : > { %v1044_v41 = vpop.f32.mrf.mxu0  ;;  %v13262_v42 = vpop.f32.mrf.mxu1 }
 0x1dc   : > { %v1047_v43 = vpop.f32.mrf.mxu0  ;;  %v1296_v45 = vpop.f32.mrf.mxu1 }
 0x1dd   : > { %11247 = vmatprep.mubr.msk.f32.mxu1 %vm1315_vm3, %v1047_v43 }
 0x1de   : > { %v1049_v46 = vpop.f32.mrf.mxu0  ;;  %v1299_v47 = vpop.f32.mrf.mxu1 }
 0x1e0   : > { %v1052_v49 = vpop.f32.mrf.mxu0  ;;  %v1301_v50 = vpop.f32.mrf.mxu1 }
 0x1e1   : > { %11248 = vmatmul.mubr.msk.f32.gmra.mxu1 %vm1315_vm3, %v1052_v49 }
 0x1e2   : > { %v1054_v51 = vpop.f32.mrf.mxu0  ;;  %v1304_v53 = vpop.f32.mrf.mxu1 }
 0x1e4   : > { %v1057_v54 = vpop.f32.mrf.mxu0  ;;  %v1306_v55 = vpop.f32.mrf.mxu1 }
 0x1e5   : > { %11250 = vmatprep.mubr.msk.f32.mxu1 %vm1315_vm3, %v1057_v54 }
 0x1e6   : > { %v1059_v57 = vpop.f32.mrf.mxu0  ;;  %v1309_v58 = vpop.f32.mrf.mxu1 }
 0x1e8   : > { %v1062_v59 = vpop.f32.mrf.mxu0  ;;  %v1311_v61 = vpop.f32.mrf.mxu1 }
 0x1e9   : > { %11251 = vmatmul.mubr.msk.f32.gmra.mxu1 %vm1315_vm3, %v1062_v59 }
 0x1ea   : > { %v1064_v62 = vpop.f32.mrf.mxu0 }
 0x1ec   : > { %v1224_v63 = vpop.f32.mrf.mxu0 }
 0x1ed   : > { %11197 = vmatprep.mubr.msk.f32.mxu0 %vm1315_vm3, %v1224_v63 }
 0x1ee   : > { %v1226_v27 = vpop.f32.mrf.mxu0 }
 0x1f0   : > { %v1229_v29 = vpop.f32.mrf.mxu0 }
 0x1f1   : > { %11198 = vmatmul.mubr.msk.f32.vlgmr.msra.gmra.mxu0 %vm1315_vm3, %v1229_v29 }
 0x1f2   : > { %1833 = vmatpush1.msra.mxu0 %v12742_v1  ;;  %v1231_v30 = vpop.f32.mrf.mxu0  ;;  %11200 = vmatprep.mubr.msk.f32.mxu0 %vm1315_vm3, %v13226_v28  ;;  %v9844_v1 = vld [vmem:[%s17635_s4 + $0x248] sm:$0xff]  ;;  %v9867_v28 = vld [vmem:[%s17635_s4 + $0x300] sm:$0xff] }
 0x1f3   : > { %1834 = vmatprep.subr.mxu0 %v17595_v0 }
 0x1f4   : > { %1835 = vmatpush1.msra.mxu0 %v12745_v2  ;;  %v9843_v2 = vld [vmem:[%s17635_s4 + $0x240] sm:$0xff] }
 0x1f5   : > { %1836 = vmatprep.subr.mxu0 %v17595_v0  ;;  %11201 = vmatmul.mubr.msk.f32.gmra.mxu0 %vm1315_vm3, %v13229_v32  ;;  %v9870_v32 = vld [vmem:[%s17635_s4 + $0x318] sm:$0xff] }
 0x1f6   : > { %1837 = vmatpush1.msra.mxu0 %v12751_v3  ;;  %11203 = vmatprep.mubr.msk.f32.mxu0 %vm1315_vm3, %v13232_v36  ;;  %v9846_v3 = vld [vmem:[%s17635_s4 + $0x258] sm:$0xff]  ;;  %v9869_v36 = vld [vmem:[%s17635_s4 + $0x310] sm:$0xff] }
 0x1f7   : > { %1838 = vmatprep.subr.mxu0 %v17595_v0 }
 0x1f8   : > { %1839 = vmatpush1.msra.mxu0 %v12758_v4  ;;  %v9845_v4 = vld [vmem:[%s17635_s4 + $0x250] sm:$0xff] }
 0x1f9   : > { %1840 = vmatprep.subr.mxu0 %v17595_v0  ;;  %11204 = vmatmul.mubr.msk.f32.gmra.mxu0 %vm1315_vm3, %v13235_v40  ;;  %v1988_v40 = vld [vmem:[#allocation2 + $0x4] sm:$0x3] }
 0x1fa   : > { %1841 = vmatpush1.msra.mxu0 %v12765_v5  ;;  %11206 = vmatprep.mubr.msk.f32.mxu0 %vm1315_vm3, %v13238_v44  ;;  %v9848_v5 = vld [vmem:[%s17635_s4 + $0x268] sm:$0xff] }
 0x1fb   : > { %1842 = vmatprep.subr.mxu0 %v17595_v0  ;;  %v9872_v44 = vld [vmem:[%s17635_s4 + $0x328] sm:$0xff]  ;;  %11253 = vmatprep.subr.msk.mxu1 %vm1370_vm2, %v1988_v40 }
 0x1fc   : > { %1843 = vmatpush1.msra.mxu0 %v12772_v6  ;;  %v9847_v6 = vld [vmem:[%s17635_s4 + $0x260] sm:$0xff]  ;;  %11254 = vmatpush3.msk.msra.mxu1 %vm1370_vm2, %v1988_v40  ;;  %v13559_v40 = vld [vmem:[%s12739_s24 + $0x58] sm:$0xff] }
 0x1fd   : > { %1844 = vmatprep.subr.mxu0 %v17595_v0  ;;  %11207 = vmatmul.mubr.msk.f32.gmra.mxu0 %vm1315_vm3, %v13241_v48  ;;  %v9871_v48 = vld [vmem:[%s17635_s4 + $0x320] sm:$0xff] }
 0x1fe   : > { %1845 = vmatpush1.msra.mxu0 %v12782_v8  ;;  %11209 = vmatprep.mubr.msk.f32.mxu0 %vm1315_vm3, %v13244_v52  ;;  %v9850_v8 = vld [vmem:[%s17635_s4 + $0x278] sm:$0xff] }
 0x1ff   : > { %1846 = vmatprep.subr.mxu0 %v17595_v0  ;;  %2310 = vmatprep.subr.mxu1 %v17595_v0  ;;  %v9874_v52 = vld [vmem:[%s17635_s4 + $0x338] sm:$0xff] }
 0x200   : > { %1847 = vmatpush1.msra.mxu0 %v12789_v9  ;;  %v9849_v9 = vld [vmem:[%s17635_s4 + $0x270] sm:$0xff] }
 0x201   : > { %1848 = vmatprep.subr.mxu0 %v17595_v0  ;;  %11210 = vmatmul.mubr.msk.f32.gmra.mxu0 %vm1315_vm3, %v13247_v56  ;;  %v9873_v56 = vld [vmem:[%s17635_s4 + $0x330] sm:$0xff] }
 0x202   : > { %1849 = vmatpush1.msra.mxu0 %v12796_v10  ;;  %11212 = vmatprep.mubr.msk.f32.mxu0 %vm1315_vm3, %v13250_v60  ;;  %v9852_v10 = vld [vmem:[%s17635_s4 + $0x288] sm:$0xff] }
 0x203   : > { %1850 = vmatprep.subr.mxu0 %v17595_v0  ;;  %v9876_v60 = vld [vmem:[%s17635_s4 + $0x348] sm:$0xff] }
 0x204   : > { %1851 = vmatpush1.msra.mxu0 %v12803_v11  ;;  %v9851_v11 = vld [vmem:[%s17635_s4 + $0x280] sm:$0xff] }
 0x205   : > { %1852 = vmatprep.subr.mxu0 %v17595_v0  ;;  %11213 = vmatmul.mubr.msk.f32.gmra.mxu0 %vm1315_vm3, %v13253_v7  ;;  %v9875_v7 = vld [vmem:[%s17635_s4 + $0x340] sm:$0xff] }
 0x206   : > { %1853 = vmatpush1.msra.mxu0 %v12810_v12  ;;  %11215 = vmatprep.mubr.msk.f32.mxu0 %vm1315_vm3, %v13256_v31  ;;  %v9854_v12 = vld [vmem:[%s17635_s4 + $0x298] sm:$0xff] }
 0x207   : > { %1854 = vmatprep.subr.mxu0 %v17595_v0  ;;  %v9878_v31 = vld [vmem:[%s17635_s4 + $0x358] sm:$0xff] }
 0x208   : > { %1855 = vmatpush1.msra.mxu0 %v12817_v13  ;;  %v9853_v13 = vld [vmem:[%s17635_s4 + $0x290] sm:$0xff] }
 0x209   : > { %1856 = vmatprep.subr.mxu0 %v17595_v0  ;;  %11216 = vmatmul.mubr.msk.f32.gmra.mxu0 %vm1315_vm3, %v13259_v37 }
 0x20a   : > { %1857 = vmatpush1.msra.mxu0 %v12824_v14  ;;  %11218 = vmatprep.mubr.msk.f32.mxu0 %vm1315_vm3, %v13262_v42  ;;  %v9856_v14 = vld [vmem:[%s17635_s4 + $0x2a8] sm:$0xff] }
 0x20b   : > { %1858 = vmatprep.subr.mxu0 %v17595_v0 }
 0x20c   : > { %1859 = vmatpush1.msra.mxu0 %v12831_v15  ;;  %v9855_v15 = vld [vmem:[%s17635_s4 + $0x2a0] sm:$0xff] }
 0x20d   : > { %1860 = vmatprep.subr.mxu0 %v17595_v0  ;;  %11219 = vmatmul.mubr.msk.f32.gmra.mxu0 %vm1315_vm3, %v1299_v47 }
 0x20e   : > { %1861 = vmatpush1.msra.mxu0 %v12838_v16  ;;  %11221 = vmatprep.mubr.msk.f32.mxu0 %vm1315_vm3, %v1304_v53  ;;  %v9858_v16 = vld [vmem:[%s17635_s4 + $0x2b8] sm:$0xff] }
 0x20f   : > { %1862 = vmatprep.subr.mxu0 %v17595_v0 }
 0x210   : > { %1863 = vmatpush1.msra.mxu0 %v12845_v17  ;;  %v9857_v17 = vld [vmem:[%s17635_s4 + $0x2b0] sm:$0xff] }
 0x211   : > { %1878 = vmatprep.subr.mxu0 %v17595_v0  ;;  %11222 = vmatmul.mubr.msk.f32.gmra.mxu0 %vm1315_vm3, %v1309_v58 }
 0x212   : > { %9879 = vmatpush2.msk.msra.mxu0 %vm907_vm1, %v12852_v18  ;;  %9880 = vmatprep.mubr.msk.f32.mxu0 %vm852_vm0, %v9844_v1  ;;  %v9860_v18 = vld [vmem:[%s17635_s4 + $0x2c8] sm:$0xff] }
 0x213   : > { %1880 = vmatprep.subr.mxu0 %v17595_v0 }
 0x214   : > { %1881 = vmatpush2.msra.mxu0 %v12859_v19  ;;  %v9859_v19 = vld [vmem:[%s17635_s4 + $0x2c0] sm:$0xff] }
 0x215   : > { %1882 = vmatprep.subr.mxu0 %v17595_v0 }
 0x216   : > { %1883 = vmatpush2.msra.mxu0 %v12867_v20  ;;  %v9862_v20 = vld [vmem:[%s17635_s4 + $0x2d8] sm:$0xff] }
 0x217   : > { %1884 = vmatprep.subr.mxu0 %v17595_v0 }
 0x218   : > { %1885 = vmatpush2.msra.mxu0 %v12875_v21  ;;  %v9861_v21 = vld [vmem:[%s17635_s4 + $0x2d0] sm:$0xff] }
 0x219   : > { %1886 = vmatprep.subr.mxu0 %v17595_v0 }
 0x21a   : > { %1887 = vmatpush2.msra.mxu0 %v12882_v22  ;;  %v9864_v22 = vld [vmem:[%s17635_s4 + $0x2e8] sm:$0xff] }
 0x21b   : > { %1888 = vmatprep.subr.mxu0 %v17595_v0 }
 0x21c   : > { %1889 = vmatpush2.msra.mxu0 %v12889_v23  ;;  %v9863_v23 = vld [vmem:[%s17635_s4 + $0x2e0] sm:$0xff] }
 0x21d   : > { %1890 = vmatprep.subr.mxu0 %v17595_v0 }
 0x21e   : > { %1891 = vmatpush2.msra.mxu0 %v12896_v24  ;;  %v9866_v24 = vld [vmem:[%s17635_s4 + $0x2f8] sm:$0xff] }
 0x21f   : > { %1892 = vmatprep.subr.mxu0 %v17595_v0 }
 0x220   : > { %1893 = vmatpush2.msra.mxu0 %v12903_v25  ;;  %v9865_v25 = vld [vmem:[%s17635_s4 + $0x2f0] sm:$0xff] }
 0x221   : > { %1894 = vmatprep.subr.mxu0 %v17595_v0 }
 0x222   : > { %1895 = vmatpush2.msra.mxu0 %v12910_v26  ;;  %v9868_v26 = vld [vmem:[%s17635_s4 + $0x308] sm:$0xff] }
 0x223   : > { %1897 = vmatmul.mubr.f32.vlgmr.msra.gmra.mxu0 %v9843_v2 }
 0x224   : > { %9881 = vmatprep.mubr.msk.f32.mxu0 %vm852_vm0, %v9846_v3 }
 0x227   : > { %1902 = vmatmul.mubr.f32.gmra.mxu0 %v9845_v4 }
 0x228   : > { %9882 = vmatprep.mubr.msk.f32.mxu0 %vm852_vm0, %v9848_v5 }
 0x22b   : > { %1907 = vmatmul.mubr.f32.gmra.mxu0 %v9847_v6 }
 0x22c   : > { %9883 = vmatprep.mubr.msk.f32.mxu0 %vm852_vm0, %v9850_v8 }
 0x22f   : > { %1912 = vmatmul.mubr.f32.gmra.mxu0 %v9849_v9 }
 0x230   : > { %9884 = vmatprep.mubr.msk.f32.mxu0 %vm852_vm0, %v9852_v10 }
 0x233   : > { %1917 = vmatmul.mubr.f32.gmra.mxu0 %v9851_v11 }
 0x234   : > { %9885 = vmatprep.mubr.msk.f32.mxu0 %vm852_vm0, %v9854_v12 }
 0x237   : > { %1922 = vmatmul.mubr.f32.gmra.mxu0 %v9853_v13 }
 0x238   : > { %9886 = vmatprep.mubr.msk.f32.mxu0 %vm852_vm0, %v9856_v14 }
 0x23b   : > { %1927 = vmatmul.mubr.f32.gmra.mxu0 %v9855_v15 }
 0x23c   : > { %9887 = vmatprep.mubr.msk.f32.mxu0 %vm852_vm0, %v9858_v16 }
 0x23f   : > { %1932 = vmatmul.mubr.f32.gmra.mxu0 %v9857_v17 }
 0x240   : > { %9888 = vmatprep.mubr.msk.f32.mxu0 %vm852_vm0, %v9860_v18 }
 0x243   : > { %1937 = vmatmul.mubr.f32.gmra.mxu0 %v9859_v19 }
 0x244   : > { %9889 = vmatprep.mubr.msk.f32.mxu0 %vm852_vm0, %v9862_v20 }
 0x247   : > { %1942 = vmatmul.mubr.f32.gmra.mxu0 %v9861_v21 }
 0x248   : > { %9890 = vmatprep.mubr.msk.f32.mxu0 %vm852_vm0, %v9864_v22  ;;  %v13537_v22 = vld [vmem:[%s12739_s24 + $0x78] sm:$0xff] }
 0x24b   : > { %1947 = vmatmul.mubr.f32.gmra.mxu0 %v9863_v23 }
 0x24c   : > { %9891 = vmatprep.mubr.msk.f32.mxu0 %vm852_vm0, %v9866_v24  ;;  %v13542_v24 = vld [vmem:[%s12739_s24 + $0x70] sm:$0xff] }
 0x24f   : > { %1952 = vmatmul.mubr.f32.gmra.mxu0 %v9865_v25 }
 0x250   : > { %9892 = vmatprep.mubr.msk.f32.mxu0 %vm852_vm0, %v9868_v26  ;;  %v13548_v26 = vld [vmem:[%s12739_s24 + $0x68] sm:$0xff] }
 0x253   : > { %1957 = vmatmul.mubr.f32.gmra.mxu0 %v9867_v28 }
 0x254   : > { %9893 = vmatprep.mubr.msk.f32.mxu0 %vm852_vm0, %v9870_v32  ;;  %v13553_v32 = vld [vmem:[%s12739_s24 + $0x60] sm:$0xff] }
 0x257   : > { %1962 = vmatmul.mubr.f32.gmra.mxu0 %v9869_v36 }
 0x258   : > { %9894 = vmatprep.mubr.msk.f32.mxu0 %vm852_vm0, %v9872_v44 }
 0x25b   : > { %1967 = vmatmul.mubr.f32.gmra.mxu0 %v9871_v48  ;;  %v13564_v48 = vld [vmem:[%s12739_s24 + $0x50] sm:$0xff] }
 0x25c   : > { %9895 = vmatprep.mubr.msk.f32.mxu0 %vm852_vm0, %v9874_v52 }
 0x25f   : > { %1972 = vmatmul.mubr.f32.gmra.mxu0 %v9873_v56  ;;  %v13570_v56 = vld [vmem:[%s12739_s24 + $0x48] sm:$0xff] }
 0x260   : > { %9896 = vmatprep.mubr.msk.f32.mxu0 %vm852_vm0, %v9876_v60 }
 0x263   : > { %1977 = vmatmul.mubr.f32.gmra.mxu0 %v9875_v7  ;;  %v13575_v7 = vld [vmem:[%s12739_s24 + $0x40] sm:$0xff] }
 0x264   : > { %9897 = vmatprep.mubr.msk.f32.mxu0 %vm852_vm0, %v9878_v31 }
 0x267   : > { %1982 = vmatmul.mubr.f32.gmra.mxu0 %v9877_v33  ;;  %v13581_v33 = vld [vmem:[%s12739_s24 + $0x38] sm:$0xff] }
 0x269   : > { %v13478_v34 = vpop.f32.mrf.mxu1 }
 0x26b   : > { %v13480_v35 = vpop.f32.mrf.mxu1 }
 0x26c   : > { %17636 = vst [vmem:[#allocation34_spill] sm:$0xff] %v13480_v35 }
 0x271   : > { %v13482_v37 = vpop.f32.mrf.mxu1 }
 0x273   : > { %v13484_v38 = vpop.f32.mrf.mxu1 }
 0x274   : > { %17637 = vst [vmem:[#allocation35_spill] sm:$0xff] %v13484_v38 }
 0x279   : > { %v11234_v39 = vpop.f32.mrf.mxu1 }
 0x27b   : > { %v13486_v41 = vpop.f32.mrf.mxu1 }
 0x27c   : > { %17638 = vst [vmem:[#allocation36_spill] sm:$0xff] %v13486_v41 }
 0x281   : > { %v11237_v43 = vpop.f32.mrf.mxu1 }
 0x283   : > { %v13494_v47 = vpop.f32.mrf.mxu1 }
 0x289   : > { %v11240_v50 = vpop.f32.mrf.mxu1 }
 0x28b   : > { %v13502_v55 = vpop.f32.mrf.mxu1 }
 0x291   : > { %v11243_v59 = vpop.f32.mrf.mxu1 }
 0x293   : > { %v13510_v27 = vpop.f32.mrf.mxu1 }
 0x299   : > { %v11246_v30 = vpop.f32.mrf.mxu1 }
 0x29b   : > { %v13518_v4 = vpop.f32.mrf.mxu1 }
 0x2a1   : > { %v11249_v8 = vpop.f32.mrf.mxu1 }
 0x2a3   : > { %v13526_v12 = vpop.f32.mrf.mxu1 }
 0x2a9   : > { %v11252_v14 = vpop.f32.mrf.mxu1 }
 0x2b1   : > { %v13488_v42 = vpop.f32.mrf.mxu0 }
 0x2b3   : > { %v13490_v45 = vpop.f32.mrf.mxu0 }
 0x2b4   : > { %17639 = vst [vmem:[#allocation37_spill] sm:$0xff] %v13490_v45 }
 0x2b5   : > { %v13492_v46 = vpop.f32.mrf.mxu0 }
 0x2b7   : > { %v13496_v49 = vpop.f32.mrf.mxu0 }
 0x2b8   : > { %17640 = vst [vmem:[#allocation38_spill] sm:$0xff] %v13496_v49 }
 0x2b9   : > { %v11205_v51 = vpop.f32.mrf.mxu0 }
 0x2ba   : > { %v13498_v53 = vadd.f32 %v11234_v39, %v11205_v51  ;;  %v13592_v51 = vld [vmem:[%s12739_s24 + $0x28] sm:$0xff] }
 0x2bb   : > { %v13500_v54 = vpop.f32.mrf.mxu0 }
 0x2bc   : > { %17641 = vst [vmem:[#allocation39_spill] sm:$0xff] %v13500_v54 }
 0x2bd   : > { %v11208_v57 = vpop.f32.mrf.mxu0 }
 0x2be   : > { %v13504_v58 = vadd.f32 %v11237_v43, %v11208_v57  ;;  %v13586_v43 = vld [vmem:[%s12739_s24 + $0x30] sm:$0xff] }
 0x2bf   : > { %v13506_v61 = vpop.f32.mrf.mxu0 }
 0x2c1   : > { %v11211_v62 = vpop.f32.mrf.mxu0 }
 0x2c2   : > { %v13508_v63 = vadd.f32 %v11240_v50, %v11211_v62 }
 0x2c3   : > { %v13512_v29 = vpop.f32.mrf.mxu0 }
 0x2c5   : > { %v11214_v1 = vpop.f32.mrf.mxu0 }
 0x2c6   : > { %v13514_v2 = vadd.f32 %v11243_v59, %v11214_v1  ;;  %v13597_v59 = vld [vmem:[%s12739_s24 + $0x20] sm:$0xff] }
 0x2c7   : > { %v13516_v3 = vpop.f32.mrf.mxu0 }
 0x2c9   : > { %v11217_v5 = vpop.f32.mrf.mxu0 }
 0x2ca   : > { %v13520_v6 = vadd.f32 %v11246_v30, %v11217_v5  ;;  %v13603_v30 = vld [vmem:[%s12739_s24 + $0x18] sm:$0xff]  ;;  %v13608_v5 = vld [vmem:[%s12739_s24 + $0x10] sm:$0xff] }
 0x2cb   : > { %v13522_v9 = vpop.f32.mrf.mxu0 }
 0x2cd   : > { %v11220_v10 = vpop.f32.mrf.mxu0 }
 0x2ce   : > { %v13524_v11 = vadd.f32 %v11249_v8, %v11220_v10  ;;  %v13614_v10 = vld [vmem:[%s12739_s24 + $0x8] sm:$0xff] }
 0x2cf   : > { %v13528_v13 = vpop.f32.mrf.mxu0 }
 0x2d1   : > { %v11223_v15 = vpop.f32.mrf.mxu0 }
 0x2d2   : > { %v13530_v16 = vadd.f32 %v11252_v14, %v11223_v15  ;;  %v13619_v15 = vld [vmem:[%s12739_s24] sm:$0xff] }
 0x2d3   : > { %v13532_v17 = vpop.f32.mrf.mxu0 }
 0x2d4   : > { %17642 = vst [vmem:[#allocation40_spill] sm:$0xff] %v13532_v17 }
 0x2e3   : > { %v1898_v18 = vpop.f32.mrf.mxu0 }
 0x2e4   : > { %11255 = vmatprep.mubr.msk.f32.mxu1 %vm1315_vm3, %v1898_v18 }
 0x2e5   : > { %v1900_v19 = vpop.f32.mrf.mxu0 }
 0x2e6   : > { %v13625_v19 = vld [vmem:[%s12739_s24 + $0xc0] sm:$0xf] }
 0x2e7   : > { %v1903_v20 = vpop.f32.mrf.mxu0 }
 0x2e8   : > { %11256 = vmatmul.mubr.msk.f32.vlgmr.msra.gmra.mxu1 %vm1315_vm3, %v1903_v20 }
 0x2e9   : > { %v1905_v21 = vpop.f32.mrf.mxu0  ;;  %2311 = vmatpush1.msra.mxu1 %v13537_v22 }
 0x2ea   : > { %2312 = vmatprep.subr.mxu1 %v17595_v0  ;;  %v13631_v21 = vld [vmem:[%s12739_s24 + $0xb8] sm:$0xff] }
 0x2eb   : > { %v1908_v23 = vpop.f32.mrf.mxu0  ;;  %2313 = vmatpush1.msra.mxu1 %v13542_v24 }
 0x2ec   : > { %11258 = vmatprep.mubr.msk.f32.mxu1 %vm1315_vm3, %v1908_v23  ;;  %2314 = vmatprep.subr.mxu1 %v17595_v0 }
 0x2ed   : > { %v1910_v25 = vpop.f32.mrf.mxu0  ;;  %2315 = vmatpush1.msra.mxu1 %v13548_v26 }
 0x2ee   : > { %2316 = vmatprep.subr.mxu1 %v17595_v0  ;;  %v13637_v25 = vld [vmem:[%s12739_s24 + $0xb0] sm:$0xff] }
 0x2ef   : > { %v1913_v28 = vpop.f32.mrf.mxu0  ;;  %2317 = vmatpush1.msra.mxu1 %v13553_v32 }
 0x2f0   : > { %11259 = vmatmul.mubr.msk.f32.gmra.mxu1 %vm1315_vm3, %v1913_v28  ;;  %2318 = vmatprep.subr.mxu1 %v17595_v0 }
 0x2f1   : > { %v1915_v36 = vpop.f32.mrf.mxu0  ;;  %2319 = vmatpush1.msra.mxu1 %v13559_v40 }
 0x2f2   : > { %2320 = vmatprep.subr.mxu1 %v17595_v0  ;;  %v13642_v36 = vld [vmem:[%s12739_s24 + $0xa8] sm:$0xff] }
 0x2f3   : > { %v1918_v44 = vpop.f32.mrf.mxu0  ;;  %2321 = vmatpush1.msra.mxu1 %v13564_v48 }
 0x2f4   : > { %11261 = vmatprep.mubr.msk.f32.mxu1 %vm1315_vm3, %v1918_v44  ;;  %2322 = vmatprep.subr.mxu1 %v17595_v0 }
 0x2f5   : > { %v1920_v52 = vpop.f32.mrf.mxu0  ;;  %2323 = vmatpush1.msra.mxu1 %v13570_v56 }
 0x2f6   : > { %2324 = vmatprep.subr.mxu1 %v17595_v0  ;;  %v13648_v52 = vld [vmem:[%s12739_s24 + $0xa0] sm:$0xff] }
 0x2f7   : > { %v1923_v60 = vpop.f32.mrf.mxu0  ;;  %2325 = vmatpush1.msra.mxu1 %v13575_v7 }
 0x2f8   : > { %11262 = vmatmul.mubr.msk.f32.gmra.mxu1 %vm1315_vm3, %v1923_v60  ;;  %2326 = vmatprep.subr.mxu1 %v17595_v0 }
 0x2f9   : > { %v1925_v31 = vpop.f32.mrf.mxu0  ;;  %2327 = vmatpush1.msra.mxu1 %v13581_v33 }
 0x2fa   : > { %2328 = vmatprep.subr.mxu1 %v17595_v0  ;;  %v13653_v31 = vld [vmem:[%s12739_s24 + $0x98] sm:$0xff] }
 0x2fb   : > { %v1928_v39 = vpop.f32.mrf.mxu0  ;;  %2329 = vmatpush1.msra.mxu1 %v13586_v43 }
 0x2fc   : > { %11264 = vmatprep.mubr.msk.f32.mxu1 %vm1315_vm3, %v1928_v39  ;;  %2330 = vmatprep.subr.mxu1 %v17595_v0 }
 0x2fd   : > { %v1930_v50 = vpop.f32.mrf.mxu0  ;;  %2331 = vmatpush1.msra.mxu1 %v13592_v51 }
 0x2fe   : > { %2332 = vmatprep.subr.mxu1 %v17595_v0  ;;  %v13659_v50 = vld [vmem:[%s12739_s24 + $0x90] sm:$0xff] }
 0x2ff   : > { %v1933_v57 = vpop.f32.mrf.mxu0  ;;  %2333 = vmatpush1.msra.mxu1 %v13597_v59 }
 0x300   : > { %11265 = vmatmul.mubr.msk.f32.gmra.mxu1 %vm1315_vm3, %v1933_v57  ;;  %2334 = vmatprep.subr.mxu1 %v17595_v0 }
 0x301   : > { %v1935_v62 = vpop.f32.mrf.mxu0  ;;  %2335 = vmatpush1.msra.mxu1 %v13603_v30 }
 0x302   : > { %2336 = vmatprep.subr.mxu1 %v17595_v0  ;;  %v13664_v62 = vld [vmem:[%s12739_s24 + $0x88] sm:$0xff] }
 0x303   : > { %v1938_v1 = vpop.f32.mrf.mxu0  ;;  %2337 = vmatpush1.msra.mxu1 %v13608_v5 }
 0x304   : > { %11267 = vmatprep.mubr.msk.f32.mxu1 %vm1315_vm3, %v1938_v1  ;;  %2338 = vmatprep.subr.mxu1 %v17595_v0 }
 0x305   : > { %v1940_v8 = vpop.f32.mrf.mxu0  ;;  %2339 = vmatpush1.msra.mxu1 %v13614_v10 }
 0x306   : > { %2340 = vmatprep.subr.mxu1 %v17595_v0  ;;  %v13670_v8 = vld [vmem:[%s12739_s24 + $0x80] sm:$0xff] }
 0x307   : > { %v1943_v14 = vpop.f32.mrf.mxu0  ;;  %2341 = vmatpush1.msra.mxu1 %v13619_v15 }
 0x308   : > { %11268 = vmatmul.mubr.msk.f32.gmra.mxu1 %vm1315_vm3, %v1943_v14  ;;  %2356 = vmatprep.subr.mxu1 %v17595_v0 }
 0x309   : > { %v1945_v18 = vpop.f32.mrf.mxu0  ;;  %9953 = vmatpush2.msk.msra.mxu1 %vm907_vm1, %v13625_v19 }
 0x30a   : > { %2358 = vmatprep.subr.mxu1 %v17595_v0 }
 0x30b   : > { %v1948_v20 = vpop.f32.mrf.mxu0  ;;  %2359 = vmatpush2.msra.mxu1 %v13631_v21 }
 0x30c   : > { %11270 = vmatprep.mubr.msk.f32.mxu1 %vm1315_vm3, %v1948_v20  ;;  %2360 = vmatprep.subr.mxu1 %v17595_v0 }
 0x30d   : > { %v1950_v23 = vpop.f32.mrf.mxu0  ;;  %2361 = vmatpush2.msra.mxu1 %v13637_v25 }
 0x30e   : > { %2362 = vmatprep.subr.mxu1 %v17595_v0 }
 0x30f   : > { %v1953_v28 = vpop.f32.mrf.mxu0  ;;  %2363 = vmatpush2.msra.mxu1 %v13642_v36 }
 0x310   : > { %11271 = vmatmul.mubr.msk.f32.gmra.mxu1 %vm1315_vm3, %v1953_v28  ;;  %2364 = vmatprep.subr.mxu1 %v17595_v0 }
 0x311   : > { %v1955_v44 = vpop.f32.mrf.mxu0  ;;  %2365 = vmatpush2.msra.mxu1 %v13648_v52 }
 0x312   : > { %2366 = vmatprep.subr.mxu1 %v17595_v0 }
 0x313   : > { %v1958_v60 = vpop.f32.mrf.mxu0  ;;  %2367 = vmatpush2.msra.mxu1 %v13653_v31 }
 0x314   : > { %11273 = vmatprep.mubr.msk.f32.mxu1 %vm1315_vm3, %v1958_v60  ;;  %2368 = vmatprep.subr.mxu1 %v17595_v0  ;;  %v9918_v60 = vld [vmem:[%s17635_s4 + $0x368] sm:$0xff] }
 0x315   : > { %v1960_v39 = vpop.f32.mrf.mxu0  ;;  %2369 = vmatpush2.msra.mxu1 %v13659_v50 }
 0x316   : > { %2370 = vmatprep.subr.mxu1 %v17595_v0 }
 0x317   : > { %v1963_v57 = vpop.f32.mrf.mxu0  ;;  %2371 = vmatpush2.msra.mxu1 %v13664_v62 }
 0x318   : > { %11274 = vmatmul.mubr.msk.f32.gmra.mxu1 %vm1315_vm3, %v1963_v57  ;;  %2372 = vmatprep.subr.mxu1 %v17595_v0 }
 0x319   : > { %v1965_v1 = vpop.f32.mrf.mxu0  ;;  %2373 = vmatpush2.msra.mxu1 %v13670_v8 }
 0x31a   : > { %2788 = vmatprep.subr.mxu1 %v17595_v0  ;;  %v9917_v1 = vld [vmem:[%s17635_s4 + $0x360] sm:$0xff] }
 0x31b   : > { %v1968_v14 = vpop.f32.mrf.mxu0 }
 0x31c   : > { %11276 = vmatprep.mubr.msk.f32.mxu1 %vm1315_vm3, %v1968_v14  ;;  %v9920_v14 = vld [vmem:[%s17635_s4 + $0x378] sm:$0xff] }
 0x31d   : > { %v1970_v18 = vpop.f32.mrf.mxu0 }
 0x31e   : > { %v9919_v18 = vld [vmem:[%s17635_s4 + $0x370] sm:$0xff] }
 0x31f   : > { %v1973_v20 = vpop.f32.mrf.mxu0 }
 0x320   : > { %11277 = vmatmul.mubr.msk.f32.gmra.mxu1 %vm1315_vm3, %v1973_v20  ;;  %v9922_v20 = vld [vmem:[%s17635_s4 + $0x388] sm:$0xff] }
 0x321   : > { %v1975_v23 = vpop.f32.mrf.mxu0 }
 0x322   : > { %v9921_v23 = vld [vmem:[%s17635_s4 + $0x380] sm:$0xff] }
 0x323   : > { %v1978_v28 = vpop.f32.mrf.mxu0 }
 0x324   : > { %11279 = vmatprep.mubr.msk.f32.mxu1 %vm1315_vm3, %v1978_v28  ;;  %v9924_v28 = vld [vmem:[%s17635_s4 + $0x398] sm:$0xff] }
 0x325   : > { %v1980_v44 = vpop.f32.mrf.mxu0 }
 0x326   : > { %v9923_v44 = vld [vmem:[%s17635_s4 + $0x390] sm:$0xff] }
 0x327   : > { %v1983_v39 = vpop.f32.mrf.mxu0 }
 0x328   : > { %11280 = vmatmul.mubr.msk.f32.gmra.mxu1 %vm1315_vm3, %v1983_v39  ;;  %v9925_v39 = vld [vmem:[%s17635_s4 + $0x3a0] sm:$0xff] }
 0x329   : > { %v1985_v57 = vpop.f32.mrf.mxu0  ;;  %9954 = vmatprep.mubr.msk.f32.mxu1 %vm852_vm0, %v9918_v60  ;;  %v9926_v60 = vld [vmem:[%s17635_s4 + $0x3a8] sm:$0xff] }
 0x32a   : > { %v9928_v57 = vld [vmem:[%s17635_s4 + $0x3b8] sm:$0xff] }
 0x32c   : > { %2375 = vmatmul.mubr.f32.vlgmr.msra.gmra.mxu1 %v9917_v1  ;;  %v9927_v1 = vld [vmem:[%s17635_s4 + $0x3b0] sm:$0xff] }
 0x32d   : > { %9955 = vmatprep.mubr.msk.f32.mxu1 %vm852_vm0, %v9920_v14  ;;  %2789 = vmatpush1.msra.mxu1 %v13537_v22  ;;  %v9930_v14 = vld [vmem:[%s17635_s4 + $0x3c8] sm:$0xff] }
 0x32e   : > { %2790 = vmatprep.subr.mxu1 %v17595_v0 }
 0x32f   : > { %2791 = vmatpush1.msra.mxu1 %v13542_v24 }
 0x330   : > { %2380 = vmatmul.mubr.f32.gmra.mxu1 %v9919_v18  ;;  %2792 = vmatprep.subr.mxu1 %v17595_v0  ;;  %v9929_v18 = vld [vmem:[%s17635_s4 + $0x3c0] sm:$0xff] }
 0x331   : > { %9956 = vmatprep.mubr.msk.f32.mxu1 %vm852_vm0, %v9922_v20  ;;  %2793 = vmatpush1.msra.mxu1 %v13548_v26  ;;  %v9932_v20 = vld [vmem:[%s17635_s4 + $0x3d8] sm:$0xff] }
 0x332   : > { %2794 = vmatprep.subr.mxu1 %v17595_v0 }
 0x333   : > { %2795 = vmatpush1.msra.mxu1 %v13553_v32 }
 0x334   : > { %2385 = vmatmul.mubr.f32.gmra.mxu1 %v9921_v23  ;;  %2796 = vmatprep.subr.mxu1 %v17595_v0  ;;  %v9931_v23 = vld [vmem:[%s17635_s4 + $0x3d0] sm:$0xff] }
 0x335   : > { %9957 = vmatprep.mubr.msk.f32.mxu1 %vm852_vm0, %v9924_v28  ;;  %2797 = vmatpush1.msra.mxu1 %v13559_v40  ;;  %v9934_v28 = vld [vmem:[%s17635_s4 + $0x3e8] sm:$0xff] }
 0x336   : > { %2798 = vmatprep.subr.mxu1 %v17595_v0 }
 0x337   : > { %2799 = vmatpush1.msra.mxu1 %v13564_v48 }
 0x338   : > { %2390 = vmatmul.mubr.f32.gmra.mxu1 %v9923_v44  ;;  %2800 = vmatprep.subr.mxu1 %v17595_v0  ;;  %v9933_v44 = vld [vmem:[%s17635_s4 + $0x3e0] sm:$0xff] }
 0x339   : > { %9958 = vmatprep.mubr.msk.f32.mxu1 %vm852_vm0, %v9926_v60  ;;  %2801 = vmatpush1.msra.mxu1 %v13570_v56  ;;  %v9936_v60 = vld [vmem:[%s17635_s4 + $0x3f8] sm:$0xff] }
 0x33a   : > { %2802 = vmatprep.subr.mxu1 %v17595_v0 }
 0x33b   : > { %2803 = vmatpush1.msra.mxu1 %v13575_v7 }
 0x33c   : > { %2395 = vmatmul.mubr.f32.gmra.mxu1 %v9925_v39  ;;  %2804 = vmatprep.subr.mxu1 %v17595_v0  ;;  %v9935_v39 = vld [vmem:[%s17635_s4 + $0x3f0] sm:$0xff] }
 0x33d   : > { %9959 = vmatprep.mubr.msk.f32.mxu1 %vm852_vm0, %v9928_v57  ;;  %2805 = vmatpush1.msra.mxu1 %v13581_v33  ;;  %v9938_v57 = vld [vmem:[%s17635_s4 + $0x408] sm:$0xff] }
 0x33e   : > { %2806 = vmatprep.subr.mxu1 %v17595_v0 }
 0x33f   : > { %2807 = vmatpush1.msra.mxu1 %v13586_v43 }
 0x340   : > { %2400 = vmatmul.mubr.f32.gmra.mxu1 %v9927_v1  ;;  %2808 = vmatprep.subr.mxu1 %v17595_v0  ;;  %v9937_v1 = vld [vmem:[%s17635_s4 + $0x400] sm:$0xff] }
 0x341   : > { %9960 = vmatprep.mubr.msk.f32.mxu1 %vm852_vm0, %v9930_v14  ;;  %2809 = vmatpush1.msra.mxu1 %v13592_v51  ;;  %v9940_v14 = vld [vmem:[%s17635_s4 + $0x418] sm:$0xff] }
 0x342   : > { %2810 = vmatprep.subr.mxu1 %v17595_v0 }
 0x343   : > { %2811 = vmatpush1.msra.mxu1 %v13597_v59 }
 0x344   : > { %2405 = vmatmul.mubr.f32.gmra.mxu1 %v9929_v18  ;;  %2812 = vmatprep.subr.mxu1 %v17595_v0  ;;  %v9939_v18 = vld [vmem:[%s17635_s4 + $0x410] sm:$0xff] }
 0x345   : > { %9961 = vmatprep.mubr.msk.f32.mxu1 %vm852_vm0, %v9932_v20  ;;  %2813 = vmatpush1.msra.mxu1 %v13603_v30  ;;  %v9942_v20 = vld [vmem:[%s17635_s4 + $0x428] sm:$0xff] }
 0x346   : > { %2814 = vmatprep.subr.mxu1 %v17595_v0 }
 0x347   : > { %2815 = vmatpush1.msra.mxu1 %v13608_v5 }
 0x348   : > { %2410 = vmatmul.mubr.f32.gmra.mxu1 %v9931_v23  ;;  %2816 = vmatprep.subr.mxu1 %v17595_v0  ;;  %v9941_v23 = vld [vmem:[%s17635_s4 + $0x420] sm:$0xff] }
 0x349   : > { %9962 = vmatprep.mubr.msk.f32.mxu1 %vm852_vm0, %v9934_v28  ;;  %2817 = vmatpush1.msra.mxu1 %v13614_v10  ;;  %v9944_v28 = vld [vmem:[%s17635_s4 + $0x438] sm:$0xff] }
 0x34a   : > { %2818 = vmatprep.subr.mxu1 %v17595_v0 }
 0x34b   : > { %2819 = vmatpush1.msra.mxu1 %v13619_v15 }
 0x34c   : > { %2415 = vmatmul.mubr.f32.gmra.mxu1 %v9933_v44  ;;  %2834 = vmatprep.subr.mxu1 %v17595_v0  ;;  %v9943_v44 = vld [vmem:[%s17635_s4 + $0x430] sm:$0xff] }
 0x34d   : > { %9963 = vmatprep.mubr.msk.f32.mxu1 %vm852_vm0, %v9936_v60  ;;  %10027 = vmatpush2.msk.msra.mxu1 %vm907_vm1, %v13625_v19  ;;  %v9946_v60 = vld [vmem:[%s17635_s4 + $0x448] sm:$0xff] }
 0x34e   : > { %2836 = vmatprep.subr.mxu1 %v17595_v0 }
 0x34f   : > { %2837 = vmatpush2.msra.mxu1 %v13631_v21 }
 0x350   : > { %2420 = vmatmul.mubr.f32.gmra.mxu1 %v9935_v39  ;;  %2838 = vmatprep.subr.mxu1 %v17595_v0  ;;  %v9945_v39 = vld [vmem:[%s17635_s4 + $0x440] sm:$0xff] }
 0x351   : > { %9964 = vmatprep.mubr.msk.f32.mxu1 %vm852_vm0, %v9938_v57  ;;  %2839 = vmatpush2.msra.mxu1 %v13637_v25  ;;  %v9948_v57 = vld [vmem:[%s17635_s4 + $0x458] sm:$0xff] }
 0x352   : > { %2840 = vmatprep.subr.mxu1 %v17595_v0 }
 0x353   : > { %2841 = vmatpush2.msra.mxu1 %v13642_v36 }
 0x354   : > { %2425 = vmatmul.mubr.f32.gmra.mxu1 %v9937_v1  ;;  %2842 = vmatprep.subr.mxu1 %v17595_v0  ;;  %v9947_v1 = vld [vmem:[%s17635_s4 + $0x450] sm:$0xff] }
 0x355   : > { %9965 = vmatprep.mubr.msk.f32.mxu1 %vm852_vm0, %v9940_v14  ;;  %2843 = vmatpush2.msra.mxu1 %v13648_v52  ;;  %v9950_v14 = vld [vmem:[%s17635_s4 + $0x468] sm:$0xff] }
 0x356   : > { %2844 = vmatprep.subr.mxu1 %v17595_v0 }
 0x357   : > { %2845 = vmatpush2.msra.mxu1 %v13653_v31 }
 0x358   : > { %2430 = vmatmul.mubr.f32.gmra.mxu1 %v9939_v18  ;;  %2846 = vmatprep.subr.mxu1 %v17595_v0  ;;  %v9949_v18 = vld [vmem:[%s17635_s4 + $0x460] sm:$0xff] }
 0x359   : > { %9966 = vmatprep.mubr.msk.f32.mxu1 %vm852_vm0, %v9942_v20  ;;  %2847 = vmatpush2.msra.mxu1 %v13659_v50  ;;  %v2466_v20 = vld [vmem:[#allocation2 + $0x6] sm:$0x3] }
 0x35a   : > { %2848 = vmatprep.subr.mxu1 %v17595_v0  ;;  %11282 = vmatprep.subr.msk.mxu0 %vm1370_vm2, %v2466_v20 }
 0x35b   : > { %2849 = vmatpush2.msra.mxu1 %v13664_v62  ;;  %11283 = vmatpush3.msk.msra.mxu0 %vm1370_vm2, %v2466_v20  ;;  %v9997_v20 = vld [vmem:[%s17635_s4 + $0x4b0] sm:$0xff] }
 0x35c   : > { %2435 = vmatmul.mubr.f32.gmra.mxu1 %v9941_v23  ;;  %2850 = vmatprep.subr.mxu1 %v17595_v0  ;;  %v9952_v23 = vld [vmem:[%s17635_s4 + $0x478] sm:$0xff] }
 0x35d   : > { %9967 = vmatprep.mubr.msk.f32.mxu1 %vm852_vm0, %v9944_v28  ;;  %2851 = vmatpush2.msra.mxu1 %v13670_v8  ;;  %v9951_v28 = vld [vmem:[%s17635_s4 + $0x470] sm:$0xff] }
 0x360   : > { %2440 = vmatmul.mubr.f32.gmra.mxu1 %v9943_v44  ;;  %v9992_v44 = vld [vmem:[%s17635_s4 + $0x488] sm:$0xff] }
 0x361   : > { %9968 = vmatprep.mubr.msk.f32.mxu1 %vm852_vm0, %v9946_v60  ;;  %v9991_v60 = vld [vmem:[%s17635_s4 + $0x480] sm:$0xff] }
 0x364   : > { %2445 = vmatmul.mubr.f32.gmra.mxu1 %v9945_v39  ;;  %v9994_v39 = vld [vmem:[%s17635_s4 + $0x498] sm:$0xff] }
 0x365   : > { %9969 = vmatprep.mubr.msk.f32.mxu1 %vm852_vm0, %v9948_v57  ;;  %v9993_v57 = vld [vmem:[%s17635_s4 + $0x490] sm:$0xff] }
 0x368   : > { %2450 = vmatmul.mubr.f32.gmra.mxu1 %v9947_v1  ;;  %v9996_v1 = vld [vmem:[%s17635_s4 + $0x4a8] sm:$0xff] }
 0x369   : > { %9970 = vmatprep.mubr.msk.f32.mxu1 %vm852_vm0, %v9950_v14  ;;  %v9995_v14 = vld [vmem:[%s17635_s4 + $0x4a0] sm:$0xff] }
 0x36c   : > { %2455 = vmatmul.mubr.f32.gmra.mxu1 %v9949_v18  ;;  %v9998_v18 = vld [vmem:[%s17635_s4 + $0x4b8] sm:$0xff] }
 0x36d   : > { %9971 = vmatprep.mubr.msk.f32.mxu1 %vm852_vm0, %v9952_v23  ;;  %v10000_v23 = vld [vmem:[%s17635_s4 + $0x4c8] sm:$0xff] }
 0x370   : > { %2460 = vmatmul.mubr.f32.gmra.mxu1 %v9951_v28  ;;  %v9999_v28 = vld [vmem:[%s17635_s4 + $0x4c0] sm:$0xff] }
 0x371   : > { %10028 = vmatprep.mubr.msk.f32.mxu1 %vm852_vm0, %v9992_v44  ;;  %v10002_v44 = vld [vmem:[%s17635_s4 + $0x4d8] sm:$0xff] }
 0x374   : > { %2853 = vmatmul.mubr.f32.vlgmr.msra.gmra.mxu1 %v9991_v60  ;;  %v10001_v60 = vld [vmem:[%s17635_s4 + $0x4d0] sm:$0xff] }
 0x375   : > { %10029 = vmatprep.mubr.msk.f32.mxu1 %vm852_vm0, %v9994_v39  ;;  %v10004_v39 = vld [vmem:[%s17635_s4 + $0x4e8] sm:$0xff] }
 0x378   : > { %2858 = vmatmul.mubr.f32.gmra.mxu1 %v9993_v57  ;;  %v10003_v57 = vld [vmem:[%s17635_s4 + $0x4e0] sm:$0xff] }
 0x379   : > { %10030 = vmatprep.mubr.msk.f32.mxu1 %vm852_vm0, %v9996_v1  ;;  %v10006_v1 = vld [vmem:[%s17635_s4 + $0x4f8] sm:$0xff] }
 0x37c   : > { %2863 = vmatmul.mubr.f32.gmra.mxu1 %v9995_v14  ;;  %v10005_v14 = vld [vmem:[%s17635_s4 + $0x4f0] sm:$0xff] }
 0x37d   : > { %10031 = vmatprep.mubr.msk.f32.mxu1 %vm852_vm0, %v9998_v18  ;;  %v10008_v18 = vld [vmem:[%s17635_s4 + $0x508] sm:$0xff] }
 0x380   : > { %2868 = vmatmul.mubr.f32.gmra.mxu1 %v9997_v20  ;;  %v10007_v20 = vld [vmem:[%s17635_s4 + $0x500] sm:$0xff] }
 0x381   : > { %10032 = vmatprep.mubr.msk.f32.mxu1 %vm852_vm0, %v10000_v23  ;;  %v10010_v23 = vld [vmem:[%s17635_s4 + $0x518] sm:$0xff] }
 0x384   : > { %2873 = vmatmul.mubr.f32.gmra.mxu1 %v9999_v28  ;;  %v10009_v28 = vld [vmem:[%s17635_s4 + $0x510] sm:$0xff] }
 0x385   : > { %10033 = vmatprep.mubr.msk.f32.mxu1 %vm852_vm0, %v10002_v44  ;;  %v10012_v44 = vld [vmem:[%s17635_s4 + $0x528] sm:$0xff] }
 0x388   : > { %2878 = vmatmul.mubr.f32.gmra.mxu1 %v10001_v60  ;;  %v10011_v60 = vld [vmem:[%s17635_s4 + $0x520] sm:$0xff] }
 0x389   : > { %10034 = vmatprep.mubr.msk.f32.mxu1 %vm852_vm0, %v10004_v39  ;;  %v10014_v39 = vld [vmem:[%s17635_s4 + $0x538] sm:$0xff] }
 0x38c   : > { %2883 = vmatmul.mubr.f32.gmra.mxu1 %v10003_v57  ;;  %v10013_v57 = vld [vmem:[%s17635_s4 + $0x530] sm:$0xff] }
 0x38d   : > { %10035 = vmatprep.mubr.msk.f32.mxu1 %vm852_vm0, %v10006_v1  ;;  %v10016_v1 = vld [vmem:[%s17635_s4 + $0x548] sm:$0xff] }
 0x390   : > { %2888 = vmatmul.mubr.f32.gmra.mxu1 %v10005_v14  ;;  %v10015_v14 = vld [vmem:[%s17635_s4 + $0x540] sm:$0xff] }
 0x391   : > { %10036 = vmatprep.mubr.msk.f32.mxu1 %vm852_vm0, %v10008_v18  ;;  %v10018_v18 = vld [vmem:[%s17635_s4 + $0x558] sm:$0xff] }
 0x394   : > { %2893 = vmatmul.mubr.f32.gmra.mxu1 %v10007_v20  ;;  %v10017_v20 = vld [vmem:[%s17635_s4 + $0x550] sm:$0xff] }
 0x395   : > { %10037 = vmatprep.mubr.msk.f32.mxu1 %vm852_vm0, %v10010_v23  ;;  %v13954_v23 = vpop.f32.mrf.mxu1 }
 0x396   : > { %17643 = vst [vmem:[#allocation41_spill] sm:$0xff] %v13954_v23 }
 0x398   : > { %2898 = vmatmul.mubr.f32.gmra.mxu1 %v10009_v28  ;;  %v10020_v28 = vld [vmem:[%s17635_s4 + $0x568] sm:$0xff] }
 0x399   : > { %10038 = vmatprep.mubr.msk.f32.mxu1 %vm852_vm0, %v10012_v44  ;;  %v1658_v44 = vadd.f32 %v13478_v34, %v13488_v42  ;;  %v10021_v34 = vld [vmem:[%s17635_s4 + $0x570] sm:$0xff] }
 0x39c   : > { %2903 = vmatmul.mubr.f32.gmra.mxu1 %v10011_v60 }
 0x39d   : > { %10039 = vmatprep.mubr.msk.f32.mxu1 %vm852_vm0, %v10014_v39 }
 0x3a0   : > { %2908 = vmatmul.mubr.f32.gmra.mxu1 %v10013_v57  ;;  %v10019_v57 = vld [vmem:[%s17635_s4 + $0x560] sm:$0xff] }
 0x3a1   : > { %10040 = vmatprep.mubr.msk.f32.mxu1 %vm852_vm0, %v10016_v1  ;;  %v10022_v1 = vld [vmem:[%s17635_s4 + $0x578] sm:$0xff] }
 0x3a4   : > { %2913 = vmatmul.mubr.f32.gmra.mxu1 %v10015_v14  ;;  %v10024_v14 = vld [vmem:[%s17635_s4 + $0x588] sm:$0xff] }
 0x3a5   : > { %10041 = vmatprep.mubr.msk.f32.mxu1 %vm852_vm0, %v10018_v18  ;;  %v1668_v18 = vadd.f32 %v13482_v37, %v13492_v46  ;;  %v10025_v37 = vld [vmem:[%s17635_s4 + $0x590] sm:$0xff] }
 0x3a8   : > { %v11257_v60 = vpop.f32.mrf.mxu1  ;;  %2918 = vmatmul.mubr.f32.gmra.mxu1 %v10017_v20 }
 0x3a9   : > { %v13961_v39 = vadd.f32 %v11257_v60, %v1658_v44  ;;  %10042 = vmatprep.mubr.msk.f32.mxu1 %vm852_vm0, %v10020_v28  ;;  %v10023_v44 = vld [vmem:[%s17635_s4 + $0x580] sm:$0xff]  ;;  %v2944_v60 = vld [vmem:[#allocation2 + $0x8] sm:$0x3] }
 0x3aa   : > { %v13974_v42 = vpop.f32.mrf.mxu1  ;;  %11311 = vmatprep.subr.msk.mxu0 %vm1370_vm2, %v2944_v60 }
 0x3ab   : > { %17644 = vst [vmem:[#allocation42_spill] sm:$0xff] %v13974_v42 }
 0x3ac   : > { %2923 = vmatmul.mubr.f32.gmra.mxu1 %v10019_v57  ;;  %v10026_v57 = vld [vmem:[%s17635_s4 + $0x598] sm:$0xff] }
 0x3ad   : > { %10043 = vmatprep.mubr.msk.f32.mxu1 %vm852_vm0, %v10022_v1 }
 0x3b0   : > { %v11260_v20 = vpop.f32.mrf.mxu1  ;;  %2928 = vmatmul.mubr.f32.gmra.mxu1 %v10021_v34 }
 0x3b1   : > { %v13981_v28 = vadd.f32 %v11260_v20, %v1668_v18  ;;  %10044 = vmatprep.mubr.msk.f32.mxu1 %vm852_vm0, %v10024_v14 }
 0x3b2   : > { %v13995_v46 = vpop.f32.mrf.mxu1 }
 0x3b3   : > { %17645 = vst [vmem:[#allocation43_spill] sm:$0xff] %v13995_v46 }
 0x3b4   : > { %2933 = vmatmul.mubr.f32.gmra.mxu1 %v10023_v44 }
 0x3b5   : > { %10045 = vmatprep.mubr.msk.f32.mxu1 %vm852_vm0, %v10026_v57 }
 0x3b8   : > { %v11263_v1 = vpop.f32.mrf.mxu1  ;;  %2938 = vmatmul.mubr.f32.gmra.mxu1 %v10025_v37 }
 0x3b9   : > { %v13998_v34 = vadd.f32 %v11263_v1, %v13498_v53 }
 0x3ba   : > { %v14000_v14 = vpop.f32.mrf.mxu1 }
 0x3bb   : > { %17646 = vst [vmem:[#allocation44_spill] sm:$0xff] %v14000_v14 }
 0x3c0   : > { %v11266_v18 = vpop.f32.mrf.mxu1 }
 0x3c1   : > { %v14003_v20 = vadd.f32 %v11266_v18, %v13504_v58 }
 0x3c2   : > { %v14005_v44 = vpop.f32.mrf.mxu1 }
 0x3c3   : > { %17647 = vst [vmem:[#allocation45_spill] sm:$0xff] %v14005_v44 }
 0x3c8   : > { %v11269_v57 = vpop.f32.mrf.mxu1 }
 0x3c9   : > { %v14008_v0 = vadd.f32 %v11269_v57, %v13508_v63 }
 0x3ca   : > { %v14010_v23 = vpop.f32.mrf.mxu1 }
 0x3d0   : > { %v11272_v17 = vpop.f32.mrf.mxu1 }
 0x3d1   : > { %v14013_v37 = vadd.f32 %v11272_v17, %v13514_v2 }
 0x3d2   : > { %v14015_v53 = vpop.f32.mrf.mxu1 }
 0x3d8   : > { %v11275_v1 = vpop.f32.mrf.mxu1 }
 0x3d9   : > { %v14018_v42 = vadd.f32 %v11275_v1, %v13520_v6 }
 0x3da   : > { %v14020_v58 = vpop.f32.mrf.mxu1 }
 0x3e0   : > { %v11278_v18 = vpop.f32.mrf.mxu1 }
 0x3e1   : > { %v14023_v35 = vadd.f32 %v11278_v18, %v13524_v11  ;;  %v17649_v11 = vmov 0.0  }
 0x3e2   : > { %v14025_v63 = vpop.f32.mrf.mxu1 }
 0x3e8   : > { %v11281_v57 = vpop.f32.mrf.mxu1 }
 0x3e9   : > { %v14028_v45 = vadd.f32 %v11281_v57, %v13530_v16 }
 0x3ea   : > { %v14030_v2 = vpop.f32.mrf.mxu1 }
 0x3eb   : > { %17648 = vst [vmem:[#allocation46_spill] sm:$0xff] %v14030_v2 }
 0x3ec   : > { %v2376_v17 = vpop.f32.mrf.mxu1 }
 0x3ed   : > { %11284 = vmatprep.mubr.msk.f32.mxu0 %vm1315_vm3, %v2376_v17 }
 0x3ee   : > { %v2378_v46 = vpop.f32.mrf.mxu1 }
 0x3f0   : > { %v2381_v6 = vpop.f32.mrf.mxu1 }
 0x3f1   : > { %11285 = vmatmul.mubr.msk.f32.vlgmr.msra.gmra.mxu0 %vm1315_vm3, %v2381_v6 }
 0x3f2   : > { %v2383_v1 = vpop.f32.mrf.mxu1  ;;  %11312 = vmatpush3.msk.msra.mxu0 %vm1370_vm2, %v2944_v60 }
 0x3f3   : > { %3266 = vmatprep.subr.mxu0 %v17649_v11 }
 0x3f4   : > { %v2386_v18 = vpop.f32.mrf.mxu1 }
 0x3f5   : > { %11287 = vmatprep.mubr.msk.f32.mxu0 %vm1315_vm3, %v2386_v18 }
 0x3f6   : > { %v2388_v38 = vpop.f32.mrf.mxu1 }
 0x3f8   : > { %v2391_v16 = vpop.f32.mrf.mxu1 }
 0x3f9   : > { %11288 = vmatmul.mubr.msk.f32.gmra.mxu0 %vm1315_vm3, %v2391_v16 }
 0x3fa   : > { %v2393_v57 = vpop.f32.mrf.mxu1 }
 0x3fc   : > { %v2396_v2 = vpop.f32.mrf.mxu1 }
 0x3fd   : > { %11290 = vmatprep.mubr.msk.f32.mxu0 %vm1315_vm3, %v2396_v2 }
 0x3fe   : > { %v2398_v46 = vpop.f32.mrf.mxu1 }
 0x400   : > { %v2401_v17 = vpop.f32.mrf.mxu1 }
 0x401   : > { %11291 = vmatmul.mubr.msk.f32.gmra.mxu0 %vm1315_vm3, %v2401_v17 }
 0x402   : > { %v2403_v6 = vpop.f32.mrf.mxu1 }
 0x404   : > { %v2406_v1 = vpop.f32.mrf.mxu1 }
 0x405   : > { %11293 = vmatprep.mubr.msk.f32.mxu0 %vm1315_vm3, %v2406_v1 }
 0x406   : > { %v2408_v60 = vpop.f32.mrf.mxu1 }
 0x408   : > { %v2411_v49 = vpop.f32.mrf.mxu1 }
 0x409   : > { %11294 = vmatmul.mubr.msk.f32.gmra.mxu0 %vm1315_vm3, %v2411_v49 }
 0x40a   : > { %v2413_v38 = vpop.f32.mrf.mxu1 }
 0x40c   : > { %v2416_v18 = vpop.f32.mrf.mxu1 }
 0x40d   : > { %11296 = vmatprep.mubr.msk.f32.mxu0 %vm1315_vm3, %v2416_v18 }
 0x40e   : > { %v2418_v16 = vpop.f32.mrf.mxu1 }
 0x410   : > { %v2421_v57 = vpop.f32.mrf.mxu1 }
 0x411   : > { %11297 = vmatmul.mubr.msk.f32.gmra.mxu0 %vm1315_vm3, %v2421_v57 }
 0x412   : > { %v2423_v2 = vpop.f32.mrf.mxu1 }
 0x414   : > { %v2426_v46 = vpop.f32.mrf.mxu1 }
 0x415   : > { %11299 = vmatprep.mubr.msk.f32.mxu0 %vm1315_vm3, %v2426_v46 }
 0x416   : > { %v2428_v17 = vpop.f32.mrf.mxu1 }
 0x418   : > { %v2431_v6 = vpop.f32.mrf.mxu1 }
 0x419   : > { %11300 = vmatmul.mubr.msk.f32.gmra.mxu0 %vm1315_vm3, %v2431_v6 }
 0x41a   : > { %v2433_v1 = vpop.f32.mrf.mxu1 }
 0x41c   : > { %v2436_v60 = vpop.f32.mrf.mxu1 }
 0x41d   : > { %11302 = vmatprep.mubr.msk.f32.mxu0 %vm1315_vm3, %v2436_v60 }
 0x41e   : > { %v2438_v49 = vpop.f32.mrf.mxu1 }
 0x420   : > { %v2441_v38 = vpop.f32.mrf.mxu1 }
 0x421   : > { %11303 = vmatmul.mubr.msk.f32.gmra.mxu0 %vm1315_vm3, %v2441_v38 }
 0x422   : > { %v2443_v18 = vpop.f32.mrf.mxu1 }
 0x424   : > { %v2446_v16 = vpop.f32.mrf.mxu1 }
 0x425   : > { %11305 = vmatprep.mubr.msk.f32.mxu0 %vm1315_vm3, %v2446_v16 }
 0x426   : > { %v2448_v57 = vpop.f32.mrf.mxu1 }
 0x428   : > { %v2451_v2 = vpop.f32.mrf.mxu1 }
 0x429   : > { %11306 = vmatmul.mubr.msk.f32.gmra.mxu0 %vm1315_vm3, %v2451_v2 }
 0x42a   : > { %v2453_v46 = vpop.f32.mrf.mxu1 }
 0x42c   : > { %v2456_v17 = vpop.f32.mrf.mxu1 }
 0x42d   : > { %11308 = vmatprep.mubr.msk.f32.mxu0 %vm1315_vm3, %v2456_v17 }
 0x42e   : > { %v2458_v6 = vpop.f32.mrf.mxu1 }
 0x430   : > { %v2461_v1 = vpop.f32.mrf.mxu1 }
 0x431   : > { %11309 = vmatmul.mubr.msk.f32.gmra.mxu0 %vm1315_vm3, %v2461_v1 }
 0x432   : > { %v2463_v60 = vpop.f32.mrf.mxu1 }
 0x434   : > { %v2854_v49 = vpop.f32.mrf.mxu1 }
 0x435   : > { %11313 = vmatprep.mubr.msk.f32.mxu0 %vm1315_vm3, %v2854_v49 }
 0x436   : > { %v2856_v38 = vpop.f32.mrf.mxu1 }
 0x438   : > { %v2859_v18 = vpop.f32.mrf.mxu1 }
 0x439   : > { %11314 = vmatmul.mubr.msk.f32.vlgmr.msra.gmra.mxu0 %vm1315_vm3, %v2859_v18 }
 0x43a   : > { %v2861_v16 = vpop.f32.mrf.mxu1  ;;  %3267 = vmatpush1.msra.mxu0 %v13537_v22 }
 0x43b   : > { %3268 = vmatprep.subr.mxu0 %v17649_v11 }
 0x43c   : > { %v2864_v57 = vpop.f32.mrf.mxu1  ;;  %3269 = vmatpush1.msra.mxu0 %v13542_v24 }
 0x43d   : > { %11316 = vmatprep.mubr.msk.f32.mxu0 %vm1315_vm3, %v2864_v57  ;;  %3270 = vmatprep.subr.mxu0 %v17649_v11 }
 0x43e   : > { %v2866_v2 = vpop.f32.mrf.mxu1  ;;  %3271 = vmatpush1.msra.mxu0 %v13548_v26 }
 0x43f   : > { %3272 = vmatprep.subr.mxu0 %v17649_v11 }
 0x440   : > { %v2869_v46 = vpop.f32.mrf.mxu1  ;;  %3273 = vmatpush1.msra.mxu0 %v13553_v32 }
 0x441   : > { %11317 = vmatmul.mubr.msk.f32.gmra.mxu0 %vm1315_vm3, %v2869_v46  ;;  %3274 = vmatprep.subr.mxu0 %v17649_v11 }
 0x442   : > { %v2871_v17 = vpop.f32.mrf.mxu1  ;;  %3275 = vmatpush1.msra.mxu0 %v13559_v40 }
 0x443   : > { %3276 = vmatprep.subr.mxu0 %v17649_v11 }
 0x444   : > { %v2874_v6 = vpop.f32.mrf.mxu1  ;;  %3277 = vmatpush1.msra.mxu0 %v13564_v48 }
 0x445   : > { %11319 = vmatprep.mubr.msk.f32.mxu0 %vm1315_vm3, %v2874_v6  ;;  %3278 = vmatprep.subr.mxu0 %v17649_v11 }
 0x446   : > { %v2876_v1 = vpop.f32.mrf.mxu1  ;;  %3279 = vmatpush1.msra.mxu0 %v13570_v56 }
 0x447   : > { %3280 = vmatprep.subr.mxu0 %v17649_v11 }
 0x448   : > { %v2879_v60 = vpop.f32.mrf.mxu1  ;;  %3281 = vmatpush1.msra.mxu0 %v13575_v7 }
 0x449   : > { %11320 = vmatmul.mubr.msk.f32.gmra.mxu0 %vm1315_vm3, %v2879_v60  ;;  %3282 = vmatprep.subr.mxu0 %v17649_v11 }
 0x44a   : > { %v2881_v49 = vpop.f32.mrf.mxu1  ;;  %3283 = vmatpush1.msra.mxu0 %v13581_v33 }
 0x44b   : > { %3284 = vmatprep.subr.mxu0 %v17649_v11 }
 0x44c   : > { %v2884_v38 = vpop.f32.mrf.mxu1  ;;  %3285 = vmatpush1.msra.mxu0 %v13586_v43 }
 0x44d   : > { %11322 = vmatprep.mubr.msk.f32.mxu0 %vm1315_vm3, %v2884_v38  ;;  %3286 = vmatprep.subr.mxu0 %v17649_v11 }
 0x44e   : > { %v2886_v18 = vpop.f32.mrf.mxu1  ;;  %3287 = vmatpush1.msra.mxu0 %v13592_v51 }
 0x44f   : > { %3288 = vmatprep.subr.mxu0 %v17649_v11 }
 0x450   : > { %v2889_v16 = vpop.f32.mrf.mxu1  ;;  %3289 = vmatpush1.msra.mxu0 %v13597_v59 }
 0x451   : > { %11323 = vmatmul.mubr.msk.f32.gmra.mxu0 %vm1315_vm3, %v2889_v16  ;;  %3290 = vmatprep.subr.mxu0 %v17649_v11 }
 0x452   : > { %v2891_v57 = vpop.f32.mrf.mxu1  ;;  %3291 = vmatpush1.msra.mxu0 %v13603_v30 }
 0x453   : > { %3292 = vmatprep.subr.mxu0 %v17649_v11 }
 0x454   : > { %v2894_v2 = vpop.f32.mrf.mxu1  ;;  %3293 = vmatpush1.msra.mxu0 %v13608_v5 }
 0x455   : > { %11325 = vmatprep.mubr.msk.f32.mxu0 %vm1315_vm3, %v2894_v2  ;;  %3294 = vmatprep.subr.mxu0 %v17649_v11 }
 0x456   : > { %v2896_v46 = vpop.f32.mrf.mxu1  ;;  %3295 = vmatpush1.msra.mxu0 %v13614_v10 }
 0x457   : > { %3296 = vmatprep.subr.mxu0 %v17649_v11 }
 0x458   : > { %v2899_v17 = vpop.f32.mrf.mxu1  ;;  %3297 = vmatpush1.msra.mxu0 %v13619_v15 }
 0x459   : > { %11326 = vmatmul.mubr.msk.f32.gmra.mxu0 %vm1315_vm3, %v2899_v17  ;;  %3312 = vmatprep.subr.mxu0 %v17649_v11 }
 0x45a   : > { %v2901_v6 = vpop.f32.mrf.mxu1  ;;  %10101 = vmatpush2.msk.msra.mxu0 %vm907_vm1, %v13625_v19 }
 0x45b   : > { %3314 = vmatprep.subr.mxu0 %v17649_v11 }
 0x45c   : > { %v2904_v1 = vpop.f32.mrf.mxu1  ;;  %3315 = vmatpush2.msra.mxu0 %v13631_v21 }
 0x45d   : > { %11328 = vmatprep.mubr.msk.f32.mxu0 %vm1315_vm3, %v2904_v1  ;;  %3316 = vmatprep.subr.mxu0 %v17649_v11 }
 0x45e   : > { %v2906_v60 = vpop.f32.mrf.mxu1  ;;  %3317 = vmatpush2.msra.mxu0 %v13637_v25 }
 0x45f   : > { %3318 = vmatprep.subr.mxu0 %v17649_v11 }
 0x460   : > { %v2909_v49 = vpop.f32.mrf.mxu1  ;;  %3319 = vmatpush2.msra.mxu0 %v13642_v36 }
 0x461   : > { %11329 = vmatmul.mubr.msk.f32.gmra.mxu0 %vm1315_vm3, %v2909_v49  ;;  %3320 = vmatprep.subr.mxu0 %v17649_v11 }
 0x462   : > { %v2911_v38 = vpop.f32.mrf.mxu1  ;;  %3321 = vmatpush2.msra.mxu0 %v13648_v52 }
 0x463   : > { %3322 = vmatprep.subr.mxu0 %v17649_v11  ;;  %v10066_v38 = vld [vmem:[%s17635_s4 + $0x5a8] sm:$0xff] }
 0x464   : > { %v2914_v18 = vpop.f32.mrf.mxu1  ;;  %3323 = vmatpush2.msra.mxu0 %v13653_v31 }
 0x465   : > { %11331 = vmatprep.mubr.msk.f32.mxu0 %vm1315_vm3, %v2914_v18  ;;  %3324 = vmatprep.subr.mxu0 %v17649_v11 }
 0x466   : > { %v2916_v16 = vpop.f32.mrf.mxu1  ;;  %3325 = vmatpush2.msra.mxu0 %v13659_v50 }
 0x467   : > { %3326 = vmatprep.subr.mxu0 %v17649_v11 }
 0x468   : > { %v2919_v57 = vpop.f32.mrf.mxu1  ;;  %3327 = vmatpush2.msra.mxu0 %v13664_v62 }
 0x469   : > { %11332 = vmatmul.mubr.msk.f32.gmra.mxu0 %vm1315_vm3, %v2919_v57  ;;  %3328 = vmatprep.subr.mxu0 %v17649_v11  ;;  %v10065_v57 = vld [vmem:[%s17635_s4 + $0x5a0] sm:$0xff] }
 0x46a   : > { %v2921_v2 = vpop.f32.mrf.mxu1  ;;  %3329 = vmatpush2.msra.mxu0 %v13670_v8 }
 0x46b   : > { %3744 = vmatprep.subr.mxu0 %v17649_v11  ;;  %v10068_v2 = vld [vmem:[%s17635_s4 + $0x5b8] sm:$0xff] }
 0x46c   : > { %v2924_v46 = vpop.f32.mrf.mxu1 }
 0x46d   : > { %11334 = vmatprep.mubr.msk.f32.mxu0 %vm1315_vm3, %v2924_v46  ;;  %v10067_v46 = vld [vmem:[%s17635_s4 + $0x5b0] sm:$0xff] }
 0x46e   : > { %v2926_v17 = vpop.f32.mrf.mxu1 }
 0x46f   : > { %v10070_v17 = vld [vmem:[%s17635_s4 + $0x5c8] sm:$0xff] }
 0x470   : > { %v2929_v6 = vpop.f32.mrf.mxu1 }
 0x471   : > { %11335 = vmatmul.mubr.msk.f32.gmra.mxu0 %vm1315_vm3, %v2929_v6  ;;  %v10069_v6 = vld [vmem:[%s17635_s4 + $0x5c0] sm:$0xff] }
 0x472   : > { %v2931_v1 = vpop.f32.mrf.mxu1 }
 0x474   : > { %v2934_v60 = vpop.f32.mrf.mxu1 }
 0x475   : > { %11337 = vmatprep.mubr.msk.f32.mxu0 %vm1315_vm3, %v2934_v60 }
 0x476   : > { %v2936_v49 = vpop.f32.mrf.mxu1 }
 0x477   : > { %v10096_v49 = vld [vmem:[%s17635_s4 + $0x698] sm:$0xff] }
 0x478   : > { %v2939_v18 = vpop.f32.mrf.mxu1 }
 0x479   : > { %11338 = vmatmul.mubr.msk.f32.gmra.mxu0 %vm1315_vm3, %v2939_v18 }
 0x47a   : > { %v2941_v16 = vpop.f32.mrf.mxu1  ;;  %10102 = vmatprep.mubr.msk.f32.mxu0 %vm852_vm0, %v10066_v38 }
 0x47d   : > { %3331 = vmatmul.mubr.f32.vlgmr.msra.gmra.mxu0 %v10065_v57  ;;  %v10097_v57 = vld [vmem:[%s17635_s4 + $0x6a0] sm:$0xff] }
 0x47e   : > { %10103 = vmatprep.mubr.msk.f32.mxu0 %vm852_vm0, %v10068_v2  ;;  %3745 = vmatpush1.msra.mxu0 %v13537_v22  ;;  %v10072_v22 = vld [vmem:[%s17635_s4 + $0x5d8] sm:$0xff]  ;;  %v3422_v2 = vld [vmem:[#allocation2 + $0xa] sm:$0x3] }
 0x47f   : > { %3746 = vmatprep.subr.mxu0 %v17649_v11  ;;  %11340 = vmatprep.subr.msk.mxu1 %vm1370_vm2, %v3422_v2 }
 0x480   : > { %3747 = vmatpush1.msra.mxu0 %v13542_v24  ;;  %v10071_v24 = vld [vmem:[%s17635_s4 + $0x5d0] sm:$0xff]  ;;  %11341 = vmatpush3.msk.msra.mxu1 %vm1370_vm2, %v3422_v2 }
 0x481   : > { %3336 = vmatmul.mubr.f32.gmra.mxu0 %v10067_v46  ;;  %3748 = vmatprep.subr.mxu0 %v17649_v11  ;;  %v10100_v46 = vld [vmem:[%s17635_s4 + $0x6b8] sm:$0xff] }
 0x482   : > { %10104 = vmatprep.mubr.msk.f32.mxu0 %vm852_vm0, %v10070_v17  ;;  %3749 = vmatpush1.msra.mxu0 %v13548_v26  ;;  %v10074_v26 = vld [vmem:[%s17635_s4 + $0x5e8] sm:$0xff] }
 0x483   : > { %3750 = vmatprep.subr.mxu0 %v17649_v11 }
 0x484   : > { %3751 = vmatpush1.msra.mxu0 %v13553_v32  ;;  %v10073_v32 = vld [vmem:[%s17635_s4 + $0x5e0] sm:$0xff] }
 0x485   : > { %3341 = vmatmul.mubr.f32.gmra.mxu0 %v10069_v6  ;;  %3752 = vmatprep.subr.mxu0 %v17649_v11  ;;  %v10140_v6 = vld [vmem:[%s17635_s4 + $0x6c8] sm:$0xff] }
 0x486   : > { %10105 = vmatprep.mubr.msk.f32.mxu0 %vm852_vm0, %v10072_v22  ;;  %3753 = vmatpush1.msra.mxu0 %v13559_v40  ;;  %v10076_v40 = vld [vmem:[%s17635_s4 + $0x5f8] sm:$0xff] }
 0x487   : > { %3754 = vmatprep.subr.mxu0 %v17649_v11 }
 0x488   : > { %3755 = vmatpush1.msra.mxu0 %v13564_v48  ;;  %v10075_v48 = vld [vmem:[%s17635_s4 + $0x5f0] sm:$0xff] }
 0x489   : > { %3346 = vmatmul.mubr.f32.gmra.mxu0 %v10071_v24  ;;  %3756 = vmatprep.subr.mxu0 %v17649_v11 }
 0x48a   : > { %10106 = vmatprep.mubr.msk.f32.mxu0 %vm852_vm0, %v10074_v26  ;;  %3757 = vmatpush1.msra.mxu0 %v13570_v56  ;;  %v10078_v56 = vld [vmem:[%s17635_s4 + $0x608] sm:$0xff]  ;;  %v10139_v26 = vld [vmem:[%s17635_s4 + $0x6c0] sm:$0xff] }
 0x48b   : > { %3758 = vmatprep.subr.mxu0 %v17649_v11 }
 0x48c   : > { %3759 = vmatpush1.msra.mxu0 %v13575_v7  ;;  %v10077_v7 = vld [vmem:[%s17635_s4 + $0x600] sm:$0xff] }
 0x48d   : > { %3351 = vmatmul.mubr.f32.gmra.mxu0 %v10073_v32  ;;  %3760 = vmatprep.subr.mxu0 %v17649_v11  ;;  %v10142_v32 = vld [vmem:[%s17635_s4 + $0x6d8] sm:$0xff] }
 0x48e   : > { %10107 = vmatprep.mubr.msk.f32.mxu0 %vm852_vm0, %v10076_v40  ;;  %3761 = vmatpush1.msra.mxu0 %v13581_v33  ;;  %v10080_v33 = vld [vmem:[%s17635_s4 + $0x618] sm:$0xff]  ;;  %v10141_v40 = vld [vmem:[%s17635_s4 + $0x6d0] sm:$0xff] }
 0x48f   : > { %3762 = vmatprep.subr.mxu0 %v17649_v11 }
 0x490   : > { %3763 = vmatpush1.msra.mxu0 %v13586_v43  ;;  %v10079_v43 = vld [vmem:[%s17635_s4 + $0x610] sm:$0xff] }
 0x491   : > { %3356 = vmatmul.mubr.f32.gmra.mxu0 %v10075_v48  ;;  %3764 = vmatprep.subr.mxu0 %v17649_v11 }
 0x492   : > { %10108 = vmatprep.mubr.msk.f32.mxu0 %vm852_vm0, %v10078_v56  ;;  %3765 = vmatpush1.msra.mxu0 %v13592_v51  ;;  %v10082_v51 = vld [vmem:[%s17635_s4 + $0x628] sm:$0xff] }
 0x493   : > { %3766 = vmatprep.subr.mxu0 %v17649_v11 }
 0x494   : > { %3767 = vmatpush1.msra.mxu0 %v13597_v59  ;;  %v10081_v59 = vld [vmem:[%s17635_s4 + $0x620] sm:$0xff] }
 0x495   : > { %3361 = vmatmul.mubr.f32.gmra.mxu0 %v10077_v7  ;;  %3768 = vmatprep.subr.mxu0 %v17649_v11 }
 0x496   : > { %10109 = vmatprep.mubr.msk.f32.mxu0 %vm852_vm0, %v10080_v33  ;;  %3769 = vmatpush1.msra.mxu0 %v13603_v30  ;;  %v10084_v30 = vld [vmem:[%s17635_s4 + $0x638] sm:$0xff]  ;;  %v10143_v33 = vld [vmem:[%s17635_s4 + $0x6e0] sm:$0xff] }
 0x497   : > { %3770 = vmatprep.subr.mxu0 %v17649_v11 }
 0x498   : > { %3771 = vmatpush1.msra.mxu0 %v13608_v5  ;;  %v10083_v5 = vld [vmem:[%s17635_s4 + $0x630] sm:$0xff] }
 0x499   : > { %3366 = vmatmul.mubr.f32.gmra.mxu0 %v10079_v43  ;;  %3772 = vmatprep.subr.mxu0 %v17649_v11  ;;  %v10146_v43 = vld [vmem:[%s17635_s4 + $0x6f8] sm:$0xff] }
 0x49a   : > { %10110 = vmatprep.mubr.msk.f32.mxu0 %vm852_vm0, %v10082_v51  ;;  %3773 = vmatpush1.msra.mxu0 %v13614_v10  ;;  %v10086_v10 = vld [vmem:[%s17635_s4 + $0x648] sm:$0xff]  ;;  %v10145_v51 = vld [vmem:[%s17635_s4 + $0x6f0] sm:$0xff] }
 0x49b   : > { %3774 = vmatprep.subr.mxu0 %v17649_v11 }
 0x49c   : > { %3775 = vmatpush1.msra.mxu0 %v13619_v15  ;;  %v10085_v15 = vld [vmem:[%s17635_s4 + $0x640] sm:$0xff] }
 0x49d   : > { %3371 = vmatmul.mubr.f32.gmra.mxu0 %v10081_v59  ;;  %3790 = vmatprep.subr.mxu0 %v17649_v11 }
 0x49e   : > { %10111 = vmatprep.mubr.msk.f32.mxu0 %vm852_vm0, %v10084_v30  ;;  %10175 = vmatpush2.msk.msra.mxu0 %vm907_vm1, %v13625_v19  ;;  %v10088_v19 = vld [vmem:[%s17635_s4 + $0x658] sm:$0xff] }
 0x49f   : > { %3792 = vmatprep.subr.mxu0 %v17649_v11 }
 0x4a0   : > { %3793 = vmatpush2.msra.mxu0 %v13631_v21  ;;  %v10087_v21 = vld [vmem:[%s17635_s4 + $0x650] sm:$0xff] }
 0x4a1   : > { %3376 = vmatmul.mubr.f32.gmra.mxu0 %v10083_v5  ;;  %3794 = vmatprep.subr.mxu0 %v17649_v11 }
 0x4a2   : > { %10112 = vmatprep.mubr.msk.f32.mxu0 %vm852_vm0, %v10086_v10  ;;  %3795 = vmatpush2.msra.mxu0 %v13637_v25  ;;  %v10090_v25 = vld [vmem:[%s17635_s4 + $0x668] sm:$0xff]  ;;  %v10147_v10 = vld [vmem:[%s17635_s4 + $0x700] sm:$0xff] }
 0x4a3   : > { %3796 = vmatprep.subr.mxu0 %v17649_v11 }
 0x4a4   : > { %3797 = vmatpush2.msra.mxu0 %v13642_v36  ;;  %v10089_v36 = vld [vmem:[%s17635_s4 + $0x660] sm:$0xff] }
 0x4a5   : > { %3381 = vmatmul.mubr.f32.gmra.mxu0 %v10085_v15  ;;  %3798 = vmatprep.subr.mxu0 %v17649_v11  ;;  %v10150_v15 = vld [vmem:[%s17635_s4 + $0x718] sm:$0xff] }
 0x4a6   : > { %10113 = vmatprep.mubr.msk.f32.mxu0 %vm852_vm0, %v10088_v19  ;;  %3799 = vmatpush2.msra.mxu0 %v13648_v52  ;;  %v10092_v52 = vld [vmem:[%s17635_s4 + $0x678] sm:$0xff]  ;;  %v10149_v19 = vld [vmem:[%s17635_s4 + $0x710] sm:$0xff] }
 0x4a7   : > { %3800 = vmatprep.subr.mxu0 %v17649_v11 }
 0x4a8   : > { %3801 = vmatpush2.msra.mxu0 %v13653_v31  ;;  %v10091_v31 = vld [vmem:[%s17635_s4 + $0x670] sm:$0xff] }
 0x4a9   : > { %3386 = vmatmul.mubr.f32.gmra.mxu0 %v10087_v21  ;;  %3802 = vmatprep.subr.mxu0 %v17649_v11 }
 0x4aa   : > { %10114 = vmatprep.mubr.msk.f32.mxu0 %vm852_vm0, %v10090_v25  ;;  %3803 = vmatpush2.msra.mxu0 %v13659_v50  ;;  %v10094_v50 = vld [vmem:[%s17635_s4 + $0x688] sm:$0xff] }
 0x4ab   : > { %3804 = vmatprep.subr.mxu0 %v17649_v11 }
 0x4ac   : > { %3805 = vmatpush2.msra.mxu0 %v13664_v62  ;;  %v10093_v62 = vld [vmem:[%s17635_s4 + $0x680] sm:$0xff] }
 0x4ad   : > { %3391 = vmatmul.mubr.f32.gmra.mxu0 %v10089_v36  ;;  %3806 = vmatprep.subr.mxu0 %v17649_v11 }
 0x4ae   : > { %10115 = vmatprep.mubr.msk.f32.mxu0 %vm852_vm0, %v10092_v52  ;;  %3807 = vmatpush2.msra.mxu0 %v13670_v8  ;;  %v10095_v8 = vld [vmem:[%s17635_s4 + $0x690] sm:$0xff]  ;;  %v10151_v52 = vld [vmem:[%s17635_s4 + $0x720] sm:$0xff] }
 0x4b1   : > { %v11286_v1 = vpop.f32.mrf.mxu0  ;;  %3396 = vmatmul.mubr.f32.gmra.mxu0 %v10091_v31  ;;  %v10154_v31 = vld [vmem:[%s17635_s4 + $0x738] sm:$0xff] }
 0x4b2   : > { %v14273_v60 = vadd.f32 %v11286_v1, %v13961_v39  ;;  %10116 = vmatprep.mubr.msk.f32.mxu0 %vm852_vm0, %v10094_v50  ;;  %v10098_v39 = vld [vmem:[%s17635_s4 + $0x6a8] sm:$0xff]  ;;  %v10153_v50 = vld [vmem:[%s17635_s4 + $0x730] sm:$0xff] }
 0x4b3   : > { %v14286_v38 = vpop.f32.mrf.mxu0 }
 0x4b4   : > { %17650 = vst [vmem:[#allocation47_spill] sm:$0xff] %v14286_v38 }
 0x4b5   : > { %3401 = vmatmul.mubr.f32.gmra.mxu0 %v10093_v62 }
 0x4b6   : > { %10117 = vmatprep.mubr.msk.f32.mxu0 %vm852_vm0, %v10096_v49 }
 0x4b9   : > { %v11289_v18 = vpop.f32.mrf.mxu0  ;;  %3406 = vmatmul.mubr.f32.gmra.mxu0 %v10095_v8  ;;  %v10155_v8 = vld [vmem:[%s17635_s4 + $0x740] sm:$0xff] }
 0x4ba   : > { %v14292_v16 = vadd.f32 %v11289_v18, %v13981_v28  ;;  %10118 = vmatprep.mubr.msk.f32.mxu0 %vm852_vm0, %v10098_v39  ;;  %v10099_v28 = vld [vmem:[%s17635_s4 + $0x6b0] sm:$0xff]  ;;  %v10158_v39 = vld [vmem:[%s17635_s4 + $0x758] sm:$0xff] }
 0x4bb   : > { %v14307_v17 = vpop.f32.mrf.mxu0  ;;  %v10157_v18 = vld [vmem:[%s17635_s4 + $0x750] sm:$0xff] }
 0x4bc   : > { %17651 = vst [vmem:[#allocation48_spill] sm:$0xff] %v14307_v17  ;;  %v14644_v17 = vld [vmem:[%s12739_s24 + $0xa0] sm:$0xff] }
 0x4bd   : > { %3411 = vmatmul.mubr.f32.gmra.mxu0 %v10097_v57 }
 0x4be   : > { %10119 = vmatprep.mubr.msk.f32.mxu0 %vm852_vm0, %v10100_v46 }
 0x4c1   : > { %v11292_v22 = vpop.f32.mrf.mxu0  ;;  %3416 = vmatmul.mubr.f32.gmra.mxu0 %v10099_v28  ;;  %v10159_v28 = vld [vmem:[%s17635_s4 + $0x760] sm:$0xff] }
 0x4c2   : > { %v14313_v24 = vadd.f32 %v11292_v22, %v13998_v34  ;;  %10176 = vmatprep.mubr.msk.f32.mxu0 %vm852_vm0, %v10140_v6  ;;  %v10144_v34 = vld [vmem:[%s17635_s4 + $0x6e8] sm:$0xff]  ;;  %v10162_v6 = vld [vmem:[%s17635_s4 + $0x778] sm:$0xff]  ;;  %v10161_v22 = vld [vmem:[%s17635_s4 + $0x770] sm:$0xff] }
 0x4c3   : > { %v14326_v48 = vpop.f32.mrf.mxu0 }
 0x4c4   : > { %17652 = vst [vmem:[#allocation49_spill] sm:$0xff] %v14326_v48  ;;  %v14655_v48 = vld [vmem:[%s12739_s24 + $0x90] sm:$0xff] }
 0x4c5   : > { %3809 = vmatmul.mubr.f32.vlgmr.msra.gmra.mxu0 %v10139_v26 }
 0x4c6   : > { %10177 = vmatprep.mubr.msk.f32.mxu0 %vm852_vm0, %v10142_v32 }
 0x4c9   : > { %v11295_v56 = vpop.f32.mrf.mxu0  ;;  %3814 = vmatmul.mubr.f32.gmra.mxu0 %v10141_v40 }
 0x4ca   : > { %v14332_v7 = vadd.f32 %v11295_v56, %v14003_v20  ;;  %10178 = vmatprep.mubr.msk.f32.mxu0 %vm852_vm0, %v10144_v34  ;;  %v10148_v20 = vld [vmem:[%s17635_s4 + $0x708] sm:$0xff]  ;;  %v10163_v34 = vld [vmem:[%s17635_s4 + $0x780] sm:$0xff]  ;;  %v10166_v56 = vld [vmem:[%s17635_s4 + $0x798] sm:$0xff] }
 0x4cb   : > { %v14345_v59 = vpop.f32.mrf.mxu0 }
 0x4cc   : > { %17653 = vst [vmem:[#allocation50_spill] sm:$0xff] %v14345_v59 }
 0x4cd   : > { %3819 = vmatmul.mubr.f32.gmra.mxu0 %v10143_v33  ;;  %v10165_v33 = vld [vmem:[%s17635_s4 + $0x790] sm:$0xff] }
 0x4ce   : > { %10179 = vmatprep.mubr.msk.f32.mxu0 %vm852_vm0, %v10146_v43 }
 0x4d1   : > { %v11298_v30 = vpop.f32.mrf.mxu0  ;;  %3824 = vmatmul.mubr.f32.gmra.mxu0 %v10145_v51 }
 0x4d2   : > { %v14351_v5 = vadd.f32 %v11298_v30, %v14008_v0  ;;  %10180 = vmatprep.mubr.msk.f32.mxu0 %vm852_vm0, %v10148_v20  ;;  %v10152_v0 = vld [vmem:[%s17635_s4 + $0x728] sm:$0xff]  ;;  %v10167_v30 = vld [vmem:[%s17635_s4 + $0x7a0] sm:$0xff] }
 0x4d3   : > { %v14364_v21 = vpop.f32.mrf.mxu0 }
 0x4d4   : > { %17654 = vst [vmem:[#allocation51_spill] sm:$0xff] %v14364_v21 }
 0x4d5   : > { %3829 = vmatmul.mubr.f32.gmra.mxu0 %v10147_v10  ;;  %v10170_v10 = vld [vmem:[%s17635_s4 + $0x7b8] sm:$0xff] }
 0x4d6   : > { %10181 = vmatprep.mubr.msk.f32.mxu0 %vm852_vm0, %v10150_v15  ;;  %v10169_v15 = vld [vmem:[%s17635_s4 + $0x7b0] sm:$0xff] }
 0x4d9   : > { %v11301_v25 = vpop.f32.mrf.mxu0  ;;  %3834 = vmatmul.mubr.f32.gmra.mxu0 %v10149_v19 }
 0x4da   : > { %v14370_v36 = vadd.f32 %v11301_v25, %v14013_v37  ;;  %10182 = vmatprep.mubr.msk.f32.mxu0 %vm852_vm0, %v10152_v0  ;;  %v10156_v37 = vld [vmem:[%s17635_s4 + $0x748] sm:$0xff] }
 0x4db   : > { %v14383_v1 = vpop.f32.mrf.mxu0 }
 0x4dd   : > { %3839 = vmatmul.mubr.f32.gmra.mxu0 %v10151_v52  ;;  %v10171_v52 = vld [vmem:[%s17635_s4 + $0x7c0] sm:$0xff] }
 0x4de   : > { %10183 = vmatprep.mubr.msk.f32.mxu0 %vm852_vm0, %v10154_v31  ;;  %v3900_v31 = vld [vmem:[#allocation2 + $0xc] sm:$0x3] }
 0x4df   : > { %11369 = vmatprep.subr.msk.mxu1 %vm1370_vm2, %v3900_v31 }
 0x4e1   : > { %v11304_v62 = vpop.f32.mrf.mxu0  ;;  %3844 = vmatmul.mubr.f32.gmra.mxu0 %v10153_v50  ;;  %v10174_v50 = vld [vmem:[%s17635_s4 + $0x7d8] sm:$0xff] }
 0x4e2   : > { %v14389_v49 = vadd.f32 %v11304_v62, %v14018_v42  ;;  %10184 = vmatprep.mubr.msk.f32.mxu0 %vm852_vm0, %v10156_v37  ;;  %v10160_v42 = vld [vmem:[%s17635_s4 + $0x768] sm:$0xff] }
 0x4e3   : > { %v14402_v57 = vpop.f32.mrf.mxu0 }
 0x4e5   : > { %3849 = vmatmul.mubr.f32.gmra.mxu0 %v10155_v8 }
 0x4e6   : > { %10185 = vmatprep.mubr.msk.f32.mxu0 %vm852_vm0, %v10158_v39 }
 0x4e9   : > { %v11307_v2 = vpop.f32.mrf.mxu0  ;;  %3854 = vmatmul.mubr.f32.gmra.mxu0 %v10157_v18 }
 0x4ea   : > { %v2694_v46 = vadd.f32 %v11307_v2, %v14023_v35  ;;  %10186 = vmatprep.mubr.msk.f32.mxu0 %vm852_vm0, %v10160_v42  ;;  %v10164_v35 = vld [vmem:[%s17635_s4 + $0x788] sm:$0xff] }
 0x4eb   : > { %v14419_v26 = vpop.f32.mrf.mxu0 }
 0x4ed   : > { %3859 = vmatmul.mubr.f32.gmra.mxu0 %v10159_v28 }
 0x4ee   : > { %10187 = vmatprep.mubr.msk.f32.mxu0 %vm852_vm0, %v10162_v6 }
 0x4f1   : > { %v11310_v32 = vpop.f32.mrf.mxu0  ;;  %3864 = vmatmul.mubr.f32.gmra.mxu0 %v10161_v22 }
 0x4f2   : > { %v2696_v40 = vadd.f32 %v11310_v32, %v14028_v45  ;;  %10188 = vmatprep.mubr.msk.f32.mxu0 %vm852_vm0, %v10164_v35  ;;  %v10168_v45 = vld [vmem:[%s17635_s4 + $0x7a8] sm:$0xff] }
 0x4f3   : > { %v14436_v43 = vpop.f32.mrf.mxu0 }
 0x4f4   : > { %17655 = vst [vmem:[#allocation52_spill] sm:$0xff] %v14436_v43  ;;  %v14621_v43 = vld [vmem:[%s12739_s24 + $0xc0] sm:$0xf] }
 0x4f5   : > { %3869 = vmatmul.mubr.f32.gmra.mxu0 %v10163_v34 }
 0x4f6   : > { %10189 = vmatprep.mubr.msk.f32.mxu0 %vm852_vm0, %v10166_v56 }
 0x4f9   : > { %v11315_v51 = vpop.f32.mrf.mxu0  ;;  %3874 = vmatmul.mubr.f32.gmra.mxu0 %v10165_v33 }
 0x4fa   : > { %v14442_v20 = vadd.f32 %v11315_v51, %v14273_v60  ;;  %10190 = vmatprep.mubr.msk.f32.mxu0 %vm852_vm0, %v10168_v45  ;;  %v10172_v60 = vld [vmem:[%s17635_s4 + $0x7c8] sm:$0xff] }
 0x4fb   : > { %v14455_v19 = vpop.f32.mrf.mxu0 }
 0x4fc   : > { %17656 = vst [vmem:[#allocation53_spill] sm:$0xff] %v14455_v19  ;;  %v14627_v19 = vld [vmem:[%s12739_s24 + $0xb8] sm:$0xff] }
 0x4fd   : > { %3879 = vmatmul.mubr.f32.gmra.mxu0 %v10167_v30 }
 0x4fe   : > { %10191 = vmatprep.mubr.msk.f32.mxu0 %vm852_vm0, %v10170_v10 }
 0x501   : > { %v11318_v0 = vpop.f32.mrf.mxu0  ;;  %3884 = vmatmul.mubr.f32.gmra.mxu0 %v10169_v15 }
 0x502   : > { %v14461_v25 = vadd.f32 %v11318_v0, %v14292_v16  ;;  %10192 = vmatprep.mubr.msk.f32.mxu0 %vm852_vm0, %v10172_v60  ;;  %v10173_v16 = vld [vmem:[%s17635_s4 + $0x7d0] sm:$0xff] }
 0x503   : > { %v14475_v37 = vpop.f32.mrf.mxu0 }
 0x504   : > { %17657 = vst [vmem:[#allocation54_spill] sm:$0xff] %v14475_v37  ;;  %v14638_v37 = vld [vmem:[%s12739_s24 + $0xa8] sm:$0xff] }
 0x505   : > { %3889 = vmatmul.mubr.f32.gmra.mxu0 %v10171_v52 }
 0x506   : > { %10193 = vmatprep.mubr.msk.f32.mxu0 %vm852_vm0, %v10174_v50 }
 0x509   : > { %v11321_v62 = vpop.f32.mrf.mxu0  ;;  %3894 = vmatmul.mubr.f32.gmra.mxu0 %v10173_v16 }
 0x50a   : > { %v14478_v8 = vadd.f32 %v11321_v62, %v14313_v24 }
 0x50b   : > { %v14480_v39 = vpop.f32.mrf.mxu0 }
 0x50c   : > { %17658 = vst [vmem:[#allocation55_spill] sm:$0xff] %v14480_v39  ;;  %v14649_v39 = vld [vmem:[%s12739_s24 + $0x98] sm:$0xff] }
 0x511   : > { %v11324_v18 = vpop.f32.mrf.mxu0 }
 0x512   : > { %v14483_v42 = vadd.f32 %v11324_v18, %v14332_v7 }
 0x513   : > { %v14485_v2 = vpop.f32.mrf.mxu0 }
 0x514   : > { %17659 = vst [vmem:[#allocation56_spill] sm:$0xff] %v14485_v2  ;;  %v14660_v2 = vld [vmem:[%s12739_s24 + $0x88] sm:$0xff] }
 0x519   : > { %v11327_v28 = vpop.f32.mrf.mxu0 }
 0x51a   : > { %v14488_v6 = vadd.f32 %v11327_v28, %v14351_v5 }
 0x51b   : > { %v14490_v22 = vpop.f32.mrf.mxu0 }
 0x51c   : > { %17660 = vst [vmem:[#allocation57_spill] sm:$0xff] %v14490_v22 }
 0x521   : > { %v11330_v35 = vpop.f32.mrf.mxu0 }
 0x522   : > { %v14493_v32 = vadd.f32 %v11330_v35, %v14370_v36 }
 0x523   : > { %v14495_v24 = vpop.f32.mrf.mxu0 }
 0x529   : > { %v11333_v34 = vpop.f32.mrf.mxu0 }
 0x52a   : > { %v14498_v56 = vadd.f32 %v11333_v34, %v14389_v49 }
 0x52b   : > { %v14500_v7 = vpop.f32.mrf.mxu0 }
 0x531   : > { %v11336_v33 = vpop.f32.mrf.mxu0 }
 0x532   : > { %v14502_v45 = vadd.f32 %v11336_v33, %v2694_v46 }
 0x533   : > { %v14504_v51 = vpop.f32.mrf.mxu0 }
 0x539   : > { %v11339_v5 = vpop.f32.mrf.mxu0 }
 0x53a   : > { %v14506_v30 = vadd.f32 %v11339_v5, %v2696_v40 }
 0x53b   : > { %v14508_v10 = vpop.f32.mrf.mxu0 }
 0x53c   : > { %17661 = vst [vmem:[#allocation58_spill] sm:$0xff] %v14508_v10  ;;  %v14615_v10 = vld [vmem:[%s12739_s24] sm:$0xff] }
 0x53d   : > { %v3332_v36 = vpop.f32.mrf.mxu0 }
 0x53e   : > { %11342 = vmatprep.mubr.msk.f32.mxu1 %vm1315_vm3, %v3332_v36 }
 0x53f   : > { %v3334_v15 = vpop.f32.mrf.mxu0 }
 0x541   : > { %v3337_v60 = vpop.f32.mrf.mxu0 }
 0x542   : > { %11343 = vmatmul.mubr.msk.f32.vlgmr.msra.gmra.mxu1 %vm1315_vm3, %v3337_v60 }
 0x543   : > { %v3339_v49 = vpop.f32.mrf.mxu0  ;;  %11370 = vmatpush3.msk.msra.mxu1 %vm1370_vm2, %v3900_v31 }
 0x544   : > { %4222 = vmatprep.subr.mxu1 %v17649_v11 }
 0x545   : > { %v3342_v46 = vpop.f32.mrf.mxu0 }
 0x546   : > { %11345 = vmatprep.mubr.msk.f32.mxu1 %vm1315_vm3, %v3342_v46 }
 0x547   : > { %v3344_v0 = vpop.f32.mrf.mxu0 }
 0x549   : > { %v3347_v40 = vpop.f32.mrf.mxu0 }
 0x54a   : > { %11346 = vmatmul.mubr.msk.f32.gmra.mxu1 %vm1315_vm3, %v3347_v40 }
 0x54b   : > { %v3349_v52 = vpop.f32.mrf.mxu0 }
 0x54d   : > { %v3352_v50 = vpop.f32.mrf.mxu0 }
 0x54e   : > { %11348 = vmatprep.mubr.msk.f32.mxu1 %vm1315_vm3, %v3352_v50 }
 0x54f   : > { %v3354_v16 = vpop.f32.mrf.mxu0 }
 0x551   : > { %v3357_v62 = vpop.f32.mrf.mxu0 }
 0x552   : > { %11349 = vmatmul.mubr.msk.f32.gmra.mxu1 %vm1315_vm3, %v3357_v62 }
 0x553   : > { %v3359_v18 = vpop.f32.mrf.mxu0 }
 0x555   : > { %v3362_v28 = vpop.f32.mrf.mxu0 }
 0x556   : > { %11351 = vmatprep.mubr.msk.f32.mxu1 %vm1315_vm3, %v3362_v28 }
 0x557   : > { %v3364_v31 = vpop.f32.mrf.mxu0 }
 0x559   : > { %v3367_v35 = vpop.f32.mrf.mxu0 }
 0x55a   : > { %11352 = vmatmul.mubr.msk.f32.gmra.mxu1 %vm1315_vm3, %v3367_v35 }
 0x55b   : > { %v3369_v34 = vpop.f32.mrf.mxu0 }
 0x55d   : > { %v3372_v33 = vpop.f32.mrf.mxu0 }
 0x55e   : > { %11354 = vmatprep.mubr.msk.f32.mxu1 %vm1315_vm3, %v3372_v33 }
 0x55f   : > { %v3374_v5 = vpop.f32.mrf.mxu0 }
 0x561   : > { %v3377_v36 = vpop.f32.mrf.mxu0 }
 0x562   : > { %11355 = vmatmul.mubr.msk.f32.gmra.mxu1 %vm1315_vm3, %v3377_v36 }
 0x563   : > { %v3379_v15 = vpop.f32.mrf.mxu0 }
 0x565   : > { %v3382_v60 = vpop.f32.mrf.mxu0 }
 0x566   : > { %11357 = vmatprep.mubr.msk.f32.mxu1 %vm1315_vm3, %v3382_v60 }
 0x567   : > { %v3384_v49 = vpop.f32.mrf.mxu0 }
 0x569   : > { %v3387_v46 = vpop.f32.mrf.mxu0 }
 0x56a   : > { %11358 = vmatmul.mubr.msk.f32.gmra.mxu1 %vm1315_vm3, %v3387_v46  ;;  %v14533_v46 = vld [vmem:[%s12739_s24 + $0x78] sm:$0xff] }
 0x56b   : > { %v3389_v0 = vpop.f32.mrf.mxu0 }
 0x56d   : > { %v3392_v40 = vpop.f32.mrf.mxu0 }
 0x56e   : > { %11360 = vmatprep.mubr.msk.f32.mxu1 %vm1315_vm3, %v3392_v40  ;;  %v14538_v40 = vld [vmem:[%s12739_s24 + $0x70] sm:$0xff] }
 0x56f   : > { %v3394_v52 = vpop.f32.mrf.mxu0 }
 0x571   : > { %v3397_v50 = vpop.f32.mrf.mxu0 }
 0x572   : > { %11361 = vmatmul.mubr.msk.f32.gmra.mxu1 %vm1315_vm3, %v3397_v50  ;;  %v14544_v50 = vld [vmem:[%s12739_s24 + $0x68] sm:$0xff] }
 0x573   : > { %v3399_v16 = vpop.f32.mrf.mxu0 }
 0x575   : > { %v3402_v62 = vpop.f32.mrf.mxu0 }
 0x576   : > { %11363 = vmatprep.mubr.msk.f32.mxu1 %vm1315_vm3, %v3402_v62  ;;  %v14549_v62 = vld [vmem:[%s12739_s24 + $0x60] sm:$0xff] }
 0x577   : > { %v3404_v18 = vpop.f32.mrf.mxu0 }
 0x579   : > { %v3407_v28 = vpop.f32.mrf.mxu0 }
 0x57a   : > { %11364 = vmatmul.mubr.msk.f32.gmra.mxu1 %vm1315_vm3, %v3407_v28  ;;  %v14555_v28 = vld [vmem:[%s12739_s24 + $0x58] sm:$0xff] }
 0x57b   : > { %v3409_v31 = vpop.f32.mrf.mxu0 }
 0x57d   : > { %v3412_v35 = vpop.f32.mrf.mxu0 }
 0x57e   : > { %11366 = vmatprep.mubr.msk.f32.mxu1 %vm1315_vm3, %v3412_v35  ;;  %v14560_v35 = vld [vmem:[%s12739_s24 + $0x50] sm:$0xff] }
 0x57f   : > { %v3414_v34 = vpop.f32.mrf.mxu0 }
 0x581   : > { %v3417_v33 = vpop.f32.mrf.mxu0 }
 0x582   : > { %11367 = vmatmul.mubr.msk.f32.gmra.mxu1 %vm1315_vm3, %v3417_v33  ;;  %v14566_v33 = vld [vmem:[%s12739_s24 + $0x48] sm:$0xff] }
 0x583   : > { %v3419_v5 = vpop.f32.mrf.mxu0 }
 0x585   : > { %v3810_v36 = vpop.f32.mrf.mxu0 }
 0x586   : > { %11371 = vmatprep.mubr.msk.f32.mxu1 %vm1315_vm3, %v3810_v36  ;;  %v14571_v36 = vld [vmem:[%s12739_s24 + $0x40] sm:$0xff] }
 0x587   : > { %v3812_v15 = vpop.f32.mrf.mxu0 }
 0x589   : > { %v3815_v60 = vpop.f32.mrf.mxu0 }
 0x58a   : > { %11372 = vmatmul.mubr.msk.f32.vlgmr.msra.gmra.mxu1 %vm1315_vm3, %v3815_v60  ;;  %v14577_v60 = vld [vmem:[%s12739_s24 + $0x38] sm:$0xff] }
 0x58b   : > { %v3817_v49 = vpop.f32.mrf.mxu0  ;;  %4223 = vmatpush1.msra.mxu1 %v14533_v46 }
 0x58c   : > { %4224 = vmatprep.subr.mxu1 %v17649_v11 }
 0x58d   : > { %v3820_v0 = vpop.f32.mrf.mxu0  ;;  %4225 = vmatpush1.msra.mxu1 %v14538_v40 }
 0x58e   : > { %11374 = vmatprep.mubr.msk.f32.mxu1 %vm1315_vm3, %v3820_v0  ;;  %4226 = vmatprep.subr.mxu1 %v17649_v11  ;;  %v14582_v0 = vld [vmem:[%s12739_s24 + $0x30] sm:$0xff] }
 0x58f   : > { %v3822_v52 = vpop.f32.mrf.mxu0  ;;  %4227 = vmatpush1.msra.mxu1 %v14544_v50 }
 0x590   : > { %4228 = vmatprep.subr.mxu1 %v17649_v11 }
 0x591   : > { %v3825_v16 = vpop.f32.mrf.mxu0  ;;  %4229 = vmatpush1.msra.mxu1 %v14549_v62 }
 0x592   : > { %11375 = vmatmul.mubr.msk.f32.gmra.mxu1 %vm1315_vm3, %v3825_v16  ;;  %4230 = vmatprep.subr.mxu1 %v17649_v11  ;;  %v14588_v16 = vld [vmem:[%s12739_s24 + $0x28] sm:$0xff] }
 0x593   : > { %v3827_v18 = vpop.f32.mrf.mxu0  ;;  %4231 = vmatpush1.msra.mxu1 %v14555_v28 }
 0x594   : > { %4232 = vmatprep.subr.mxu1 %v17649_v11 }
 0x595   : > { %v3830_v31 = vpop.f32.mrf.mxu0  ;;  %4233 = vmatpush1.msra.mxu1 %v14560_v35 }
 0x596   : > { %11377 = vmatprep.mubr.msk.f32.mxu1 %vm1315_vm3, %v3830_v31  ;;  %4234 = vmatprep.subr.mxu1 %v17649_v11  ;;  %v14593_v31 = vld [vmem:[%s12739_s24 + $0x20] sm:$0xff] }
 0x597   : > { %v3832_v34 = vpop.f32.mrf.mxu0  ;;  %4235 = vmatpush1.msra.mxu1 %v14566_v33 }
 0x598   : > { %4236 = vmatprep.subr.mxu1 %v17649_v11 }
 0x599   : > { %v3835_v5 = vpop.f32.mrf.mxu0  ;;  %4237 = vmatpush1.msra.mxu1 %v14571_v36 }
 0x59a   : > { %11378 = vmatmul.mubr.msk.f32.gmra.mxu1 %vm1315_vm3, %v3835_v5  ;;  %4238 = vmatprep.subr.mxu1 %v17649_v11  ;;  %v14599_v5 = vld [vmem:[%s12739_s24 + $0x18] sm:$0xff] }
 0x59b   : > { %v3837_v15 = vpop.f32.mrf.mxu0  ;;  %4239 = vmatpush1.msra.mxu1 %v14577_v60 }
 0x59c   : > { %4240 = vmatprep.subr.mxu1 %v17649_v11 }
 0x59d   : > { %v3840_v49 = vpop.f32.mrf.mxu0  ;;  %4241 = vmatpush1.msra.mxu1 %v14582_v0 }
 0x59e   : > { %11380 = vmatprep.mubr.msk.f32.mxu1 %vm1315_vm3, %v3840_v49  ;;  %4242 = vmatprep.subr.mxu1 %v17649_v11  ;;  %v14604_v49 = vld [vmem:[%s12739_s24 + $0x10] sm:$0xff] }
 0x59f   : > { %v3842_v52 = vpop.f32.mrf.mxu0  ;;  %4243 = vmatpush1.msra.mxu1 %v14588_v16 }
 0x5a0   : > { %4244 = vmatprep.subr.mxu1 %v17649_v11 }
 0x5a1   : > { %v3845_v18 = vpop.f32.mrf.mxu0  ;;  %4245 = vmatpush1.msra.mxu1 %v14593_v31 }
 0x5a2   : > { %11381 = vmatmul.mubr.msk.f32.gmra.mxu1 %vm1315_vm3, %v3845_v18  ;;  %4246 = vmatprep.subr.mxu1 %v17649_v11  ;;  %v14610_v18 = vld [vmem:[%s12739_s24 + $0x8] sm:$0xff] }
 0x5a3   : > { %v3847_v34 = vpop.f32.mrf.mxu0  ;;  %4247 = vmatpush1.msra.mxu1 %v14599_v5 }
 0x5a4   : > { %4248 = vmatprep.subr.mxu1 %v17649_v11 }
 0x5a5   : > { %v3850_v15 = vpop.f32.mrf.mxu0  ;;  %4249 = vmatpush1.msra.mxu1 %v14604_v49 }
 0x5a6   : > { %11383 = vmatprep.mubr.msk.f32.mxu1 %vm1315_vm3, %v3850_v15  ;;  %4250 = vmatprep.subr.mxu1 %v17649_v11 }
 0x5a7   : > { %v3852_v52 = vpop.f32.mrf.mxu0  ;;  %4251 = vmatpush1.msra.mxu1 %v14610_v18 }
 0x5a8   : > { %4252 = vmatprep.subr.mxu1 %v17649_v11 }
 0x5a9   : > { %v3855_v34 = vpop.f32.mrf.mxu0  ;;  %4253 = vmatpush1.msra.mxu1 %v14615_v10 }
 0x5aa   : > { %11384 = vmatmul.mubr.msk.f32.gmra.mxu1 %vm1315_vm3, %v3855_v34  ;;  %4268 = vmatprep.subr.mxu1 %v17649_v11 }
 0x5ab   : > { %v3857_v15 = vpop.f32.mrf.mxu0  ;;  %10249 = vmatpush2.msk.msra.mxu1 %vm907_vm1, %v14621_v43 }
 0x5ac   : > { %4270 = vmatprep.subr.mxu1 %v17649_v11  ;;  %v14633_v15 = vld [vmem:[%s12739_s24 + $0xb0] sm:$0xff] }
 0x5ad   : > { %v3860_v52 = vpop.f32.mrf.mxu0  ;;  %4271 = vmatpush2.msra.mxu1 %v14627_v19 }
 0x5ae   : > { %11386 = vmatprep.mubr.msk.f32.mxu1 %vm1315_vm3, %v3860_v52  ;;  %4272 = vmatprep.subr.mxu1 %v17649_v11 }
 0x5af   : > { %v3862_v34 = vpop.f32.mrf.mxu0  ;;  %4273 = vmatpush2.msra.mxu1 %v14633_v15 }
 0x5b0   : > { %4274 = vmatprep.subr.mxu1 %v17649_v11 }
 0x5b1   : > { %v3865_v38 = vpop.f32.mrf.mxu0  ;;  %4275 = vmatpush2.msra.mxu1 %v14638_v37 }
 0x5b2   : > { %11387 = vmatmul.mubr.msk.f32.gmra.mxu1 %vm1315_vm3, %v3865_v38  ;;  %4276 = vmatprep.subr.mxu1 %v17649_v11 }
 0x5b3   : > { %v3867_v52 = vpop.f32.mrf.mxu0  ;;  %4277 = vmatpush2.msra.mxu1 %v14644_v17 }
 0x5b4   : > { %4278 = vmatprep.subr.mxu1 %v17649_v11 }
 0x5b5   : > { %v3870_v34 = vpop.f32.mrf.mxu0  ;;  %4279 = vmatpush2.msra.mxu1 %v14649_v39 }
 0x5b6   : > { %11389 = vmatprep.mubr.msk.f32.mxu1 %vm1315_vm3, %v3870_v34  ;;  %4280 = vmatprep.subr.mxu1 %v17649_v11  ;;  %v14666_v34 = vld [vmem:[%s12739_s24 + $0x80] sm:$0xff]  ;;  %s16960_s24 = sand.u32 1, %s12426_s25  }
 0x5b7   : > { %v3872_v38 = vpop.f32.mrf.mxu0  ;;  %4281 = vmatpush2.msra.mxu1 %v14655_v48  ;;  %s17597_s23 = scalar_lea.vmem [#allocation17], %s16960_s24  ;;  %s779_s1 = scalar_lea.vmem [#allocation18], %s16960_s24 }
 0x5b8   : > { %4282 = vmatprep.subr.mxu1 %v17649_v11  ;;  %s9499_s21 = sshll.u32 %s779_s1, 4  ;;  %s9500_s21 = int_to_ptr.vmem [resolvable:$true] %s9499_s21 }
 0x5b9   : > { %v3875_v52 = vpop.f32.mrf.mxu0  ;;  %4283 = vmatpush2.msra.mxu1 %v14660_v2 }
 0x5ba   : > { %11390 = vmatmul.mubr.msk.f32.gmra.mxu1 %vm1315_vm3, %v3875_v52  ;;  %4284 = vmatprep.subr.mxu1 %v17649_v11 }
 0x5bb   : > { %v3877_v14 = vpop.f32.mrf.mxu0  ;;  %4285 = vmatpush2.msra.mxu1 %v14666_v34 }
 0x5bc   : > { %4700 = vmatprep.subr.mxu1 %v17649_v11  ;;  %v10214_v14 = vld [vmem:[%s17635_s4 + $0x7e8] sm:$0xff] }
 0x5bd   : > { %v3880_v38 = vpop.f32.mrf.mxu0 }
 0x5be   : > { %11392 = vmatprep.mubr.msk.f32.mxu1 %vm1315_vm3, %v3880_v38  ;;  %v10241_v38 = vld [vmem:[%s17635_s4 + $0x8c0] sm:$0xff] }
 0x5bf   : > { %v3882_v59 = vpop.f32.mrf.mxu0 }
 0x5c0   : > { %v10213_v59 = vld [vmem:[%s17635_s4 + $0x7e0] sm:$0xff] }
 0x5c1   : > { %v3885_v41 = vpop.f32.mrf.mxu0 }
 0x5c2   : > { %11393 = vmatmul.mubr.msk.f32.gmra.mxu1 %vm1315_vm3, %v3885_v41  ;;  %v10216_v41 = vld [vmem:[%s17635_s4 + $0x7f8] sm:$0xff] }
 0x5c3   : > { %v3887_v54 = vpop.f32.mrf.mxu0 }
 0x5c4   : > { %v10215_v54 = vld [vmem:[%s17635_s4 + $0x7f0] sm:$0xff] }
 0x5c5   : > { %v3890_v22 = vpop.f32.mrf.mxu0 }
 0x5c6   : > { %11395 = vmatprep.mubr.msk.f32.mxu1 %vm1315_vm3, %v3890_v22  ;;  %v10220_v22 = vld [vmem:[%s17635_s4 + $0x818] sm:$0xff] }
 0x5c7   : > { %v3892_v52 = vpop.f32.mrf.mxu0 }
 0x5c8   : > { %v10243_v52 = vld [vmem:[%s17635_s4 + $0x8d0] sm:$0xff] }
 0x5c9   : > { %v3895_v44 = vpop.f32.mrf.mxu0 }
 0x5ca   : > { %11396 = vmatmul.mubr.msk.f32.gmra.mxu1 %vm1315_vm3, %v3895_v44  ;;  %v10218_v44 = vld [vmem:[%s17635_s4 + $0x808] sm:$0xff] }
 0x5cb   : > { %v3897_v21 = vpop.f32.mrf.mxu0  ;;  %10250 = vmatprep.mubr.msk.f32.mxu1 %vm852_vm0, %v10214_v14 }
 0x5cc   : > { %v10217_v21 = vld [vmem:[%s17635_s4 + $0x800] sm:$0xff] }
 0x5ce   : > { %4287 = vmatmul.mubr.f32.vlgmr.msra.gmra.mxu1 %v10213_v59 }
 0x5cf   : > { %10251 = vmatprep.mubr.msk.f32.mxu1 %vm852_vm0, %v10216_v41  ;;  %4701 = vmatpush1.msra.mxu1 %v14533_v46  ;;  %v10219_v46 = vld [vmem:[%s17635_s4 + $0x810] sm:$0xff] }
 0x5d0   : > { %4702 = vmatprep.subr.mxu1 %v17649_v11 }
 0x5d1   : > { %4703 = vmatpush1.msra.mxu1 %v14538_v40  ;;  %v10222_v40 = vld [vmem:[%s17635_s4 + $0x828] sm:$0xff] }
 0x5d2   : > { %4292 = vmatmul.mubr.f32.gmra.mxu1 %v10215_v54  ;;  %4704 = vmatprep.subr.mxu1 %v17649_v11  ;;  %v10245_v54 = vld [vmem:[%s17635_s4 + $0x8e0] sm:$0xff] }
 0x5d3   : > { %10252 = vmatprep.mubr.msk.f32.mxu1 %vm852_vm0, %v10218_v44  ;;  %4705 = vmatpush1.msra.mxu1 %v14544_v50  ;;  %v10221_v50 = vld [vmem:[%s17635_s4 + $0x820] sm:$0xff]  ;;  %v10248_v44 = vld [vmem:[%s17635_s4 + $0x8f8] sm:$0xff] }
 0x5d4   : > { %4706 = vmatprep.subr.mxu1 %v17649_v11 }
 0x5d5   : > { %4707 = vmatpush1.msra.mxu1 %v14549_v62  ;;  %v10224_v62 = vld [vmem:[%s17635_s4 + $0x838] sm:$0xff] }
 0x5d6   : > { %4297 = vmatmul.mubr.f32.gmra.mxu1 %v10217_v21  ;;  %4708 = vmatprep.subr.mxu1 %v17649_v11  ;;  %v10247_v21 = vld [vmem:[%s17635_s4 + $0x8f0] sm:$0xff] }
 0x5d7   : > { %10253 = vmatprep.mubr.msk.f32.mxu1 %vm852_vm0, %v10220_v22  ;;  %4709 = vmatpush1.msra.mxu1 %v14555_v28  ;;  %v10223_v28 = vld [vmem:[%s17635_s4 + $0x830] sm:$0xff] }
 0x5d8   : > { %4710 = vmatprep.subr.mxu1 %v17649_v11 }
 0x5d9   : > { %4711 = vmatpush1.msra.mxu1 %v14560_v35  ;;  %v10226_v35 = vld [vmem:[%s17635_s4 + $0x848] sm:$0xff] }
 0x5da   : > { %4302 = vmatmul.mubr.f32.gmra.mxu1 %v10219_v46  ;;  %4712 = vmatprep.subr.mxu1 %v17649_v11  ;;  %v4378_v46 = vld [vmem:[#allocation2 + $0xe] sm:$0x3] }
 0x5db   : > { %10254 = vmatprep.mubr.msk.f32.mxu1 %vm852_vm0, %v10222_v40  ;;  %4713 = vmatpush1.msra.mxu1 %v14566_v33  ;;  %v10225_v33 = vld [vmem:[%s17635_s4 + $0x840] sm:$0xff] }
 0x5dc   : > { %4714 = vmatprep.subr.mxu1 %v17649_v11  ;;  %11398 = vmatprep.subr.msk.mxu0 %vm1370_vm2, %v4378_v46 }
 0x5dd   : > { %4715 = vmatpush1.msra.mxu1 %v14571_v36  ;;  %v10228_v36 = vld [vmem:[%s17635_s4 + $0x858] sm:$0xff]  ;;  %11399 = vmatpush3.msk.msra.mxu0 %vm1370_vm2, %v4378_v46 }
 0x5de   : > { %4307 = vmatmul.mubr.f32.gmra.mxu1 %v10221_v50  ;;  %4716 = vmatprep.subr.mxu1 %v17649_v11 }
 0x5df   : > { %10255 = vmatprep.mubr.msk.f32.mxu1 %vm852_vm0, %v10224_v62  ;;  %4717 = vmatpush1.msra.mxu1 %v14577_v60  ;;  %v10227_v60 = vld [vmem:[%s17635_s4 + $0x850] sm:$0xff]  ;;  %v10287_v62 = vld [vmem:[%s17635_s4 + $0x900] sm:$0xff] }
 0x5e0   : > { %4718 = vmatprep.subr.mxu1 %v17649_v11 }
 0x5e1   : > { %4719 = vmatpush1.msra.mxu1 %v14582_v0  ;;  %v10230_v0 = vld [vmem:[%s17635_s4 + $0x868] sm:$0xff] }
 0x5e2   : > { %4312 = vmatmul.mubr.f32.gmra.mxu1 %v10223_v28  ;;  %4720 = vmatprep.subr.mxu1 %v17649_v11  ;;  %v10290_v28 = vld [vmem:[%s17635_s4 + $0x918] sm:$0xff] }
 0x5e3   : > { %10256 = vmatprep.mubr.msk.f32.mxu1 %vm852_vm0, %v10226_v35  ;;  %4721 = vmatpush1.msra.mxu1 %v14588_v16  ;;  %v10229_v16 = vld [vmem:[%s17635_s4 + $0x860] sm:$0xff]  ;;  %v10289_v35 = vld [vmem:[%s17635_s4 + $0x910] sm:$0xff] }
 0x5e4   : > { %4722 = vmatprep.subr.mxu1 %v17649_v11 }
 0x5e5   : > { %4723 = vmatpush1.msra.mxu1 %v14593_v31  ;;  %v10232_v31 = vld [vmem:[%s17635_s4 + $0x878] sm:$0xff] }
 0x5e6   : > { %4317 = vmatmul.mubr.f32.gmra.mxu1 %v10225_v33  ;;  %4724 = vmatprep.subr.mxu1 %v17649_v11 }
 0x5e7   : > { %10257 = vmatprep.mubr.msk.f32.mxu1 %vm852_vm0, %v10228_v36  ;;  %4725 = vmatpush1.msra.mxu1 %v14599_v5  ;;  %v10231_v5 = vld [vmem:[%s17635_s4 + $0x870] sm:$0xff] }
 0x5e8   : > { %4726 = vmatprep.subr.mxu1 %v17649_v11 }
 0x5e9   : > { %4727 = vmatpush1.msra.mxu1 %v14604_v49  ;;  %v10234_v49 = vld [vmem:[%s17635_s4 + $0x888] sm:$0xff] }
 0x5ea   : > { %4322 = vmatmul.mubr.f32.gmra.mxu1 %v10227_v60  ;;  %4728 = vmatprep.subr.mxu1 %v17649_v11 }
 0x5eb   : > { %10258 = vmatprep.mubr.msk.f32.mxu1 %vm852_vm0, %v10230_v0  ;;  %4729 = vmatpush1.msra.mxu1 %v14610_v18  ;;  %v10238_v18 = vld [vmem:[%s17635_s4 + $0x8a8] sm:$0xff]  ;;  %v10291_v0 = vld [vmem:[%s17635_s4 + $0x920] sm:$0xff] }
 0x5ec   : > { %4730 = vmatprep.subr.mxu1 %v17649_v11 }
 0x5ed   : > { %4731 = vmatpush1.msra.mxu1 %v14615_v10  ;;  %v10233_v10 = vld [vmem:[%s17635_s4 + $0x880] sm:$0xff] }
 0x5ee   : > { %4327 = vmatmul.mubr.f32.gmra.mxu1 %v10229_v16  ;;  %4746 = vmatprep.subr.mxu1 %v17649_v11  ;;  %v10294_v16 = vld [vmem:[%s17635_s4 + $0x938] sm:$0xff] }
 0x5ef   : > { %10259 = vmatprep.mubr.msk.f32.mxu1 %vm852_vm0, %v10232_v31  ;;  %10323 = vmatpush2.msk.msra.mxu1 %vm907_vm1, %v14621_v43  ;;  %v10236_v43 = vld [vmem:[%s17635_s4 + $0x898] sm:$0xff]  ;;  %v10293_v31 = vld [vmem:[%s17635_s4 + $0x930] sm:$0xff] }
 0x5f0   : > { %4748 = vmatprep.subr.mxu1 %v17649_v11 }
 0x5f1   : > { %4749 = vmatpush2.msra.mxu1 %v14627_v19  ;;  %v10235_v19 = vld [vmem:[%s17635_s4 + $0x890] sm:$0xff] }
 0x5f2   : > { %4332 = vmatmul.mubr.f32.gmra.mxu1 %v10231_v5  ;;  %4750 = vmatprep.subr.mxu1 %v17649_v11 }
 0x5f3   : > { %10260 = vmatprep.mubr.msk.f32.mxu1 %vm852_vm0, %v10234_v49  ;;  %4751 = vmatpush2.msra.mxu1 %v14633_v15 }
 0x5f4   : > { %4752 = vmatprep.subr.mxu1 %v17649_v11 }
 0x5f5   : > { %4753 = vmatpush2.msra.mxu1 %v14638_v37  ;;  %v10237_v37 = vld [vmem:[%s17635_s4 + $0x8a0] sm:$0xff] }
 0x5f6   : > { %4337 = vmatmul.mubr.f32.gmra.mxu1 %v10233_v10  ;;  %4754 = vmatprep.subr.mxu1 %v17649_v11 }
 0x5f7   : > { %10261 = vmatprep.mubr.msk.f32.mxu1 %vm852_vm0, %v10236_v43  ;;  %4755 = vmatpush2.msra.mxu1 %v14644_v17  ;;  %v10240_v17 = vld [vmem:[%s17635_s4 + $0x8b8] sm:$0xff]  ;;  %v10295_v43 = vld [vmem:[%s17635_s4 + $0x940] sm:$0xff] }
 0x5f8   : > { %4756 = vmatprep.subr.mxu1 %v17649_v11 }
 0x5f9   : > { %4757 = vmatpush2.msra.mxu1 %v14649_v39  ;;  %v10239_v39 = vld [vmem:[%s17635_s4 + $0x8b0] sm:$0xff] }
 0x5fa   : > { %4342 = vmatmul.mubr.f32.gmra.mxu1 %v10235_v19  ;;  %4758 = vmatprep.subr.mxu1 %v17649_v11  ;;  %v10298_v19 = vld [vmem:[%s17635_s4 + $0x958] sm:$0xff] }
 0x5fb   : > { %10262 = vmatprep.mubr.msk.f32.mxu1 %vm852_vm0, %v10238_v18  ;;  %4759 = vmatpush2.msra.mxu1 %v14655_v48  ;;  %v10242_v48 = vld [vmem:[%s17635_s4 + $0x8c8] sm:$0xff]  ;;  %v10297_v18 = vld [vmem:[%s17635_s4 + $0x950] sm:$0xff] }
 0x5fc   : > { %4760 = vmatprep.subr.mxu1 %v17649_v11 }
 0x5fd   : > { %4761 = vmatpush2.msra.mxu1 %v14660_v2 }
 0x5fe   : > { %4347 = vmatmul.mubr.f32.gmra.mxu1 %v10237_v37  ;;  %4762 = vmatprep.subr.mxu1 %v17649_v11 }
 0x5ff   : > { %10263 = vmatprep.mubr.msk.f32.mxu1 %vm852_vm0, %v10240_v17  ;;  %4763 = vmatpush2.msra.mxu1 %v14666_v34  ;;  %v10244_v34 = vld [vmem:[%s17635_s4 + $0x8d8] sm:$0xff] }
 0x600   : > { %5375 = vmatprep.subr.mxu1 %v17649_v11 }
 0x602   : > { %v11344_v15 = vpop.f32.mrf.mxu1  ;;  %4352 = vmatmul.mubr.f32.gmra.mxu1 %v10239_v39 }
 0x603   : > { %v14827_v2 = vadd.f32 %v11344_v15, %v14442_v20  ;;  %10264 = vmatprep.mubr.msk.f32.mxu1 %vm852_vm0, %v10242_v48  ;;  %v10246_v20 = vld [vmem:[%s17635_s4 + $0x8e8] sm:$0xff]  ;;  %v10299_v48 = vld [vmem:[%s17635_s4 + $0x960] sm:$0xff]  ;;  %v10302_v15 = vld [vmem:[%s17635_s4 + $0x978] sm:$0xff] }
 0x604   : > { %v14840_v14 = vpop.f32.mrf.mxu1 }
 0x605   : > { %17662 = vst [vmem:[#allocation59_spill] sm:$0xff] %v14840_v14 }
 0x606   : > { %4357 = vmatmul.mubr.f32.gmra.mxu1 %v10241_v38  ;;  %v10301_v38 = vld [vmem:[%s17635_s4 + $0x970] sm:$0xff] }
 0x607   : > { %10265 = vmatprep.mubr.msk.f32.mxu1 %vm852_vm0, %v10244_v34 }
 0x60a   : > { %v11347_v59 = vpop.f32.mrf.mxu1  ;;  %4362 = vmatmul.mubr.f32.gmra.mxu1 %v10243_v52 }
 0x60b   : > { %v14846_v41 = vadd.f32 %v11347_v59, %v14461_v25  ;;  %10266 = vmatprep.mubr.msk.f32.mxu1 %vm852_vm0, %v10246_v20  ;;  %v10288_v25 = vld [vmem:[%s17635_s4 + $0x908] sm:$0xff]  ;;  %v10303_v59 = vld [vmem:[%s17635_s4 + $0x980] sm:$0xff] }
 0x60c   : > { %v14859_v22 = vpop.f32.mrf.mxu1 }
 0x60e   : > { %4367 = vmatmul.mubr.f32.gmra.mxu1 %v10245_v54  ;;  %v10306_v54 = vld [vmem:[%s17635_s4 + $0x998] sm:$0xff] }
 0x60f   : > { %10267 = vmatprep.mubr.msk.f32.mxu1 %vm852_vm0, %v10248_v44  ;;  %v10305_v44 = vld [vmem:[%s17635_s4 + $0x990] sm:$0xff] }
 0x612   : > { %v11350_v40 = vpop.f32.mrf.mxu1  ;;  %4372 = vmatmul.mubr.f32.gmra.mxu1 %v10247_v21 }
 0x613   : > { %v14867_v50 = vadd.f32 %v11350_v40, %v14478_v8  ;;  %10324 = vmatprep.mubr.msk.f32.mxu1 %vm852_vm0, %v10288_v25  ;;  %v10292_v8 = vld [vmem:[%s17635_s4 + $0x928] sm:$0xff]  ;;  %v10307_v40 = vld [vmem:[%s17635_s4 + $0x9a0] sm:$0xff] }
 0x614   : > { %v14880_v33 = vpop.f32.mrf.mxu1 }
 0x616   : > { %4765 = vmatmul.mubr.f32.vlgmr.msra.gmra.mxu1 %v10287_v62  ;;  %v10310_v62 = vld [vmem:[%s17635_s4 + $0x9b8] sm:$0xff] }
 0x617   : > { %10325 = vmatprep.mubr.msk.f32.mxu1 %vm852_vm0, %v10290_v28  ;;  %v10309_v28 = vld [vmem:[%s17635_s4 + $0x9b0] sm:$0xff] }
 0x61a   : > { %v11353_v36 = vpop.f32.mrf.mxu1  ;;  %4770 = vmatmul.mubr.f32.gmra.mxu1 %v10289_v35 }
 0x61b   : > { %v14886_v60 = vadd.f32 %v11353_v36, %v14483_v42  ;;  %10326 = vmatprep.mubr.msk.f32.mxu1 %vm852_vm0, %v10292_v8  ;;  %v10296_v42 = vld [vmem:[%s17635_s4 + $0x948] sm:$0xff] }
 0x61c   : > { %v14899_v5 = vpop.f32.mrf.mxu1 }
 0x61e   : > { %4775 = vmatmul.mubr.f32.gmra.mxu1 %v10291_v0  ;;  %v10311_v0 = vld [vmem:[%s17635_s4 + $0x9c0] sm:$0xff] }
 0x61f   : > { %10327 = vmatprep.mubr.msk.f32.mxu1 %vm852_vm0, %v10294_v16  ;;  %v10314_v16 = vld [vmem:[%s17635_s4 + $0x9d8] sm:$0xff] }
 0x622   : > { %v11356_v49 = vpop.f32.mrf.mxu1  ;;  %4780 = vmatmul.mubr.f32.gmra.mxu1 %v10293_v31  ;;  %v10313_v31 = vld [vmem:[%s17635_s4 + $0x9d0] sm:$0xff] }
 0x623   : > { %v14905_v10 = vadd.f32 %v11356_v49, %v14488_v6  ;;  %10328 = vmatprep.mubr.msk.f32.mxu1 %vm852_vm0, %v10296_v42  ;;  %v10300_v6 = vld [vmem:[%s17635_s4 + $0x968] sm:$0xff] }
 0x624   : > { %v14918_v37 = vpop.f32.mrf.mxu1 }
 0x626   : > { %4785 = vmatmul.mubr.f32.gmra.mxu1 %v10295_v43 }
 0x627   : > { %10329 = vmatprep.mubr.msk.f32.mxu1 %vm852_vm0, %v10298_v19  ;;  %v10315_v19 = vld [vmem:[%s17635_s4 + $0x9e0] sm:$0xff] }
 0x62a   : > { %v11359_v17 = vpop.f32.mrf.mxu1  ;;  %4790 = vmatmul.mubr.f32.gmra.mxu1 %v10297_v18  ;;  %v10318_v18 = vld [vmem:[%s17635_s4 + $0x9f8] sm:$0xff] }
 0x62b   : > { %v14924_v39 = vadd.f32 %v11359_v17, %v14493_v32  ;;  %10330 = vmatprep.mubr.msk.f32.mxu1 %vm852_vm0, %v10300_v6  ;;  %v10304_v32 = vld [vmem:[%s17635_s4 + $0x988] sm:$0xff]  ;;  %v10317_v6 = vld [vmem:[%s17635_s4 + $0x9f0] sm:$0xff] }
 0x62c   : > { %v14937_v34 = vpop.f32.mrf.mxu1 }
 0x62e   : > { %4795 = vmatmul.mubr.f32.gmra.mxu1 %v10299_v48 }
 0x62f   : > { %10331 = vmatprep.mubr.msk.f32.mxu1 %vm852_vm0, %v10302_v15 }
 0x632   : > { %v11362_v52 = vpop.f32.mrf.mxu1  ;;  %4800 = vmatmul.mubr.f32.gmra.mxu1 %v10301_v38  ;;  %v10319_v38 = vld [vmem:[%s17635_s4 + $0xa00] sm:$0xff] }
 0x633   : > { %v14943_v20 = vadd.f32 %v11362_v52, %v14498_v56  ;;  %10332 = vmatprep.mubr.msk.f32.mxu1 %vm852_vm0, %v10304_v32  ;;  %v10308_v56 = vld [vmem:[%s17635_s4 + $0x9a8] sm:$0xff]  ;;  %v10322_v32 = vld [vmem:[%s17635_s4 + $0xa18] sm:$0xff]  ;;  %v10321_v52 = vld [vmem:[%s17635_s4 + $0xa10] sm:$0xff] }
 0x634   : > { %v14956_v21 = vpop.f32.mrf.mxu1 }
 0x636   : > { %4805 = vmatmul.mubr.f32.gmra.mxu1 %v10303_v59 }
 0x637   : > { %10333 = vmatprep.mubr.msk.f32.mxu1 %vm852_vm0, %v10306_v54 }
 0x63a   : > { %v11365_v25 = vpop.f32.mrf.mxu1  ;;  %4810 = vmatmul.mubr.f32.gmra.mxu1 %v10305_v44 }
 0x63b   : > { %v3650_v46 = vadd.f32 %v11365_v25, %v14502_v45  ;;  %10334 = vmatprep.mubr.msk.f32.mxu1 %vm852_vm0, %v10308_v56  ;;  %v10312_v45 = vld [vmem:[%s17635_s4 + $0x9c8] sm:$0xff] }
 0x63c   : > { %v14973_v35 = vpop.f32.mrf.mxu1 }
 0x63e   : > { %4815 = vmatmul.mubr.f32.gmra.mxu1 %v10307_v40 }
 0x63f   : > { %10335 = vmatprep.mubr.msk.f32.mxu1 %vm852_vm0, %v10310_v62 }
 0x642   : > { %v11368_v8 = vpop.f32.mrf.mxu1  ;;  %4820 = vmatmul.mubr.f32.gmra.mxu1 %v10309_v28 }
 0x643   : > { %v3652_v36 = vadd.f32 %v11368_v8, %v14506_v30  ;;  %10336 = vmatprep.mubr.msk.f32.mxu1 %vm852_vm0, %v10312_v45  ;;  %v10316_v30 = vld [vmem:[%s17635_s4 + $0x9e8] sm:$0xff] }
 0x644   : > { %v14990_v42 = vpop.f32.mrf.mxu1 }
 0x645   : > { %17663 = vst [vmem:[#allocation60_spill] sm:$0xff] %v14990_v42 }
 0x646   : > { %4825 = vmatmul.mubr.f32.gmra.mxu1 %v10311_v0 }
 0x647   : > { %10337 = vmatprep.mubr.msk.f32.mxu1 %vm852_vm0, %v10314_v16 }
 0x64a   : > { %v11373_v49 = vpop.f32.mrf.mxu1  ;;  %4830 = vmatmul.mubr.f32.gmra.mxu1 %v10313_v31 }
 0x64b   : > { %v14996_v43 = vadd.f32 %v11373_v49, %v14827_v2  ;;  %10338 = vmatprep.mubr.msk.f32.mxu1 %vm852_vm0, %v10316_v30  ;;  %v10320_v2 = vld [vmem:[%s17635_s4 + $0xa08] sm:$0xff]  ;;  %s12298_s4 = scalar_lea.vmem %s9500_s21, 16 }
 0x64c   : > { %v15009_v17 = vpop.f32.mrf.mxu1  ;;  %p12299_p1 = scmp.ne.s32.totalorder %s9500_s21, %s12298_s4 }
 0x64d   : > { %17664 = vst [vmem:[#allocation61_spill] sm:$0xff] %v15009_v17 }
 0x64e   : > { %4835 = vmatmul.mubr.f32.gmra.mxu1 %v10315_v19  ;;  %p12300_p9 = pnand %p12299_p1, %p17728_p2 }
 0x64f   : > { %10339 = vmatprep.mubr.msk.f32.mxu1 %vm852_vm0, %v10318_v18 }
 0x650   : > { %p12301_p3 = pneg %p12300_p9 }
 0x652   : > { %v11376_v48 = vpop.f32.mrf.mxu1  ;;  %4840 = vmatmul.mubr.f32.gmra.mxu1 %v10317_v6 }
 0x653   : > { %v15015_v15 = vadd.f32 %v11376_v48, %v14846_v41  ;;  %10340 = vmatprep.mubr.msk.f32.mxu1 %vm852_vm0, %v10320_v2  ;;  %v4856_v41 = vld [vmem:[#allocation2 + $0x10] sm:$0x3] }
 0x654   : > { %v15028_v59 = vpop.f32.mrf.mxu1  ;;  %11427 = vmatprep.subr.msk.mxu0 %vm1370_vm2, %v4856_v41 }
 0x655   : > { %17665 = vst [vmem:[#allocation62_spill] sm:$0xff] %v15028_v59 }
 0x656   : > { %4845 = vmatmul.mubr.f32.gmra.mxu1 %v10319_v38 }
 0x657   : > { %10341 = vmatprep.mubr.msk.f32.mxu1 %vm852_vm0, %v10322_v32 }
 0x65a   : > { %v11379_v54 = vpop.f32.mrf.mxu1  ;;  %4850 = vmatmul.mubr.f32.gmra.mxu1 %v10321_v52 }
 0x65b   : > { %v15032_v44 = vadd.f32 %v11379_v54, %v14867_v50 }
 0x65c   : > { %v15034_v56 = vpop.f32.mrf.mxu1 }
 0x662   : > { %v11382_v25 = vpop.f32.mrf.mxu1 }
 0x663   : > { %v15037_v40 = vadd.f32 %v11382_v25, %v14886_v60 }
 0x664   : > { %v15039_v62 = vpop.f32.mrf.mxu1 }
 0x66a   : > { %v11385_v28 = vpop.f32.mrf.mxu1 }
 0x66b   : > { %v15042_v45 = vadd.f32 %v11385_v28, %v14905_v10 }
 0x66c   : > { %v15044_v8 = vpop.f32.mrf.mxu1 }
 0x672   : > { %v11388_v0 = vpop.f32.mrf.mxu1 }
 0x673   : > { %v15047_v16 = vadd.f32 %v11388_v0, %v14924_v39 }
 0x674   : > { %v15049_v50 = vpop.f32.mrf.mxu1 }
 0x67a   : > { %v11391_v31 = vpop.f32.mrf.mxu1 }
 0x67b   : > { %v15052_v30 = vadd.f32 %v11391_v31, %v14943_v20 }
 0x67c   : > { %v15054_v60 = vpop.f32.mrf.mxu1 }
 0x682   : > { %v11394_v49 = vpop.f32.mrf.mxu1 }
 0x683   : > { %v15056_v19 = vadd.f32 %v11394_v49, %v3650_v46 }
 0x684   : > { %v15058_v18 = vpop.f32.mrf.mxu1 }
 0x68a   : > { %v11397_v10 = vpop.f32.mrf.mxu1 }
 0x68b   : > { %v15060_v6 = vadd.f32 %v11397_v10, %v3652_v36 }
 0x68c   : > { %v15062_v2 = vpop.f32.mrf.mxu1 }
 0x68d   : > { %17666 = vst [vmem:[#allocation63_spill] sm:$0xff] %v15060_v6  ;;  %17667 = vst [vmem:[#allocation64_spill] sm:$0xff] %v15062_v2 }
 0x68e   : > { %v4288_v39 = vpop.f32.mrf.mxu1 }
 0x68f   : > { %11400 = vmatprep.mubr.msk.f32.mxu0 %vm1315_vm3, %v4288_v39 }
 0x690   : > { %v4290_v48 = vpop.f32.mrf.mxu1 }
 0x692   : > { %v4293_v38 = vpop.f32.mrf.mxu1 }
 0x693   : > { %11401 = vmatmul.mubr.msk.f32.vlgmr.msra.gmra.mxu0 %vm1315_vm3, %v4293_v38 }
 0x694   : > { %v4295_v20 = vpop.f32.mrf.mxu1  ;;  %11428 = vmatpush3.msk.msra.mxu0 %vm1370_vm2, %v4856_v41 }
 0x695   : > { %5138 = vmatprep.subr.mxu0 %v17649_v11 }
 0x696   : > { %v4298_v46 = vpop.f32.mrf.mxu1 }
 0x697   : > { %11403 = vmatprep.mubr.msk.f32.mxu0 %vm1315_vm3, %v4298_v46 }
 0x698   : > { %v4300_v32 = vpop.f32.mrf.mxu1 }
 0x69a   : > { %v4303_v36 = vpop.f32.mrf.mxu1 }
 0x69b   : > { %11404 = vmatmul.mubr.msk.f32.gmra.mxu0 %vm1315_vm3, %v4303_v36 }
 0x69c   : > { %v4305_v52 = vpop.f32.mrf.mxu1 }
 0x69e   : > { %v4308_v54 = vpop.f32.mrf.mxu1 }
 0x69f   : > { %11406 = vmatprep.mubr.msk.f32.mxu0 %vm1315_vm3, %v4308_v54 }
 0x6a0   : > { %v4310_v25 = vpop.f32.mrf.mxu1 }
 0x6a2   : > { %v4313_v28 = vpop.f32.mrf.mxu1 }
 0x6a3   : > { %11407 = vmatmul.mubr.msk.f32.gmra.mxu0 %vm1315_vm3, %v4313_v28 }
 0x6a4   : > { %v4315_v0 = vpop.f32.mrf.mxu1 }
 0x6a6   : > { %v4318_v31 = vpop.f32.mrf.mxu1 }
 0x6a7   : > { %11409 = vmatprep.mubr.msk.f32.mxu0 %vm1315_vm3, %v4318_v31 }
 0x6a8   : > { %v4320_v41 = vpop.f32.mrf.mxu1 }
 0x6aa   : > { %v4323_v49 = vpop.f32.mrf.mxu1 }
 0x6ab   : > { %11410 = vmatmul.mubr.msk.f32.gmra.mxu0 %vm1315_vm3, %v4323_v49 }
 0x6ac   : > { %v4325_v10 = vpop.f32.mrf.mxu1 }
 0x6ae   : > { %v4328_v39 = vpop.f32.mrf.mxu1 }
 0x6af   : > { %11412 = vmatprep.mubr.msk.f32.mxu0 %vm1315_vm3, %v4328_v39 }
 0x6b0   : > { %v4330_v48 = vpop.f32.mrf.mxu1 }
 0x6b2   : > { %v4333_v38 = vpop.f32.mrf.mxu1 }
 0x6b3   : > { %11413 = vmatmul.mubr.msk.f32.gmra.mxu0 %vm1315_vm3, %v4333_v38 }
 0x6b4   : > { %v4335_v20 = vpop.f32.mrf.mxu1 }
 0x6b6   : > { %v4338_v46 = vpop.f32.mrf.mxu1 }
 0x6b7   : > { %11415 = vmatprep.mubr.msk.f32.mxu0 %vm1315_vm3, %v4338_v46 }
 0x6b8   : > { %v4340_v32 = vpop.f32.mrf.mxu1 }
 0x6ba   : > { %v4343_v36 = vpop.f32.mrf.mxu1 }
 0x6bb   : > { %11416 = vmatmul.mubr.msk.f32.gmra.mxu0 %vm1315_vm3, %v4343_v36 }
 0x6bc   : > { %v4345_v52 = vpop.f32.mrf.mxu1 }
 0x6be   : > { %v4348_v54 = vpop.f32.mrf.mxu1 }
 0x6bf   : > { %11418 = vmatprep.mubr.msk.f32.mxu0 %vm1315_vm3, %v4348_v54 }
 0x6c0   : > { %v4350_v25 = vpop.f32.mrf.mxu1 }
 0x6c2   : > { %v4353_v28 = vpop.f32.mrf.mxu1 }
 0x6c3   : > { %11419 = vmatmul.mubr.msk.f32.gmra.mxu0 %vm1315_vm3, %v4353_v28 }
 0x6c4   : > { %v4355_v0 = vpop.f32.mrf.mxu1 }
 0x6c6   : > { %v4358_v31 = vpop.f32.mrf.mxu1 }
 0x6c7   : > { %11421 = vmatprep.mubr.msk.f32.mxu0 %vm1315_vm3, %v4358_v31 }
 0x6c8   : > { %v4360_v41 = vpop.f32.mrf.mxu1 }
 0x6ca   : > { %v4363_v49 = vpop.f32.mrf.mxu1 }
 0x6cb   : > { %11422 = vmatmul.mubr.msk.f32.gmra.mxu0 %vm1315_vm3, %v4363_v49 }
 0x6cc   : > { %v4365_v10 = vpop.f32.mrf.mxu1 }
 0x6ce   : > { %v4368_v39 = vpop.f32.mrf.mxu1 }
 0x6cf   : > { %11424 = vmatprep.mubr.msk.f32.mxu0 %vm1315_vm3, %v4368_v39 }
 0x6d0   : > { %v4370_v48 = vpop.f32.mrf.mxu1 }
 0x6d2   : > { %v4373_v38 = vpop.f32.mrf.mxu1 }
 0x6d3   : > { %11425 = vmatmul.mubr.msk.f32.gmra.mxu0 %vm1315_vm3, %v4373_v38 }
 0x6d4   : > { %v4375_v20 = vpop.f32.mrf.mxu1 }
 0x6d6   : > { %v4766_v46 = vpop.f32.mrf.mxu1 }
 0x6d7   : > { %11429 = vmatprep.mubr.msk.f32.mxu0 %vm1315_vm3, %v4766_v46 }
 0x6d8   : > { %v4768_v32 = vpop.f32.mrf.mxu1 }
 0x6da   : > { %v4771_v36 = vpop.f32.mrf.mxu1 }
 0x6db   : > { %11430 = vmatmul.mubr.msk.f32.vlgmr.msra.gmra.mxu0 %vm1315_vm3, %v4771_v36 }
 0x6dc   : > { %v4773_v52 = vpop.f32.mrf.mxu1 }
 0x6de   : > { %v4776_v54 = vpop.f32.mrf.mxu1 }
 0x6df   : > { %11432 = vmatprep.mubr.msk.f32.mxu0 %vm1315_vm3, %v4776_v54 }
 0x6e0   : > { %v4778_v25 = vpop.f32.mrf.mxu1 }
 0x6e2   : > { %v4781_v28 = vpop.f32.mrf.mxu1 }
 0x6e3   : > { %11433 = vmatmul.mubr.msk.f32.gmra.mxu0 %vm1315_vm3, %v4781_v28 }
 0x6e4   : > { %v4783_v0 = vpop.f32.mrf.mxu1 }
 0x6e6   : > { %v4786_v31 = vpop.f32.mrf.mxu1 }
 0x6e7   : > { %11435 = vmatprep.mubr.msk.f32.mxu0 %vm1315_vm3, %v4786_v31 }
 0x6e8   : > { %v4788_v41 = vpop.f32.mrf.mxu1 }
 0x6ea   : > { %v4791_v49 = vpop.f32.mrf.mxu1 }
 0x6eb   : > { %11436 = vmatmul.mubr.msk.f32.gmra.mxu0 %vm1315_vm3, %v4791_v49 }
 0x6ec   : > { %v4793_v10 = vpop.f32.mrf.mxu1 }
 0x6ee   : > { %v4796_v39 = vpop.f32.mrf.mxu1 }
 0x6ef   : > { %11438 = vmatprep.mubr.msk.f32.mxu0 %vm1315_vm3, %v4796_v39 }
 0x6f0   : > { %v4798_v48 = vpop.f32.mrf.mxu1 }
 0x6f2   : > { %v4801_v38 = vpop.f32.mrf.mxu1 }
 0x6f3   : > { %11439 = vmatmul.mubr.msk.f32.gmra.mxu0 %vm1315_vm3, %v4801_v38 }
 0x6f4   : > { %v4803_v20 = vpop.f32.mrf.mxu1 }
 0x6f6   : > { %v4806_v46 = vpop.f32.mrf.mxu1 }
 0x6f7   : > { %11441 = vmatprep.mubr.msk.f32.mxu0 %vm1315_vm3, %v4806_v46 }
 0x6f8   : > { %v4808_v32 = vpop.f32.mrf.mxu1 }
 0x6fa   : > { %v4811_v36 = vpop.f32.mrf.mxu1 }
 0x6fb   : > { %11442 = vmatmul.mubr.msk.f32.gmra.mxu0 %vm1315_vm3, %v4811_v36 }
 0x6fc   : > { %v4813_v52 = vpop.f32.mrf.mxu1 }
 0x6fe   : > { %v4816_v54 = vpop.f32.mrf.mxu1 }
 0x6ff   : > { %11444 = vmatprep.mubr.msk.f32.mxu0 %vm1315_vm3, %v4816_v54 }
 0x700   : > { %v4818_v25 = vpop.f32.mrf.mxu1 }
 0x702   : > { %v4821_v28 = vpop.f32.mrf.mxu1 }
 0x703   : > { %11445 = vmatmul.mubr.msk.f32.gmra.mxu0 %vm1315_vm3, %v4821_v28 }
 0x704   : > { %v4823_v0 = vpop.f32.mrf.mxu1 }
 0x706   : > { %v4826_v31 = vpop.f32.mrf.mxu1 }
 0x707   : > { %11447 = vmatprep.mubr.msk.f32.mxu0 %vm1315_vm3, %v4826_v31 }
 0x708   : > { %v4828_v41 = vpop.f32.mrf.mxu1 }
 0x70a   : > { %v4831_v49 = vpop.f32.mrf.mxu1 }
 0x70b   : > { %11448 = vmatmul.mubr.msk.f32.gmra.mxu0 %vm1315_vm3, %v4831_v49 }
 0x70c   : > { %v4833_v10 = vpop.f32.mrf.mxu1 }
 0x70e   : > { %v4836_v39 = vpop.f32.mrf.mxu1 }
 0x70f   : > { %11450 = vmatprep.mubr.msk.f32.mxu0 %vm1315_vm3, %v4836_v39 }
 0x710   : > { %v4838_v48 = vpop.f32.mrf.mxu1 }
 0x712   : > { %v4841_v38 = vpop.f32.mrf.mxu1 }
 0x713   : > { %11451 = vmatmul.mubr.msk.f32.gmra.mxu0 %vm1315_vm3, %v4841_v38 }
 0x714   : > { %v4843_v20 = vpop.f32.mrf.mxu1 }
 0x716   : > { %v4846_v46 = vpop.f32.mrf.mxu1 }
 0x717   : > { %11453 = vmatprep.mubr.msk.f32.mxu0 %vm1315_vm3, %v4846_v46 }
 0x718   : > { %v4848_v32 = vpop.f32.mrf.mxu1 }
 0x71a   : > { %v4851_v36 = vpop.f32.mrf.mxu1 }
 0x71b   : > { %11454 = vmatmul.mubr.msk.f32.gmra.mxu0 %vm1315_vm3, %v4851_v36 }
 0x71c   : > { %v4853_v52 = vpop.f32.mrf.mxu1 }
 0x753   : > { %v11402_v54 = vpop.f32.mrf.mxu0 }
 0x754   : > { %v15103_v25 = vadd.f32 %v11402_v54, %v14996_v43  ;;  %v5113_v43 = vld [vmem:[%s17673_s26 + $0x8] sm:$0xff]  ;;  %s12302_s26 = sshll.u32 %s12457_s3, 4  ;;  %s12303_s26 = int_to_ptr.vmem [resolvable:$false] %s12302_s26 }
 0x755   : > { %v15105_v28 = vpop.f32.mrf.mxu0  ;;  %10362 = vmatprep.mubr.msk.f32.mxu0 %vm5122_vm4, %v5113_v43  ;;  %v10383_v54 = vld [vmem:[%s17674_s30 + $0xa8] sm:$0xff]  ;;  %s12304_s7 = scalar_lea.vmem %s12303_s26, 32  ;;  %p12305_p13 = scmp.lt.s32.totalorder %s9500_s21, %s12303_s26 }
 0x756   : > { %17668 = vst [vmem:[#allocation65_spill] sm:$0xff] %v15103_v25  ;;  %17669 = vst [vmem:[#allocation66_spill] sm:$0xff] %v15105_v28  ;;  %10392 = vmatprep.mubr.msk.f32.mxu1 %vm5122_vm4, %v10383_v54  ;;  %p12306_p5 = scmp.lt.s32.totalorder %s12304_s7, %s12298_s4 }
 0x758   : > { %p12307_p6 = por %p12306_p5, %p12305_p13 }
 0x75a   : > { %p12308_p10 = pnand %p12307_p6, %p12301_p3 }
 0x75b   : > { %v11405_v0 = vpop.f32.mrf.mxu0 }
 0x75c   : > { %v15108_v31 = vadd.f32 %v11405_v0, %v15015_v15 }
 0x75d   : > { %v15110_v41 = vpop.f32.mrf.mxu0 }
 0x75e   : > { %17670 = vst [vmem:[#allocation67_spill] sm:$0xff] %v15108_v31  ;;  %17671 = vst [vmem:[#allocation68_spill] sm:$0xff] %v15110_v41 }
 0x763   : > { %v11408_v49 = vpop.f32.mrf.mxu0 }
 0x764   : > { %v15113_v10 = vadd.f32 %v11408_v49, %v15032_v44 }
 0x765   : > { %v15115_v39 = vpop.f32.mrf.mxu0 }
 0x766   : > { %17672 = vst [vmem:[#allocation69_spill] sm:$0xff] %v15113_v10 }
 0x76b   : > { %v11411_v48 = vpop.f32.mrf.mxu0 }
 0x76c   : > { %v15118_v38 = vadd.f32 %v11411_v48, %v15037_v40 }
 0x76d   : > { %v15124_v15 = vpop.f32.mrf.mxu0 }
 0x773   : > { %v15126_v20 = vpop.f32.mrf.mxu0 }
 0x775   : > { %v15128_v46 = vpop.f32.mrf.mxu0 }
 0x77b   : > { %v11417_v44 = vpop.f32.mrf.mxu0 }
 0x77d   : > { %v15130_v32 = vpop.f32.mrf.mxu0 }
 0x783   : > { %v11420_v36 = vpop.f32.mrf.mxu0 }
 0x785   : > { %v4562_v52 = vpop.f32.mrf.mxu0 }
 0x78b   : > { %v11423_v40 = vpop.f32.mrf.mxu0 }
 0x78d   : > { %v4572_v0 = vpop.f32.mrf.mxu0 }
 0x793   : > { %v15136_v49 = vpop.f32.mrf.mxu0 }
 0x794   : > { %17675 = vst [vmem:[#allocation70_spill] sm:$0xff] %v15136_v49 }
 0x795   : > { %v15138_v48 = vpop.f32.mrf.mxu0 }
 0x796   : > { %17676 = vst [vmem:[#allocation71_spill] sm:$0xff] %v15138_v48 }
 0x79b   : > { %v15140_v43 = vpop.f32.mrf.mxu0 }
 0x79c   : > { %17677 = vst [vmem:[#allocation72_spill] sm:$0xff] %v15140_v43  ;;  %v1713_v43 = vadd.f32 %v13518_v4, %v13522_v9  ;;  %v1693_v9 = vadd.f32 %v13502_v55, %v13512_v29  ;;  %v1683_v29 = vadd.f32 %v13494_v47, %v13506_v61  ;;  %v4602_v47 = vadd.f32 %v11417_v44, %v15047_v16 }
 0x79d   : > { %v15142_v6 = vpop.f32.mrf.mxu0 }
 0x79e   : > { %17678 = vst [vmem:[#allocation73_spill] sm:$0xff] %v15142_v6  ;;  %v1723_v6 = vadd.f32 %v13526_v12, %v13528_v13  ;;  %v2213_v41 = vadd.f32 %v14020_v58, %v1713_v43 }
 0x7a3   : > { %v15144_v2 = vpop.f32.mrf.mxu0 }
 0x7a4   : > { %17679 = vst [vmem:[#allocation74_spill] sm:$0xff] %v15144_v2 }
 0x7a5   : > { %v15146_v25 = vpop.f32.mrf.mxu0 }
 0x7a6   : > { %17680 = vst [vmem:[#allocation75_spill] sm:$0xff] %v15146_v25  ;;  %v2215_v25 = vadd.f32 %v14025_v63, %v1723_v6 }
 0x7a8   : > { %v2693_v14 = vadd.f32 %v14419_v26, %v2215_v25  ;;  %v17684_v25 = vld [vmem:[#allocation45_spill] sm:$0xff] }
 0x7aa   : > { %v3171_v10 = vadd.f32 %v14504_v51, %v2693_v14  ;;  %v4604_v14 = vadd.f32 %v11420_v36, %v15052_v30  ;;  %v2207_v30 = vadd.f32 %v17684_v25, %v1683_v29  ;;  %v17687_v36 = vld [vmem:[#allocation36_spill] sm:$0xff] }
 0x7ab   : > { %v15148_v28 = vpop.f32.mrf.mxu0 }
 0x7ac   : > { %17681 = vst [vmem:[#allocation76_spill] sm:$0xff] %v15148_v28  ;;  %v2691_v28 = vadd.f32 %v14402_v57, %v2213_v41  ;;  %v3649_v4 = vadd.f32 %v14973_v35, %v3171_v10  ;;  %v2209_v57 = vadd.f32 %v14010_v23, %v1693_v9 }
 0x7ad   : > { %v15150_v42 = vpop.f32.mrf.mxu0 }
 0x7ae   : > { %17682 = vst [vmem:[#allocation77_spill] sm:$0xff] %v15150_v42  ;;  %v1703_v42 = vadd.f32 %v13510_v27, %v13516_v3  ;;  %v3169_v13 = vadd.f32 %v14500_v7, %v2691_v28  ;;  %v4127_v27 = vadd.f32 %v15058_v18, %v3649_v4  ;;  %v4606_v3 = vadd.f32 %v11423_v40, %v15056_v19  ;;  %v15188_v18 = vld [vmem:[#allocation5] ss:$0 sm:$0xff]  ;;  %v17685_v28 = vld [vmem:[#allocation57_spill] sm:$0xff]  ;;  %v17690_v4 = vld [vmem:[#allocation56_spill] sm:$0xff] }
 0x7af   : > { %v17688_v40 = vld [vmem:[#allocation50_spill] sm:$0xff] }
 0x7b0   : > { %v2211_v12 = vadd.f32 %v14015_v53, %v1703_v42  ;;  %v3647_v26 = vadd.f32 %v14956_v21, %v3169_v13  ;;  %v4605_v35 = vadd.f32 %v4572_v0, %v4127_v27  ;;  %v2685_v0 = vadd.f32 %v17688_v40, %v2207_v30  ;;  %v17702_v30 = vld [vmem:[#allocation41_spill] sm:$0xff] }
 0x7b2   : > { %v2689_v58 = vadd.f32 %v14383_v1, %v2211_v12  ;;  %v4125_v7 = vadd.f32 %v15054_v60, %v3647_v26  ;;  %v17683_v1 = vld [vmem:[#allocation51_spill] sm:$0xff]  ;;  %v17689_v12 = vld [vmem:[#allocation44_spill] sm:$0xff]  ;;  %v3163_v9 = vadd.f32 %v17690_v4, %v2685_v0  ;;  %v17707_v0 = vld [vmem:[#allocation53_spill] sm:$0xff] }
 0x7b3   : > { %v15152_v17 = vpop.f32.mrf.mxu0  ;;  %v2687_v21 = vadd.f32 %v17683_v1, %v2209_v57  ;;  %v17692_v26 = vld [vmem:[#allocation35_spill] sm:$0xff]  ;;  %v17698_v1 = vld [vmem:[#allocation48_spill] sm:$0xff] }
 0x7b4   : > { %v3167_v53 = vadd.f32 %v14495_v24, %v2689_v58  ;;  %v4603_v23 = vadd.f32 %v4562_v52, %v4125_v7  ;;  %v3641_v57 = vadd.f32 %v14899_v5, %v3163_v9  ;;  %v17695_v7 = vld [vmem:[#allocation55_spill] sm:$0xff] }
 0x7b5   : > { %v15154_v54 = vpop.f32.mrf.mxu0  ;;  %v3165_v41 = vadd.f32 %v17685_v28, %v2687_v21  ;;  %v17711_v9 = vld [vmem:[#allocation59_spill] sm:$0xff] }
 0x7b6   : > { %v3645_v42 = vadd.f32 %v14937_v34, %v3167_v53  ;;  %v17694_v53 = vld [vmem:[#allocation43_spill] sm:$0xff]  ;;  %v4119_v5 = vadd.f32 %v15039_v62, %v3641_v57 }
 0x7b7   : > { %v3643_v43 = vadd.f32 %v14918_v37, %v3165_v41  ;;  %v17703_v41 = vld [vmem:[#allocation47_spill] sm:$0xff] }
 0x7b8   : > { %v4123_v10 = vadd.f32 %v15049_v50, %v3645_v42  ;;  %v4597_v62 = vadd.f32 %v15124_v15, %v4119_v5 }
 0x7b9   : > { %v4121_v37 = vadd.f32 %v15044_v8, %v3643_v43  ;;  %v17708_v43 = vld [vmem:[#allocation62_spill] sm:$0xff] }
 0x7ba   : > { %v4601_v16 = vadd.f32 %v15130_v32, %v4123_v10  ;;  %v4600_v32 = vadd.f32 %v15126_v20, %v15042_v45  ;;  %v5075_v25 = vadd.f32 %v15154_v54, %v4597_v62  ;;  %v17704_v54 = vld [vmem:[#allocation69_spill] sm:$0xff]  ;;  %v17722_v62 = vld [vmem:[#allocation64_spill] sm:$0xff] }
 0x7bb   : > { %v15156_v31 = vpop.f32.mrf.mxu0  ;;  %v4599_v45 = vadd.f32 %v15128_v46, %v4121_v37 }
 0x7bd   : > { %v15158_v49 = vpop.f32.mrf.mxu0 }
 0x7be   : > { %v5077_v46 = vadd.f32 %v15158_v49, %v4599_v45  ;;  %v5076_v49 = vadd.f32 %v15152_v17, %v15118_v38  ;;  %v17701_v38 = vld [vmem:[#allocation40_spill] sm:$0xff]  ;;  %v17716_v45 = vld [vmem:[#allocation61_spill] sm:$0xff] }
 0x7bf   : > { %v1733_v28 = vadd.f32 %v17702_v30, %v17701_v38  ;;  %v17726_v30 = vld [vmem:[#allocation71_spill] sm:$0xff] }
 0x7c0   : > { %v15271_v17 = vadd.f32 %v15188_v18, %v5077_v46 }
 0x7c3   : > { %v11446_v48 = vpop.f32.mrf.mxu0 }
 0x7c4   : > { %v5080_v50 = vadd.f32 %v11446_v48, %v4602_v47 }
 0x7c5   : > { %v5030_v2 = vpop.f32.mrf.mxu0 }
 0x7c6   : > { %v5079_v48 = vadd.f32 %v5030_v2, %v4601_v16  ;;  %v5078_v2 = vadd.f32 %v15156_v31, %v4600_v32  ;;  %v15235_v20 = vadd.f32 %v15188_v18, %v5080_v50  ;;  %v17709_v16 = vld [vmem:[#allocation77_spill] sm:$0xff]  ;;  %v17712_v32 = vld [vmem:[#allocation68_spill] sm:$0xff] }
 0x7c8   : > { %v15246_v31 = vadd.f32 %v15188_v18, %v5079_v48 }
 0x7cb   : > { %v11449_v59 = vpop.f32.mrf.mxu0 }
 0x7cc   : > { %v5082_v6 = vadd.f32 %v11449_v59, %v4604_v14  ;;  %v17686_v59 = vld [vmem:[#allocation39_spill] sm:$0xff] }
 0x7cd   : > { %v5040_v63 = vpop.f32.mrf.mxu0  ;;  %v1673_v52 = vadd.f32 %v17687_v36, %v17686_v59  ;;  %v15285_v36 = vadd.f32 %v15188_v18, %v5076_v49 }
 0x7ce   : > { %v5081_v61 = vadd.f32 %v5040_v63, %v4603_v23  ;;  %v15210_v44 = vadd.f32 %v15188_v18, %v5082_v6  ;;  %v17691_v63 = vld [vmem:[#allocation38_spill] sm:$0xff] }
 0x7cf   : > { %v2205_v13 = vadd.f32 %v17689_v12, %v1673_v52  ;;  %v1663_v27 = vadd.f32 %v17692_v26, %v17691_v63  ;;  %v17699_v23 = vld [vmem:[#allocation42_spill] sm:$0xff]  ;;  %v15296_v12 = vadd.f32 %v15188_v18, %v5075_v25  ;;  %v17713_v63 = vld [vmem:[#allocation67_spill] sm:$0xff] }
 0x7d0   : > { %v15222_v58 = vadd.f32 %v15188_v18, %v5081_v61  ;;  %v17705_v61 = vld [vmem:[#allocation76_spill] sm:$0xff]  ;;  %v17706_v52 = vld [vmem:[#allocation46_spill] sm:$0xff] }
 0x7d1   : > { %v5074_v59 = vadd.f32 %v17705_v61, %v17704_v54  ;;  %v2217_v40 = vadd.f32 %v17706_v52, %v1733_v28  ;;  %v17714_v26 = vld [vmem:[#allocation74_spill] sm:$0xff]  ;;  %v5115_v52 = vld [vmem:[%s17674_s30 + $0x18] sm:$0xff] }
 0x7d3   : > { %v11452_v51 = vpop.f32.mrf.mxu0 }
 0x7d4   : > { %v5084_v55 = vadd.f32 %v11452_v51, %v4606_v3  ;;  %v17693_v3 = vld [vmem:[#allocation49_spill] sm:$0xff]  ;;  %v2203_v51 = vadd.f32 %v17694_v53, %v1663_v27  ;;  %v5072_v27 = vadd.f32 %v17714_v26, %v17713_v63  ;;  %v17717_v53 = vld [vmem:[#allocation75_spill] sm:$0xff]  ;;  %v5120_v63 = vld [vmem:[%s17674_s30 + $0x40] sm:$0xf] }
 0x7d5   : > { %v5050_v19 = vpop.f32.mrf.mxu0  ;;  %v2683_v8 = vadd.f32 %v17693_v3, %v2205_v13  ;;  %v17710_v13 = vld [vmem:[#allocation52_spill] sm:$0xff]  ;;  %v15308_v3 = vadd.f32 %v15188_v18, %v5074_v59 }
 0x7d6   : > { %v15191_v24 = vadd.f32 %v15188_v18, %v5084_v55  ;;  %v5083_v60 = vadd.f32 %v5050_v19, %v4605_v35  ;;  %v17696_v35 = vld [vmem:[#allocation37_spill] sm:$0xff]  ;;  %v17697_v55 = vld [vmem:[#allocation34_spill] sm:$0xff]  ;;  %v2681_v21 = vadd.f32 %v17698_v1, %v2203_v51  ;;  %v15260_v19 = vadd.f32 %v15188_v18, %v5078_v2  ;;  %v17721_v1 = vld [vmem:[#allocation72_spill] sm:$0xff] }
 0x7d7   : > { %v3161_v14 = vadd.f32 %v17695_v7, %v2683_v8  ;;  %v1653_v29 = vadd.f32 %v17697_v55, %v17696_v35  ;;  %v2695_v4 = vadd.f32 %v17710_v13, %v2217_v40  ;;  %v17715_v8 = vld [vmem:[#allocation58_spill] sm:$0xff]  ;;  %v5112_v59 = vld [vmem:[%s17674_s30] sm:$0xff]  ;;  %v10385_v40 = vld [vmem:[%s17674_s30 + $0xb8] sm:$0xff] }
 0x7d8   : > { %v15198_v34 = vadd.f32 %v15188_v18, %v5083_v60  ;;  %5139 = vmatpush1.msra.mxu0 %v15191_v24  ;;  %5376 = vmatpush1.msra.mxu1 %v15191_v24  ;;  %v17700_v60 = vld [vmem:[#allocation54_spill] sm:$0xff]  ;;  %v10386_v13 = vld [vmem:[%s17674_s30 + $0xc0] sm:$0xff]  ;;  %v10368_v26 = vld [vmem:[%s17674_s30 + $0x58] sm:$0xff] }
 0x7d9   : > { %5140 = vmatprep.subr.mxu0 %v17649_v11  ;;  %5377 = vmatprep.subr.mxu1 %v17649_v11  ;;  %v3639_v42 = vadd.f32 %v14880_v33, %v3161_v14  ;;  %v2201_v6 = vadd.f32 %v17699_v23, %v1653_v29  ;;  %v3159_v33 = vadd.f32 %v17700_v60, %v2681_v21  ;;  %v17718_v14 = vld [vmem:[#allocation60_spill] sm:$0xff]  ;;  %v17719_v35 = vld [vmem:[#allocation66_spill] sm:$0xff]  ;;  %v17720_v29 = vld [vmem:[#allocation65_spill] sm:$0xff] }
 0x7da   : > { %5141 = vmatpush1.msra.mxu0 %v15198_v34  ;;  %5378 = vmatpush1.msra.mxu1 %v15198_v34  ;;  %v3173_v57 = vadd.f32 %v17715_v8, %v2695_v4  ;;  %v5070_v21 = vadd.f32 %v17721_v1, %v17720_v29  ;;  %v17723_v23 = vld [vmem:[#allocation63_spill] sm:$0xff] }
 0x7db   : > { %5142 = vmatprep.subr.mxu0 %v17649_v11  ;;  %5379 = vmatprep.subr.mxu1 %v17649_v11  ;;  %v4117_v15 = vadd.f32 %v15034_v56, %v3639_v42  ;;  %v2679_v10 = vadd.f32 %v17703_v41, %v2201_v6  ;;  %v3637_v47 = vadd.f32 %v14859_v22, %v3159_v33  ;;  %v11455_v46 = vpop.f32.mrf.mxu0  ;;  %v17724_v6 = vld [vmem:[#allocation70_spill] sm:$0xff]  ;;  %v17725_v33 = vld [vmem:[#allocation73_spill] sm:$0xff]  ;;  %v10389_v4 = vld [vmem:[%s17674_s30 + $0xd8] sm:$0xff] }
 0x7dc   : > { %5143 = vmatpush1.msra.mxu0 %v15210_v44  ;;  %5380 = vmatpush1.msra.mxu1 %v15210_v44  ;;  %v3651_v5 = vadd.f32 %v17718_v14, %v3173_v57  ;;  %v15329_v42 = vadd.f32 %v15188_v18, %v5072_v27  ;;  %v4608_v60 = vadd.f32 %v17724_v6, %v17723_v23  ;;  %v10390_v27 = vld [vmem:[%s17674_s30 + $0xe0] sm:$0xf]  ;;  %v10367_v8 = vld [vmem:[%s17674_s30 + $0x50] sm:$0xff]  ;;  %v10370_v57 = vld [vmem:[%s17674_s30 + $0x68] sm:$0xff] }
 0x7dd   : > { %5144 = vmatprep.subr.mxu0 %v17649_v11  ;;  %5381 = vmatprep.subr.mxu1 %v17649_v11  ;;  %v4595_v56 = vadd.f32 %v15115_v39, %v4117_v15  ;;  %v3157_v22 = vadd.f32 %v17707_v0, %v2679_v10  ;;  %v4115_v39 = vadd.f32 %v17708_v43, %v3637_v47  ;;  %v5060_v38 = vpop.f32.mrf.mxu0  ;;  %v5114_v0 = vld [vmem:[%s17674_s30 + $0x10] sm:$0xff] }
 0x7de   : > { %5145 = vmatpush1.msra.mxu0 %v15222_v58  ;;  %5382 = vmatpush1.msra.mxu1 %v15222_v58  ;;  %v4129_v49 = vadd.f32 %v17722_v62, %v3651_v5  ;;  %v15348_v41 = vadd.f32 %v15188_v18, %v5070_v21  ;;  %v5086_v10 = vadd.f32 %v11455_v46, %v4608_v60  ;;  %v10384_v43 = vld [vmem:[%s17674_s30 + $0xb0] sm:$0xff]  ;;  %v5688_v21 = vld [vmem:[%s17727_s6 + $0x28] sm:$0xff]  ;;  %v5686_v60 = vld [vmem:[%s17727_s6 + $0x18] sm:$0xff] }
 0x7df   : > { %5146 = vmatprep.subr.mxu0 %v17649_v11  ;;  %5383 = vmatprep.subr.mxu1 %v17649_v11  ;;  %v5073_v50 = vadd.f32 %v17709_v16, %v4595_v56  ;;  %v3635_v37 = vadd.f32 %v17711_v9, %v3157_v22  ;;  %v4593_v48 = vadd.f32 %v17712_v32, %v4115_v39  ;;  %v5117_v22 = vld [vmem:[%s17674_s30 + $0x28] sm:$0xff]  ;;  %v5116_v16 = vld [vmem:[%s17674_s30 + $0x20] sm:$0xff]  ;;  %v5118_v9 = vld [vmem:[%s17674_s30 + $0x30] sm:$0xff] }
 0x7e0   : > { %5147 = vmatpush1.msra.mxu0 %v15235_v20  ;;  %5384 = vmatpush1.msra.mxu1 %v15235_v20  ;;  %v4607_v28 = vadd.f32 %v17726_v30, %v4129_v49  ;;  %v15362_v54 = vadd.f32 %v15188_v18, %v5086_v10  ;;  %v10387_v39 = vld [vmem:[%s17674_s30 + $0xc8] sm:$0xff]  ;;  %v10388_v32 = vld [vmem:[%s17674_s30 + $0xd0] sm:$0xff]  ;;  %v5687_v49 = vld [vmem:[%s17727_s6 + $0x20] sm:$0xff] }
 0x7e1   : > { %5148 = vmatprep.subr.mxu0 %v17649_v11  ;;  %5385 = vmatprep.subr.mxu1 %v17649_v11  ;;  %v4113_v2 = vadd.f32 %v17716_v45, %v3635_v37  ;;  %v5071_v51 = vadd.f32 %v17717_v53, %v4593_v48  ;;  %v15318_v7 = vadd.f32 %v15188_v18, %v5073_v50  ;;  %v5119_v50 = vld [vmem:[%s17674_s30 + $0x38] sm:$0xff]  ;;  %v5121_v37 = vld [vmem:[%s17674_s30 + $0x48] sm:$0xf]  ;;  %v10369_v45 = vld [vmem:[%s17674_s30 + $0x60] sm:$0xff] }
 0x7e2   : > { %5149 = vmatpush1.msra.mxu0 %v15246_v31  ;;  %5386 = vmatpush1.msra.mxu1 %v15246_v31  ;;  %v5085_v56 = vadd.f32 %v5060_v38, %v4607_v28  ;;  %v10391_v48 = vld [vmem:[%s17674_s30 + $0xe8] sm:$0xf]  ;;  %v10405_v14 = vld [vmem:[%s17674_s30 + $0x130] sm:$0xf]  ;;  %v5596_v5 = vld [vmem:[#allocation7] sm:$0xff] }
 0x7e3   : > { %5150 = vmatprep.subr.mxu0 %v17649_v11  ;;  %5387 = vmatprep.subr.mxu1 %v17649_v11  ;;  %v4591_v55 = vadd.f32 %v17719_v35, %v4113_v2  ;;  %v15340_v25 = vadd.f32 %v15188_v18, %v5071_v51  ;;  %v10372_v2 = vld [vmem:[%s17674_s30 + $0x78] sm:$0xff]  ;;  %v10374_v53 = vld [vmem:[%s17674_s30 + $0x88] sm:$0xff]  ;;  %v10403_v51 = vld [vmem:[%s17674_s30 + $0x120] sm:$0xff] }
 0x7e4   : > { %5151 = vmatpush1.msra.mxu0 %v15260_v19  ;;  %5388 = vmatpush1.msra.mxu1 %v15260_v19  ;;  %v15369_v61 = vadd.f32 %v15188_v18, %v5085_v56  ;;  %v5690_v35 = vld [vmem:[%s17727_s6 + $0x38] sm:$0xff]  ;;  %v5684_v28 = vld [vmem:[%s17727_s6 + $0x8] sm:$0xff] }
 0x7e5   : > { %5152 = vmatprep.subr.mxu0 %v17649_v11  ;;  %5389 = vmatprep.subr.mxu1 %v17649_v11  ;;  %v5069_v15 = vadd.f32 %v17725_v33, %v4591_v55  ;;  %v5689_v55 = vld [vmem:[%s17727_s6 + $0x30] sm:$0xff] }
 0x7e6   : > { %5153 = vmatpush1.msra.mxu0 %v15271_v17  ;;  %5390 = vmatpush1.msra.mxu1 %v15271_v17 }
 0x7e7   : > { %5154 = vmatprep.subr.mxu0 %v17649_v11  ;;  %5391 = vmatprep.subr.mxu1 %v17649_v11  ;;  %v15355_v47 = vadd.f32 %v15188_v18, %v5069_v15  ;;  %v10382_v18 = vld [vmem:[%s17674_s30 + $0xa0] sm:$0xff] }
 0x7e8   : > { %5155 = vmatpush1.msra.mxu0 %v15285_v36  ;;  %5392 = vmatpush1.msra.mxu1 %v15285_v36 }
 0x7e9   : > { %5156 = vmatprep.subr.mxu0 %v17649_v11  ;;  %5393 = vmatprep.subr.mxu1 %v17649_v11 }
 0x7ea   : > { %5157 = vmatpush1.msra.mxu0 %v15296_v12  ;;  %5394 = vmatpush1.msra.mxu1 %v15296_v12 }
 0x7eb   : > { %5158 = vmatprep.subr.mxu0 %v17649_v11  ;;  %5395 = vmatprep.subr.mxu1 %v17649_v11 }
 0x7ec   : > { %5159 = vmatpush1.msra.mxu0 %v15308_v3  ;;  %5396 = vmatpush1.msra.mxu1 %v15308_v3 }
 0x7ed   : > { %5160 = vmatprep.subr.mxu0 %v17649_v11  ;;  %5397 = vmatprep.subr.mxu1 %v17649_v11 }
 0x7ee   : > { %5161 = vmatpush1.msra.mxu0 %v15318_v7  ;;  %5398 = vmatpush1.msra.mxu1 %v15318_v7 }
 0x7ef   : > { %5162 = vmatprep.subr.mxu0 %v17649_v11  ;;  %5399 = vmatprep.subr.mxu1 %v17649_v11 }
 0x7f0   : > { %5163 = vmatpush1.msra.mxu0 %v15329_v42  ;;  %5400 = vmatpush1.msra.mxu1 %v15329_v42 }
 0x7f1   : > { %5164 = vmatprep.subr.mxu0 %v17649_v11  ;;  %5401 = vmatprep.subr.mxu1 %v17649_v11 }
 0x7f2   : > { %5165 = vmatpush1.msra.mxu0 %v15340_v25  ;;  %5402 = vmatpush1.msra.mxu1 %v15340_v25 }
 0x7f3   : > { %5166 = vmatprep.subr.mxu0 %v17649_v11  ;;  %5403 = vmatprep.subr.mxu1 %v17649_v11 }
 0x7f4   : > { %5167 = vmatpush1.msra.mxu0 %v15348_v41  ;;  %5404 = vmatpush1.msra.mxu1 %v15348_v41 }
 0x7f5   : > { %5168 = vmatprep.subr.mxu0 %v17649_v11  ;;  %5405 = vmatprep.subr.mxu1 %v17649_v11 }
 0x7f6   : > { %5169 = vmatpush1.msra.mxu0 %v15355_v47  ;;  %5406 = vmatpush1.msra.mxu1 %v15355_v47 }
 0x7f7   : > { %5198 = vmatprep.subr.mxu0 %v17649_v11  ;;  %5435 = vmatprep.subr.mxu1 %v17649_v11 }
 0x7f8   : > { %5199 = vmatpush2.msra.mxu0 %v15362_v54  ;;  %5436 = vmatpush2.msra.mxu1 %v15362_v54 }
 0x7f9   : > { %5200 = vmatprep.subr.mxu0 %v17649_v11  ;;  %5437 = vmatprep.subr.mxu1 %v17649_v11 }
 0x7fa   : > { %5201 = vmatpush2.msra.mxu0 %v15369_v61  ;;  %5438 = vmatpush2.msra.mxu1 %v15369_v61 }
 0x7fb   : > { %5203 = vmatmul.mubr.f32.vlgmr.msra.gmra.mxu0 %v5112_v59  ;;  %5254 = vmatprep.subr.mxu0 %v17649_v11 }
 0x7fc   : > { %5255 = vmatpush1.msra.mxu0 %v15191_v24  ;;  %10363 = vmatprep.mubr.msk.f32.mxu0 %vm5122_vm4, %v5115_v52 }
 0x7fd   : > { %5256 = vmatprep.subr.mxu0 %v17649_v11  ;;  %5440 = vmatmul.mubr.f32.vlgmr.msra.gmra.mxu1 %v10382_v18 }
 0x7fe   : > { %5257 = vmatpush1.msra.mxu0 %v15198_v34  ;;  %10393 = vmatprep.mubr.msk.f32.mxu1 %vm5122_vm4, %v10385_v40 }
 0x7ff   : > { %5258 = vmatprep.subr.mxu0 %v17649_v11  ;;  %5208 = vmatmul.mubr.f32.gmra.mxu0 %v5114_v0 }
 0x800   : > { %5259 = vmatpush1.msra.mxu0 %v15210_v44  ;;  %10364 = vmatprep.mubr.msk.f32.mxu0 %vm5122_vm4, %v5117_v22 }
 0x801   : > { %5260 = vmatprep.subr.mxu0 %v17649_v11  ;;  %5445 = vmatmul.mubr.f32.gmra.mxu1 %v10384_v43 }
 0x802   : > { %5261 = vmatpush1.msra.mxu0 %v15222_v58  ;;  %10394 = vmatprep.mubr.msk.f32.mxu1 %vm5122_vm4, %v10387_v39 }
 0x803   : > { %5262 = vmatprep.subr.mxu0 %v17649_v11  ;;  %5213 = vmatmul.mubr.f32.gmra.mxu0 %v5116_v16 }
 0x804   : > { %5263 = vmatpush1.msra.mxu0 %v15235_v20  ;;  %10365 = vmatprep.mubr.msk.f32.mxu0 %vm5122_vm4, %v5119_v50 }
 0x805   : > { %5264 = vmatprep.subr.mxu0 %v17649_v11  ;;  %5450 = vmatmul.mubr.f32.gmra.mxu1 %v10386_v13 }
 0x806   : > { %5265 = vmatpush1.msra.mxu0 %v15246_v31  ;;  %10395 = vmatprep.mubr.msk.f32.mxu1 %vm5122_vm4, %v10389_v4 }
 0x807   : > { %5266 = vmatprep.subr.mxu0 %v17649_v11  ;;  %5218 = vmatmul.mubr.f32.gmra.mxu0 %v5118_v9 }
 0x808   : > { %5267 = vmatpush1.msra.mxu0 %v15260_v19  ;;  %10366 = vmatprep.mubr.msk.f32.mxu0 %vm5122_vm4, %v5121_v37 }
 0x809   : > { %5268 = vmatprep.subr.mxu0 %v17649_v11  ;;  %5455 = vmatmul.mubr.f32.gmra.mxu1 %v10388_v32 }
 0x80a   : > { %5269 = vmatpush1.msra.mxu0 %v15271_v17  ;;  %10396 = vmatprep.mubr.msk.f32.mxu1 %vm5122_vm4, %v10391_v48 }
 0x80b   : > { %5270 = vmatprep.subr.mxu0 %v17649_v11  ;;  %5223 = vmatmul.mubr.f32.gmra.mxu0 %v5120_v63 }
 0x80c   : > { %5271 = vmatpush1.msra.mxu0 %v15285_v36  ;;  %10377 = vmatprep.mubr.msk.f32.mxu0 %vm5122_vm4, %v10368_v26 }
 0x80d   : > { %5272 = vmatprep.subr.mxu0 %v17649_v11  ;;  %5460 = vmatmul.mubr.f32.gmra.mxu1 %v10390_v27 }
 0x80e   : > { %5273 = vmatpush1.msra.mxu0 %v15296_v12  ;;  %11466 = vmatprep.mubr.msk.f32.mxu1 %vm5598_vm5, %v5596_v5 }
 0x80f   : > { %5274 = vmatprep.subr.mxu0 %v17649_v11 }
 0x810   : > { %5275 = vmatpush1.msra.mxu0 %v15308_v3 }
 0x811   : > { %5276 = vmatprep.subr.mxu0 %v17649_v11 }
 0x812   : > { %5277 = vmatpush1.msra.mxu0 %v15318_v7 }
 0x813   : > { %5278 = vmatprep.subr.mxu0 %v17649_v11 }
 0x814   : > { %5279 = vmatpush1.msra.mxu0 %v15329_v42 }
 0x815   : > { %5280 = vmatprep.subr.mxu0 %v17649_v11 }
 0x816   : > { %5281 = vmatpush1.msra.mxu0 %v15340_v25 }
 0x817   : > { %5282 = vmatprep.subr.mxu0 %v17649_v11 }
 0x818   : > { %5283 = vmatpush1.msra.mxu0 %v15348_v41 }
 0x819   : > { %5284 = vmatprep.subr.mxu0 %v17649_v11 }
 0x81a   : > { %5285 = vmatpush1.msra.mxu0 %v15355_v47 }
 0x81b   : > { %5314 = vmatprep.subr.mxu0 %v17649_v11 }
 0x81c   : > { %5315 = vmatpush2.msra.mxu0 %v15362_v54 }
 0x81d   : > { %5316 = vmatprep.subr.mxu0 %v17649_v11 }
 0x81e   : > { %5317 = vmatpush2.msra.mxu0 %v15369_v61 }
 0x81f   : > { %5319 = vmatmul.mubr.f32.vlgmr.msra.gmra.mxu0 %v10367_v8  ;;  %5496 = vmatprep.subr.mxu0 %v17649_v11 }
 0x820   : > { %5497 = vmatpush1.msra.mxu0 %v15191_v24  ;;  %10378 = vmatprep.mubr.msk.f32.mxu0 %vm5122_vm4, %v10370_v57  ;;  %v10371_v24 = vld [vmem:[%s17674_s30 + $0x70] sm:$0xff] }
 0x821   : > { %5498 = vmatprep.subr.mxu0 %v17649_v11 }
 0x822   : > { %5499 = vmatpush1.msra.mxu0 %v15198_v34  ;;  %v10373_v34 = vld [vmem:[%s17674_s30 + $0x80] sm:$0xff] }
 0x823   : > { %5324 = vmatmul.mubr.f32.gmra.mxu0 %v10369_v45  ;;  %5500 = vmatprep.subr.mxu0 %v17649_v11 }
 0x824   : > { %5501 = vmatpush1.msra.mxu0 %v15210_v44  ;;  %10379 = vmatprep.mubr.msk.f32.mxu0 %vm5122_vm4, %v10372_v2  ;;  %v10376_v44 = vld [vmem:[%s17674_s30 + $0x98] sm:$0xf] }
 0x825   : > { %5502 = vmatprep.subr.mxu0 %v17649_v11 }
 0x826   : > { %5503 = vmatpush1.msra.mxu0 %v15222_v58  ;;  %v10375_v58 = vld [vmem:[%s17674_s30 + $0x90] sm:$0xf] }
 0x827   : > { %5329 = vmatmul.mubr.f32.gmra.mxu0 %v10371_v24  ;;  %5504 = vmatprep.subr.mxu0 %v17649_v11 }
 0x828   : > { %5505 = vmatpush1.msra.mxu0 %v15235_v20  ;;  %10380 = vmatprep.mubr.msk.f32.mxu0 %vm5122_vm4, %v10374_v53  ;;  %v10398_v20 = vld [vmem:[%s17674_s30 + $0xf8] sm:$0xff] }
 0x829   : > { %5506 = vmatprep.subr.mxu0 %v17649_v11 }
 0x82a   : > { %5507 = vmatpush1.msra.mxu0 %v15246_v31  ;;  %v10397_v31 = vld [vmem:[%s17674_s30 + $0xf0] sm:$0xff] }
 0x82b   : > { %5334 = vmatmul.mubr.f32.gmra.mxu0 %v10373_v34  ;;  %5508 = vmatprep.subr.mxu0 %v17649_v11 }
 0x82c   : > { %5509 = vmatpush1.msra.mxu0 %v15260_v19  ;;  %10381 = vmatprep.mubr.msk.f32.mxu0 %vm5122_vm4, %v10376_v44  ;;  %v10400_v19 = vld [vmem:[%s17674_s30 + $0x108] sm:$0xff] }
 0x82d   : > { %5510 = vmatprep.subr.mxu0 %v17649_v11 }
 0x82e   : > { %5511 = vmatpush1.msra.mxu0 %v15271_v17  ;;  %v10399_v17 = vld [vmem:[%s17674_s30 + $0x100] sm:$0xff] }
 0x82f   : > { %5339 = vmatmul.mubr.f32.gmra.mxu0 %v10375_v58  ;;  %5512 = vmatprep.subr.mxu0 %v17649_v11 }
 0x830   : > { %5513 = vmatpush1.msra.mxu0 %v15285_v36  ;;  %10407 = vmatprep.mubr.msk.f32.mxu0 %vm5122_vm4, %v10398_v20  ;;  %v10402_v36 = vld [vmem:[%s17674_s30 + $0x118] sm:$0xff] }
 0x831   : > { %5514 = vmatprep.subr.mxu0 %v17649_v11 }
 0x832   : > { %5515 = vmatpush1.msra.mxu0 %v15296_v12  ;;  %v10401_v12 = vld [vmem:[%s17674_s30 + $0x110] sm:$0xff] }
 0x833   : > { %5516 = vmatprep.subr.mxu0 %v17649_v11 }
 0x834   : > { %5517 = vmatpush1.msra.mxu0 %v15308_v3  ;;  %v10404_v3 = vld [vmem:[%s17674_s30 + $0x128] sm:$0xff] }
 0x835   : > { %5518 = vmatprep.subr.mxu0 %v17649_v11 }
 0x836   : > { %5519 = vmatpush1.msra.mxu0 %v15318_v7  ;;  %v10406_v7 = vld [vmem:[%s17674_s30 + $0x138] sm:$0xf] }
 0x837   : > { %5520 = vmatprep.subr.mxu0 %v17649_v11 }
 0x838   : > { %5521 = vmatpush1.msra.mxu0 %v15329_v42 }
 0x839   : > { %5522 = vmatprep.subr.mxu0 %v17649_v11 }
 0x83a   : > { %5523 = vmatpush1.msra.mxu0 %v15340_v25  ;;  %v5685_v25 = vld [vmem:[%s17727_s6 + $0x10] sm:$0xff] }
 0x83b   : > { %5524 = vmatprep.subr.mxu0 %v17649_v11 }
 0x83c   : > { %5525 = vmatpush1.msra.mxu0 %v15348_v41 }
 0x83d   : > { %5526 = vmatprep.subr.mxu0 %v17649_v11 }
 0x83e   : > { %5527 = vmatpush1.msra.mxu0 %v15355_v47 }
 0x83f   : > { %5556 = vmatprep.subr.mxu0 %v17649_v11 }
 0x840   : > { %5557 = vmatpush2.msra.mxu0 %v15362_v54 }
 0x841   : > { %5558 = vmatprep.subr.mxu0 %v17649_v11 }
 0x842   : > { %5559 = vmatpush2.msra.mxu0 %v15369_v61 }
 0x843   : > { %5561 = vmatmul.mubr.f32.vlgmr.msra.gmra.mxu0 %v10397_v31  ;;  %11501 = vmatprep.subr.mxu0 %v5690_v35 }
 0x844   : > { %10408 = vmatprep.mubr.msk.f32.mxu0 %vm5122_vm4, %v10400_v19  ;;  %11502 = vmatpush3.msra.mxu0 %v5690_v35 }
 0x845   : > { %11503 = vmatprep.subr.mxu0 %v5689_v55 }
 0x846   : > { %11504 = vmatpush3.msra.mxu0 %v5689_v55 }
 0x847   : > { %5566 = vmatmul.mubr.f32.gmra.mxu0 %v10399_v17  ;;  %11505 = vmatprep.subr.mxu0 %v5688_v21 }
 0x848   : > { %10409 = vmatprep.mubr.msk.f32.mxu0 %vm5122_vm4, %v10402_v36  ;;  %11506 = vmatpush3.msra.mxu0 %v5688_v21  ;;  %v5692_v21 = vld [vmem:[#allocation7 + $0x10] sm:$0xff] }
 0x849   : > { %11507 = vmatprep.subr.mxu0 %v5687_v49 }
 0x84a   : > { %11508 = vmatpush3.msra.mxu0 %v5687_v49  ;;  %v10424_v49 = vld [vmem:[%s17727_s6 + $0x70] sm:$0xff] }
 0x84b   : > { %5571 = vmatmul.mubr.f32.gmra.mxu0 %v10401_v12  ;;  %11509 = vmatprep.subr.mxu0 %v5686_v60 }
 0x84c   : > { %10410 = vmatprep.mubr.msk.f32.mxu0 %vm5122_vm4, %v10404_v3  ;;  %11510 = vmatpush3.msra.mxu0 %v5686_v60  ;;  %v10421_v60 = vld [vmem:[%s17727_s6 + $0x58] sm:$0xff] }
 0x84d   : > { %11511 = vmatprep.subr.mxu0 %v5685_v25 }
 0x84e   : > { %11512 = vmatpush3.msra.mxu0 %v5685_v25  ;;  %v10418_v25 = vld [vmem:[%s17727_s6 + $0x40] sm:$0xff] }
 0x84f   : > { %5576 = vmatmul.mubr.f32.gmra.mxu0 %v10403_v51  ;;  %11513 = vmatprep.subr.mxu0 %v5684_v28 }
 0x850   : > { %10411 = vmatprep.mubr.msk.f32.mxu0 %vm5122_vm4, %v10406_v7  ;;  %11514 = vmatpush3.msra.mxu0 %v5684_v28 }
 0x853   : > { %5581 = vmatmul.mubr.f32.gmra.mxu0 %v10405_v14 }
 0x8bb   : > { %v5204_v46 = vpop.f32.mrf.mxu0 }
 0x8bd   : > { %v5206_v29 = vpop.f32.mrf.mxu0  ;;  %v5441_v1 = vpop.f32.mrf.mxu1 }
 0x8bf   : > { %v5209_v42 = vpop.f32.mrf.mxu0  ;;  %v5443_v62 = vpop.f32.mrf.mxu1 }
 0x8c0   : > { %v10425_v62 = vld [vmem:[%s17727_s6 + $0x78] sm:$0xff] }
 0x8c1   : > { %v5211_v23 = vpop.f32.mrf.mxu0  ;;  %v5446_v6 = vpop.f32.mrf.mxu1 }
 0x8c2   : > { %v10423_v23 = vld [vmem:[%s17727_s6 + $0x68] sm:$0xff] }
 0x8c3   : > { %v5214_v33 = vpop.f32.mrf.mxu0  ;;  %v5448_v15 = vpop.f32.mrf.mxu1 }
 0x8c4   : > { %v10419_v15 = vld [vmem:[%s17727_s6 + $0x48] sm:$0xff] }
 0x8c5   : > { %v5216_v38 = vpop.f32.mrf.mxu0  ;;  %v5451_v30 = vpop.f32.mrf.mxu1 }
 0x8c6   : > { %v5683_v38 = vld [vmem:[%s17727_s6] sm:$0xff] }
 0x8c7   : > { %v5219_v41 = vpop.f32.mrf.mxu0  ;;  %v5453_v10 = vpop.f32.mrf.mxu1  ;;  %11515 = vmatprep.subr.mxu0 %v5683_v38 }
 0x8c8   : > { %11516 = vmatpush3.msra.mxu0 %v5683_v38  ;;  %v10439_v10 = vld [vmem:[%s17727_s6 + $0xb0] sm:$0xff] }
 0x8c9   : > { %v5221_v47 = vpop.f32.mrf.mxu0  ;;  %v5456_v56 = vpop.f32.mrf.mxu1 }
 0x8ca   : > { %v10438_v47 = vld [vmem:[%s17727_s6 + $0xa8] sm:$0xff] }
 0x8cb   : > { %v5224_v54 = vpop.f32.mrf.mxu0  ;;  %v5458_v61 = vpop.f32.mrf.mxu1 }
 0x8cd   : > { %v5226_v59 = vpop.f32.mrf.mxu0  ;;  %v5461_v52 = vpop.f32.mrf.mxu1 }
 0x8ce   : > { %v10435_v59 = vld [vmem:[%s17727_s6 + $0x90] sm:$0xff] }
 0x8cf   : > { %v5463_v18 = vpop.f32.mrf.mxu1 }
 0x8d0   : > { %v10434_v18 = vld [vmem:[%s17727_s6 + $0x88] sm:$0xff] }
 0x8df   : > { %v5320_v40 = vpop.f32.mrf.mxu0 }
 0x8e0   : > { %v5344_v0 = vmax.f32 %v5204_v46, %v5320_v40  ;;  %v10433_v40 = vld [vmem:[%s17727_s6 + $0x80] sm:$0xff] }
 0x8e1   : > { %v5322_v22 = vpop.f32.mrf.mxu0 }
 0x8e2   : > { %v5465_v43 = vmax.f32 %v5344_v0, %v5441_v1  ;;  %v5597_v1 = vld [vmem:[#allocation7 + $0x8] sm:$0xff]  ;;  %v5948_v0 = vld [vmem:[#allocation7 + $0x20] sm:$0xff] }
 0x8e3   : > { %v5325_v39 = vpop.f32.mrf.mxu0  ;;  %v5949_v22 = vld [vmem:[#allocation7 + $0x28] sm:$0xff] }
 0x8e4   : > { %v5345_v16 = vmax.f32 %v5209_v42, %v5325_v39  ;;  %v5693_v42 = vld [vmem:[#allocation7 + $0x18] sm:$0xff] }
 0x8e5   : > { %v5327_v50 = vpop.f32.mrf.mxu0  ;;  %v6125_v39 = vld [vmem:[#allocation7 + $0x38] sm:$0xff] }
 0x8e6   : > { %v5466_v13 = vmax.f32 %v5345_v16, %v5446_v6  ;;  %v10422_v6 = vld [vmem:[%s17727_s6 + $0x60] sm:$0xff]  ;;  %v10453_v16 = vld [vmem:[%s17727_s6 + $0xf8] sm:$0xff]  ;;  %v10452_v50 = vld [vmem:[%s17727_s6 + $0xf0] sm:$0xff] }
 0x8e7   : > { %v5330_v4 = vpop.f32.mrf.mxu0 }
 0x8e8   : > { %v5346_v9 = vmax.f32 %v5214_v33, %v5330_v4  ;;  %v10420_v33 = vld [vmem:[%s17727_s6 + $0x50] sm:$0xff]  ;;  %v10450_v4 = vld [vmem:[%s17727_s6 + $0xe0] sm:$0xff] }
 0x8e9   : > { %v5332_v37 = vpop.f32.mrf.mxu0 }
 0x8ea   : > { %v5467_v32 = vmax.f32 %v5346_v9, %v5451_v30  ;;  %v10440_v30 = vld [vmem:[%s17727_s6 + $0xb8] sm:$0xff]  ;;  %v10448_v37 = vld [vmem:[%s17727_s6 + $0xd0] sm:$0xff] }
 0x8eb   : > { %v5335_v48 = vpop.f32.mrf.mxu0  ;;  %11533 = vmatprep.subr.mxu0 %v10440_v30  ;;  %v10449_v9 = vld [vmem:[%s17727_s6 + $0xd8] sm:$0xff] }
 0x8ec   : > { %v5347_v63 = vmax.f32 %v5219_v41, %v5335_v48  ;;  %v10446_v48 = vld [vmem:[%s17727_s6 + $0xc0] sm:$0xff] }
 0x8ed   : > { %v5337_v26 = vpop.f32.mrf.mxu0 }
 0x8ee   : > { %v5468_v27 = vmax.f32 %v5347_v63, %v5456_v56  ;;  %v10437_v56 = vld [vmem:[%s17727_s6 + $0xa0] sm:$0xff] }
 0x8ef   : > { %v5340_v8 = vpop.f32.mrf.mxu0 }
 0x8f0   : > { %v5348_v57 = vmax.f32 %v5224_v54, %v5340_v8  ;;  %v10436_v54 = vld [vmem:[%s17727_s6 + $0x98] sm:$0xff] }
 0x8f1   : > { %v5342_v45 = vpop.f32.mrf.mxu0 }
 0x8f2   : > { %v5469_v2 = vmax.f32 %v5348_v57, %v5461_v52 }
 0x903   : > { %v5562_v24 = vpop.f32.mrf.mxu0 }
 0x904   : > { %v5586_v46 = vmax.f32 %v5465_v43, %v5562_v24  ;;  %v6124_v43 = vld [vmem:[#allocation7 + $0x30] sm:$0xff] }
 0x905   : > { %v5564_v53 = vpop.f32.mrf.mxu0 }
 0x906   : > { %v15619_v29 = vmax.f32 %v5586_v46, 0.0  ;;  %v6301_v53 = vld [vmem:[#allocation7 + $0x48] sm:$0xff] }
 0x907   : > { %v5567_v34 = vpop.f32.mrf.mxu0  ;;  %v10459_v46 = vld [vmem:[%s17727_s6 + $0x100] sm:$0xff] }
 0x908   : > { %v5587_v14 = vmax.f32 %v5466_v13, %v5567_v34  ;;  %v10451_v13 = vld [vmem:[%s17727_s6 + $0xe8] sm:$0xff]  ;;  %v10466_v34 = vld [vmem:[%s17727_s6 + $0x138] sm:$0xff] }
 0x909   : > { %v5569_v44 = vpop.f32.mrf.mxu0 }
 0x90a   : > { %v15615_v55 = vmax.f32 %v5587_v14, 0.0  ;;  %v10478_v14 = vld [vmem:[%s17727_s6 + $0x170] sm:$0xff] }
 0x90b   : > { %v5572_v58 = vpop.f32.mrf.mxu0 }
 0x90c   : > { %v5588_v51 = vmax.f32 %v5467_v32, %v5572_v58  ;;  %v10447_v32 = vld [vmem:[%s17727_s6 + $0xc8] sm:$0xff]  ;;  %v10465_v58 = vld [vmem:[%s17727_s6 + $0x130] sm:$0xff] }
 0x90d   : > { %v5574_v20 = vpop.f32.mrf.mxu0 }
 0x90e   : > { %v15611_v35 = vmax.f32 %v5588_v51, 0.0  ;;  %v10464_v20 = vld [vmem:[%s17727_s6 + $0x128] sm:$0xff] }
 0x90f   : > { %v5577_v31 = vpop.f32.mrf.mxu0  ;;  %v10460_v51 = vld [vmem:[%s17727_s6 + $0x108] sm:$0xff] }
 0x910   : > { %v5589_v36 = vmax.f32 %v5468_v27, %v5577_v31  ;;  %v10463_v31 = vld [vmem:[%s17727_s6 + $0x120] sm:$0xff] }
 0x911   : > { %v5579_v19 = vpop.f32.mrf.mxu0 }
 0x912   : > { %v15605_v5 = vmax.f32 %v5589_v36, 0.0  ;;  %v10462_v19 = vld [vmem:[%s17727_s6 + $0x118] sm:$0xff]  ;;  %v10461_v36 = vld [vmem:[%s17727_s6 + $0x110] sm:$0xff] }
 0x913   : > { %v5582_v17 = vpop.f32.mrf.mxu0 }
 0x914   : > { %v5590_v12 = vmax.f32 %v5469_v2, %v5582_v17  ;;  %v6300_v2 = vld [vmem:[#allocation7 + $0x40] sm:$0xff]  ;;  %v6476_v17 = vld [vmem:[#allocation7 + $0x50] sm:$0xff] }
 0x915   : > { %v5584_v3 = vpop.f32.mrf.mxu0 }
 0x916   : > { %v15603_v7 = vmax.f32 %v5590_v12, 0.0  ;;  %v6477_v12 = vld [vmem:[#allocation7 + $0x58] sm:$0xff]  ;;  %v10479_v3 = vld [vmem:[%s17727_s6 + $0x178] sm:$0xff] }
 0x918   : > { %11456 = vmatprep.subr.msk.mxu1 %vm907_vm1, %v15603_v7 }
 0x919   : > { %11457 = vmatpush3.msk.msra.mxu1 %vm907_vm1, %v15603_v7 }
 0x91a   : > { %11458 = vmatprep.subr.mxu1 %v15605_v5 }
 0x91b   : > { %11459 = vmatpush3.msra.mxu1 %v15605_v5 }
 0x91c   : > { %11460 = vmatprep.subr.mxu1 %v15611_v35 }
 0x91d   : > { %11461 = vmatpush3.msra.mxu1 %v15611_v35 }
 0x91e   : > { %11462 = vmatprep.subr.mxu1 %v15615_v55 }
 0x91f   : > { %11463 = vmatpush3.msra.mxu1 %v15615_v55 }
 0x920   : > { %11464 = vmatprep.subr.mxu1 %v15619_v29 }
 0x921   : > { %11465 = vmatpush3.msra.mxu1 %v15619_v29 }
 0x922   : > { %11467 = vmatmul.mubr.msk.f32.vlgmr.msra.gmra.mxu1 %vm5598_vm5, %v5597_v1  ;;  %11469 = vmatprep.subr.msk.mxu1 %vm907_vm1, %v15603_v7  ;;  %v10477_v1 = vld [vmem:[%s17727_s6 + $0x168] sm:$0xff] }
 0x923   : > { %11470 = vmatpush3.msk.msra.mxu1 %vm907_vm1, %v15603_v7  ;;  %11479 = vmatprep.mubr.msk.f32.mxu1 %vm5598_vm5, %v5692_v21  ;;  %v10476_v21 = vld [vmem:[%s17727_s6 + $0x160] sm:$0xff] }
 0x924   : > { %11471 = vmatprep.subr.mxu1 %v15605_v5 }
 0x925   : > { %11472 = vmatpush3.msra.mxu1 %v15605_v5 }
 0x926   : > { %11473 = vmatprep.subr.mxu1 %v15611_v35 }
 0x927   : > { %11474 = vmatpush3.msra.mxu1 %v15611_v35 }
 0x928   : > { %11475 = vmatprep.subr.mxu1 %v15615_v55 }
 0x929   : > { %11476 = vmatpush3.msra.mxu1 %v15615_v55 }
 0x92a   : > { %11477 = vmatprep.subr.mxu1 %v15619_v29 }
 0x92b   : > { %11478 = vmatpush3.msra.mxu1 %v15619_v29 }
 0x92c   : > { %11480 = vmatmul.mubr.msk.f32.vlgmr.msra.gmra.mxu1 %vm5598_vm5, %v5693_v42  ;;  %11482 = vmatprep.subr.mxu1 %v10425_v62  ;;  %v10475_v42 = vld [vmem:[%s17727_s6 + $0x158] sm:$0xff] }
 0x92d   : > { %11483 = vmatpush3.msra.mxu1 %v10425_v62  ;;  %v10474_v62 = vld [vmem:[%s17727_s6 + $0x150] sm:$0xff] }
 0x92e   : > { %11484 = vmatprep.subr.mxu1 %v10424_v49 }
 0x92f   : > { %11485 = vmatpush3.msra.mxu1 %v10424_v49  ;;  %v10473_v49 = vld [vmem:[%s17727_s6 + $0x148] sm:$0xff] }
 0x930   : > { %11486 = vmatprep.subr.mxu1 %v10423_v23 }
 0x931   : > { %11487 = vmatpush3.msra.mxu1 %v10423_v23  ;;  %v10472_v23 = vld [vmem:[%s17727_s6 + $0x140] sm:$0xff] }
 0x932   : > { %11488 = vmatprep.subr.mxu1 %v10422_v6 }
 0x933   : > { %11489 = vmatpush3.msra.mxu1 %v10422_v6 }
 0x934   : > { %11490 = vmatprep.subr.mxu1 %v10421_v60 }
 0x935   : > { %11491 = vmatpush3.msra.mxu1 %v10421_v60 }
 0x936   : > { %11492 = vmatprep.subr.mxu1 %v10420_v33 }
 0x937   : > { %11493 = vmatpush3.msra.mxu1 %v10420_v33 }
 0x938   : > { %11494 = vmatprep.subr.mxu1 %v10419_v15 }
 0x939   : > { %11495 = vmatpush3.msra.mxu1 %v10419_v15 }
 0x93a   : > { %11496 = vmatprep.subr.mxu1 %v10418_v25 }
 0x93b   : > { %11497 = vmatpush3.msra.mxu1 %v10418_v25 }
 0x93c   : > { %11520 = vmatprep.subr.msk.mxu1 %vm907_vm1, %v15603_v7 }
 0x9e2   : > { %v11468_v28 = vpop.f32.mrf.mxu1 }
 0x9e4   : > { %v5674_v41 = vpop.f32.mrf.mxu1 }
 0x9e5   : > { %11517 = vmatprep.mubr.msk.f32.mxu0 %vm5784_vm6, %v5674_v41 }
 0x9e6   : > { %11518 = vmatmul.mubr.msk.f32.vlgmr.msra.gmra.mxu0 %vm5784_vm6, %v11468_v28 }
 0x9e7   : > { %11534 = vmatpush3.msra.mxu0 %v10440_v30 }
 0x9e8   : > { %11535 = vmatprep.subr.mxu0 %v10439_v10 }
 0x9e9   : > { %11536 = vmatpush3.msra.mxu0 %v10439_v10 }
 0x9ea   : > { %11537 = vmatprep.subr.mxu0 %v10438_v47 }
 0x9eb   : > { %11538 = vmatpush3.msra.mxu0 %v10438_v47  ;;  %v6652_v47 = vld [vmem:[#allocation7 + $0x60] sm:$0xff] }
 0x9ec   : > { %11539 = vmatprep.subr.mxu0 %v10437_v56  ;;  %v11481_v61 = vpop.f32.mrf.mxu1 }
 0x9ed   : > { %11540 = vmatpush3.msra.mxu0 %v10437_v56 }
 0x9ee   : > { %11541 = vmatprep.subr.mxu0 %v10436_v54  ;;  %v5766_v52 = vpop.f32.mrf.mxu1 }
 0x9ef   : > { %11542 = vmatpush3.msra.mxu0 %v10436_v54  ;;  %11498 = vmatprep.mubr.msk.f32.mxu1 %vm5784_vm6, %v5766_v52  ;;  %v10492_v52 = vld [vmem:[%s17727_s6 + $0x1b8] sm:$0xff] }
 0x9f0   : > { %11543 = vmatprep.subr.mxu0 %v10435_v59  ;;  %11499 = vmatmul.mubr.msk.f32.vlgmr.msra.gmra.mxu1 %vm5784_vm6, %v11481_v61 }
 0x9f1   : > { %11521 = vmatpush3.msk.msra.mxu1 %vm907_vm1, %v15603_v7  ;;  %11544 = vmatpush3.msra.mxu0 %v10435_v59  ;;  %v6653_v59 = vld [vmem:[#allocation7 + $0x68] sm:$0xff] }
 0x9f2   : > { %11522 = vmatprep.subr.mxu1 %v15605_v5  ;;  %11545 = vmatprep.subr.mxu0 %v10434_v18 }
 0x9f3   : > { %11523 = vmatpush3.msra.mxu1 %v15605_v5  ;;  %11546 = vmatpush3.msra.mxu0 %v10434_v18 }
 0x9f4   : > { %11524 = vmatprep.subr.mxu1 %v15611_v35  ;;  %11547 = vmatprep.subr.mxu0 %v10433_v40 }
 0x9f5   : > { %11525 = vmatpush3.msra.mxu1 %v15611_v35  ;;  %11548 = vmatpush3.msra.mxu0 %v10433_v40  ;;  %v10491_v40 = vld [vmem:[%s17727_s6 + $0x1b0] sm:$0xff] }
 0x9f6   : > { %11526 = vmatprep.subr.mxu1 %v15615_v55  ;;  %11584 = vmatprep.subr.msk.mxu0 %vm907_vm1, %v15603_v7 }
 0x9f7   : > { %11527 = vmatpush3.msra.mxu1 %v15615_v55  ;;  %11530 = vmatprep.mubr.msk.f32.mxu1 %vm5598_vm5, %v5948_v0  ;;  %v10490_v0 = vld [vmem:[%s17727_s6 + $0x1a8] sm:$0xff] }
 0x9f8   : > { %11528 = vmatprep.subr.mxu1 %v15619_v29 }
 0x9f9   : > { %11529 = vmatpush3.msra.mxu1 %v15619_v29 }
 0x9fa   : > { %11531 = vmatmul.mubr.msk.f32.vlgmr.msra.gmra.mxu1 %vm5598_vm5, %v5949_v22  ;;  %11552 = vmatprep.subr.msk.mxu1 %vm907_vm1, %v15603_v7  ;;  %v10489_v22 = vld [vmem:[%s17727_s6 + $0x1a0] sm:$0xff] }
 0x9fb   : > { %11553 = vmatpush3.msk.msra.mxu1 %vm907_vm1, %v15603_v7  ;;  %11562 = vmatprep.mubr.msk.f32.mxu1 %vm5598_vm5, %v6124_v43  ;;  %v10488_v43 = vld [vmem:[%s17727_s6 + $0x198] sm:$0xff] }
 0x9fc   : > { %11554 = vmatprep.subr.mxu1 %v15605_v5 }
 0x9fd   : > { %11555 = vmatpush3.msra.mxu1 %v15605_v5 }
 0x9fe   : > { %11556 = vmatprep.subr.mxu1 %v15611_v35 }
 0x9ff   : > { %11557 = vmatpush3.msra.mxu1 %v15611_v35 }
 0xa00   : > { %11558 = vmatprep.subr.mxu1 %v15615_v55 }
 0xa01   : > { %11559 = vmatpush3.msra.mxu1 %v15615_v55 }
 0xa02   : > { %11560 = vmatprep.subr.mxu1 %v15619_v29 }
 0xa03   : > { %11561 = vmatpush3.msra.mxu1 %v15619_v29 }
 0xa04   : > { %11563 = vmatmul.mubr.msk.f32.vlgmr.msra.gmra.mxu1 %vm5598_vm5, %v6125_v39  ;;  %11565 = vmatprep.subr.mxu1 %v10453_v16  ;;  %v6828_v39 = vld [vmem:[#allocation7 + $0x70] sm:$0xff] }
 0xa05   : > { %11566 = vmatpush3.msra.mxu1 %v10453_v16  ;;  %v10487_v16 = vld [vmem:[%s17727_s6 + $0x190] sm:$0xff] }
 0xa06   : > { %11567 = vmatprep.subr.mxu1 %v10452_v50 }
 0xa07   : > { %11568 = vmatpush3.msra.mxu1 %v10452_v50  ;;  %v6829_v50 = vld [vmem:[#allocation7 + $0x78] sm:$0xff] }
 0xa08   : > { %11569 = vmatprep.subr.mxu1 %v10451_v13 }
 0xa09   : > { %11570 = vmatpush3.msra.mxu1 %v10451_v13  ;;  %v10486_v13 = vld [vmem:[%s17727_s6 + $0x188] sm:$0xff] }
 0xa0a   : > { %11571 = vmatprep.subr.mxu1 %v10450_v4 }
 0xa0b   : > { %11572 = vmatpush3.msra.mxu1 %v10450_v4  ;;  %v10485_v4 = vld [vmem:[%s17727_s6 + $0x180] sm:$0xff] }
 0xa0c   : > { %11573 = vmatprep.subr.mxu1 %v10449_v9 }
 0xa0d   : > { %11574 = vmatpush3.msra.mxu1 %v10449_v9  ;;  %v10505_v9 = vld [vmem:[%s17727_s6 + $0x1f8] sm:$0xff] }
 0xa0e   : > { %11575 = vmatprep.subr.mxu1 %v10448_v37 }
 0xa0f   : > { %11576 = vmatpush3.msra.mxu1 %v10448_v37  ;;  %v10504_v37 = vld [vmem:[%s17727_s6 + $0x1f0] sm:$0xff] }
 0xa10   : > { %11577 = vmatprep.subr.mxu1 %v10447_v32 }
 0xa11   : > { %11578 = vmatpush3.msra.mxu1 %v10447_v32  ;;  %v10503_v32 = vld [vmem:[%s17727_s6 + $0x1e8] sm:$0xff] }
 0xa12   : > { %11579 = vmatprep.subr.mxu1 %v10446_v48 }
 0xa13   : > { %11580 = vmatpush3.msra.mxu1 %v10446_v48  ;;  %v10502_v48 = vld [vmem:[%s17727_s6 + $0x1e0] sm:$0xff] }
 0xa14   : > { %11616 = vmatprep.subr.msk.mxu1 %vm907_vm1, %v15603_v7 }
 0xaa6   : > { %v11519_v63 = vpop.f32.mrf.mxu0 }
 0xaa8   : > { %v5938_v6 = vpop.f32.mrf.mxu0 }
 0xab0   : > { %v11500_v26 = vpop.f32.mrf.mxu1 }
 0xab1   : > { %v15751_v27 = vadd.f32 %v11519_v63, %v11500_v26  ;;  %v10501_v63 = vld [vmem:[%s17727_s6 + $0x1d8] sm:$0xff]  ;;  %v10500_v26 = vld [vmem:[%s17727_s6 + $0x1d0] sm:$0xff] }
 0xab2   : > { %v15753_v8 = vpop.f32.mrf.mxu1 }
 0xab3   : > { %v5939_v33 = vadd.f32 %v5938_v6, %v15753_v8  ;;  %v10498_v8 = vld [vmem:[%s17727_s6 + $0x1c0] sm:$0xff] }
 0xab4   : > { %v7552_v6 = vld [vmem:[%s17568_s9 + $0x1e0] sm:$0xff] }
 0xaba   : > { %v11532_v57 = vpop.f32.mrf.mxu1 }
 0xabc   : > { %v6022_v45 = vpop.f32.mrf.mxu1 }
 0xabd   : > { %11549 = vmatprep.mubr.msk.f32.mxu0 %vm5784_vm6, %v6022_v45 }
 0xabe   : > { %11550 = vmatmul.mubr.msk.f32.vlgmr.msra.gmra.mxu0 %vm5784_vm6, %v11532_v57 }
 0xabf   : > { %11585 = vmatpush3.msk.msra.mxu0 %vm907_vm1, %v15603_v7  ;;  %11594 = vmatprep.mubr.msk.f32.mxu0 %vm5598_vm5, %v6300_v2 }
 0xac0   : > { %11586 = vmatprep.subr.mxu0 %v15605_v5 }
 0xac1   : > { %11587 = vmatpush3.msra.mxu0 %v15605_v5 }
 0xac2   : > { %11588 = vmatprep.subr.mxu0 %v15611_v35 }
 0xac3   : > { %11589 = vmatpush3.msra.mxu0 %v15611_v35 }
 0xac4   : > { %11590 = vmatprep.subr.mxu0 %v15615_v55  ;;  %v11564_v24 = vpop.f32.mrf.mxu1 }
 0xac5   : > { %11591 = vmatpush3.msra.mxu0 %v15615_v55 }
 0xac6   : > { %11592 = vmatprep.subr.mxu0 %v15619_v29  ;;  %v6198_v44 = vpop.f32.mrf.mxu1 }
 0xac7   : > { %11593 = vmatpush3.msra.mxu0 %v15619_v29  ;;  %11581 = vmatprep.mubr.msk.f32.mxu1 %vm5784_vm6, %v6198_v44 }
 0xac8   : > { %11595 = vmatmul.mubr.msk.f32.vlgmr.msra.gmra.mxu0 %vm5598_vm5, %v6301_v53  ;;  %11597 = vmatprep.subr.mxu0 %v10466_v34 }
 0xac9   : > { %11582 = vmatmul.mubr.msk.f32.vlgmr.msra.gmra.mxu1 %vm5784_vm6, %v11564_v24  ;;  %11598 = vmatpush3.msra.mxu0 %v10466_v34 }
 0xaca   : > { %11617 = vmatpush3.msk.msra.mxu1 %vm907_vm1, %v15603_v7  ;;  %11599 = vmatprep.subr.mxu0 %v10465_v58 }
 0xacb   : > { %11618 = vmatprep.subr.mxu1 %v15605_v5  ;;  %11600 = vmatpush3.msra.mxu0 %v10465_v58 }
 0xacc   : > { %11619 = vmatpush3.msra.mxu1 %v15605_v5  ;;  %11601 = vmatprep.subr.mxu0 %v10464_v20 }
 0xacd   : > { %11620 = vmatprep.subr.mxu1 %v15611_v35  ;;  %11602 = vmatpush3.msra.mxu0 %v10464_v20  ;;  %v7004_v20 = vld [vmem:[#allocation7 + $0x80] sm:$0xff] }
 0xace   : > { %11621 = vmatpush3.msra.mxu1 %v15611_v35  ;;  %11603 = vmatprep.subr.mxu0 %v10463_v31 }
 0xacf   : > { %11622 = vmatprep.subr.mxu1 %v15615_v55  ;;  %11604 = vmatpush3.msra.mxu0 %v10463_v31 }
 0xad0   : > { %11623 = vmatpush3.msra.mxu1 %v15615_v55  ;;  %11605 = vmatprep.subr.mxu0 %v10462_v19 }
 0xad1   : > { %11624 = vmatprep.subr.mxu1 %v15619_v29  ;;  %11606 = vmatpush3.msra.mxu0 %v10462_v19 }
 0xad2   : > { %11625 = vmatpush3.msra.mxu1 %v15619_v29  ;;  %11626 = vmatprep.mubr.msk.f32.mxu1 %vm5598_vm5, %v6476_v17  ;;  %v7005_v17 = vld [vmem:[#allocation7 + $0x88] sm:$0xff] }
 0xad3   : > { %11607 = vmatprep.subr.mxu0 %v10461_v36  ;;  %11627 = vmatmul.mubr.msk.f32.vlgmr.msra.gmra.mxu1 %vm5598_vm5, %v6477_v12 }
 0xad4   : > { %11629 = vmatprep.subr.mxu1 %v10479_v3  ;;  %11608 = vmatpush3.msra.mxu0 %v10461_v36  ;;  %v10518_v36 = vld [vmem:[%s17727_s6 + $0x238] sm:$0xff] }
 0xad5   : > { %11630 = vmatpush3.msra.mxu1 %v10479_v3  ;;  %11609 = vmatprep.subr.mxu0 %v10460_v51  ;;  %v10513_v3 = vld [vmem:[%s17727_s6 + $0x210] sm:$0xff] }
 0xad6   : > { %11631 = vmatprep.subr.mxu1 %v10478_v14  ;;  %11610 = vmatpush3.msra.mxu0 %v10460_v51  ;;  %v10512_v51 = vld [vmem:[%s17727_s6 + $0x208] sm:$0xff] }
 0xad7   : > { %11632 = vmatpush3.msra.mxu1 %v10478_v14  ;;  %11611 = vmatprep.subr.mxu0 %v10459_v46  ;;  %v10511_v14 = vld [vmem:[%s17727_s6 + $0x200] sm:$0xff] }
 0xad8   : > { %11633 = vmatprep.subr.mxu1 %v10477_v1  ;;  %11612 = vmatpush3.msra.mxu0 %v10459_v46 }
 0xad9   : > { %11634 = vmatpush3.msra.mxu1 %v10477_v1  ;;  %11648 = vmatprep.subr.msk.mxu0 %vm907_vm1, %v15603_v7 }
 0xada   : > { %11635 = vmatprep.subr.mxu1 %v10476_v21 }
 0xadb   : > { %11636 = vmatpush3.msra.mxu1 %v10476_v21 }
 0xadc   : > { %11637 = vmatprep.subr.mxu1 %v10475_v42 }
 0xadd   : > { %11638 = vmatpush3.msra.mxu1 %v10475_v42 }
 0xade   : > { %11639 = vmatprep.subr.mxu1 %v10474_v62 }
 0xadf   : > { %11640 = vmatpush3.msra.mxu1 %v10474_v62 }
 0xae0   : > { %11641 = vmatprep.subr.mxu1 %v10473_v49 }
 0xae1   : > { %11642 = vmatpush3.msra.mxu1 %v10473_v49 }
 0xae2   : > { %11643 = vmatprep.subr.mxu1 %v10472_v23 }
 0xae3   : > { %11644 = vmatpush3.msra.mxu1 %v10472_v23  ;;  %v7553_v23 = vld [vmem:[%s17568_s9 + $0x1e8] sm:$0xff] }
 0xae4   : > { %11680 = vmatprep.subr.msk.mxu1 %vm907_vm1, %v15603_v7 }
 0xb7e   : > { %v11551_v60 = vpop.f32.mrf.mxu0 }
 0xb7f   : > { %v6122_v15 = vadd.f32 %v11551_v60, %v15751_v27  ;;  %v10499_v27 = vld [vmem:[%s17727_s6 + $0x1c8] sm:$0xff] }
 0xb80   : > { %v6112_v25 = vpop.f32.mrf.mxu0  ;;  %v7549_v60 = vld [vmem:[%s17568_s9 + $0x1c8] sm:$0xff] }
 0xb81   : > { %v6121_v38 = vadd.f32 %v6112_v25, %v5939_v33  ;;  %v7548_v33 = vld [vmem:[%s17568_s9 + $0x1c0] sm:$0xff] }
 0xb82   : > { %v7544_v25 = vld [vmem:[%s17568_s9 + $0x1a0] sm:$0xff] }
 0xb88   : > { %v11596_v30 = vpop.f32.mrf.mxu0 }
 0xb89   : > { %v11583_v28 = vpop.f32.mrf.mxu1 }
 0xb8a   : > { %v15837_v41 = vadd.f32 %v11583_v28, %v6122_v15  ;;  %v6374_v10 = vpop.f32.mrf.mxu0  ;;  %v7545_v15 = vld [vmem:[%s17568_s9 + $0x1a8] sm:$0xff] }
 0xb8b   : > { %v6288_v56 = vpop.f32.mrf.mxu1  ;;  %11613 = vmatprep.mubr.msk.f32.mxu0 %vm5784_vm6, %v6374_v10  ;;  %v7537_v28 = vld [vmem:[%s17568_s9 + $0x168] sm:$0xff] }
 0xb8c   : > { %v15840_v54 = vadd.f32 %v6288_v56, %v6121_v38  ;;  %11614 = vmatmul.mubr.msk.f32.vlgmr.msra.gmra.mxu0 %vm5784_vm6, %v11596_v30  ;;  %v7541_v38 = vld [vmem:[%s17568_s9 + $0x188] sm:$0xff]  ;;  %v7540_v30 = vld [vmem:[%s17568_s9 + $0x180] sm:$0xff] }
 0xb8d   : > { %11649 = vmatpush3.msk.msra.mxu0 %vm907_vm1, %v15603_v7  ;;  %11658 = vmatprep.mubr.msk.f32.mxu0 %vm5598_vm5, %v6652_v47  ;;  %v7533_v10 = vld [vmem:[%s17568_s9 + $0x148] sm:$0xff]  ;;  %v7532_v47 = vld [vmem:[%s17568_s9 + $0x140] sm:$0xff] }
 0xb8e   : > { %11650 = vmatprep.subr.mxu0 %v15605_v5  ;;  %v7529_v56 = vld [vmem:[%s17568_s9 + $0x128] sm:$0xff] }
 0xb8f   : > { %11651 = vmatpush3.msra.mxu0 %v15605_v5 }
 0xb90   : > { %11652 = vmatprep.subr.mxu0 %v15611_v35 }
 0xb91   : > { %11653 = vmatpush3.msra.mxu0 %v15611_v35 }
 0xb92   : > { %11654 = vmatprep.subr.mxu0 %v15615_v55 }
 0xb93   : > { %v11628_v61 = vpop.f32.mrf.mxu1  ;;  %11655 = vmatpush3.msra.mxu0 %v15615_v55 }
 0xb94   : > { %11656 = vmatprep.subr.mxu0 %v15619_v29 }
 0xb95   : > { %v6550_v18 = vpop.f32.mrf.mxu1  ;;  %11657 = vmatpush3.msra.mxu0 %v15619_v29 }
 0xb96   : > { %11645 = vmatprep.mubr.msk.f32.mxu1 %vm5784_vm6, %v6550_v18  ;;  %11659 = vmatmul.mubr.msk.f32.vlgmr.msra.gmra.mxu0 %vm5598_vm5, %v6653_v59  ;;  %v7524_v59 = vld [vmem:[%s17568_s9 + $0x100] sm:$0xff] }
 0xb97   : > { %11661 = vmatprep.subr.mxu0 %v10492_v52  ;;  %11646 = vmatmul.mubr.msk.f32.vlgmr.msra.gmra.mxu1 %vm5784_vm6, %v11628_v61  ;;  %v7525_v61 = vld [vmem:[%s17568_s9 + $0x108] sm:$0xff] }
 0xb98   : > { %11662 = vmatpush3.msra.mxu0 %v10492_v52  ;;  %11681 = vmatpush3.msk.msra.mxu1 %vm907_vm1, %v15603_v7 }
 0xb99   : > { %11663 = vmatprep.subr.mxu0 %v10491_v40  ;;  %11682 = vmatprep.subr.mxu1 %v15605_v5 }
 0xb9a   : > { %11664 = vmatpush3.msra.mxu0 %v10491_v40  ;;  %11683 = vmatpush3.msra.mxu1 %v15605_v5 }
 0xb9b   : > { %11665 = vmatprep.subr.mxu0 %v10490_v0  ;;  %11684 = vmatprep.subr.mxu1 %v15611_v35 }
 0xb9c   : > { %11666 = vmatpush3.msra.mxu0 %v10490_v0  ;;  %11685 = vmatpush3.msra.mxu1 %v15611_v35 }
 0xb9d   : > { %11667 = vmatprep.subr.mxu0 %v10489_v22  ;;  %11686 = vmatprep.subr.mxu1 %v15615_v55 }
 0xb9e   : > { %11668 = vmatpush3.msra.mxu0 %v10489_v22  ;;  %11687 = vmatpush3.msra.mxu1 %v15615_v55  ;;  %v10521_v22 = vld [vmem:[#allocation8] ss:$0 sm:$0xff] }
 0xb9f   : > { %11669 = vmatprep.subr.mxu0 %v10488_v43  ;;  %11688 = vmatprep.subr.mxu1 %v15619_v29 }
 0xba0   : > { %11670 = vmatpush3.msra.mxu0 %v10488_v43  ;;  %11689 = vmatpush3.msra.mxu1 %v15619_v29 }
 0xba1   : > { %11690 = vmatprep.mubr.msk.f32.mxu1 %vm5598_vm5, %v6828_v39  ;;  %11671 = vmatprep.subr.mxu0 %v10487_v16 }
 0xba2   : > { %11691 = vmatmul.mubr.msk.f32.vlgmr.msra.gmra.mxu1 %vm5598_vm5, %v6829_v50  ;;  %11672 = vmatpush3.msra.mxu0 %v10487_v16 }
 0xba3   : > { %11673 = vmatprep.subr.mxu0 %v10486_v13  ;;  %11693 = vmatprep.subr.mxu1 %v10505_v9 }
 0xba4   : > { %11674 = vmatpush3.msra.mxu0 %v10486_v13  ;;  %11694 = vmatpush3.msra.mxu1 %v10505_v9  ;;  %v7188_v9 = vld [vmem:[#allocation10] sm:$0xf] }
 0xba5   : > { %11675 = vmatprep.subr.mxu0 %v10485_v4  ;;  %11695 = vmatprep.subr.mxu1 %v10504_v37 }
 0xba6   : > { %11676 = vmatpush3.msra.mxu0 %v10485_v4  ;;  %11696 = vmatpush3.msra.mxu1 %v10504_v37  ;;  %v7263_v37 = vld [vmem:[#allocation10 + $0x4] sm:$0xf] }
 0xba7   : > { %11712 = vmatprep.subr.msk.mxu0 %vm907_vm1, %v15603_v7  ;;  %11697 = vmatprep.subr.mxu1 %v10503_v32 }
 0xba8   : > { %11698 = vmatpush3.msra.mxu1 %v10503_v32  ;;  %v7339_v32 = vld [vmem:[#allocation10 + $0x8] sm:$0xf] }
 0xba9   : > { %11699 = vmatprep.subr.mxu1 %v10502_v48 }
 0xbaa   : > { %11700 = vmatpush3.msra.mxu1 %v10502_v48  ;;  %v7415_v48 = vld [vmem:[#allocation10 + $0xc] sm:$0xf] }
 0xbab   : > { %11701 = vmatprep.subr.mxu1 %v10501_v63 }
 0xbac   : > { %11702 = vmatpush3.msra.mxu1 %v10501_v63  ;;  %v7555_v63 = vld [vmem:[%s17568_s9 + $0x1f8] sm:$0xff] }
 0xbad   : > { %11703 = vmatprep.subr.mxu1 %v10500_v26 }
 0xbae   : > { %11704 = vmatpush3.msra.mxu1 %v10500_v26  ;;  %v7554_v26 = vld [vmem:[%s17568_s9 + $0x1f0] sm:$0xff] }
 0xbaf   : > { %11705 = vmatprep.subr.mxu1 %v10499_v27 }
 0xbb0   : > { %11706 = vmatpush3.msra.mxu1 %v10499_v27  ;;  %v7551_v27 = vld [vmem:[%s17568_s9 + $0x1d8] sm:$0xff] }
 0xbb1   : > { %11707 = vmatprep.subr.mxu1 %v10498_v8 }
 0xbb2   : > { %11708 = vmatpush3.msra.mxu1 %v10498_v8  ;;  %v7550_v8 = vld [vmem:[%s17568_s9 + $0x1d0] sm:$0xff] }
 0xbb3   : > { %11744 = vmatprep.subr.mxu1 %v17649_v11 }
 0xc4c   : > { %v11615_v57 = vpop.f32.mrf.mxu0 }
 0xc4d   : > { %v6474_v45 = vadd.f32 %v11615_v57, %v15837_v41  ;;  %v7536_v41 = vld [vmem:[%s17568_s9 + $0x160] sm:$0xff]  ;;  %v7547_v57 = vld [vmem:[%s17568_s9 + $0x1b8] sm:$0xff] }
 0xc4e   : > { %v6464_v2 = vpop.f32.mrf.mxu0 }
 0xc4f   : > { %v6473_v24 = vadd.f32 %v6464_v2, %v15840_v54  ;;  %v7528_v54 = vld [vmem:[%s17568_s9 + $0x120] sm:$0xff]  ;;  %v7543_v2 = vld [vmem:[%s17568_s9 + $0x198] sm:$0xff] }
 0xc56   : > { %v11660_v53 = vpop.f32.mrf.mxu0 }
 0xc57   : > { %v11647_v34 = vpop.f32.mrf.mxu1 }
 0xc58   : > { %v6650_v44 = vadd.f32 %v11647_v34, %v6474_v45  ;;  %v6726_v58 = vpop.f32.mrf.mxu0  ;;  %v7546_v45 = vld [vmem:[%s17568_s9 + $0x1b0] sm:$0xff] }
 0xc59   : > { %v6640_v31 = vpop.f32.mrf.mxu1  ;;  %11677 = vmatprep.mubr.msk.f32.mxu0 %vm5784_vm6, %v6726_v58  ;;  %v7538_v34 = vld [vmem:[%s17568_s9 + $0x170] sm:$0xff] }
 0xc5a   : > { %v6649_v19 = vadd.f32 %v6640_v31, %v6473_v24  ;;  %11678 = vmatmul.mubr.msk.f32.vlgmr.msra.gmra.mxu0 %vm5784_vm6, %v11660_v53  ;;  %v7542_v24 = vld [vmem:[%s17568_s9 + $0x190] sm:$0xff]  ;;  %v7539_v53 = vld [vmem:[%s17568_s9 + $0x178] sm:$0xff] }
 0xc5b   : > { %11713 = vmatpush3.msk.msra.mxu0 %vm907_vm1, %v15603_v7  ;;  %11722 = vmatprep.mubr.msk.f32.mxu0 %vm5598_vm5, %v7004_v20  ;;  %v7534_v58 = vld [vmem:[%s17568_s9 + $0x150] sm:$0xff]  ;;  %v7531_v20 = vld [vmem:[%s17568_s9 + $0x138] sm:$0xff] }
 0xc5c   : > { %11714 = vmatprep.subr.mxu0 %v15605_v5  ;;  %v7530_v31 = vld [vmem:[%s17568_s9 + $0x130] sm:$0xff] }
 0xc5d   : > { %11715 = vmatpush3.msra.mxu0 %v15605_v5  ;;  %v10517_v5 = vld [vmem:[%s17727_s6 + $0x230] sm:$0xff] }
 0xc5e   : > { %11716 = vmatprep.subr.mxu0 %v15611_v35 }
 0xc5f   : > { %11717 = vmatpush3.msra.mxu0 %v15611_v35  ;;  %v10516_v35 = vld [vmem:[%s17727_s6 + $0x228] sm:$0xff] }
 0xc60   : > { %11718 = vmatprep.subr.mxu0 %v15615_v55 }
 0xc61   : > { %11719 = vmatpush3.msra.mxu0 %v15615_v55  ;;  %v10515_v55 = vld [vmem:[%s17727_s6 + $0x220] sm:$0xff] }
 0xc62   : > { %v11692_v7 = vpop.f32.mrf.mxu1  ;;  %11720 = vmatprep.subr.mxu0 %v15619_v29 }
 0xc63   : > { %11721 = vmatpush3.msra.mxu0 %v15619_v29  ;;  %v10514_v29 = vld [vmem:[%s17727_s6 + $0x218] sm:$0xff] }
 0xc64   : > { %v6902_v12 = vpop.f32.mrf.mxu1  ;;  %11723 = vmatmul.mubr.msk.f32.vlgmr.msra.gmra.mxu0 %vm5598_vm5, %v7005_v17  ;;  %11725 = vmatprep.subr.mxu0 %v10518_v36  ;;  %v7526_v17 = vld [vmem:[%s17568_s9 + $0x110] sm:$0xff] }
 0xc65   : > { %11709 = vmatprep.mubr.msk.f32.mxu1 %vm5784_vm6, %v6902_v12  ;;  %11726 = vmatpush3.msra.mxu0 %v10518_v36  ;;  %v7521_v36 = vld [vmem:[%s17568_s9 + $0xe8] sm:$0xff]  ;;  %v7522_v12 = vld [vmem:[%s17568_s9 + $0xf0] sm:$0xff] }
 0xc66   : > { %11710 = vmatmul.mubr.msk.f32.vlgmr.msra.gmra.mxu1 %vm5784_vm6, %v11692_v7  ;;  %11727 = vmatprep.subr.mxu0 %v10517_v5  ;;  %v7523_v7 = vld [vmem:[%s17568_s9 + $0xf8] sm:$0xff] }
 0xc67   : > { %11728 = vmatpush3.msra.mxu0 %v10517_v5  ;;  %11748 = vmatprep.mubr.msk.f32.mxu1 %vm12454_vm7, %v17649_v11  ;;  %v7520_v5 = vld [vmem:[%s17568_s9 + $0xe0] sm:$0xff] }
 0xc68   : > { %11729 = vmatprep.subr.mxu0 %v10516_v35 }
 0xc69   : > { %11730 = vmatpush3.msra.mxu0 %v10516_v35  ;;  %v7517_v35 = vld [vmem:[%s17568_s9 + $0xc8] sm:$0xff] }
 0xc6a   : > { %11731 = vmatprep.subr.mxu0 %v10515_v55 }
 0xc6b   : > { %11732 = vmatpush3.msra.mxu0 %v10515_v55  ;;  %v7519_v55 = vld [vmem:[%s17568_s9 + $0xd8] sm:$0xff] }
 0xc6c   : > { %11733 = vmatprep.subr.mxu0 %v10514_v29 }
 0xc6d   : > { %11734 = vmatpush3.msra.mxu0 %v10514_v29  ;;  %v7516_v29 = vld [vmem:[%s17568_s9 + $0xc0] sm:$0xff] }
 0xc6e   : > { %11735 = vmatprep.subr.mxu0 %v10513_v3 }
 0xc6f   : > { %11736 = vmatpush3.msra.mxu0 %v10513_v3  ;;  %v7518_v3 = vld [vmem:[%s17568_s9 + $0xd0] sm:$0xff] }
 0xc70   : > { %11737 = vmatprep.subr.mxu0 %v10512_v51 }
 0xc71   : > { %11738 = vmatpush3.msra.mxu0 %v10512_v51  ;;  %v7513_v51 = vld [vmem:[%s17568_s9 + $0xa8] sm:$0xff] }
 0xc72   : > { %11739 = vmatprep.subr.mxu0 %v10511_v14 }
 0xc73   : > { %11740 = vmatpush3.msra.mxu0 %v10511_v14  ;;  %v7515_v14 = vld [vmem:[%s17568_s9 + $0xb8] sm:$0xff] }
 0xc74   : > { %7556 = vmatprep.subr.mxu0 %v7553_v23  ;;  %v7505_v23 = vld [vmem:[%s17568_s9 + $0x68] sm:$0xff] }
 0xd1a   : > { %v11679_v46 = vpop.f32.mrf.mxu0 }
 0xd1b   : > { %v6826_v1 = vadd.f32 %v11679_v46, %v6650_v44  ;;  %v7535_v44 = vld [vmem:[%s17568_s9 + $0x158] sm:$0xff]  ;;  %v7512_v46 = vld [vmem:[%s17568_s9 + $0xa0] sm:$0xff] }
 0xd1c   : > { %v6816_v21 = vpop.f32.mrf.mxu0 }
 0xd1d   : > { %v6825_v42 = vadd.f32 %v6816_v21, %v6649_v19  ;;  %v7527_v19 = vld [vmem:[%s17568_s9 + $0x118] sm:$0xff]  ;;  %v7509_v21 = vld [vmem:[%s17568_s9 + $0x88] sm:$0xff] }
 0xd24   : > { %v11724_v62 = vpop.f32.mrf.mxu0 }
 0xd26   : > { %v7078_v49 = vpop.f32.mrf.mxu0  ;;  %v11711_v52 = vpop.f32.mrf.mxu1 }
 0xd27   : > { %11741 = vmatprep.mubr.msk.f32.mxu0 %vm5784_vm6, %v7078_v49  ;;  %v7002_v40 = vadd.f32 %v11711_v52, %v6826_v1  ;;  %v7514_v1 = vld [vmem:[%s17568_s9 + $0xb0] sm:$0xff]  ;;  %v10587_v52 = vld [vmem:[%s17568_s9 + $0x3e8] sm:$0xff] }
 0xd28   : > { %11742 = vmatmul.mubr.msk.f32.vlgmr.msra.gmra.mxu0 %vm5784_vm6, %v11724_v62  ;;  %v6992_v18 = vpop.f32.mrf.mxu1  ;;  %v7508_v62 = vld [vmem:[%s17568_s9 + $0x80] sm:$0xff]  ;;  %v7510_v49 = vld [vmem:[%s17568_s9 + $0x90] sm:$0xff] }
 0xd29   : > { %7620 = vmatprep.mubr.f32.mxu0 %v17649_v11  ;;  %7557 = vmatpush1.msra.mxu0 %v7552_v6  ;;  %v7001_v43 = vadd.f32 %v6992_v18, %v6825_v42  ;;  %v7511_v42 = vld [vmem:[%s17568_s9 + $0x98] sm:$0xff] }
 0xd2a   : > { %7558 = vmatprep.subr.mxu0 %v7549_v60  ;;  %v7507_v6 = vld [vmem:[%s17568_s9 + $0x78] sm:$0xff]  ;;  %v7504_v60 = vld [vmem:[%s17568_s9 + $0x60] sm:$0xff] }
 0xd2b   : > { %7559 = vmatpush1.msra.mxu0 %v7548_v33  ;;  %v7506_v33 = vld [vmem:[%s17568_s9 + $0x70] sm:$0xff]  ;;  %v10589_v18 = vld [vmem:[%s17568_s9 + $0x3f8] sm:$0xff] }
 0xd2c   : > { %7560 = vmatprep.subr.mxu0 %v7545_v15  ;;  %v7501_v15 = vld [vmem:[%s17568_s9 + $0x48] sm:$0xff] }
 0xd2d   : > { %7561 = vmatpush1.msra.mxu0 %v7544_v25  ;;  %v7503_v25 = vld [vmem:[%s17568_s9 + $0x58] sm:$0xff] }
 0xd2e   : > { %7562 = vmatprep.subr.mxu0 %v7541_v38  ;;  %v7500_v38 = vld [vmem:[%s17568_s9 + $0x40] sm:$0xff] }
 0xd2f   : > { %7563 = vmatpush1.msra.mxu0 %v7540_v30  ;;  %v7502_v30 = vld [vmem:[%s17568_s9 + $0x50] sm:$0xff] }
 0xd30   : > { %7564 = vmatprep.subr.mxu0 %v7537_v28  ;;  %v7497_v28 = vld [vmem:[%s17568_s9 + $0x28] sm:$0xff] }
 0xd31   : > { %7565 = vmatpush1.msra.mxu0 %v7536_v41  ;;  %v7499_v41 = vld [vmem:[%s17568_s9 + $0x38] sm:$0xff] }
 0xd32   : > { %7566 = vmatprep.subr.mxu0 %v7533_v10  ;;  %v7496_v10 = vld [vmem:[%s17568_s9 + $0x20] sm:$0xff] }
 0xd33   : > { %7567 = vmatpush1.msra.mxu0 %v7532_v47  ;;  %v7498_v47 = vld [vmem:[%s17568_s9 + $0x30] sm:$0xff] }
 0xd34   : > { %7568 = vmatprep.subr.mxu0 %v7529_v56  ;;  %v7493_v56 = vld [vmem:[%s17568_s9 + $0x8] sm:$0xff] }
 0xd35   : > { %7569 = vmatpush1.msra.mxu0 %v7528_v54  ;;  %v7495_v54 = vld [vmem:[%s17568_s9 + $0x18] sm:$0xff] }
 0xd36   : > { %7570 = vmatprep.subr.mxu0 %v7525_v61  ;;  %v7492_v61 = vld [vmem:[%s17568_s9] sm:$0xff] }
 0xd37   : > { %7571 = vmatpush1.msra.mxu0 %v7524_v59  ;;  %v7494_v59 = vld [vmem:[%s17568_s9 + $0x10] sm:$0xff] }
 0xd38   : > { %7572 = vmatprep.subr.mxu0 %v7521_v36  ;;  %v10572_v36 = vld [vmem:[%s17568_s9 + $0x370] sm:$0xff] }
 0xd39   : > { %7573 = vmatpush1.msra.mxu0 %v7520_v5  ;;  %v10569_v5 = vld [vmem:[%s17568_s9 + $0x358] sm:$0xff] }
 0xd3a   : > { %7574 = vmatprep.subr.mxu0 %v7517_v35  ;;  %v10568_v35 = vld [vmem:[%s17568_s9 + $0x350] sm:$0xff] }
 0xd3b   : > { %7575 = vmatpush1.msra.mxu0 %v7516_v29  ;;  %v10565_v29 = vld [vmem:[%s17568_s9 + $0x338] sm:$0xff] }
 0xd3c   : > { %7576 = vmatprep.subr.mxu0 %v7513_v51  ;;  %v10564_v51 = vld [vmem:[%s17568_s9 + $0x330] sm:$0xff] }
 0xd3d   : > { %7577 = vmatpush1.msra.mxu0 %v7512_v46  ;;  %v10561_v46 = vld [vmem:[%s17568_s9 + $0x318] sm:$0xff] }
 0xd3e   : > { %7578 = vmatprep.subr.mxu0 %v7509_v21  ;;  %v10560_v21 = vld [vmem:[%s17568_s9 + $0x310] sm:$0xff] }
 0xd3f   : > { %7579 = vmatpush1.msra.mxu0 %v7508_v62  ;;  %v10557_v62 = vld [vmem:[%s17568_s9 + $0x2f8] sm:$0xff] }
 0xd40   : > { %7580 = vmatprep.subr.mxu0 %v7505_v23  ;;  %v10556_v23 = vld [vmem:[%s17568_s9 + $0x2f0] sm:$0xff] }
 0xd41   : > { %7581 = vmatpush1.msra.mxu0 %v7504_v60  ;;  %v10553_v60 = vld [vmem:[%s17568_s9 + $0x2d8] sm:$0xff] }
 0xd42   : > { %7582 = vmatprep.subr.mxu0 %v7501_v15  ;;  %v10552_v15 = vld [vmem:[%s17568_s9 + $0x2d0] sm:$0xff] }
 0xd43   : > { %7583 = vmatpush1.msra.mxu0 %v7500_v38  ;;  %v10549_v38 = vld [vmem:[%s17568_s9 + $0x2b8] sm:$0xff] }
 0xd44   : > { %7584 = vmatprep.subr.mxu0 %v7497_v28  ;;  %v10548_v28 = vld [vmem:[%s17568_s9 + $0x2b0] sm:$0xff] }
 0xd45   : > { %7585 = vmatpush1.msra.mxu0 %v7496_v10  ;;  %v10545_v10 = vld [vmem:[%s17568_s9 + $0x298] sm:$0xff] }
 0xd46   : > { %7586 = vmatprep.subr.mxu0 %v7493_v56  ;;  %v10544_v56 = vld [vmem:[%s17568_s9 + $0x290] sm:$0xff] }
 0xd47   : > { %7587 = vmatpush1.msra.mxu0 %v7492_v61  ;;  %v10541_v61 = vld [vmem:[%s17568_s9 + $0x278] sm:$0xff] }
 0xd48   : > { %7796 = vmatprep.subr.mxu0 %v10587_v52  ;;  %v10540_v52 = vld [vmem:[%s17568_s9 + $0x270] sm:$0xff] }
 0xde8   : > { %v11743_v0 = vpop.f32.mrf.mxu0 }
 0xde9   : > { %v7178_v39 = vadd.f32 %v11743_v0, %v7002_v40 }
 0xdea   : > { %v7168_v16 = vpop.f32.mrf.mxu0 }
 0xdeb   : > { %v7187_v50 = vadd.f32 %v10521_v22, %v7178_v39  ;;  %v7177_v13 = vadd.f32 %v7168_v16, %v7001_v43 }
 0xded   : > { %v7186_v4 = vadd.f32 %v10521_v22, %v7177_v13  ;;  %11745 = vmatpush3.msra.mxu1 %v7187_v50 }
 0xdee   : > { %11746 = vmatprep.subr.mxu1 %v17649_v11 }
 0xdef   : > { %11747 = vmatpush3.msra.mxu1 %v7186_v4 }
 0xdf0   : > { %11749 = vmatmul.mubr.msk.f32.vlgmr.msra.gmra.mxu1 %vm5122_vm4, %v7188_v9  ;;  %11751 = vmatprep.subr.mxu1 %v17649_v11 }
 0xdf1   : > { %11752 = vmatpush3.msra.mxu1 %v7187_v50  ;;  %11755 = vmatprep.mubr.msk.f32.mxu1 %vm12454_vm7, %v17649_v11 }
 0xdf2   : > { %11753 = vmatprep.subr.mxu1 %v17649_v11 }
 0xdf3   : > { %11754 = vmatpush3.msra.mxu1 %v7186_v4 }
 0xdf4   : > { %11756 = vmatmul.mubr.msk.f32.vlgmr.msra.gmra.mxu1 %vm5122_vm4, %v7263_v37  ;;  %11758 = vmatprep.subr.mxu1 %v17649_v11 }
 0xdf5   : > { %11759 = vmatpush3.msra.mxu1 %v7187_v50  ;;  %11762 = vmatprep.mubr.msk.f32.mxu1 %vm12454_vm7, %v17649_v11 }
 0xdf6   : > { %11760 = vmatprep.subr.mxu1 %v17649_v11 }
 0xdf7   : > { %11761 = vmatpush3.msra.mxu1 %v7186_v4 }
 0xdf8   : > { %11763 = vmatmul.mubr.msk.f32.vlgmr.msra.gmra.mxu1 %vm5122_vm4, %v7339_v32  ;;  %11765 = vmatprep.subr.mxu1 %v17649_v11 }
 0xdf9   : > { %11766 = vmatpush3.msra.mxu1 %v7187_v50  ;;  %11769 = vmatprep.mubr.msk.f32.mxu1 %vm12454_vm7, %v17649_v11 }
 0xdfa   : > { %11767 = vmatprep.subr.mxu1 %v17649_v11 }
 0xdfb   : > { %11768 = vmatpush3.msra.mxu1 %v7186_v4 }
 0xdfc   : > { %11770 = vmatmul.mubr.msk.f32.vlgmr.msra.gmra.mxu1 %vm5122_vm4, %v7415_v48  ;;  %7627 = vmatprep.subr.mxu1 %v7555_v63  ;;  %v10586_v48 = vld [vmem:[%s17568_s9 + $0x3e0] sm:$0xff]  ;;  %v10588_v63 = vld [vmem:[%s17568_s9 + $0x3f0] sm:$0xff] }
 0xdfd   : > { %7628 = vmatpush1.msra.mxu1 %v7554_v26  ;;  %7691 = vmatprep.mubr.f32.mxu1 %v17649_v11  ;;  %v10583_v26 = vld [vmem:[%s17568_s9 + $0x3c8] sm:$0xff] }
 0xdfe   : > { %7629 = vmatprep.subr.mxu1 %v7551_v27  ;;  %v10585_v27 = vld [vmem:[%s17568_s9 + $0x3d8] sm:$0xff] }
 0xdff   : > { %7630 = vmatpush1.msra.mxu1 %v7550_v8  ;;  %v10582_v8 = vld [vmem:[%s17568_s9 + $0x3c0] sm:$0xff] }
 0xe00   : > { %7631 = vmatprep.subr.mxu1 %v7547_v57  ;;  %v10584_v57 = vld [vmem:[%s17568_s9 + $0x3d0] sm:$0xff] }
 0xe01   : > { %7632 = vmatpush1.msra.mxu1 %v7546_v45  ;;  %v10579_v45 = vld [vmem:[%s17568_s9 + $0x3a8] sm:$0xff] }
 0xe02   : > { %7633 = vmatprep.subr.mxu1 %v7543_v2  ;;  %v10581_v2 = vld [vmem:[%s17568_s9 + $0x3b8] sm:$0xff] }
 0xe03   : > { %7634 = vmatpush1.msra.mxu1 %v7542_v24  ;;  %v10578_v24 = vld [vmem:[%s17568_s9 + $0x3a0] sm:$0xff] }
 0xe04   : > { %7635 = vmatprep.subr.mxu1 %v7539_v53  ;;  %v10580_v53 = vld [vmem:[%s17568_s9 + $0x3b0] sm:$0xff] }
 0xe05   : > { %7636 = vmatpush1.msra.mxu1 %v7538_v34  ;;  %v10575_v34 = vld [vmem:[%s17568_s9 + $0x388] sm:$0xff] }
 0xe06   : > { %7637 = vmatprep.subr.mxu1 %v7535_v44  ;;  %v10577_v44 = vld [vmem:[%s17568_s9 + $0x398] sm:$0xff] }
 0xe07   : > { %7638 = vmatpush1.msra.mxu1 %v7534_v58  ;;  %v10574_v58 = vld [vmem:[%s17568_s9 + $0x380] sm:$0xff] }
 0xe08   : > { %7639 = vmatprep.subr.mxu1 %v7531_v20  ;;  %v10576_v20 = vld [vmem:[%s17568_s9 + $0x390] sm:$0xff] }
 0xe09   : > { %7640 = vmatpush1.msra.mxu1 %v7530_v31  ;;  %v10571_v31 = vld [vmem:[%s17568_s9 + $0x368] sm:$0xff] }
 0xe0a   : > { %7641 = vmatprep.subr.mxu1 %v7527_v19  ;;  %v10573_v19 = vld [vmem:[%s17568_s9 + $0x378] sm:$0xff] }
 0xe0b   : > { %7642 = vmatpush1.msra.mxu1 %v7526_v17  ;;  %v10570_v17 = vld [vmem:[%s17568_s9 + $0x360] sm:$0xff] }
 0xe0c   : > { %7643 = vmatprep.subr.mxu1 %v7523_v7  ;;  %v10567_v7 = vld [vmem:[%s17568_s9 + $0x348] sm:$0xff] }
 0xe0d   : > { %7644 = vmatpush1.msra.mxu1 %v7522_v12  ;;  %v10566_v12 = vld [vmem:[%s17568_s9 + $0x340] sm:$0xff] }
 0xe0e   : > { %7645 = vmatprep.subr.mxu1 %v7519_v55  ;;  %v10563_v55 = vld [vmem:[%s17568_s9 + $0x328] sm:$0xff] }
 0xe0f   : > { %7646 = vmatpush1.msra.mxu1 %v7518_v3  ;;  %v10562_v3 = vld [vmem:[%s17568_s9 + $0x320] sm:$0xff] }
 0xe10   : > { %7647 = vmatprep.subr.mxu1 %v7515_v14  ;;  %v10559_v14 = vld [vmem:[%s17568_s9 + $0x308] sm:$0xff] }
 0xe11   : > { %7648 = vmatpush1.msra.mxu1 %v7514_v1  ;;  %v10558_v1 = vld [vmem:[%s17568_s9 + $0x300] sm:$0xff] }
 0xe12   : > { %7649 = vmatprep.subr.mxu1 %v7511_v42  ;;  %v10555_v42 = vld [vmem:[%s17568_s9 + $0x2e8] sm:$0xff] }
 0xe13   : > { %7650 = vmatpush1.msra.mxu1 %v7510_v49  ;;  %v10554_v49 = vld [vmem:[%s17568_s9 + $0x2e0] sm:$0xff] }
 0xe14   : > { %7651 = vmatprep.subr.mxu1 %v7507_v6  ;;  %v10551_v6 = vld [vmem:[%s17568_s9 + $0x2c8] sm:$0xff] }
 0xe15   : > { %7652 = vmatpush1.msra.mxu1 %v7506_v33  ;;  %v10550_v33 = vld [vmem:[%s17568_s9 + $0x2c0] sm:$0xff] }
 0xe16   : > { %7653 = vmatprep.subr.mxu1 %v7503_v25  ;;  %v10547_v25 = vld [vmem:[%s17568_s9 + $0x2a8] sm:$0xff] }
 0xe17   : > { %7654 = vmatpush1.msra.mxu1 %v7502_v30  ;;  %v10546_v30 = vld [vmem:[%s17568_s9 + $0x2a0] sm:$0xff] }
 0xe18   : > { %7655 = vmatprep.subr.mxu1 %v7499_v41  ;;  %v10543_v41 = vld [vmem:[%s17568_s9 + $0x288] sm:$0xff] }
 0xe19   : > { %7656 = vmatpush1.msra.mxu1 %v7498_v47  ;;  %v10542_v47 = vld [vmem:[%s17568_s9 + $0x280] sm:$0xff] }
 0xe1a   : > { %7657 = vmatprep.subr.mxu1 %v7495_v54  ;;  %v10539_v54 = vld [vmem:[%s17568_s9 + $0x268] sm:$0xff] }
 0xe1b   : > { %7658 = vmatpush1.msra.mxu1 %v7494_v59  ;;  %v10538_v59 = vld [vmem:[%s17568_s9 + $0x260] sm:$0xff] }
 0xe1c   : > { %7867 = vmatprep.subr.mxu1 %v10589_v18  ;;  %v10535_v18 = vld [vmem:[%s17568_s9 + $0x248] sm:$0xff] }
 0xeb0   : > { %v7258_v40 = vpop.f32.mrf.mxu1 }
 0xeb2   : > { %v11750_v0 = vpop.f32.mrf.mxu1 }
 0xeb3   : > { %v10534_v0 = vld [vmem:[%s17568_s9 + $0x240] sm:$0xff] }
 0xeb4   : > { %v7333_v22 = vpop.f32.mrf.mxu1 }
 0xeb5   : > { %v7337_v16 = vmax.f32 %v7258_v40, %v7333_v22  ;;  %v10537_v40 = vld [vmem:[%s17568_s9 + $0x258] sm:$0xff]  ;;  %v10536_v22 = vld [vmem:[%s17568_s9 + $0x250] sm:$0xff] }
 0xeb6   : > { %v11757_v43 = vpop.f32.mrf.mxu1 }
 0xeb7   : > { %v10531_v43 = vld [vmem:[%s17568_s9 + $0x228] sm:$0xff] }
 0xeb8   : > { %v7409_v39 = vpop.f32.mrf.mxu1 }
 0xeb9   : > { %v7413_v13 = vmax.f32 %v7337_v16, %v7409_v39  ;;  %v10533_v39 = vld [vmem:[%s17568_s9 + $0x238] sm:$0xff]  ;;  %v10530_v16 = vld [vmem:[%s17568_s9 + $0x220] sm:$0xff] }
 0xeba   : > { %v11764_v50 = vpop.f32.mrf.mxu1 }
 0xebb   : > { %v10532_v50 = vld [vmem:[%s17568_s9 + $0x230] sm:$0xff] }
 0xebc   : > { %v7485_v4 = vpop.f32.mrf.mxu1 }
 0xebd   : > { %v7489_v9 = vmax.f32 %v7413_v13, %v7485_v4  ;;  %v10527_v13 = vld [vmem:[%s17568_s9 + $0x208] sm:$0xff]  ;;  %v10529_v4 = vld [vmem:[%s17568_s9 + $0x218] sm:$0xff] }
 0xebe   : > { %v11771_v37 = vpop.f32.mrf.mxu1 }
 0xebf   : > { %v16183_v32 = vmax.f32 %v7489_v9, 0.0  ;;  %v10526_v9 = vld [vmem:[%s17568_s9 + $0x200] sm:$0xff]  ;;  %v10528_v37 = vld [vmem:[%s17568_s9 + $0x210] sm:$0xff] }
 0xec1   : > { %7621 = vmatmul.mubr.f32.vlgmr.msra.gmra.mxu0 %v16183_v32  ;;  %7692 = vmatmul.mubr.f32.vlgmr.msra.gmra.mxu1 %v16183_v32 }
 0xec2   : > { %7797 = vmatpush1.msra.mxu0 %v10586_v48  ;;  %7868 = vmatpush1.msra.mxu1 %v10588_v63  ;;  %v7794_v48 = vrot.slane %v16183_v32, 1  ;;  %v10651_v63 = vld [vmem:[%s17568_s9 + $0x5e8] sm:$0xff] }
 0xec3   : > { %7798 = vmatprep.subr.mxu0 %v10583_v26  ;;  %7869 = vmatprep.subr.mxu1 %v10585_v27  ;;  %v10653_v26 = vld [vmem:[%s17568_s9 + $0x5f8] sm:$0xff]  ;;  %v10650_v27 = vld [vmem:[%s17568_s9 + $0x5e0] sm:$0xff] }
 0xec4   : > { %7799 = vmatpush1.msra.mxu0 %v10582_v8  ;;  %7870 = vmatpush1.msra.mxu1 %v10584_v57  ;;  %v10652_v8 = vld [vmem:[%s17568_s9 + $0x5f0] sm:$0xff]  ;;  %v10647_v57 = vld [vmem:[%s17568_s9 + $0x5c8] sm:$0xff] }
 0xec5   : > { %7800 = vmatprep.subr.mxu0 %v10579_v45  ;;  %7871 = vmatprep.subr.mxu1 %v10581_v2  ;;  %v10649_v45 = vld [vmem:[%s17568_s9 + $0x5d8] sm:$0xff]  ;;  %v10646_v2 = vld [vmem:[%s17568_s9 + $0x5c0] sm:$0xff] }
 0xec6   : > { %7801 = vmatpush1.msra.mxu0 %v10578_v24  ;;  %7872 = vmatpush1.msra.mxu1 %v10580_v53  ;;  %v10648_v24 = vld [vmem:[%s17568_s9 + $0x5d0] sm:$0xff]  ;;  %v10643_v53 = vld [vmem:[%s17568_s9 + $0x5a8] sm:$0xff] }
 0xec7   : > { %7802 = vmatprep.subr.mxu0 %v10575_v34  ;;  %7873 = vmatprep.subr.mxu1 %v10577_v44  ;;  %v10645_v34 = vld [vmem:[%s17568_s9 + $0x5b8] sm:$0xff]  ;;  %v10642_v44 = vld [vmem:[%s17568_s9 + $0x5a0] sm:$0xff] }
 0xec8   : > { %7803 = vmatpush1.msra.mxu0 %v10574_v58  ;;  %7874 = vmatpush1.msra.mxu1 %v10576_v20  ;;  %v10644_v58 = vld [vmem:[%s17568_s9 + $0x5b0] sm:$0xff]  ;;  %v10639_v20 = vld [vmem:[%s17568_s9 + $0x588] sm:$0xff] }
 0xec9   : > { %7804 = vmatprep.subr.mxu0 %v10571_v31  ;;  %7875 = vmatprep.subr.mxu1 %v10573_v19  ;;  %v10641_v31 = vld [vmem:[%s17568_s9 + $0x598] sm:$0xff]  ;;  %v10638_v19 = vld [vmem:[%s17568_s9 + $0x580] sm:$0xff] }
 0xeca   : > { %7805 = vmatpush1.msra.mxu0 %v10570_v17  ;;  %7876 = vmatpush1.msra.mxu1 %v10572_v36  ;;  %v10640_v17 = vld [vmem:[%s17568_s9 + $0x590] sm:$0xff]  ;;  %v10635_v36 = vld [vmem:[%s17568_s9 + $0x568] sm:$0xff] }
 0xecb   : > { %7806 = vmatprep.subr.mxu0 %v10567_v7  ;;  %7877 = vmatprep.subr.mxu1 %v10569_v5  ;;  %v10637_v7 = vld [vmem:[%s17568_s9 + $0x578] sm:$0xff]  ;;  %v10634_v5 = vld [vmem:[%s17568_s9 + $0x560] sm:$0xff] }
 0xecc   : > { %7807 = vmatpush1.msra.mxu0 %v10566_v12  ;;  %7878 = vmatpush1.msra.mxu1 %v10568_v35  ;;  %v10636_v12 = vld [vmem:[%s17568_s9 + $0x570] sm:$0xff]  ;;  %v10631_v35 = vld [vmem:[%s17568_s9 + $0x548] sm:$0xff] }
 0xecd   : > { %7808 = vmatprep.subr.mxu0 %v10563_v55  ;;  %7879 = vmatprep.subr.mxu1 %v10565_v29  ;;  %v10633_v55 = vld [vmem:[%s17568_s9 + $0x558] sm:$0xff]  ;;  %v10630_v29 = vld [vmem:[%s17568_s9 + $0x540] sm:$0xff] }
 0xece   : > { %7809 = vmatpush1.msra.mxu0 %v10562_v3  ;;  %7880 = vmatpush1.msra.mxu1 %v10564_v51  ;;  %v10632_v3 = vld [vmem:[%s17568_s9 + $0x550] sm:$0xff]  ;;  %v10627_v51 = vld [vmem:[%s17568_s9 + $0x528] sm:$0xff] }
 0xecf   : > { %7810 = vmatprep.subr.mxu0 %v10559_v14  ;;  %7881 = vmatprep.subr.mxu1 %v10561_v46  ;;  %v10629_v14 = vld [vmem:[%s17568_s9 + $0x538] sm:$0xff]  ;;  %v10626_v46 = vld [vmem:[%s17568_s9 + $0x520] sm:$0xff] }
 0xed0   : > { %7811 = vmatpush1.msra.mxu0 %v10558_v1  ;;  %7882 = vmatpush1.msra.mxu1 %v10560_v21  ;;  %v10628_v1 = vld [vmem:[%s17568_s9 + $0x530] sm:$0xff]  ;;  %v10623_v21 = vld [vmem:[%s17568_s9 + $0x508] sm:$0xff] }
 0xed1   : > { %7812 = vmatprep.subr.mxu0 %v10555_v42  ;;  %7883 = vmatprep.subr.mxu1 %v10557_v62  ;;  %v10625_v42 = vld [vmem:[%s17568_s9 + $0x518] sm:$0xff]  ;;  %v10622_v62 = vld [vmem:[%s17568_s9 + $0x500] sm:$0xff] }
 0xed2   : > { %7813 = vmatpush1.msra.mxu0 %v10554_v49  ;;  %7884 = vmatpush1.msra.mxu1 %v10556_v23  ;;  %v10624_v49 = vld [vmem:[%s17568_s9 + $0x510] sm:$0xff]  ;;  %v10619_v23 = vld [vmem:[%s17568_s9 + $0x4e8] sm:$0xff] }
 0xed3   : > { %7814 = vmatprep.subr.mxu0 %v10551_v6  ;;  %7885 = vmatprep.subr.mxu1 %v10553_v60  ;;  %v10621_v6 = vld [vmem:[%s17568_s9 + $0x4f8] sm:$0xff]  ;;  %v10618_v60 = vld [vmem:[%s17568_s9 + $0x4e0] sm:$0xff] }
 0xed4   : > { %7815 = vmatpush1.msra.mxu0 %v10550_v33  ;;  %7886 = vmatpush1.msra.mxu1 %v10552_v15  ;;  %v10620_v33 = vld [vmem:[%s17568_s9 + $0x4f0] sm:$0xff]  ;;  %v10615_v15 = vld [vmem:[%s17568_s9 + $0x4c8] sm:$0xff] }
 0xed5   : > { %7816 = vmatprep.subr.mxu0 %v10547_v25  ;;  %7887 = vmatprep.subr.mxu1 %v10549_v38  ;;  %v10617_v25 = vld [vmem:[%s17568_s9 + $0x4d8] sm:$0xff]  ;;  %v10614_v38 = vld [vmem:[%s17568_s9 + $0x4c0] sm:$0xff] }
 0xed6   : > { %7817 = vmatpush1.msra.mxu0 %v10546_v30  ;;  %7888 = vmatpush1.msra.mxu1 %v10548_v28  ;;  %v10616_v30 = vld [vmem:[%s17568_s9 + $0x4d0] sm:$0xff]  ;;  %v10611_v28 = vld [vmem:[%s17568_s9 + $0x4a8] sm:$0xff] }
 0xed7   : > { %7818 = vmatprep.subr.mxu0 %v10543_v41  ;;  %7889 = vmatprep.subr.mxu1 %v10545_v10  ;;  %v10613_v41 = vld [vmem:[%s17568_s9 + $0x4b8] sm:$0xff]  ;;  %v10610_v10 = vld [vmem:[%s17568_s9 + $0x4a0] sm:$0xff] }
 0xed8   : > { %7819 = vmatpush1.msra.mxu0 %v10542_v47  ;;  %7890 = vmatpush1.msra.mxu1 %v10544_v56  ;;  %v10612_v47 = vld [vmem:[%s17568_s9 + $0x4b0] sm:$0xff]  ;;  %v10607_v56 = vld [vmem:[%s17568_s9 + $0x488] sm:$0xff] }
 0xed9   : > { %7820 = vmatprep.subr.mxu0 %v10539_v54  ;;  %7891 = vmatprep.subr.mxu1 %v10541_v61  ;;  %v10609_v54 = vld [vmem:[%s17568_s9 + $0x498] sm:$0xff]  ;;  %v10606_v61 = vld [vmem:[%s17568_s9 + $0x480] sm:$0xff] }
 0xeda   : > { %7821 = vmatpush1.msra.mxu0 %v10538_v59  ;;  %7892 = vmatpush1.msra.mxu1 %v10540_v52  ;;  %v10608_v59 = vld [vmem:[%s17568_s9 + $0x490] sm:$0xff]  ;;  %v10603_v52 = vld [vmem:[%s17568_s9 + $0x468] sm:$0xff] }
 0xedb   : > { %7822 = vmatprep.subr.mxu0 %v10535_v18  ;;  %7893 = vmatprep.subr.mxu1 %v10537_v40  ;;  %v10605_v18 = vld [vmem:[%s17568_s9 + $0x478] sm:$0xff]  ;;  %v10602_v40 = vld [vmem:[%s17568_s9 + $0x460] sm:$0xff] }
 0xedc   : > { %7823 = vmatpush1.msra.mxu0 %v10534_v0  ;;  %7894 = vmatpush1.msra.mxu1 %v10536_v22  ;;  %v10604_v0 = vld [vmem:[%s17568_s9 + $0x470] sm:$0xff]  ;;  %v10599_v22 = vld [vmem:[%s17568_s9 + $0x448] sm:$0xff] }
 0xedd   : > { %7824 = vmatprep.subr.mxu0 %v10531_v43  ;;  %7895 = vmatprep.subr.mxu1 %v10533_v39  ;;  %v10601_v43 = vld [vmem:[%s17568_s9 + $0x458] sm:$0xff]  ;;  %v10598_v39 = vld [vmem:[%s17568_s9 + $0x440] sm:$0xff] }
 0xede   : > { %7825 = vmatpush1.msra.mxu0 %v10530_v16  ;;  %7896 = vmatpush1.msra.mxu1 %v10532_v50  ;;  %v10600_v16 = vld [vmem:[%s17568_s9 + $0x450] sm:$0xff]  ;;  %v10595_v50 = vld [vmem:[%s17568_s9 + $0x428] sm:$0xff] }
 0xedf   : > { %7826 = vmatprep.subr.mxu0 %v10527_v13  ;;  %7897 = vmatprep.subr.mxu1 %v10529_v4  ;;  %v10597_v13 = vld [vmem:[%s17568_s9 + $0x438] sm:$0xff]  ;;  %v10594_v4 = vld [vmem:[%s17568_s9 + $0x420] sm:$0xff] }
 0xee0   : > { %7827 = vmatpush1.msra.mxu0 %v10526_v9  ;;  %7860 = vmatprep.mubr.f32.mxu0 %v17649_v11  ;;  %v10596_v9 = vld [vmem:[%s17568_s9 + $0x430] sm:$0xff] }
 0xee1   : > { %7898 = vmatpush1.msra.mxu1 %v10528_v37  ;;  %7931 = vmatprep.mubr.f32.mxu1 %v17649_v11  ;;  %v10591_v37 = vld [vmem:[%s17568_s9 + $0x408] sm:$0xff] }
 0xee2   : > { %7861 = vmatmul.mubr.f32.vlgmr.msra.gmra.mxu0 %v7794_v48  ;;  %7932 = vmatmul.mubr.f32.vlgmr.msra.gmra.mxu1 %v7794_v48  ;;  %v10593_v48 = vld [vmem:[%s17568_s9 + $0x418] sm:$0xff] }
 0xee3   : > { %8035 = vmatprep.subr.mxu0 %v10651_v63  ;;  %8106 = vmatprep.subr.mxu1 %v10653_v26  ;;  %v10590_v63 = vld [vmem:[%s17568_s9 + $0x400] sm:$0xff]  ;;  %v10592_v26 = vld [vmem:[%s17568_s9 + $0x410] sm:$0xff] }
 0xee4   : > { %8036 = vmatpush1.msra.mxu0 %v10650_v27  ;;  %8107 = vmatpush1.msra.mxu1 %v10652_v8  ;;  %v8033_v27 = vrot.slane %v16183_v32, 2  ;;  %v10715_v8 = vld [vmem:[%s17568_s9 + $0x7e8] sm:$0xff] }
 0xee5   : > { %8037 = vmatprep.subr.mxu0 %v10647_v57  ;;  %8108 = vmatprep.subr.mxu1 %v10649_v45  ;;  %v10717_v57 = vld [vmem:[%s17568_s9 + $0x7f8] sm:$0xff]  ;;  %v10714_v45 = vld [vmem:[%s17568_s9 + $0x7e0] sm:$0xff] }
 0xee6   : > { %8038 = vmatpush1.msra.mxu0 %v10646_v2  ;;  %8109 = vmatpush1.msra.mxu1 %v10648_v24  ;;  %v10716_v2 = vld [vmem:[%s17568_s9 + $0x7f0] sm:$0xff]  ;;  %v10711_v24 = vld [vmem:[%s17568_s9 + $0x7c8] sm:$0xff] }
 0xee7   : > { %8039 = vmatprep.subr.mxu0 %v10643_v53  ;;  %8110 = vmatprep.subr.mxu1 %v10645_v34  ;;  %v10713_v53 = vld [vmem:[%s17568_s9 + $0x7d8] sm:$0xff]  ;;  %v10710_v34 = vld [vmem:[%s17568_s9 + $0x7c0] sm:$0xff] }
 0xee8   : > { %8040 = vmatpush1.msra.mxu0 %v10642_v44  ;;  %8111 = vmatpush1.msra.mxu1 %v10644_v58  ;;  %v10712_v44 = vld [vmem:[%s17568_s9 + $0x7d0] sm:$0xff]  ;;  %v10707_v58 = vld [vmem:[%s17568_s9 + $0x7a8] sm:$0xff] }
 0xee9   : > { %8041 = vmatprep.subr.mxu0 %v10639_v20  ;;  %8112 = vmatprep.subr.mxu1 %v10641_v31  ;;  %v10709_v20 = vld [vmem:[%s17568_s9 + $0x7b8] sm:$0xff]  ;;  %v10706_v31 = vld [vmem:[%s17568_s9 + $0x7a0] sm:$0xff] }
 0xeea   : > { %8042 = vmatpush1.msra.mxu0 %v10638_v19  ;;  %8113 = vmatpush1.msra.mxu1 %v10640_v17  ;;  %v10708_v19 = vld [vmem:[%s17568_s9 + $0x7b0] sm:$0xff]  ;;  %v10703_v17 = vld [vmem:[%s17568_s9 + $0x788] sm:$0xff] }
 0xeeb   : > { %8043 = vmatprep.subr.mxu0 %v10635_v36  ;;  %8114 = vmatprep.subr.mxu1 %v10637_v7  ;;  %v10705_v36 = vld [vmem:[%s17568_s9 + $0x798] sm:$0xff]  ;;  %v10702_v7 = vld [vmem:[%s17568_s9 + $0x780] sm:$0xff] }
 0xeec   : > { %8044 = vmatpush1.msra.mxu0 %v10634_v5  ;;  %8115 = vmatpush1.msra.mxu1 %v10636_v12  ;;  %v10704_v5 = vld [vmem:[%s17568_s9 + $0x790] sm:$0xff]  ;;  %v10699_v12 = vld [vmem:[%s17568_s9 + $0x768] sm:$0xff] }
 0xeed   : > { %8045 = vmatprep.subr.mxu0 %v10631_v35  ;;  %8116 = vmatprep.subr.mxu1 %v10633_v55  ;;  %v10701_v35 = vld [vmem:[%s17568_s9 + $0x778] sm:$0xff]  ;;  %v10698_v55 = vld [vmem:[%s17568_s9 + $0x760] sm:$0xff] }
 0xeee   : > { %8046 = vmatpush1.msra.mxu0 %v10630_v29  ;;  %8117 = vmatpush1.msra.mxu1 %v10632_v3  ;;  %v10700_v29 = vld [vmem:[%s17568_s9 + $0x770] sm:$0xff]  ;;  %v10695_v3 = vld [vmem:[%s17568_s9 + $0x748] sm:$0xff] }
 0xeef   : > { %8047 = vmatprep.subr.mxu0 %v10627_v51  ;;  %8118 = vmatprep.subr.mxu1 %v10629_v14  ;;  %v10697_v51 = vld [vmem:[%s17568_s9 + $0x758] sm:$0xff]  ;;  %v10694_v14 = vld [vmem:[%s17568_s9 + $0x740] sm:$0xff] }
 0xef0   : > { %8048 = vmatpush1.msra.mxu0 %v10626_v46  ;;  %8119 = vmatpush1.msra.mxu1 %v10628_v1  ;;  %v10696_v46 = vld [vmem:[%s17568_s9 + $0x750] sm:$0xff]  ;;  %v10691_v1 = vld [vmem:[%s17568_s9 + $0x728] sm:$0xff] }
 0xef1   : > { %8049 = vmatprep.subr.mxu0 %v10623_v21  ;;  %8120 = vmatprep.subr.mxu1 %v10625_v42  ;;  %v10693_v21 = vld [vmem:[%s17568_s9 + $0x738] sm:$0xff]  ;;  %v10690_v42 = vld [vmem:[%s17568_s9 + $0x720] sm:$0xff] }
 0xef2   : > { %8050 = vmatpush1.msra.mxu0 %v10622_v62  ;;  %8121 = vmatpush1.msra.mxu1 %v10624_v49  ;;  %v10692_v62 = vld [vmem:[%s17568_s9 + $0x730] sm:$0xff]  ;;  %v10687_v49 = vld [vmem:[%s17568_s9 + $0x708] sm:$0xff] }
 0xef3   : > { %8051 = vmatprep.subr.mxu0 %v10619_v23  ;;  %8122 = vmatprep.subr.mxu1 %v10621_v6  ;;  %v10689_v23 = vld [vmem:[%s17568_s9 + $0x718] sm:$0xff]  ;;  %v10686_v6 = vld [vmem:[%s17568_s9 + $0x700] sm:$0xff] }
 0xef4   : > { %8052 = vmatpush1.msra.mxu0 %v10618_v60  ;;  %8123 = vmatpush1.msra.mxu1 %v10620_v33  ;;  %v10688_v60 = vld [vmem:[%s17568_s9 + $0x710] sm:$0xff]  ;;  %v10683_v33 = vld [vmem:[%s17568_s9 + $0x6e8] sm:$0xff] }
 0xef5   : > { %8053 = vmatprep.subr.mxu0 %v10615_v15  ;;  %8124 = vmatprep.subr.mxu1 %v10617_v25  ;;  %v10685_v15 = vld [vmem:[%s17568_s9 + $0x6f8] sm:$0xff]  ;;  %v10682_v25 = vld [vmem:[%s17568_s9 + $0x6e0] sm:$0xff] }
 0xef6   : > { %8054 = vmatpush1.msra.mxu0 %v10614_v38  ;;  %8125 = vmatpush1.msra.mxu1 %v10616_v30  ;;  %v10684_v38 = vld [vmem:[%s17568_s9 + $0x6f0] sm:$0xff]  ;;  %v10679_v30 = vld [vmem:[%s17568_s9 + $0x6c8] sm:$0xff] }
 0xef7   : > { %8055 = vmatprep.subr.mxu0 %v10611_v28  ;;  %8126 = vmatprep.subr.mxu1 %v10613_v41  ;;  %v10681_v28 = vld [vmem:[%s17568_s9 + $0x6d8] sm:$0xff]  ;;  %v10678_v41 = vld [vmem:[%s17568_s9 + $0x6c0] sm:$0xff] }
 0xef8   : > { %8056 = vmatpush1.msra.mxu0 %v10610_v10  ;;  %8127 = vmatpush1.msra.mxu1 %v10612_v47  ;;  %v10680_v10 = vld [vmem:[%s17568_s9 + $0x6d0] sm:$0xff]  ;;  %v10675_v47 = vld [vmem:[%s17568_s9 + $0x6a8] sm:$0xff] }
 0xef9   : > { %8057 = vmatprep.subr.mxu0 %v10607_v56  ;;  %8128 = vmatprep.subr.mxu1 %v10609_v54  ;;  %v10677_v56 = vld [vmem:[%s17568_s9 + $0x6b8] sm:$0xff]  ;;  %v10674_v54 = vld [vmem:[%s17568_s9 + $0x6a0] sm:$0xff] }
 0xefa   : > { %8058 = vmatpush1.msra.mxu0 %v10606_v61  ;;  %8129 = vmatpush1.msra.mxu1 %v10608_v59  ;;  %v10676_v61 = vld [vmem:[%s17568_s9 + $0x6b0] sm:$0xff]  ;;  %v10671_v59 = vld [vmem:[%s17568_s9 + $0x688] sm:$0xff] }
 0xefb   : > { %8059 = vmatprep.subr.mxu0 %v10603_v52  ;;  %8130 = vmatprep.subr.mxu1 %v10605_v18  ;;  %v10673_v52 = vld [vmem:[%s17568_s9 + $0x698] sm:$0xff]  ;;  %v10670_v18 = vld [vmem:[%s17568_s9 + $0x680] sm:$0xff] }
 0xefc   : > { %8060 = vmatpush1.msra.mxu0 %v10602_v40  ;;  %8131 = vmatpush1.msra.mxu1 %v10604_v0  ;;  %v10672_v40 = vld [vmem:[%s17568_s9 + $0x690] sm:$0xff]  ;;  %v10667_v0 = vld [vmem:[%s17568_s9 + $0x668] sm:$0xff] }
 0xefd   : > { %8061 = vmatprep.subr.mxu0 %v10599_v22  ;;  %8132 = vmatprep.subr.mxu1 %v10601_v43  ;;  %v10669_v22 = vld [vmem:[%s17568_s9 + $0x678] sm:$0xff]  ;;  %v10666_v43 = vld [vmem:[%s17568_s9 + $0x660] sm:$0xff] }
 0xefe   : > { %8062 = vmatpush1.msra.mxu0 %v10598_v39  ;;  %8133 = vmatpush1.msra.mxu1 %v10600_v16  ;;  %v10668_v39 = vld [vmem:[%s17568_s9 + $0x670] sm:$0xff]  ;;  %v10663_v16 = vld [vmem:[%s17568_s9 + $0x648] sm:$0xff] }
 0xeff   : > { %8063 = vmatprep.subr.mxu0 %v10595_v50  ;;  %8134 = vmatprep.subr.mxu1 %v10597_v13  ;;  %v10665_v50 = vld [vmem:[%s17568_s9 + $0x658] sm:$0xff]  ;;  %v10662_v13 = vld [vmem:[%s17568_s9 + $0x640] sm:$0xff] }
 0xf00   : > { %8064 = vmatpush1.msra.mxu0 %v10594_v4  ;;  %8135 = vmatpush1.msra.mxu1 %v10596_v9  ;;  %v10664_v4 = vld [vmem:[%s17568_s9 + $0x650] sm:$0xff]  ;;  %v10659_v9 = vld [vmem:[%s17568_s9 + $0x628] sm:$0xff] }
 0xf01   : > { %8065 = vmatprep.subr.mxu0 %v10591_v37  ;;  %8136 = vmatprep.subr.mxu1 %v10593_v48  ;;  %v10661_v37 = vld [vmem:[%s17568_s9 + $0x638] sm:$0xff]  ;;  %v10658_v48 = vld [vmem:[%s17568_s9 + $0x620] sm:$0xff] }
 0xf02   : > { %8066 = vmatpush1.msra.mxu0 %v10590_v63  ;;  %8099 = vmatprep.mubr.f32.mxu0 %v17649_v11  ;;  %v10660_v63 = vld [vmem:[%s17568_s9 + $0x630] sm:$0xff] }
 0xf03   : > { %8137 = vmatpush1.msra.mxu1 %v10592_v26  ;;  %8170 = vmatprep.mubr.f32.mxu1 %v17649_v11  ;;  %v10655_v26 = vld [vmem:[%s17568_s9 + $0x608] sm:$0xff] }
 0xf04   : > { %8100 = vmatmul.mubr.f32.vlgmr.msra.gmra.mxu0 %v8033_v27  ;;  %8171 = vmatmul.mubr.f32.vlgmr.msra.gmra.mxu1 %v8033_v27  ;;  %v10657_v27 = vld [vmem:[%s17568_s9 + $0x618] sm:$0xff] }
 0xf05   : > { %8274 = vmatprep.subr.mxu0 %v10715_v8  ;;  %8345 = vmatprep.subr.mxu1 %v10717_v57  ;;  %v10654_v8 = vld [vmem:[%s17568_s9 + $0x600] sm:$0xff]  ;;  %v10656_v57 = vld [vmem:[%s17568_s9 + $0x610] sm:$0xff] }
 0xf06   : > { %8275 = vmatpush1.msra.mxu0 %v10714_v45  ;;  %8346 = vmatpush1.msra.mxu1 %v10716_v2  ;;  %v8272_v45 = vrot.slane %v16183_v32, 3  ;;  %v8494_v2 = vld [vmem:[%s17570_s11 + $0x178] sm:$0xff] }
 0xf07   : > { %8276 = vmatprep.subr.mxu0 %v10711_v24  ;;  %8347 = vmatprep.subr.mxu1 %v10713_v53  ;;  %v8493_v24 = vld [vmem:[%s17570_s11 + $0x170] sm:$0xff]  ;;  %v8478_v53 = vld [vmem:[%s17570_s11 + $0xf8] sm:$0xff] }
 0xf08   : > { %8277 = vmatpush1.msra.mxu0 %v10710_v34  ;;  %8348 = vmatpush1.msra.mxu1 %v10712_v44  ;;  %v8462_v32 = vld [vmem:[%s17570_s11 + $0x78] sm:$0xff]  ;;  %v8477_v34 = vld [vmem:[%s17570_s11 + $0xf0] sm:$0xff]  ;;  %v8492_v44 = vld [vmem:[%s17570_s11 + $0x168] sm:$0xff] }
 0xf09   : > { %8278 = vmatprep.subr.mxu0 %v10707_v58  ;;  %8349 = vmatprep.subr.mxu1 %v10709_v20  ;;  %v8461_v58 = vld [vmem:[%s17570_s11 + $0x70] sm:$0xff]  ;;  %v8476_v20 = vld [vmem:[%s17570_s11 + $0xe8] sm:$0xff] }
 0xf0a   : > { %8279 = vmatpush1.msra.mxu0 %v10706_v31  ;;  %8350 = vmatpush1.msra.mxu1 %v10708_v19  ;;  %v8460_v31 = vld [vmem:[%s17570_s11 + $0x68] sm:$0xff]  ;;  %v8491_v19 = vld [vmem:[%s17570_s11 + $0x160] sm:$0xff] }
 0xf0b   : > { %8280 = vmatprep.subr.mxu0 %v10703_v17  ;;  %8351 = vmatprep.subr.mxu1 %v10705_v36  ;;  %v8475_v17 = vld [vmem:[%s17570_s11 + $0xe0] sm:$0xff] }
 0xf0c   : > { %8281 = vmatpush1.msra.mxu0 %v10702_v7  ;;  %8352 = vmatpush1.msra.mxu1 %v10704_v5  ;;  %v8459_v36 = vld [vmem:[%s17570_s11 + $0x60] sm:$0xff]  ;;  %v8490_v7 = vld [vmem:[%s17570_s11 + $0x158] sm:$0xff] }
 0xf0d   : > { %8282 = vmatprep.subr.mxu0 %v10699_v12  ;;  %8353 = vmatprep.subr.mxu1 %v10701_v35  ;;  %v8474_v5 = vld [vmem:[%s17570_s11 + $0xd8] sm:$0xff]  ;;  %v8489_v35 = vld [vmem:[%s17570_s11 + $0x150] sm:$0xff] }
 0xf0e   : > { %8283 = vmatpush1.msra.mxu0 %v10698_v55  ;;  %8354 = vmatpush1.msra.mxu1 %v10700_v29  ;;  %v8458_v12 = vld [vmem:[%s17570_s11 + $0x58] sm:$0xff]  ;;  %v8473_v55 = vld [vmem:[%s17570_s11 + $0xd0] sm:$0xff] }
 0xf0f   : > { %8284 = vmatprep.subr.mxu0 %v10695_v3  ;;  %8355 = vmatprep.subr.mxu1 %v10697_v51  ;;  %v8457_v29 = vld [vmem:[%s17570_s11 + $0x50] sm:$0xff]  ;;  %v8488_v3 = vld [vmem:[%s17570_s11 + $0x148] sm:$0xff] }
 0xf10   : > { %8285 = vmatpush1.msra.mxu0 %v10694_v14  ;;  %8356 = vmatpush1.msra.mxu1 %v10696_v46  ;;  %v8472_v51 = vld [vmem:[%s17570_s11 + $0xc8] sm:$0xff]  ;;  %v8487_v46 = vld [vmem:[%s17570_s11 + $0x140] sm:$0xff] }
 0xf11   : > { %8286 = vmatprep.subr.mxu0 %v10691_v1  ;;  %8357 = vmatprep.subr.mxu1 %v10693_v21  ;;  %v8456_v14 = vld [vmem:[%s17570_s11 + $0x48] sm:$0xff]  ;;  %v8486_v1 = vld [vmem:[%s17570_s11 + $0x138] sm:$0xff]  ;;  %v8471_v21 = vld [vmem:[%s17570_s11 + $0xc0] sm:$0xff] }
 0xf12   : > { %8287 = vmatpush1.msra.mxu0 %v10690_v42  ;;  %8358 = vmatpush1.msra.mxu1 %v10692_v62  ;;  %v8455_v42 = vld [vmem:[%s17570_s11 + $0x40] sm:$0xff]  ;;  %v8485_v62 = vld [vmem:[%s17570_s11 + $0x130] sm:$0xff] }
 0xf13   : > { %8288 = vmatprep.subr.mxu0 %v10687_v49  ;;  %8359 = vmatprep.subr.mxu1 %v10689_v23  ;;  %v8470_v49 = vld [vmem:[%s17570_s11 + $0xb8] sm:$0xff] }
 0xf14   : > { %8289 = vmatpush1.msra.mxu0 %v10686_v6  ;;  %8360 = vmatpush1.msra.mxu1 %v10688_v60  ;;  %v8454_v23 = vld [vmem:[%s17570_s11 + $0x38] sm:$0xff]  ;;  %v8484_v6 = vld [vmem:[%s17570_s11 + $0x128] sm:$0xff]  ;;  %v8469_v60 = vld [vmem:[%s17570_s11 + $0xb0] sm:$0xff] }
 0xf15   : > { %8290 = vmatprep.subr.mxu0 %v10683_v33  ;;  %8361 = vmatprep.subr.mxu1 %v10685_v15  ;;  %v8453_v33 = vld [vmem:[%s17570_s11 + $0x30] sm:$0xff]  ;;  %v8483_v15 = vld [vmem:[%s17570_s11 + $0x120] sm:$0xff] }
 0xf16   : > { %8291 = vmatpush1.msra.mxu0 %v10682_v25  ;;  %8362 = vmatpush1.msra.mxu1 %v10684_v38  ;;  %v8468_v25 = vld [vmem:[%s17570_s11 + $0xa8] sm:$0xff] }
 0xf17   : > { %8292 = vmatprep.subr.mxu0 %v10679_v30  ;;  %8363 = vmatprep.subr.mxu1 %v10681_v28  ;;  %v8452_v38 = vld [vmem:[%s17570_s11 + $0x28] sm:$0xff]  ;;  %v8482_v30 = vld [vmem:[%s17570_s11 + $0x118] sm:$0xff]  ;;  %v8467_v28 = vld [vmem:[%s17570_s11 + $0xa0] sm:$0xff] }
 0xf18   : > { %8293 = vmatpush1.msra.mxu0 %v10678_v41  ;;  %8364 = vmatpush1.msra.mxu1 %v10680_v10  ;;  %v8451_v41 = vld [vmem:[%s17570_s11 + $0x20] sm:$0xff]  ;;  %v8481_v10 = vld [vmem:[%s17570_s11 + $0x110] sm:$0xff] }
 0xf19   : > { %8294 = vmatprep.subr.mxu0 %v10675_v47  ;;  %8365 = vmatprep.subr.mxu1 %v10677_v56  ;;  %v8466_v47 = vld [vmem:[%s17570_s11 + $0x98] sm:$0xff] }
 0xf1a   : > { %8295 = vmatpush1.msra.mxu0 %v10674_v54  ;;  %8366 = vmatpush1.msra.mxu1 %v10676_v61  ;;  %v8450_v56 = vld [vmem:[%s17570_s11 + $0x18] sm:$0xff]  ;;  %v8480_v54 = vld [vmem:[%s17570_s11 + $0x108] sm:$0xff]  ;;  %v8465_v61 = vld [vmem:[%s17570_s11 + $0x90] sm:$0xff] }
 0xf1b   : > { %8296 = vmatprep.subr.mxu0 %v10671_v59  ;;  %8367 = vmatprep.subr.mxu1 %v10673_v52  ;;  %v8449_v59 = vld [vmem:[%s17570_s11 + $0x10] sm:$0xff]  ;;  %v8479_v52 = vld [vmem:[%s17570_s11 + $0x100] sm:$0xff] }
 0xf1c   : > { %8297 = vmatpush1.msra.mxu0 %v10670_v18  ;;  %8368 = vmatpush1.msra.mxu1 %v10672_v40  ;;  %v8464_v18 = vld [vmem:[%s17570_s11 + $0x88] sm:$0xff] }
 0xf1d   : > { %8298 = vmatprep.subr.mxu0 %v10667_v0  ;;  %8369 = vmatprep.subr.mxu1 %v10669_v22  ;;  %v8448_v40 = vld [vmem:[%s17570_s11 + $0x8] sm:$0xff]  ;;  %v8463_v22 = vld [vmem:[%s17570_s11 + $0x80] sm:$0xff] }
 0xf1e   : > { %8299 = vmatpush1.msra.mxu0 %v10666_v43  ;;  %8370 = vmatpush1.msra.mxu1 %v10668_v39  ;;  %v8496_v0 = vld [vmem:[%s17570_s11 + $0x188] sm:$0xff]  ;;  %v8447_v43 = vld [vmem:[%s17570_s11] sm:$0xff] }
 0xf1f   : > { %8300 = vmatprep.subr.mxu0 %v10663_v16  ;;  %8371 = vmatprep.subr.mxu1 %v10665_v50  ;;  %v8495_v39 = vld [vmem:[%s17570_s11 + $0x180] sm:$0xff] }
 0xf20   : > { %8301 = vmatpush1.msra.mxu0 %v10662_v13  ;;  %8372 = vmatpush1.msra.mxu1 %v10664_v4 }
 0xf21   : > { %8302 = vmatprep.subr.mxu0 %v10659_v9  ;;  %8373 = vmatprep.subr.mxu1 %v10661_v37 }
 0xf22   : > { %8303 = vmatpush1.msra.mxu0 %v10658_v48  ;;  %8374 = vmatpush1.msra.mxu1 %v10660_v63  ;;  %v12455_v48 = vmov 1966171168  }
 0xf23   : > { %8304 = vmatprep.subr.mxu0 %v10655_v26  ;;  %8375 = vmatprep.subr.mxu1 %v10657_v27  ;;  %v7705_v63 = vunpack.c.l.s4 %v12455_v48  ;;  %v7707_v26 = vlaneseq  ;;  %v8889_v48 = vld [vmem:[%s17574_s15 + $0x170] sm:$0xff] }
 0xf24   : > { %8305 = vmatpush1.msra.mxu0 %v10654_v8  ;;  %8338 = vmatprep.mubr.f32.mxu0 %v17649_v11 }
 0xf25   : > { %8376 = vmatpush1.msra.mxu1 %v10656_v57  ;;  %8409 = vmatprep.mubr.f32.mxu1 %v17649_v11  ;;  %v7706_v57 = vunpack.c.0.s8 %v7705_v63 }
 0xf26   : > { %8339 = vmatmul.mubr.f32.vlgmr.msra.gmra.mxu0 %v8272_v45  ;;  %8410 = vmatmul.mubr.f32.vlgmr.msra.gmra.mxu1 %v8272_v45  ;;  %v7708_v45 = vshrl.u32 %v7707_v26, 7 }
 0xf27   : > { %8590 = vmatprep.subr.mxu1 %v17649_v11  ;;  %11072 = vmatprep.subr.mxu0 %v8478_v53 }
 0xf28   : > { %8591 = vmatpush1.msra.mxu1 %v8494_v2  ;;  %11073 = vmatpush3.msra.mxu0 %v8462_v32  ;;  %v7709_v32 = vsub.s32 %v7706_v57, %v7708_v45 }
 0xf29   : > { %8592 = vmatprep.subr.mxu1 %v17649_v11  ;;  %11074 = vmatprep.subr.mxu0 %v8477_v34 }
 0xf2a   : > { %8593 = vmatpush1.msra.mxu1 %v8493_v24  ;;  %11075 = vmatpush3.msra.mxu0 %v8461_v58 }
 0xf2b   : > { %8594 = vmatprep.subr.mxu1 %v17649_v11  ;;  %11076 = vmatprep.subr.mxu0 %v8476_v20 }
 0xf2c   : > { %8595 = vmatpush1.msra.mxu1 %v8492_v44  ;;  %11077 = vmatpush3.msra.mxu0 %v8460_v31 }
 0xf2d   : > { %8596 = vmatprep.subr.mxu1 %v17649_v11  ;;  %11078 = vmatprep.subr.mxu0 %v8475_v17 }
 0xf2e   : > { %8597 = vmatpush1.msra.mxu1 %v8491_v19  ;;  %11079 = vmatpush3.msra.mxu0 %v8459_v36 }
 0xf2f   : > { %8598 = vmatprep.subr.mxu1 %v17649_v11  ;;  %11080 = vmatprep.subr.mxu0 %v8474_v5 }
 0xf30   : > { %8599 = vmatpush1.msra.mxu1 %v8490_v7  ;;  %11081 = vmatpush3.msra.mxu0 %v8458_v12 }
 0xf31   : > { %8600 = vmatprep.subr.mxu1 %v17649_v11  ;;  %11082 = vmatprep.subr.mxu0 %v8473_v55 }
 0xf32   : > { %8601 = vmatpush1.msra.mxu1 %v8489_v35  ;;  %11083 = vmatpush3.msra.mxu0 %v8457_v29 }
 0xf33   : > { %8602 = vmatprep.subr.mxu1 %v17649_v11  ;;  %11084 = vmatprep.subr.mxu0 %v8472_v51 }
 0xf34   : > { %8603 = vmatpush1.msra.mxu1 %v8488_v3  ;;  %11085 = vmatpush3.msra.mxu0 %v8456_v14 }
 0xf35   : > { %8604 = vmatprep.subr.mxu1 %v17649_v11  ;;  %11086 = vmatprep.subr.mxu0 %v8471_v21  ;;  %v7491_v21 = vld [vmem:[%s17569_s10] sm:$0xf] }
 0xf36   : > { %8605 = vmatpush1.msra.mxu1 %v8487_v46  ;;  %11087 = vmatpush3.msra.mxu0 %v8455_v42 }
 0xf37   : > { %8606 = vmatprep.subr.mxu1 %v17649_v11  ;;  %11088 = vmatprep.subr.mxu0 %v8470_v49 }
 0xf38   : > { %8607 = vmatpush1.msra.mxu1 %v8486_v1  ;;  %11089 = vmatpush3.msra.mxu0 %v8454_v23 }
 0xf39   : > { %8608 = vmatprep.subr.mxu1 %v17649_v11  ;;  %11090 = vmatprep.subr.mxu0 %v8469_v60 }
 0xf3a   : > { %8609 = vmatpush1.msra.mxu1 %v8485_v62  ;;  %11091 = vmatpush3.msra.mxu0 %v8453_v33 }
 0xf3b   : > { %8610 = vmatprep.subr.mxu1 %v17649_v11  ;;  %11092 = vmatprep.subr.mxu0 %v8468_v25 }
 0xf3c   : > { %8611 = vmatpush1.msra.mxu1 %v8484_v6  ;;  %11093 = vmatpush3.msra.mxu0 %v8452_v38 }
 0xf3d   : > { %8612 = vmatprep.subr.mxu1 %v17649_v11  ;;  %11094 = vmatprep.subr.mxu0 %v8467_v28 }
 0xf3e   : > { %8613 = vmatpush1.msra.mxu1 %v8483_v15  ;;  %11095 = vmatpush3.msra.mxu0 %v8451_v41 }
 0xf3f   : > { %8614 = vmatprep.subr.mxu1 %v17649_v11  ;;  %11096 = vmatprep.subr.mxu0 %v8466_v47 }
 0xf40   : > { %8615 = vmatpush1.msra.mxu1 %v8482_v30  ;;  %11097 = vmatpush3.msra.mxu0 %v8450_v56  ;;  %v8513_v56 = vsub.s32 3, %v7708_v45 }
 0xf41   : > { %8616 = vmatprep.subr.mxu1 %v17649_v11  ;;  %11098 = vmatprep.subr.mxu0 %v8465_v61  ;;  %v16942_v61 = vsub.s32 2, %v7708_v45 }
 0xf42   : > { %8617 = vmatpush1.msra.mxu1 %v8481_v10  ;;  %11099 = vmatpush3.msra.mxu0 %v8449_v59  ;;  %v16938_v10 = vsub.s32 1, %v7708_v45 }
 0xf43   : > { %8618 = vmatprep.subr.mxu1 %v17649_v11  ;;  %11100 = vmatprep.subr.mxu0 %v8464_v18 }
 0xf44   : > { %8619 = vmatpush1.msra.mxu1 %v8480_v54  ;;  %11101 = vmatpush3.msra.mxu0 %v8448_v40  ;;  %v16940_v54 = vsub.s32 0, %v7708_v45 }
 0xf45   : > { %8620 = vmatprep.subr.mxu1 %v17649_v11  ;;  %11102 = vmatprep.subr.mxu0 %v8463_v22  ;;  %v8667_v22 = vld [vmem:[#allocation13 + $0x38] sm:$0xf] }
 0xf46   : > { %8621 = vmatpush1.msra.mxu1 %v8479_v52  ;;  %11103 = vmatpush3.msra.mxu0 %v8447_v43  ;;  %v8666_v43 = vld [vmem:[#allocation13 + $0x30] sm:$0xf] }
 0xf47   : > { %8650 = vmatprep.subr.mxu1 %v17649_v11  ;;  %10719 = vmatprep.subr.msk.mxu0 %vm907_vm1, %v8667_v22  ;;  %v8933_v22 = vld [vmem:[%s17574_s15 + $0x2d0] sm:$0xff] }
 0xf48   : > { %8651 = vmatpush2.msra.mxu1 %v8496_v0 }
 0xf49   : > { %8652 = vmatprep.subr.mxu1 %v17649_v11 }
 0xf4a   : > { %8653 = vmatpush2.msra.mxu1 %v8495_v39  ;;  %v8668_v39 = vld [vmem:[#allocation13 + $0x40] sm:$0xf] }
 0xf4b   : > { %11772 = vmatprep.subr.mxu1 %v17649_v11 }
 0xf81   : > { %v7622_v16 = vpop.f32.mrf.mxu0  ;;  %v7693_v50 = vpop.f32.mrf.mxu1 }
 0xf83   : > { %v7624_v13 = vpop.f32.mrf.mxu0  ;;  %v7695_v4 = vpop.f32.mrf.mxu1 }
 0xf84   : > { %v7702_v53 = vcombine.low %v7622_v16, %v7624_v13  ;;  %v7703_v34 = vcombine.low %v7693_v50, %v7695_v4  ;;  %v8664_v16 = vld [vmem:[#allocation13 + $0x20] sm:$0xff]  ;;  %v8663_v50 = vld [vmem:[#allocation13 + $0x18] sm:$0xff]  ;;  %v8665_v13 = vld [vmem:[#allocation13 + $0x28] sm:$0xff] }
 0xf85   : > { %v8661_v4 = vld [vmem:[#allocation13 + $0x8] sm:$0xff] }
 0xf86   : > { %v7710_v19 = vrot.slane %v7702_v53, %v7709_v32  ;;  %v7717_v17 = vrot.slane %v7703_v34, %v7709_v32  ;;  %v8888_v53 = vld [vmem:[%s17574_s15 + $0x168] sm:$0xff]  ;;  %v8885_v34 = vld [vmem:[%s17574_s15 + $0x150] sm:$0xff] }
 0xf88   : > { %v7718_v35 = vcombine.low %v7710_v19, %v7717_v17  ;;  %v8955_v19 = vld [vmem:[%s17574_s15 + $0x380] sm:$0xf]  ;;  %v8877_v17 = vld [vmem:[%s17574_s15 + $0x110] sm:$0xff] }
 0xf8a   : > { %v7725_v46 = vrot.slane %v7718_v35, %v7709_v32  ;;  %v8874_v35 = vld [vmem:[%s17574_s15 + $0xf8] sm:$0xff] }
 0xf8c   : > { %v7727_v60 = vadd.f32 %v7725_v46, %v7491_v21  ;;  %v8945_v46 = vld [vmem:[%s17574_s15 + $0x330] sm:$0xff]  ;;  %v8868_v21 = vld [vmem:[%s17574_s15 + $0xc8] sm:$0xff] }
 0xfa2   : > { %v7862_v9 = vpop.f32.mrf.mxu0  ;;  %v7933_v37 = vpop.f32.mrf.mxu1 }
 0xfa4   : > { %v7864_v27 = vpop.f32.mrf.mxu0  ;;  %v7935_v8 = vpop.f32.mrf.mxu1 }
 0xfa5   : > { %v7942_v20 = vcombine.low %v7862_v9, %v7864_v27  ;;  %v7943_v31 = vcombine.low %v7933_v37, %v7935_v8  ;;  %v8660_v9 = vld [vmem:[#allocation13] sm:$0xff]  ;;  %v8662_v37 = vld [vmem:[#allocation13 + $0x10] sm:$0xff]  ;;  %v8497_v27 = vld [vmem:[#allocation11] sm:$0x1] }
 0xfa7   : > { %v7950_v5 = vrot.slane %v7942_v20, %v7709_v32  ;;  %v7957_v12 = vrot.slane %v7943_v31, %v7709_v32  ;;  %v8880_v20 = vld [vmem:[%s17574_s15 + $0x128] sm:$0xff]  ;;  %v8879_v31 = vld [vmem:[%s17574_s15 + $0x120] sm:$0xff] }
 0xfa9   : > { %v7958_v3 = vcombine.low %v7950_v5, %v7957_v12  ;;  %v8876_v5 = vld [vmem:[%s17574_s15 + $0x108] sm:$0xff]  ;;  %v8951_v12 = vld [vmem:[%s17574_s15 + $0x360] sm:$0xff] }
 0xfab   : > { %v7965_v49 = vrot.slane %v7958_v3, %v7709_v32  ;;  %v8873_v3 = vld [vmem:[%s17574_s15 + $0xf0] sm:$0xff] }
 0xfad   : > { %v7967_v38 = vadd.f32 %v7965_v49, %v7727_v60  ;;  %v8864_v49 = vld [vmem:[%s17574_s15 + $0xa8] sm:$0xff]  ;;  %v8859_v60 = vld [vmem:[%s17574_s15 + $0x80] sm:$0xff] }
 0xfc4   : > { %v8101_v2 = vpop.f32.mrf.mxu0  ;;  %v8172_v24 = vpop.f32.mrf.mxu1 }
 0xfc6   : > { %v8103_v44 = vpop.f32.mrf.mxu0  ;;  %v8174_v58 = vpop.f32.mrf.mxu1 }
 0xfc7   : > { %v8181_v36 = vcombine.low %v8101_v2, %v8103_v44  ;;  %v8182_v7 = vcombine.low %v8172_v24, %v8174_v58  ;;  %v8883_v44 = vld [vmem:[%s17574_s15 + $0x140] sm:$0xff]  ;;  %v8882_v58 = vld [vmem:[%s17574_s15 + $0x138] sm:$0xff] }
 0xfc9   : > { %v8189_v55 = vrot.slane %v8181_v36, %v7709_v32  ;;  %v8196_v29 = vrot.slane %v8182_v7, %v7709_v32  ;;  %v8954_v36 = vld [vmem:[%s17574_s15 + $0x378] sm:$0xf]  ;;  %v8952_v7 = vld [vmem:[%s17574_s15 + $0x368] sm:$0xff] }
 0xfcb   : > { %v8197_v1 = vcombine.low %v8189_v55, %v8196_v29  ;;  %v8949_v55 = vld [vmem:[%s17574_s15 + $0x350] sm:$0xff]  ;;  %v8948_v29 = vld [vmem:[%s17574_s15 + $0x348] sm:$0xff] }
 0xfcd   : > { %v8204_v33 = vrot.slane %v8197_v1, %v7709_v32  ;;  %v8870_v1 = vld [vmem:[%s17574_s15 + $0xd8] sm:$0xff] }
 0xfcf   : > { %v8206_v28 = vadd.f32 %v8204_v33, %v7967_v38  ;;  %v8858_v33 = vld [vmem:[%s17574_s15 + $0x78] sm:$0xff]  ;;  %v8853_v38 = vld [vmem:[%s17574_s15 + $0x50] sm:$0xff] }
 0xfe6   : > { %v8340_v51 = vpop.f32.mrf.mxu0  ;;  %v8411_v14 = vpop.f32.mrf.mxu1 }
 0xfe8   : > { %v8342_v42 = vpop.f32.mrf.mxu0  ;;  %v8413_v62 = vpop.f32.mrf.mxu1 }
 0xfe9   : > { %v8420_v23 = vcombine.low %v8340_v51, %v8342_v42  ;;  %v8421_v6 = vcombine.low %v8411_v14, %v8413_v62  ;;  %v8946_v51 = vld [vmem:[%s17574_s15 + $0x338] sm:$0xff]  ;;  %v8871_v14 = vld [vmem:[%s17574_s15 + $0xe0] sm:$0xff]  ;;  %v8865_v62 = vld [vmem:[%s17574_s15 + $0xb0] sm:$0xff] }
 0xfea   : > { %v8867_v42 = vld [vmem:[%s17574_s15 + $0xc0] sm:$0xff] }
 0xfeb   : > { %v8428_v15 = vrot.slane %v8420_v23, %v7709_v32  ;;  %v8435_v25 = vrot.slane %v8421_v6, %v7709_v32  ;;  %v8862_v23 = vld [vmem:[%s17574_s15 + $0x98] sm:$0xff]  ;;  %v8861_v6 = vld [vmem:[%s17574_s15 + $0x90] sm:$0xff] }
 0xfed   : > { %v8436_v30 = vcombine.low %v8428_v15, %v8435_v25  ;;  %v8856_v15 = vld [vmem:[%s17574_s15 + $0x68] sm:$0xff]  ;;  %v8855_v25 = vld [vmem:[%s17574_s15 + $0x60] sm:$0xff] }
 0xfef   : > { %v8443_v41 = vrot.slane %v8436_v30, %v7709_v32  ;;  %v8886_v32 = vld [vmem:[%s17574_s15 + $0x158] sm:$0xff]  ;;  %v8852_v30 = vld [vmem:[%s17574_s15 + $0x48] sm:$0xff] }
 0xff1   : > { %v8445_v47 = vadd.f32 %v8443_v41, %v8206_v28  ;;  %v8850_v28 = vld [vmem:[%s17574_s15 + $0x38] sm:$0xff]  ;;  %v8849_v41 = vld [vmem:[%s17574_s15 + $0x30] sm:$0xff] }
 0xff3   : > { %v8446_v59 = vmax.f32 %v8445_v47, 0.0  ;;  %v8847_v47 = vld [vmem:[%s17574_s15 + $0x20] sm:$0xff] }
 0xff5   : > { %v8506_v52 = vrot.slane %v8446_v59, %v16938_v10  ;;  %v8514_v18 = vrot.slane %v8446_v59, %v8513_v56  ;;  %v8502_v40 = vrot.slane %v8446_v59, %v16940_v54  ;;  %v8510_v0 = vrot.slane %v8446_v59, %v16942_v61  ;;  %v8846_v56 = vld [vmem:[%s17574_s15 + $0x18] sm:$0xff]  ;;  %v8844_v59 = vld [vmem:[%s17574_s15 + $0x8] sm:$0xff] }
 0xff7   : > { %8584 = vmatprep.mubr.f32.mxu0 %v8506_v52  ;;  %10718 = vmatprep.mubr.msk.f32.mxu1 %vm5122_vm4, %v8514_v18  ;;  %v8843_v52 = vld [vmem:[%s17574_s15] sm:$0xff]  ;;  %v8937_v18 = vld [vmem:[%s17574_s15 + $0x2f0] sm:$0xff] }
 0xff8   : > { %8585 = vmatmul.mubr.f32.vlgmr.msra.gmra.mxu0 %v8502_v40  ;;  %8655 = vmatmul.mubr.f32.vlgmr.msra.gmra.mxu1 %v8510_v0  ;;  %v8936_v40 = vld [vmem:[%s17574_s15 + $0x2e8] sm:$0xff]  ;;  %v8934_v0 = vld [vmem:[%s17574_s15 + $0x2d8] sm:$0xff] }
 0xff9   : > { %8763 = vmatprep.mubr.f32.mxu0 %v17649_v11  ;;  %11778 = vmatprep.mubr.msk.f32.mxu1 %vm12454_vm7, %v17649_v11 }
 0xffa   : > { %10720 = vmatpush1.msk.msra.mxu0 %vm907_vm1, %v8666_v43  ;;  %11773 = vmatpush3.msk.msra.mxu1 %vm907_vm1, %v8668_v39  ;;  %v8931_v43 = vld [vmem:[%s17574_s15 + $0x2c0] sm:$0xff]  ;;  %v8930_v39 = vld [vmem:[%s17574_s15 + $0x2b8] sm:$0xff] }
 0xffb   : > { %8727 = vmatprep.subr.mxu0 %v8664_v16  ;;  %11774 = vmatprep.subr.mxu1 %v17649_v11  ;;  %v8928_v16 = vld [vmem:[%s17574_s15 + $0x2a8] sm:$0xff] }
 0xffc   : > { %8728 = vmatpush1.msra.mxu0 %v8663_v50  ;;  %11775 = vmatpush3.msra.mxu1 %v8665_v13  ;;  %v8927_v50 = vld [vmem:[%s17574_s15 + $0x2a0] sm:$0xff]  ;;  %v8925_v13 = vld [vmem:[%s17574_s15 + $0x290] sm:$0xff] }
 0xffd   : > { %8729 = vmatprep.subr.mxu0 %v8661_v4  ;;  %11776 = vmatprep.subr.mxu1 %v17649_v11  ;;  %v8924_v4 = vld [vmem:[%s17574_s15 + $0x288] sm:$0xff] }
 0xffe   : > { %8730 = vmatpush1.msra.mxu0 %v8660_v9  ;;  %11777 = vmatpush3.msra.mxu1 %v8662_v37  ;;  %v8922_v9 = vld [vmem:[%s17574_s15 + $0x278] sm:$0xff]  ;;  %v8921_v37 = vld [vmem:[%s17574_s15 + $0x270] sm:$0xff] }
 0xfff   : > { %8987 = vmatprep.subr.mxu0 %v8889_v48  ;;  %10724 = vmatprep.subr.msk.mxu1 %vm907_vm1, %v8955_v19  ;;  %v8919_v48 = vld [vmem:[%s17574_s15 + $0x260] sm:$0xff]  ;;  %v8898_v19 = vld [vmem:[%s17574_s15 + $0x1b8] sm:$0xff] }
0x10b8   : > { %v11104_v63 = vpop.f32.mrf.mxu0  ;;  %v8656_v26 = vpop.f32.mrf.mxu1 }
0x10ba   : > { %v11105_v8 = vpop.f32.mrf.mxu0  ;;  %v8658_v57 = vpop.f32.mrf.mxu1 }
0x10bb   : > { %v11106_v45 = vadd.f32 %v11105_v8, %v11104_v63  ;;  %v8918_v63 = vld [vmem:[%s17574_s15 + $0x258] sm:$0xff]  ;;  %v8913_v8 = vld [vmem:[%s17574_s15 + $0x230] sm:$0xff]  ;;  %v8912_v57 = vld [vmem:[%s17574_s15 + $0x228] sm:$0xff] }
0x10bd   : > { %v8587_v2 = vadd.f32 %v11106_v45, %v8497_v27  ;;  %v8915_v27 = vld [vmem:[%s17574_s15 + $0x240] sm:$0xff]  ;;  %v8910_v45 = vld [vmem:[%s17574_s15 + $0x218] sm:$0xff] }
0x10bf   : > { %v8657_v24 = vadd.f32 %v8656_v26, %v8587_v2  ;;  %v8916_v26 = vld [vmem:[%s17574_s15 + $0x248] sm:$0xff]  ;;  %v8909_v2 = vld [vmem:[%s17574_s15 + $0x210] sm:$0xff] }
0x10c1   : > { %10721 = vmatmul.mubr.msk.f32.vlgmr.msra.gmra.mxu0 %vm8686_vm8, %v8657_v24  ;;  %11779 = vmatmul.mubr.msk.f32.vlgmr.msra.gmra.mxu1 %vm8686_vm8, %v8657_v24  ;;  %9458 = vst.msk [vmem:[%s17597_s23] sm:$0x1] %vm9457_vm9, %v8657_v24  ;;  %s17474_s23 = scalar_lea.hbm %s17579_s20, %s17468_s0 }
0x10c2   : > { %9459 = vrot.lane.b32.xlu0 %v8657_v24, %s12456_s27  ;;  %8988 = vmatpush1.msra.mxu0 %v8888_v53  ;;  %v8907_v24 = vld [vmem:[%s17574_s15 + $0x200] sm:$0xff]  ;;  %v8906_v53 = vld [vmem:[%s17574_s15 + $0x1f8] sm:$0xff]  ;;  %s17482_s27 = scalar_lea.hbm %s17578_s19, %s17468_s0 }
0x10c3   : > { %8989 = vmatprep.subr.mxu0 %v8886_v32  ;;  %9122 = vmatprep.mubr.f32.mxu1 %v17649_v11  ;;  %v8904_v32 = vld [vmem:[%s17574_s15 + $0x1e8] sm:$0xff] }
0x10c4   : > { %8990 = vmatpush1.msra.mxu0 %v8885_v34  ;;  %10725 = vmatpush1.msk.msra.mxu1 %vm907_vm1, %v8954_v36  ;;  %v8903_v34 = vld [vmem:[%s17574_s15 + $0x1e0] sm:$0xff]  ;;  %v8897_v36 = vld [vmem:[%s17574_s15 + $0x1b0] sm:$0xff] }
0x10c5   : > { %8991 = vmatprep.subr.mxu0 %v8883_v44  ;;  %9080 = vmatprep.subr.mxu1 %v8952_v7  ;;  %v8901_v44 = vld [vmem:[%s17574_s15 + $0x1d0] sm:$0xff]  ;;  %v8939_v7 = vld [vmem:[%s17574_s15 + $0x300] sm:$0xff] }
0x10c6   : > { %8992 = vmatpush1.msra.mxu0 %v8882_v58  ;;  %9081 = vmatpush1.msra.mxu1 %v8951_v12  ;;  %v8943_v58 = vld [vmem:[%s17574_s15 + $0x320] sm:$0xff]  ;;  %v8938_v12 = vld [vmem:[%s17574_s15 + $0x2f8] sm:$0xff] }
0x10c7   : > { %8993 = vmatprep.subr.mxu0 %v8880_v20  ;;  %9082 = vmatprep.subr.mxu1 %v8949_v55  ;;  %v8900_v20 = vld [vmem:[%s17574_s15 + $0x1c8] sm:$0xff] }
0x10c8   : > { %8994 = vmatpush1.msra.mxu0 %v8879_v31  ;;  %9083 = vmatpush1.msra.mxu1 %v8948_v29  ;;  %v8942_v31 = vld [vmem:[%s17574_s15 + $0x318] sm:$0xff]  ;;  %v8892_v55 = vld [vmem:[%s17574_s15 + $0x188] sm:$0xff]  ;;  %v8891_v29 = vld [vmem:[%s17574_s15 + $0x180] sm:$0xff] }
0x10c9   : > { %8995 = vmatprep.subr.mxu0 %v8877_v17  ;;  %9084 = vmatprep.subr.mxu1 %v8946_v51  ;;  %v8940_v17 = vld [vmem:[%s17574_s15 + $0x308] sm:$0xff]  ;;  %v8669_v51 = vld [vmem:[%s17573_s14] sm:$0x7] }
0x10ca   : > { %8996 = vmatpush1.msra.mxu0 %v8876_v5  ;;  %9085 = vmatpush1.msra.mxu1 %v8945_v46  ;;  %v8895_v5 = vld [vmem:[%s17574_s15 + $0x1a0] sm:$0xff]  ;;  %v8674_v46 = vrot.slane %v8669_v51, %v16940_v54 }
0x10cb   : > { %8997 = vmatprep.subr.mxu0 %v8874_v35  ;;  %9086 = vmatprep.subr.mxu1 %v8943_v58  ;;  %v8894_v35 = vld [vmem:[%s17574_s15 + $0x198] sm:$0xff] }
0x10cc   : > { %8998 = vmatpush1.msra.mxu0 %v8873_v3  ;;  %9087 = vmatpush1.msra.mxu1 %v8942_v31  ;;  %v8950_v58 = vld [vmem:[%s17574_s15 + $0x358] sm:$0xff]  ;;  %v8944_v31 = vld [vmem:[%s17574_s15 + $0x328] sm:$0xff] }
0x10cd   : > { %8999 = vmatprep.subr.mxu0 %v8871_v14  ;;  %9088 = vmatprep.subr.mxu1 %v8940_v17  ;;  %v8682_v14 = vrot.slane %v8669_v51, %v16942_v61  ;;  %v9303_v17 = vld [vmem:[%s17576_s17 + $0xf8] sm:$0xff] }
0x10ce   : > { %9000 = vmatpush1.msra.mxu0 %v8870_v1  ;;  %9089 = vmatpush1.msra.mxu1 %v8939_v7  ;;  %v8678_v1 = vrot.slane %v8669_v51, %v16938_v10  ;;  %v9302_v7 = vld [vmem:[%s17576_s17 + $0xf0] sm:$0xff]  ;;  %v9283_v51 = vld [vmem:[%s17576_s17 + $0x58] sm:$0xff] }
0x10cf   : > { %9001 = vmatprep.subr.mxu0 %v8868_v21  ;;  %11111 = vmatprep.subr.mxu1 %v8938_v12  ;;  %v9301_v12 = vld [vmem:[%s17576_s17 + $0xe8] sm:$0xff] }
0x10d0   : > { %9002 = vmatpush1.msra.mxu0 %v8867_v42 }
0x10d1   : > { %9003 = vmatprep.subr.mxu0 %v8865_v62 }
0x10d2   : > { %9004 = vmatpush1.msra.mxu0 %v8864_v49 }
0x10d3   : > { %9005 = vmatprep.subr.mxu0 %v8862_v23 }
0x10d4   : > { %9006 = vmatpush1.msra.mxu0 %v8861_v6 }
0x10d5   : > { %9007 = vmatprep.subr.mxu0 %v8859_v60 }
0x10d6   : > { %9008 = vmatpush1.msra.mxu0 %v8858_v33 }
0x10d7   : > { %9009 = vmatprep.subr.mxu0 %v8856_v15  ;;  %v8890_v15 = vld [vmem:[%s17574_s15 + $0x178] sm:$0xff] }
0x10d8   : > { %9010 = vmatpush1.msra.mxu0 %v8855_v25  ;;  %v8935_v25 = vld [vmem:[%s17574_s15 + $0x2e0] sm:$0xff] }
0x10d9   : > { %9011 = vmatprep.subr.mxu0 %v8853_v38 }
0x10da   : > { %9012 = vmatpush1.msra.mxu0 %v8852_v30  ;;  %v8887_v30 = vld [vmem:[%s17574_s15 + $0x160] sm:$0xff] }
0x10db   : > { %9013 = vmatprep.subr.mxu0 %v8850_v28  ;;  %v8932_v28 = vld [vmem:[%s17574_s15 + $0x2c8] sm:$0xff] }
0x10dc   : > { %9014 = vmatpush1.msra.mxu0 %v8849_v41 }
0x10dd   : > { %9015 = vmatprep.subr.mxu0 %v8847_v47  ;;  %v8884_v47 = vld [vmem:[%s17574_s15 + $0x148] sm:$0xff] }
0x10de   : > { %9016 = vmatpush1.msra.mxu0 %v8846_v56  ;;  %v8929_v56 = vld [vmem:[%s17574_s15 + $0x2b0] sm:$0xff] }
0x10df   : > { %9017 = vmatprep.subr.mxu0 %v8844_v59  ;;  %v8881_v59 = vld [vmem:[%s17574_s15 + $0x130] sm:$0xff] }
0x10e0   : > { %9018 = vmatpush1.msra.mxu0 %v8843_v52  ;;  %v8926_v52 = vld [vmem:[%s17574_s15 + $0x298] sm:$0xff] }
0x10e1   : > { %9019 = vmatprep.subr.mxu0 %v8937_v18  ;;  %v8878_v18 = vld [vmem:[%s17574_s15 + $0x118] sm:$0xff] }
0x10e2   : > { %9020 = vmatpush2.msra.mxu0 %v8936_v40  ;;  %v8923_v40 = vld [vmem:[%s17574_s15 + $0x280] sm:$0xff] }
0x10e3   : > { %9021 = vmatprep.subr.mxu0 %v8934_v0  ;;  %v8875_v0 = vld [vmem:[%s17574_s15 + $0x100] sm:$0xff] }
0x10e4   : > { %9022 = vmatpush2.msra.mxu0 %v8933_v22  ;;  %v8920_v22 = vld [vmem:[%s17574_s15 + $0x268] sm:$0xff] }
0x10e5   : > { %9023 = vmatprep.subr.mxu0 %v8931_v43  ;;  %v8872_v43 = vld [vmem:[%s17574_s15 + $0xe8] sm:$0xff] }
0x10e6   : > { %9024 = vmatpush2.msra.mxu0 %v8930_v39  ;;  %v8917_v39 = vld [vmem:[%s17574_s15 + $0x250] sm:$0xff] }
0x10e7   : > { %9025 = vmatprep.subr.mxu0 %v8928_v16  ;;  %v8869_v16 = vld [vmem:[%s17574_s15 + $0xd0] sm:$0xff] }
0x10e8   : > { %9026 = vmatpush2.msra.mxu0 %v8927_v50  ;;  %v8914_v50 = vld [vmem:[%s17574_s15 + $0x238] sm:$0xff] }
0x10e9   : > { %9027 = vmatprep.subr.mxu0 %v8925_v13  ;;  %v8866_v13 = vld [vmem:[%s17574_s15 + $0xb8] sm:$0xff] }
0x10ea   : > { %9028 = vmatpush2.msra.mxu0 %v8924_v4  ;;  %v8911_v4 = vld [vmem:[%s17574_s15 + $0x220] sm:$0xff] }
0x10eb   : > { %9029 = vmatprep.subr.mxu0 %v8922_v9  ;;  %v8863_v9 = vld [vmem:[%s17574_s15 + $0xa0] sm:$0xff] }
0x10ec   : > { %9030 = vmatpush2.msra.mxu0 %v8921_v37  ;;  %v8908_v37 = vld [vmem:[%s17574_s15 + $0x208] sm:$0xff] }
0x10ed   : > { %9031 = vmatprep.subr.mxu0 %v8919_v48  ;;  %v8860_v48 = vld [vmem:[%s17574_s15 + $0x88] sm:$0xff] }
0x10ee   : > { %9032 = vmatpush2.msra.mxu0 %v8918_v63  ;;  %v8905_v63 = vld [vmem:[%s17574_s15 + $0x1f0] sm:$0xff] }
0x10ef   : > { %9033 = vmatprep.subr.mxu0 %v8916_v26  ;;  %v8857_v26 = vld [vmem:[%s17574_s15 + $0x70] sm:$0xff] }
0x10f0   : > { %9034 = vmatpush2.msra.mxu0 %v8915_v27  ;;  %v8902_v27 = vld [vmem:[%s17574_s15 + $0x1d8] sm:$0xff] }
0x10f1   : > { %9035 = vmatprep.subr.mxu0 %v8913_v8  ;;  %v8854_v8 = vld [vmem:[%s17574_s15 + $0x58] sm:$0xff] }
0x10f2   : > { %9036 = vmatpush2.msra.mxu0 %v8912_v57  ;;  %v8899_v57 = vld [vmem:[%s17574_s15 + $0x1c0] sm:$0xff] }
0x10f3   : > { %9037 = vmatprep.subr.mxu0 %v8910_v45  ;;  %v8851_v45 = vld [vmem:[%s17574_s15 + $0x40] sm:$0xff] }
0x10f4   : > { %9038 = vmatpush2.msra.mxu0 %v8909_v2  ;;  %v8896_v2 = vld [vmem:[%s17574_s15 + $0x1a8] sm:$0xff] }
0x10f5   : > { %9039 = vmatprep.subr.mxu0 %v8907_v24  ;;  %v8848_v24 = vld [vmem:[%s17574_s15 + $0x28] sm:$0xff] }
0x10f6   : > { %9040 = vmatpush2.msra.mxu0 %v8906_v53  ;;  %v8893_v53 = vld [vmem:[%s17574_s15 + $0x190] sm:$0xff] }
0x10f7   : > { %9041 = vmatprep.subr.mxu0 %v8904_v32  ;;  %v8845_v32 = vld [vmem:[%s17574_s15 + $0x10] sm:$0xff] }
0x10f8   : > { %9042 = vmatpush2.msra.mxu0 %v8903_v34  ;;  %v8956_v34 = vld [vmem:[%s17574_s15 + $0x388] sm:$0xf] }
0x10f9   : > { %9043 = vmatprep.subr.mxu0 %v8901_v44  ;;  %v8953_v44 = vld [vmem:[%s17574_s15 + $0x370] sm:$0xff] }
0x10fa   : > { %9044 = vmatpush2.msra.mxu0 %v8900_v20  ;;  %v8947_v20 = vld [vmem:[%s17574_s15 + $0x340] sm:$0xff] }
0x10fb   : > { %9045 = vmatprep.subr.mxu0 %v8898_v19  ;;  %v8941_v19 = vld [vmem:[%s17574_s15 + $0x310] sm:$0xff] }
0x10fc   : > { %9046 = vmatpush2.msra.mxu0 %v8897_v36  ;;  %v9287_v36 = vld [vmem:[%s17576_s17 + $0x78] sm:$0xff] }
0x10fd   : > { %9047 = vmatprep.subr.mxu0 %v8895_v5  ;;  %v9286_v5 = vld [vmem:[%s17576_s17 + $0x70] sm:$0xff] }
0x10fe   : > { %9048 = vmatpush2.msra.mxu0 %v8894_v35  ;;  %v9285_v35 = vld [vmem:[%s17576_s17 + $0x68] sm:$0xff] }
0x10ff   : > { %9049 = vmatprep.subr.mxu0 %v8892_v55  ;;  %v9300_v55 = vld [vmem:[%s17576_s17 + $0xe0] sm:$0xff] }
0x1100   : > { %9050 = vmatpush2.msra.mxu0 %v8891_v29  ;;  %v9284_v29 = vld [vmem:[%s17576_s17 + $0x60] sm:$0xff] }
0x1101   : > { %11796 = vmatprep.subr.mxu0 %v17649_v11 }
0x1134   : > { %v9460_v3 = vpop.permute.xlu0 %9459 }
0x1135   : > { %9462 = vst.msk [vmem:[%s779_s1] sm:$0x1] %vm9457_vm9, %v9460_v3  ;;  %v9299_v3 = vld [vmem:[%s17576_s17 + $0xd8] sm:$0xff] }
0x1181   : > { %v8765_v21 = vpop.f32.mrf.mxu0  ;;  %v8836_v42 = vpop.f32.mrf.mxu1 }
0x1182   : > { %v17208_v62 = vadd.f32 %v8836_v42, %v8682_v14  ;;  %v17210_v6 = vadd.f32 %v8765_v21, %v8674_v46  ;;  %v9298_v14 = vld [vmem:[%s17576_s17 + $0xd0] sm:$0xff]  ;;  %v9281_v21 = vld [vmem:[%s17576_s17 + $0x48] sm:$0xff]  ;;  %v9296_v42 = vld [vmem:[%s17576_s17 + $0xc0] sm:$0xff] }
0x1183   : > { %v8767_v49 = vpop.f32.mrf.mxu0  ;;  %v11780_v23 = vpop.f32.mrf.mxu1  ;;  %v9282_v46 = vld [vmem:[%s17576_s17 + $0x50] sm:$0xff] }
0x1184   : > { %v8842_v60 = vmax.f32 %v17208_v62, 0.0  ;;  %v8768_v33 = vadd.f32 %v8767_v49, %v8678_v1  ;;  %v8840_v41 = vmax.f32 %v17210_v6, 0.0  ;;  %v9297_v1 = vld [vmem:[%s17576_s17 + $0xc8] sm:$0xff]  ;;  %v9280_v62 = vld [vmem:[%s17576_s17 + $0x40] sm:$0xff]  ;;  %v9295_v49 = vld [vmem:[%s17576_s17 + $0xb8] sm:$0xff] }
0x1185   : > { %v9279_v23 = vld [vmem:[%s17576_s17 + $0x38] sm:$0xff]  ;;  %v9294_v6 = vld [vmem:[%s17576_s17 + $0xb0] sm:$0xff] }
0x1186   : > { %v8841_v38 = vmax.f32 %v8768_v33, 0.0  ;;  %10726 = vmatmul.mubr.msk.f32.vlgmr.msra.gmra.mxu1 %vm8974_vm10, %v8842_v60  ;;  %v9293_v33 = vld [vmem:[%s17576_s17 + $0xa8] sm:$0xff] }
0x1187   : > { %11112 = vmatpush3.msra.mxu1 %v8890_v15  ;;  %v9277_v15 = vld [vmem:[%s17576_s17 + $0x28] sm:$0xff] }
0x1188   : > { %11113 = vmatprep.subr.mxu1 %v8935_v25  ;;  %9051 = vmatprep.mubr.f32.mxu0 %v8841_v38  ;;  %v9292_v25 = vld [vmem:[%s17576_s17 + $0xa0] sm:$0xff] }
0x1189   : > { %11114 = vmatpush3.msra.mxu1 %v8887_v30  ;;  %9193 = vmatprep.mubr.f32.mxu1 %v8841_v38  ;;  %v9276_v38 = vld [vmem:[%s17576_s17 + $0x20] sm:$0xff]  ;;  %v9291_v30 = vld [vmem:[%s17576_s17 + $0x98] sm:$0xff] }
0x118a   : > { %9052 = vmatmul.mubr.f32.vlgmr.msra.gmra.mxu0 %v8840_v41  ;;  %11115 = vmatprep.subr.mxu1 %v8932_v28  ;;  %v9275_v28 = vld [vmem:[%s17576_s17 + $0x18] sm:$0xff] }
0x118b   : > { %11116 = vmatpush3.msra.mxu1 %v8884_v47  ;;  %11808 = vmatprep.mubr.msk.f32.mxu0 %vm12454_vm7, %v17649_v11  ;;  %v9274_v47 = vld [vmem:[%s17576_s17 + $0x10] sm:$0xff] }
0x118c   : > { %11117 = vmatprep.subr.mxu1 %v8929_v56  ;;  %v9289_v56 = vld [vmem:[%s17576_s17 + $0x88] sm:$0xff] }
0x118d   : > { %11118 = vmatpush3.msra.mxu1 %v8881_v59  ;;  %v9273_v59 = vld [vmem:[%s17576_s17 + $0x8] sm:$0xff] }
0x118e   : > { %11119 = vmatprep.subr.mxu1 %v8926_v52  ;;  %v9288_v52 = vld [vmem:[%s17576_s17 + $0x80] sm:$0xff] }
0x118f   : > { %11120 = vmatpush3.msra.mxu1 %v8878_v18  ;;  %v9272_v18 = vld [vmem:[%s17576_s17] sm:$0xff] }
0x1190   : > { %11121 = vmatprep.subr.mxu1 %v8923_v40  ;;  %v9309_v40 = vld [vmem:[%s17576_s17 + $0x128] sm:$0xf] }
0x1191   : > { %11122 = vmatpush3.msra.mxu1 %v8875_v0  ;;  %v9308_v0 = vld [vmem:[%s17576_s17 + $0x120] sm:$0xff]  ;;  %11797 = vmatpush3.msk.msra.mxu0 %vm907_vm1, %v9309_v40 }
0x1192   : > { %11123 = vmatprep.subr.mxu1 %v8920_v22  ;;  %11798 = vmatprep.subr.mxu0 %v17649_v11  ;;  %v9307_v22 = vld [vmem:[%s17576_s17 + $0x118] sm:$0xff] }
0x1193   : > { %11124 = vmatpush3.msra.mxu1 %v8872_v43  ;;  %11799 = vmatpush3.msra.mxu0 %v9308_v0  ;;  %v9306_v43 = vld [vmem:[%s17576_s17 + $0x110] sm:$0xff] }
0x1194   : > { %11125 = vmatprep.subr.mxu1 %v8917_v39  ;;  %11800 = vmatprep.subr.mxu0 %v17649_v11  ;;  %v9305_v39 = vld [vmem:[%s17576_s17 + $0x108] sm:$0xff] }
0x1195   : > { %11126 = vmatpush3.msra.mxu1 %v8869_v16  ;;  %11801 = vmatpush3.msra.mxu0 %v9307_v22  ;;  %v9304_v16 = vld [vmem:[%s17576_s17 + $0x100] sm:$0xff] }
0x1196   : > { %11127 = vmatprep.subr.mxu1 %v8914_v50  ;;  %11802 = vmatprep.subr.mxu0 %v17649_v11  ;;  %v8957_v50 = vld [vmem:[#allocation14] sm:$0x7] }
0x1197   : > { %11128 = vmatpush3.msra.mxu1 %v8866_v13  ;;  %11803 = vmatpush3.msra.mxu0 %v9306_v43  ;;  %v8962_v13 = vrot.slane %v8957_v50, %v16940_v54 }
0x1198   : > { %11129 = vmatprep.subr.mxu1 %v8911_v4  ;;  %11804 = vmatprep.subr.mxu0 %v17649_v11  ;;  %v8966_v4 = vrot.slane %v8957_v50, %v16938_v10  ;;  %v8970_v10 = vrot.slane %v8957_v50, %v16942_v61 }
0x1199   : > { %11130 = vmatpush3.msra.mxu1 %v8863_v9  ;;  %11805 = vmatpush3.msra.mxu0 %v9305_v39 }
0x119a   : > { %11131 = vmatprep.subr.mxu1 %v8908_v37  ;;  %11806 = vmatprep.subr.mxu0 %v17649_v11 }
0x119b   : > { %11132 = vmatpush3.msra.mxu1 %v8860_v48  ;;  %11807 = vmatpush3.msra.mxu0 %v9304_v16 }
0x119c   : > { %11133 = vmatprep.subr.mxu1 %v8905_v63 }
0x119d   : > { %11134 = vmatpush3.msra.mxu1 %v8857_v26 }
0x119e   : > { %11135 = vmatprep.subr.mxu1 %v8902_v27 }
0x119f   : > { %11136 = vmatpush3.msra.mxu1 %v8854_v8 }
0x11a0   : > { %11137 = vmatprep.subr.mxu1 %v8899_v57 }
0x11a1   : > { %11138 = vmatpush3.msra.mxu1 %v8851_v45 }
0x11a2   : > { %11139 = vmatprep.subr.mxu1 %v8896_v2 }
0x11a3   : > { %11140 = vmatpush3.msra.mxu1 %v8848_v24 }
0x11a4   : > { %11141 = vmatprep.subr.mxu1 %v8893_v53 }
0x11a5   : > { %11142 = vmatpush3.msra.mxu1 %v8845_v32 }
0x11a6   : > { %9194 = vmatmul.mubr.f32.vlgmr.msra.gmra.mxu1 %v8840_v41  ;;  %11781 = vmatprep.subr.mxu1 %v17649_v11  ;;  %v9290_v41 = vld [vmem:[%s17576_s17 + $0x90] sm:$0xff] }
0x11a7   : > { %11782 = vmatpush3.msk.msra.mxu1 %vm907_vm1, %v8956_v34  ;;  %11793 = vmatprep.mubr.msk.f32.mxu1 %vm12454_vm7, %v17649_v11 }
0x11a8   : > { %11783 = vmatprep.subr.mxu1 %v17649_v11 }
0x11a9   : > { %11784 = vmatpush3.msra.mxu1 %v8953_v44 }
0x11aa   : > { %11785 = vmatprep.subr.mxu1 %v17649_v11 }
0x11ab   : > { %11786 = vmatpush3.msra.mxu1 %v8950_v58 }
0x11ac   : > { %11787 = vmatprep.subr.mxu1 %v17649_v11 }
0x11ad   : > { %11788 = vmatpush3.msra.mxu1 %v8947_v20 }
0x11ae   : > { %11789 = vmatprep.subr.mxu1 %v17649_v11 }
0x11af   : > { %11790 = vmatpush3.msra.mxu1 %v8944_v31 }
0x11b0   : > { %11791 = vmatprep.subr.mxu1 %v17649_v11 }
0x11b1   : > { %11792 = vmatpush3.msra.mxu1 %v8941_v19 }
0x11b2   : > { %11794 = vmatmul.mubr.msk.f32.vlgmr.msra.gmra.mxu1 %vm8974_vm10, %v8842_v60  ;;  %11153 = vmatprep.subr.mxu1 %v9303_v17  ;;  %v9278_v60 = vld [vmem:[%s17576_s17 + $0x30] sm:$0xff] }
0x11b3   : > { %11154 = vmatpush3.msra.mxu1 %v9287_v36 }
0x11b4   : > { %11155 = vmatprep.subr.mxu1 %v9302_v7 }
0x11b5   : > { %11156 = vmatpush3.msra.mxu1 %v9286_v5 }
0x11b6   : > { %11157 = vmatprep.subr.mxu1 %v9301_v12 }
0x11b7   : > { %11158 = vmatpush3.msra.mxu1 %v9285_v35 }
0x11b8   : > { %11159 = vmatprep.subr.mxu1 %v9300_v55 }
0x11b9   : > { %11160 = vmatpush3.msra.mxu1 %v9284_v29 }
0x11ba   : > { %11161 = vmatprep.subr.mxu1 %v9299_v3 }
0x11bb   : > { %11162 = vmatpush3.msra.mxu1 %v9283_v51 }
0x11bc   : > { %11163 = vmatprep.subr.mxu1 %v9298_v14 }
0x11bd   : > { %11164 = vmatpush3.msra.mxu1 %v9282_v46 }
0x11be   : > { %11165 = vmatprep.subr.mxu1 %v9297_v1 }
0x11bf   : > { %11166 = vmatpush3.msra.mxu1 %v9281_v21 }
0x11c0   : > { %11167 = vmatprep.subr.mxu1 %v9296_v42 }
0x11c1   : > { %11168 = vmatpush3.msra.mxu1 %v9280_v62 }
0x11c2   : > { %11169 = vmatprep.subr.mxu1 %v9295_v49 }
0x11c3   : > { %11170 = vmatpush3.msra.mxu1 %v9279_v23 }
0x11c4   : > { %11171 = vmatprep.subr.mxu1 %v9294_v6 }
0x11c5   : > { %11172 = vmatpush3.msra.mxu1 %v9278_v60 }
0x11c6   : > { %11173 = vmatprep.subr.mxu1 %v9293_v33 }
0x11c7   : > { %11174 = vmatpush3.msra.mxu1 %v9277_v15 }
0x11c8   : > { %11175 = vmatprep.subr.mxu1 %v9292_v25 }
0x11c9   : > { %11176 = vmatpush3.msra.mxu1 %v9276_v38 }
0x11ca   : > { %11177 = vmatprep.subr.mxu1 %v9291_v30 }
0x11cb   : > { %11178 = vmatpush3.msra.mxu1 %v9275_v28 }
0x11cc   : > { %11179 = vmatprep.subr.mxu1 %v9290_v41 }
0x11cd   : > { %11180 = vmatpush3.msra.mxu1 %v9274_v47 }
0x11ce   : > { %11181 = vmatprep.subr.mxu1 %v9289_v56 }
0x11cf   : > { %11182 = vmatpush3.msra.mxu1 %v9273_v59 }
0x11d0   : > { %11183 = vmatprep.subr.mxu1 %v9288_v52 }
0x11d1   : > { %11184 = vmatpush3.msra.mxu1 %v9272_v18 }
0x1246   : > { %v9124_v9 = vpop.f32.mrf.mxu1 }
0x1248   : > { %v9126_v27 = vpop.f32.mrf.mxu1 }
0x124a   : > { %v9053_v37 = vpop.f32.mrf.mxu0 }
0x124b   : > { %v9054_v48 = vadd.f32 %v9053_v37, %v8962_v13 }
0x124c   : > { %v9055_v63 = vpop.f32.mrf.mxu0 }
0x124d   : > { %v9056_v26 = vadd.f32 %v9055_v63, %v8966_v4  ;;  %v9125_v8 = vadd.f32 %v9124_v9, %v9054_v48 }
0x124f   : > { %v9127_v57 = vadd.f32 %v9126_v27, %v9056_v26  ;;  %v9269_v45 = vmax.f32 %v9125_v8, 0.0 }
0x1251   : > { %v9270_v11 = vmax.f32 %v9127_v57, 0.0 }
0x1253   : > { %9381 = vmatprep.mubr.f32.mxu1 %v9270_v11 }
0x1254   : > { %9382 = vmatmul.mubr.f32.vlgmr.msra.gmra.mxu1 %v9269_v45 }
0x1266   : > { %v11143_v2 = vpop.f32.mrf.mxu1 }
0x1268   : > { %v11144_v24 = vpop.f32.mrf.mxu1 }
0x1269   : > { %v11145_v54 = vadd.f32 %v11144_v24, %v11143_v2 }
0x126b   : > { %v9196_v53 = vadd.f32 %v11145_v54, %v8970_v10 }
0x1272   : > { %v9265_v32 = vpop.f32.mrf.mxu1 }
0x1273   : > { %v9266_v34 = vadd.f32 %v9265_v32, %v9196_v53 }
0x1274   : > { %v11795_v44 = vpop.f32.mrf.mxu1 }
0x1275   : > { %v9271_v58 = vmax.f32 %v9266_v34, 0.0 }
0x1277   : > { %11809 = vmatmul.mubr.msk.f32.vlgmr.msra.gmra.mxu0 %vm8974_vm10, %v9271_v58 }
0x1278   : > { %12311 = shalt.err (!%p12308_p10)
}
0x1279   : > { %s12312_s1 = scalar_lea.hbm %s17474_s23, 16  ;;  %s12316_s29 = scalar_lea.hbm %s17579_s20, 32 }
0x127a   : > { %p12313_p12 = scmp.ne.s32.totalorder %s17474_s23, %s12312_s1  ;;  %p12317_p8 = scmp.lt.s32.totalorder %s17474_s23, %s17579_s20 }
0x127b   : > { %p12318_p11 = scmp.lt.s32.totalorder %s12316_s29, %s12312_s1 }
0x127c   : > { %p12314_p4 = pnand %p12313_p12, %p17728_p2 }
0x127d   : > { %p12319_p0 = por %p12318_p11, %p12317_p8 }
0x127e   : > { %p12315_p7 = pneg %p12314_p4 }
0x1280   : > { %p12320_p1 = pnand %p12319_p0, %p12315_p7 }
0x1282   : > { %12323 = shalt.err (!%p12320_p1)
}
0x1283   : > { %11899 = dma.vmem_to_hbm [thread:$0]  (%p17728_p2), %s9500_s21, 16, %s17474_s23, %s17484_s22  }
0x1284   : > { %s17729_s4 = scalar_lea.vmem [#allocation17], %s16960_s24  ;;  %s9466_s7 = scalar_lea.sflag [#allocation4], %s16960_s24 }
0x1285   : > { %s9486_s26 = sshll.u32 %s17729_s4, 4  ;;  %s12458_s6 = smov [#allocation17]   ;;  %s9487_s26 = int_to_ptr.vmem [resolvable:$true] %s9486_s26 }
0x1286   : > { %s12324_s2 = scalar_lea.vmem %s9487_s26, 16  ;;  %s12328_s1 = sshll.u32 %s12458_s6, 4  ;;  %s12329_s1 = int_to_ptr.vmem [resolvable:$false] %s12328_s1 }
0x1287   : > { %p12325_p9 = scmp.ne.s32.totalorder %s9487_s26, %s12324_s2  ;;  %s12330_s28 = scalar_lea.vmem %s12329_s1, 32 }
0x1288   : > { %p12331_p5 = scmp.lt.s32.totalorder %s9487_s26, %s12329_s1  ;;  %p12332_p6 = scmp.lt.s32.totalorder %s12330_s28, %s12324_s2 }
0x1289   : > { %p12326_p3 = pnand %p12325_p9, %p17728_p2 }
0x128a   : > { %p12333_p10 = por %p12332_p6, %p12331_p5 }
0x128b   : > { %p12327_p13 = pneg %p12326_p3 }
0x128d   : > { %p12334_p12 = pnand %p12333_p10, %p12327_p13 }
0x128f   : > { %12337 = shalt.err (!%p12334_p12)
}
0x1290   : > { %s12338_s23 = scalar_lea.hbm %s17482_s27, 16  ;;  %s12342_s3 = scalar_lea.hbm %s17578_s19, 32 }
0x1291   : > { %p12339_p4 = scmp.ne.s32.totalorder %s17482_s27, %s12338_s23  ;;  %p12343_p11 = scmp.lt.s32.totalorder %s17482_s27, %s17578_s19 }
0x1292   : > { %p12344_p0 = scmp.lt.s32.totalorder %s12342_s3, %s12338_s23 }
0x1293   : > { %p12340_p7 = pnand %p12339_p4, %p17728_p2 }
0x1294   : > { %p12345_p1 = por %p12344_p0, %p12343_p11 }
0x1295   : > { %p12341_p8 = pneg %p12340_p7 }
0x1297   : > { %p12346_p9 = pnand %p12345_p1, %p12341_p8 }
0x1299   : > { %12349 = shalt.err (!%p12346_p9)
}
0x129a   : > { %11898 = dma.vmem_to_hbm [thread:$0]  (%p17728_p2), %s9487_s26, 16, %s17482_s27, %s9466_s7   ;;  %v9310_v19 = vld [vmem:[#allocation16] sm:$0x1]  ;;  %vm9463_vm11 = vcmask 8192  }
0x129b   : > { %s785_s2 = scalar_lea.vmem [#allocation20], %s16960_s24  ;;  %s17730_s21 = sld [smem:[#allocation86_spill]] }
0x129c   : > { %s9512_s1 = sshll.u32 %s785_s2, 4  ;;  %s12459_s27 = smov [#allocation20]   ;;  %s9513_s1 = int_to_ptr.vmem [resolvable:$true] %s9512_s1 }
0x129d   : > { %s12350_s3 = scalar_lea.vmem %s9513_s1, 16  ;;  %s12354_s26 = sshll.u32 %s12459_s27, 4  ;;  %s12355_s26 = int_to_ptr.vmem [resolvable:$false] %s12354_s26 }
0x129e   : > { %p12351_p3 = scmp.ne.s32.totalorder %s9513_s1, %s12350_s3  ;;  %s12356_s24 = scalar_lea.vmem %s12355_s26, 32 }
0x129f   : > { %p12357_p6 = scmp.lt.s32.totalorder %s9513_s1, %s12355_s26  ;;  %p12358_p10 = scmp.lt.s32.totalorder %s12356_s24, %s12350_s3 }
0x12a0   : > { %p12352_p13 = pnand %p12351_p3, %p17728_p2 }
0x12a1   : > { %s9510_s29 = scalar_lea.hbm %s17730_s21, %s17468_s0  ;;  %p12359_p12 = por %p12358_p10, %p12357_p6 }
0x12a2   : > { %p12353_p5 = pneg %p12352_p13 }
0x12a4   : > { %p12360_p4 = pnand %p12359_p12, %p12353_p5 }
0x1314   : > { %v11185_v61 = vpop.f32.mrf.mxu1 }
0x1316   : > { %v11186_v20 = vpop.f32.mrf.mxu1 }
0x1317   : > { %v11187_v31 = vadd.f32 %v11186_v20, %v11185_v61 }
0x1319   : > { %v9384_v17 = vadd.f32 %v11187_v31, %v9310_v19 }
0x1337   : > { %v9453_v36 = vpop.f32.mrf.mxu0 }
0x1338   : > { %v9454_v7 = vadd.f32 %v9453_v36, %v9384_v17 }
0x1339   : > { %v11810_v5 = vpop.f32.mrf.mxu0 }
0x133a   : > { %9464 = vst.msk [vmem:[%s785_s2] sm:$0x1] %vm9463_vm11, %v9454_v7 }
0x133b   : > { %12363 = shalt.err (!%p12360_p4)
}
0x133c   : > { %s12364_s7 = scalar_lea.hbm %s9510_s29, 16  ;;  %s12368_s6 = scalar_lea.hbm %s17730_s21, 32 }
0x133d   : > { %p12365_p7 = scmp.ne.s32.totalorder %s9510_s29, %s12364_s7  ;;  %p12369_p0 = scmp.lt.s32.totalorder %s9510_s29, %s17730_s21 }
0x133e   : > { %p12370_p1 = scmp.lt.s32.totalorder %s12368_s6, %s12364_s7 }
0x133f   : > { %p12366_p8 = pnand %p12365_p7, %p17728_p2 }
0x1340   : > { %p12371_p9 = por %p12370_p1, %p12369_p0 }
0x1341   : > { %p12367_p11 = pneg %p12366_p8 }
0x1343   : > { %p12372_p3 = pnand %p12371_p9, %p12367_p11 }
0x1345   : > { %12375 = shalt.err (!%p12372_p3)
}
0x1346   : > { %11900 = dma.vmem_to_hbm [thread:$0]  (%p17728_p2), %s9513_s1, 16, %s9510_s29, %s17484_s22  }
0x1347 PF: > { %s17731_s23 = sld [smem:[#allocation30_spill]] }
0x1348   : > { %s17732_s3 = sld [smem:[#allocation28_spill]] }
0x1349   : > { %s17733_s27 = sld [smem:[#allocation33_spill]] }
0x134d   : > { %p11960_p13 = scmp.ge.s32.totalorder %s17731_s23, 2 }
0x134e   : > { %s9524_s26 = sand.u32 1, %s17732_s3  }
0x134f   : > { %p17734_p5 = scmp.ne.s32.totalorder %s17733_s27, 0  ;;  %s9525_s24 = scalar_lea.sflag [#allocation4], %s9524_s26 }
0x1351   : > { %p11933_p6 = pnand %p11960_p13, %p17734_p5 }
0x1353   : > { %p11934_p10 = pneg %p11933_p6 }
0x1355   : > { %12413 = dma.done.wait (%p11934_p10), %s9525_s24, 16  }
0x1356   : > { %12415 = vsyncadd (%p11934_p10), %s9525_s24, 4294967280  ;;  %s17735_s7 = sadd.s32 4294967294, %s17731_s23  }
0x1357   : > { %s9532_s0 = sand.u32 1, %s17735_s7  }
0x1358   : > { %s9533_s4 = scalar_lea.sflag [#allocation19], %s9532_s0 }
0x1359   : > { %12417 = dma.done.wait (%p11934_p10), %s9533_s4, 32  }
0x135a   : > { %12419 = vsyncadd (%p11934_p10), %s9533_s4, 4294967264  ;;  %s17736_s27 = sld [smem:[#allocation31_spill]]  ;;  %s17739_s2 = smov %s12426_s25 }
0x135b   : > { %s17737_s5 = sld [smem:[#allocation29_spill]] }
0x135c   : > { %s17738_s26 = sld [smem:[#allocation32_spill]] }
0x1360   : > { %p40_p2 = scmp.ge.s32.totalorder %s17736_s27, 4  }
0x1361   : > { %s17740_s25 = smov %s17737_s5 }
0x1362   :  { %42 = sbr.rel (!%p40_p2) target bundleno = 20 (0x14), region = 241 }
0x1367   :  { %9545 = vsyncpa [#allocation3], 1 }
0x1368   :  { %9547 = vsyncpa [#allocation3 + $0x1], 1 }
0x1369   :  { %9548 = vsyncpa [#allocation6], 1 }
0x136a   :  { %9549 = vsyncpa [#allocation9], 1 }
0x136b   :  { %9550 = vsyncpa [#allocation12], 1 }
0x136c   :  { %9551 = vsyncpa [#allocation15], 1 }
0x136d   :  { %9552 = vsyncpa [#allocation4], 1 }
0x136e   :  { %9554 = vsyncpa [#allocation4 + $0x1], 1 }
0x136f   :  { %9555 = vsyncpa [#allocation19], 1 }
0x1370   :  { %9557 = vsyncpa [#allocation19 + $0x1], 1 }

</bundles_post_ra>
